<compile_context>
chip_gen: v5e
topology: v5e:2x2
jax: 0.10.0
libtpu: 0.0.40
codegen_flags: <defaults>
</compile_context>

<pallas_src>
import functools

import numpy as np
import jax
import jax.numpy as jnp
from jax.experimental import pallas as pl
from jax.experimental.pallas import tpu as pltpu

_MASK = -1e9  # additive bias for disallowed key positions (exp -> exactly 0 in f32)


# ----------------------------------------------------------------------------
# Pallas kernel: one (head-group, query-tile) step per grid point.
# ----------------------------------------------------------------------------
def _local_attn_kernel(*refs, HPB, GW, n_sub, span, los, scale,
                       has_prev, has_next, n_tiles):
    it = iter(refs)
    q_ref = next(it)
    kp_ref = next(it) if has_prev else None
    kc_ref = next(it)
    kn_ref = next(it) if has_next else None
    vp_ref = next(it) if has_prev else None
    vc_ref = next(it)
    vn_ref = next(it) if has_next else None
    bm_ref = next(it)                       # (n_sub, GW, span) band bias, hoisted
    bp_ref = next(it) if has_prev else None  # (GW, hb) backward-halo bias
    bn_ref = next(it) if has_next else None  # (GW, hf) forward-halo bias
    o_ref = next(it)

    t = pl.program_id(1)
    # Sequence-boundary masking: the (clamped) backward halo is entirely out of
    # range only on the first tile; the forward halo only on the last tile.
    edge_prev = jnp.where(t == 0, _MASK, 0.0)
    edge_next = jnp.where(t == n_tiles - 1, _MASK, 0.0)

    for j in range(n_sub):                      # static: band-blocked query rows
        r0 = j * GW
        lo = los[j]
        bias_c = bm_ref[j]                      # (GW, span)
        use_prev = has_prev and j == 0
        use_next = has_next and j == n_sub - 1
        if use_prev:
            bias_p = bp_ref[...] + edge_prev
        if use_next:
            bias_n = bn_ref[...] + edge_next

        outs = []
        for h in range(HPB):                    # static: heads folded per step
            q = q_ref[h, r0:r0 + GW, :] * scale                    # (GW, E)

            # (key slab, value slab, additive bias) pieces for this sub-block.
            pieces = [(kc_ref[h, lo:lo + span, :],
                       vc_ref[h, lo:lo + span, :], bias_c)]
            if use_prev:
                pieces.append((kp_ref[h], vp_ref[h], bias_p))
            if use_next:
                pieces.append((kn_ref[h], vn_ref[h], bias_n))

            # q . k^T per piece on the MXU (contract last dims, no k relayout).
            scores = [
                jax.lax.dot_general(q, ks, (((1,), (1,)), ((), ())),
                                    preferred_element_type=jnp.float32) + bias
                for ks, _, bias in pieces
            ]

            # Flash-style merge across pieces (single pass, all pieces resident).
            m = scores[0].max(axis=-1, keepdims=True)
            for s in scores[1:]:
                m = jnp.maximum(m, s.max(axis=-1, keepdims=True))
            l = None
            acc = None
            for s, (_, vs, _) in zip(scores, pieces):
                p = jnp.exp(s - m)
                r = p.sum(axis=-1, keepdims=True)
                l = r if l is None else l + r
                pv = jnp.dot(p.astype(vs.dtype), vs,
                             preferred_element_type=jnp.float32)
                acc = pv if acc is None else acc + pv
            outs.append(acc * pl.reciprocal(l, approx=True))

        tile = outs[0] if HPB == 1 else jnp.concatenate(outs, axis=-1)
        o_ref[0, r0:r0 + GW, :] = tile.astype(o_ref.dtype)


# ----------------------------------------------------------------------------
# Wrapper: hoisted band-bias construction, halo BlockSpecs, head folding.
# ----------------------------------------------------------------------------
def local_attention_pallas(q, k, v, *, window_size, causal=False,
                           look_backward=1, look_forward=None,
                           block_q=256, sub_block_q=128):
    look_forward = (0 if causal else 1) if look_forward is None else look_forward
    assert not (causal and look_forward > 0), "you cannot look forward if causal"

    shape = q.shape
    qm, km, vm = (x.reshape(-1, x.shape[-2], x.shape[-1]) for x in (q, k, v))
    BH, T, E = qm.shape
    W = window_size
    lb, lf = look_backward, look_forward
    assert T % W == 0, f"seq len {T} must be divisible by window size {W}"
    assert W % 8 == 0, "Pallas path requires window_size to be a multiple of 8"
    windows = T // W

    # ---- query-tile size (windows per grid step) ----------------------------
    def _ok(d):
        return (windows % d == 0 and (lb == 0 or d % lb == 0)
                and (lf == 0 or d % lf == 0))
    valid = [d for d in range(1, windows + 1) if _ok(d)]
    if not valid:
        raise ValueError("no compatible query-tile size for this "
                         "look_backward/look_forward/sequence-length combination")
    fitting = [d for d in valid if d * W <= block_q]
    nwt = max(fitting) if fitting else min(valid)
    TQ = nwt * W
    n_tiles = T // TQ
    hb, hf = lb * W, lf * W
    has_prev, has_next = lb > 0, lf > 0

    # ---- in-kernel band blocking (windows per query sub-block) --------------
    cand = [g for g in range(1, nwt + 1)
            if nwt % g == 0 and g >= lb and g >= lf]
    fit_g = [g for g in cand if g * W <= max(sub_block_q, W)]
    G = max(fit_g) if fit_g else min(cand)
    GW = G * W
    n_sub = nwt // G
    span = min((G + lb + lf) * W, TQ)
    los = tuple(int(np.clip((j * G - lb) * W, 0, TQ - span)) for j in range(n_sub))

    # ---- fold two heads per step so the output tile is lane-dense -----------
    HPB = 2 if (BH % 2 == 0 and E < 128) else 1
    BHg = BH // HPB

    # ---- hoisted, grid-invariant band-mask biases (built once on host) ------
    i = np.arange(TQ)[:, None]
    w = i // W
    c = np.arange(TQ)[None, :]
    keep = (c >= (w - lb) * W) & (c < (w + lf + 1) * W)
    if causal:
        keep &= c <= i
    bias_full = np.where(keep, 0.0, _MASK).astype(np.float32)
    bias_main = np.stack(
        [bias_full[j * GW:(j + 1) * GW, los[j]:los[j] + span] for j in range(n_sub)], 0)

    operands = [qm]
    in_specs = [pl.BlockSpec((HPB, TQ, E), lambda b, t: (b, t, 0))]
    main_spec = pl.BlockSpec((HPB, TQ, E), lambda b, t: (b, t, 0))
    prev_spec = (pl.BlockSpec(
        (HPB, hb, E),
        lambda b, t: (b, jnp.maximum(t * (TQ // hb) - 1, 0), 0))
        if has_prev else None)
    next_spec = (pl.BlockSpec(
        (HPB, hf, E),
        lambda b, t: (b, jnp.minimum((t + 1) * (TQ // hf), T // hf - 1), 0))
        if has_next else None)

    for arr in (km, vm):
        if has_prev:
            operands.append(arr); in_specs.append(prev_spec)
        operands.append(arr); in_specs.append(main_spec)
        if has_next:
            operands.append(arr); in_specs.append(next_spec)

    operands.append(jnp.asarray(bias_main))
    in_specs.append(pl.BlockSpec((n_sub, GW, span), lambda b, t: (0, 0, 0)))
    if has_prev:
        rw = np.arange(GW)[:, None] // W
        pc = np.arange(hb)[None, :]
        bias_prev = np.where((rw < lb) & (pc >= rw * W), 0.0, _MASK).astype(np.float32)
        operands.append(jnp.asarray(bias_prev))
        in_specs.append(pl.BlockSpec((GW, hb), lambda b, t: (0, 0)))
    if has_next:
        wabs = ((n_sub - 1) * GW + np.arange(GW)[:, None]) // W
        nc = np.arange(hf)[None, :]
        bias_next = np.where((wabs >= nwt - lf) & (nc < (wabs + lf + 1 - nwt) * W),
                             0.0, _MASK).astype(np.float32)
        operands.append(jnp.asarray(bias_next))
        in_specs.append(pl.BlockSpec((GW, hf), lambda b, t: (0, 0)))

    kernel = functools.partial(
        _local_attn_kernel, HPB=HPB, GW=GW, n_sub=n_sub, span=span, los=los,
        scale=E ** -0.5, has_prev=has_prev, has_next=has_next, n_tiles=n_tiles)

    out = pl.pallas_call(
        kernel,
        out_shape=jax.ShapeDtypeStruct((BHg, T, HPB * E), qm.dtype),
        grid_spec=pltpu.PrefetchScalarGridSpec(
            num_scalar_prefetch=0,
            grid=(BHg, n_tiles),
            in_specs=in_specs,
            out_specs=pl.BlockSpec((1, TQ, HPB * E), lambda b, t: (b, t, 0)),
        ),
        compiler_params=pltpu.CompilerParams(
            dimension_semantics=("parallel", "parallel")),
    )(*operands)

    if HPB > 1:
        out = out.reshape(BHg, T, HPB, E).transpose(0, 2, 1, 3).reshape(BH, T, E)
    return out.reshape(shape)


# ----------------------------------------------------------------------------
# Pure-JAX reference mirroring the PyTorch forward (for verification).
# ----------------------------------------------------------------------------
def local_attention_ref(q, k, v, *, window_size, causal=False,
                        look_backward=1, look_forward=None):
    look_forward = (0 if causal else 1) if look_forward is None else look_forward
    shape = q.shape
    q, k, v = (x.reshape(-1, x.shape[-2], x.shape[-1]) for x in (q, k, v))
    b, t, e = q.shape
    W = window_size
    windows = t // W

    ticker = jnp.arange(t, dtype=q.dtype)[None, :]
    b_t = ticker.reshape(1, windows, W)
    bq, bk, bv = (x.reshape(b, windows, W, -1) for x in (q, k, v))

    def look_around(x, backward, forward, pad_value):
        pads = [(0, 0)] * x.ndim
        pads[1] = (backward, forward)
        padded = jnp.pad(x, pads, constant_values=pad_value)
        chunks = [padded[:, ind:ind + windows] for ind in range(forward + backward + 1)]
        return jnp.concatenate(chunks, axis=2)

    bk = look_around(bk, look_backward, look_forward, -1.0)
    bv = look_around(bv, look_backward, look_forward, -1.0)
    bq_t = b_t
    bq_k = look_around(b_t, look_backward, look_forward, -1.0)

    dots = jnp.einsum('bhie,bhje->bhij', bq, bk) * e ** (-0.5)
    mask_value = -jnp.finfo(dots.dtype).max
    if causal:
        cmask = bq_t[:, :, :, None] < bq_k[:, :, None, :]
        dots = jnp.where(cmask, mask_value, dots)
    pad_mask = bq_k[:, :, None, :] == -1
    dots = jnp.where(pad_mask, mask_value, dots)
    attn = jax.nn.softmax(dots, axis=-1)
    out = jnp.einsum('bhij,bhje->bhie', attn, bv)
    return out.reshape(-1, t, e).reshape(shape)


if __name__ == "__main__":
    # Small deterministic example: batch=2, heads=2, seq=768, dim=64, window=16.
    key = jax.random.PRNGKey(0)
    kq, kk, kv = jax.random.split(key, 3)
    B, H, T, E = 2, 2, 768, 64
    W = 16
    q = jax.random.normal(kq, (B, H, T, E), dtype=jnp.float32)
    k = jax.random.normal(kk, (B, H, T, E), dtype=jnp.float32)
    v = jax.random.normal(kv, (B, H, T, E), dtype=jnp.float32)

    # Non-causal (module defaults: look_backward=1, look_forward=1).
    out = local_attention_pallas(q, k, v, window_size=W, causal=False)
    out = jax.block_until_ready(out)
    ref = local_attention_ref(q, k, v, window_size=W, causal=False)
    assert out.shape == (B, H, T, E)
    err = jnp.max(jnp.abs(out - ref))
    assert jnp.allclose(out, ref, atol=5e-3, rtol=5e-3), f"max abs err {err}"

    # Causal (look_forward defaults to 0; no forward-halo operands fetched).
    out_c = local_attention_pallas(q, k, v, window_size=W, causal=True)
    out_c = jax.block_until_ready(out_c)
    ref_c = local_attention_ref(q, k, v, window_size=W, causal=True)
    err_c = jnp.max(jnp.abs(out_c - ref_c))
    assert jnp.allclose(out_c, ref_c, atol=5e-3, rtol=5e-3), f"max abs err {err_c}"

    print("KERNEL_OK")
</pallas_src>

<mosaic_0001>
module attributes {stable_mosaic.version = 11 : i64} {
  func.func @_local_attn_kernel(%arg0: i32, %arg1: i32, %arg2: memref<2x256x64xf32, #tpu.memory_space<vmem>>, %arg3: memref<2x16x64xf32, #tpu.memory_space<vmem>>, %arg4: memref<2x256x64xf32, #tpu.memory_space<vmem>>, %arg5: memref<2x16x64xf32, #tpu.memory_space<vmem>>, %arg6: memref<2x16x64xf32, #tpu.memory_space<vmem>>, %arg7: memref<2x256x64xf32, #tpu.memory_space<vmem>>, %arg8: memref<2x16x64xf32, #tpu.memory_space<vmem>>, %arg9: memref<2x128x160xf32, #tpu.memory_space<vmem>>, %arg10: memref<128x16xf32, #tpu.memory_space<vmem>>, %arg11: memref<128x16xf32, #tpu.memory_space<vmem>>, %arg12: memref<1x256x128xf32, #tpu.memory_space<vmem>>) attributes {dimension_semantics = [#tpu.dimension_semantics<parallel>, #tpu.dimension_semantics<parallel>], iteration_bounds = array<i64: 2, 3>, scalar_prefetch = 0 : i64, scratch_operands = 0 : i64, tpu.core_type = #tpu.core_type<tc>, window_params = [{transform_indices = @transform_0, window_bounds = array<i64: 2, 256, 64>}, {transform_indices = @transform_1, window_bounds = array<i64: 2, 16, 64>}, {transform_indices = @transform_2, window_bounds = array<i64: 2, 256, 64>}, {transform_indices = @transform_3, window_bounds = array<i64: 2, 16, 64>}, {transform_indices = @transform_4, window_bounds = array<i64: 2, 16, 64>}, {transform_indices = @transform_5, window_bounds = array<i64: 2, 256, 64>}, {transform_indices = @transform_6, window_bounds = array<i64: 2, 16, 64>}, {pipeline_mode = #tpu.pipeline_mode<synchronous>, transform_indices = @transform_7, window_bounds = array<i64: 2, 128, 160>}, {pipeline_mode = #tpu.pipeline_mode<synchronous>, transform_indices = @transform_8, window_bounds = array<i64: 128, 16>}, {pipeline_mode = #tpu.pipeline_mode<synchronous>, transform_indices = @transform_9, window_bounds = array<i64: 128, 16>}, {transform_indices = @transform_10, window_bounds = array<i64: 1, 256, 128>}]} {
    %c0_i32 = arith.constant 0 : i32
    %0 = arith.cmpi eq, %arg1, %c0_i32 : i32
    %cst = arith.constant -1.000000e+09 : f32
    %cst_0 = arith.constant 0.000000e+00 : f32
    %1 = arith.select %0, %cst, %cst_0 : f32
    %c2_i32 = arith.constant 2 : i32
    %2 = arith.cmpi eq, %arg1, %c2_i32 : i32
    %cst_1 = arith.constant -1.000000e+09 : f32
    %cst_2 = arith.constant 0.000000e+00 : f32
    %3 = arith.select %2, %cst_1, %cst_2 : f32
    %c0 = arith.constant 0 : index
    %c0_3 = arith.constant 0 : index
    %c0_4 = arith.constant 0 : index
    %4 = vector.load %arg9[%c0, %c0_3, %c0_4] : memref<2x128x160xf32, #tpu.memory_space<vmem>>, vector<1x128x160xf32>
    %5 = vector.shape_cast %4 : vector<1x128x160xf32> to vector<128x160xf32>
    %c0_5 = arith.constant 0 : index
    %c0_6 = arith.constant 0 : index
    %6 = vector.load %arg10[%c0_5, %c0_6] : memref<128x16xf32, #tpu.memory_space<vmem>>, vector<128x16xf32>
    %7 = vector.broadcast %1 : f32 to vector<128x16xf32>
    %8 = arith.addf %6, %7 : vector<128x16xf32>
    %c0_7 = arith.constant 0 : index
    %c0_8 = arith.constant 0 : index
    %c0_9 = arith.constant 0 : index
    %9 = vector.load %arg2[%c0_7, %c0_8, %c0_9] : memref<2x256x64xf32, #tpu.memory_space<vmem>>, vector<1x128x64xf32>
    %10 = vector.shape_cast %9 : vector<1x128x64xf32> to vector<128x64xf32>
    %cst_10 = arith.constant 1.250000e-01 : f32
    %11 = vector.broadcast %cst_10 : f32 to vector<128x64xf32>
    %12 = arith.mulf %10, %11 : vector<128x64xf32>
    %c0_11 = arith.constant 0 : index
    %c0_12 = arith.constant 0 : index
    %c0_13 = arith.constant 0 : index
    %13 = vector.load %arg4[%c0_11, %c0_12, %c0_13] : memref<2x256x64xf32, #tpu.memory_space<vmem>>, vector<1x160x64xf32>
    %14 = vector.shape_cast %13 : vector<1x160x64xf32> to vector<160x64xf32>
    %c0_14 = arith.constant 0 : index
    %c0_15 = arith.constant 0 : index
    %c0_16 = arith.constant 0 : index
    %15 = vector.load %arg7[%c0_14, %c0_15, %c0_16] : memref<2x256x64xf32, #tpu.memory_space<vmem>>, vector<1x160x64xf32>
    %16 = vector.shape_cast %15 : vector<1x160x64xf32> to vector<160x64xf32>
    %c0_17 = arith.constant 0 : index
    %c0_18 = arith.constant 0 : index
    %c0_19 = arith.constant 0 : index
    %17 = vector.load %arg3[%c0_17, %c0_18, %c0_19] : memref<2x16x64xf32, #tpu.memory_space<vmem>>, vector<1x16x64xf32>
    %18 = vector.shape_cast %17 : vector<1x16x64xf32> to vector<16x64xf32>
    %c0_20 = arith.constant 0 : index
    %c0_21 = arith.constant 0 : index
    %c0_22 = arith.constant 0 : index
    %19 = vector.load %arg6[%c0_20, %c0_21, %c0_22] : memref<2x16x64xf32, #tpu.memory_space<vmem>>, vector<1x16x64xf32>
    %20 = vector.shape_cast %19 : vector<1x16x64xf32> to vector<16x64xf32>
    %cst_23 = arith.constant dense<0.000000e+00> : vector<128x160xf32>
    %21 = tpu.matmul %12, %14, %cst_23 {dimension_numbers = #tpu.dot_dimension_numbers<[1], [1], [0], [0], [0, 0, 1, 0], [], []>} : vector<128x64xf32>, vector<160x64xf32>, vector<128x160xf32> -> vector<128x160xf32>
    %22 = arith.addf %21, %5 : vector<128x160xf32>
    %cst_24 = arith.constant dense<0.000000e+00> : vector<128x16xf32>
    %23 = tpu.matmul %12, %18, %cst_24 {dimension_numbers = #tpu.dot_dimension_numbers<[1], [1], [0], [0], [0, 0, 1, 0], [], []>} : vector<128x64xf32>, vector<16x64xf32>, vector<128x16xf32> -> vector<128x16xf32>
    %24 = arith.addf %23, %8 : vector<128x16xf32>
    %cst_25 = arith.constant dense<0xFF800000> : vector<128xf32>
    %25 = vector.multi_reduction <maximumf>, %22, %cst_25 [1] : vector<128x160xf32> to vector<128xf32>
    %26 = vector.shape_cast %25 : vector<128xf32> to vector<128x1xf32>
    %cst_26 = arith.constant dense<0xFF800000> : vector<128xf32>
    %27 = vector.multi_reduction <maximumf>, %24, %cst_26 [1] : vector<128x16xf32> to vector<128xf32>
    %28 = vector.shape_cast %27 : vector<128xf32> to vector<128x1xf32>
    %29 = arith.maximumf %26, %28 : vector<128x1xf32>
    %30 = vector.broadcast %29 : vector<128x1xf32> to vector<128x160xf32>
    %31 = arith.subf %22, %30 : vector<128x160xf32>
    %32 = math.exp %31 : vector<128x160xf32>
    %cst_27 = arith.constant dense<0.000000e+00> : vector<128xf32>
    %33 = vector.multi_reduction <add>, %32, %cst_27 [1] : vector<128x160xf32> to vector<128xf32>
    %34 = vector.shape_cast %33 : vector<128xf32> to vector<128x1xf32>
    %cst_28 = arith.constant dense<0.000000e+00> : vector<128x64xf32>
    %35 = tpu.matmul %32, %16, %cst_28 {dimension_numbers = #tpu.dot_dimension_numbers<[1], [0], [0], [1], [0, 0, 1, 1], [], []>} : vector<128x160xf32>, vector<160x64xf32>, vector<128x64xf32> -> vector<128x64xf32>
    %36 = vector.broadcast %29 : vector<128x1xf32> to vector<128x16xf32>
    %37 = arith.subf %24, %36 : vector<128x16xf32>
    %38 = math.exp %37 : vector<128x16xf32>
    %cst_29 = arith.constant dense<0.000000e+00> : vector<128xf32>
    %39 = vector.multi_reduction <add>, %38, %cst_29 [1] : vector<128x16xf32> to vector<128xf32>
    %40 = vector.shape_cast %39 : vector<128xf32> to vector<128x1xf32>
    %41 = arith.addf %34, %40 : vector<128x1xf32>
    %cst_30 = arith.constant dense<0.000000e+00> : vector<128x64xf32>
    %42 = tpu.matmul %38, %20, %cst_30 {dimension_numbers = #tpu.dot_dimension_numbers<[1], [0], [0], [1], [0, 0, 1, 1], [], []>} : vector<128x16xf32>, vector<16x64xf32>, vector<128x64xf32> -> vector<128x64xf32>
    %43 = arith.addf %35, %42 : vector<128x64xf32>
    %44 = tpu.reciprocal %41 {approx = true} : vector<128x1xf32> -> vector<128x1xf32>
    %45 = vector.broadcast %44 : vector<128x1xf32> to vector<128x64xf32>
    %46 = arith.mulf %43, %45 : vector<128x64xf32>
    %c1 = arith.constant 1 : index
    %c0_31 = arith.constant 0 : index
    %c0_32 = arith.constant 0 : index
    %47 = vector.load %arg2[%c1, %c0_31, %c0_32] : memref<2x256x64xf32, #tpu.memory_space<vmem>>, vector<1x128x64xf32>
    %48 = vector.shape_cast %47 : vector<1x128x64xf32> to vector<128x64xf32>
    %cst_33 = arith.constant 1.250000e-01 : f32
    %49 = vector.broadcast %cst_33 : f32 to vector<128x64xf32>
    %50 = arith.mulf %48, %49 : vector<128x64xf32>
    %c1_34 = arith.constant 1 : index
    %c0_35 = arith.constant 0 : index
    %c0_36 = arith.constant 0 : index
    %51 = vector.load %arg4[%c1_34, %c0_35, %c0_36] : memref<2x256x64xf32, #tpu.memory_space<vmem>>, vector<1x160x64xf32>
    %52 = vector.shape_cast %51 : vector<1x160x64xf32> to vector<160x64xf32>
    %c1_37 = arith.constant 1 : index
    %c0_38 = arith.constant 0 : index
    %c0_39 = arith.constant 0 : index
    %53 = vector.load %arg7[%c1_37, %c0_38, %c0_39] : memref<2x256x64xf32, #tpu.memory_space<vmem>>, vector<1x160x64xf32>
    %54 = vector.shape_cast %53 : vector<1x160x64xf32> to vector<160x64xf32>
    %c1_40 = arith.constant 1 : index
    %c0_41 = arith.constant 0 : index
    %c0_42 = arith.constant 0 : index
    %55 = vector.load %arg3[%c1_40, %c0_41, %c0_42] : memref<2x16x64xf32, #tpu.memory_space<vmem>>, vector<1x16x64xf32>
    %56 = vector.shape_cast %55 : vector<1x16x64xf32> to vector<16x64xf32>
    %c1_43 = arith.constant 1 : index
    %c0_44 = arith.constant 0 : index
    %c0_45 = arith.constant 0 : index
    %57 = vector.load %arg6[%c1_43, %c0_44, %c0_45] : memref<2x16x64xf32, #tpu.memory_space<vmem>>, vector<1x16x64xf32>
    %58 = vector.shape_cast %57 : vector<1x16x64xf32> to vector<16x64xf32>
    %cst_46 = arith.constant dense<0.000000e+00> : vector<128x160xf32>
    %59 = tpu.matmul %50, %52, %cst_46 {dimension_numbers = #tpu.dot_dimension_numbers<[1], [1], [0], [0], [0, 0, 1, 0], [], []>} : vector<128x64xf32>, vector<160x64xf32>, vector<128x160xf32> -> vector<128x160xf32>
    %60 = arith.addf %59, %5 : vector<128x160xf32>
    %cst_47 = arith.constant dense<0.000000e+00> : vector<128x16xf32>
    %61 = tpu.matmul %50, %56, %cst_47 {dimension_numbers = #tpu.dot_dimension_numbers<[1], [1], [0], [0], [0, 0, 1, 0], [], []>} : vector<128x64xf32>, vector<16x64xf32>, vector<128x16xf32> -> vector<128x16xf32>
    %62 = arith.addf %61, %8 : vector<128x16xf32>
    %cst_48 = arith.constant dense<0xFF800000> : vector<128xf32>
    %63 = vector.multi_reduction <maximumf>, %60, %cst_48 [1] : vector<128x160xf32> to vector<128xf32>
    %64 = vector.shape_cast %63 : vector<128xf32> to vector<128x1xf32>
    %cst_49 = arith.constant dense<0xFF800000> : vector<128xf32>
    %65 = vector.multi_reduction <maximumf>, %62, %cst_49 [1] : vector<128x16xf32> to vector<128xf32>
    %66 = vector.shape_cast %65 : vector<128xf32> to vector<128x1xf32>
    %67 = arith.maximumf %64, %66 : vector<128x1xf32>
    %68 = vector.broadcast %67 : vector<128x1xf32> to vector<128x160xf32>
    %69 = arith.subf %60, %68 : vector<128x160xf32>
    %70 = math.exp %69 : vector<128x160xf32>
    %cst_50 = arith.constant dense<0.000000e+00> : vector<128xf32>
    %71 = vector.multi_reduction <add>, %70, %cst_50 [1] : vector<128x160xf32> to vector<128xf32>
    %72 = vector.shape_cast %71 : vector<128xf32> to vector<128x1xf32>
    %cst_51 = arith.constant dense<0.000000e+00> : vector<128x64xf32>
    %73 = tpu.matmul %70, %54, %cst_51 {dimension_numbers = #tpu.dot_dimension_numbers<[1], [0], [0], [1], [0, 0, 1, 1], [], []>} : vector<128x160xf32>, vector<160x64xf32>, vector<128x64xf32> -> vector<128x64xf32>
    %74 = vector.broadcast %67 : vector<128x1xf32> to vector<128x16xf32>
    %75 = arith.subf %62, %74 : vector<128x16xf32>
    %76 = math.exp %75 : vector<128x16xf32>
    %cst_52 = arith.constant dense<0.000000e+00> : vector<128xf32>
    %77 = vector.multi_reduction <add>, %76, %cst_52 [1] : vector<128x16xf32> to vector<128xf32>
    %78 = vector.shape_cast %77 : vector<128xf32> to vector<128x1xf32>
    %79 = arith.addf %72, %78 : vector<128x1xf32>
    %cst_53 = arith.constant dense<0.000000e+00> : vector<128x64xf32>
    %80 = tpu.matmul %76, %58, %cst_53 {dimension_numbers = #tpu.dot_dimension_numbers<[1], [0], [0], [1], [0, 0, 1, 1], [], []>} : vector<128x16xf32>, vector<16x64xf32>, vector<128x64xf32> -> vector<128x64xf32>
    %81 = arith.addf %73, %80 : vector<128x64xf32>
    %82 = tpu.reciprocal %79 {approx = true} : vector<128x1xf32> -> vector<128x1xf32>
    %83 = vector.broadcast %82 : vector<128x1xf32> to vector<128x64xf32>
    %84 = arith.mulf %81, %83 : vector<128x64xf32>
    %85 = tpu.concatenate %46, %84 in 1 : vector<128x64xf32>, vector<128x64xf32> -> vector<128x128xf32>
    %c0_54 = arith.constant 0 : index
    %c0_55 = arith.constant 0 : index
    %c0_56 = arith.constant 0 : index
    %86 = vector.load %arg12[%c0_54, %c0_55, %c0_56] : memref<1x256x128xf32, #tpu.memory_space<vmem>>, vector<1x128x128xf32>
    %87 = vector.shape_cast %86 : vector<1x128x128xf32> to vector<128x128xf32>
    %88 = vector.shape_cast %85 : vector<128x128xf32> to vector<1x128x128xf32>
    tpu.vector_store %arg12[%c0_54, %c0_55, %c0_56], %88 {strides = array<i32>} : memref<1x256x128xf32, #tpu.memory_space<vmem>>, vector<1x128x128xf32>,
    %c1_57 = arith.constant 1 : index
    %c0_58 = arith.constant 0 : index
    %c0_59 = arith.constant 0 : index
    %89 = vector.load %arg9[%c1_57, %c0_58, %c0_59] : memref<2x128x160xf32, #tpu.memory_space<vmem>>, vector<1x128x160xf32>
    %90 = vector.shape_cast %89 : vector<1x128x160xf32> to vector<128x160xf32>
    %c0_60 = arith.constant 0 : index
    %c0_61 = arith.constant 0 : index
    %91 = vector.load %arg11[%c0_60, %c0_61] : memref<128x16xf32, #tpu.memory_space<vmem>>, vector<128x16xf32>
    %92 = vector.broadcast %3 : f32 to vector<128x16xf32>
    %93 = arith.addf %91, %92 : vector<128x16xf32>
    %c0_62 = arith.constant 0 : index
    %c128 = arith.constant 128 : index
    %c0_63 = arith.constant 0 : index
    %94 = vector.load %arg2[%c0_62, %c128, %c0_63] : memref<2x256x64xf32, #tpu.memory_space<vmem>>, vector<1x128x64xf32>
    %95 = vector.shape_cast %94 : vector<1x128x64xf32> to vector<128x64xf32>
    %cst_64 = arith.constant 1.250000e-01 : f32
    %96 = vector.broadcast %cst_64 : f32 to vector<128x64xf32>
    %97 = arith.mulf %95, %96 : vector<128x64xf32>
    %c0_65 = arith.constant 0 : index
    %c96 = arith.constant 96 : index
    %c0_66 = arith.constant 0 : index
    %98 = vector.load %arg4[%c0_65, %c96, %c0_66] : memref<2x256x64xf32, #tpu.memory_space<vmem>>, vector<1x160x64xf32>
    %99 = vector.shape_cast %98 : vector<1x160x64xf32> to vector<160x64xf32>
    %c0_67 = arith.constant 0 : index
    %c96_68 = arith.constant 96 : index
    %c0_69 = arith.constant 0 : index
    %100 = vector.load %arg7[%c0_67, %c96_68, %c0_69] : memref<2x256x64xf32, #tpu.memory_space<vmem>>, vector<1x160x64xf32>
    %101 = vector.shape_cast %100 : vector<1x160x64xf32> to vector<160x64xf32>
    %c0_70 = arith.constant 0 : index
    %c0_71 = arith.constant 0 : index
    %c0_72 = arith.constant 0 : index
    %102 = vector.load %arg5[%c0_70, %c0_71, %c0_72] : memref<2x16x64xf32, #tpu.memory_space<vmem>>, vector<1x16x64xf32>
    %103 = vector.shape_cast %102 : vector<1x16x64xf32> to vector<16x64xf32>
    %c0_73 = arith.constant 0 : index
    %c0_74 = arith.constant 0 : index
    %c0_75 = arith.constant 0 : index
    %104 = vector.load %arg8[%c0_73, %c0_74, %c0_75] : memref<2x16x64xf32, #tpu.memory_space<vmem>>, vector<1x16x64xf32>
    %105 = vector.shape_cast %104 : vector<1x16x64xf32> to vector<16x64xf32>
    %cst_76 = arith.constant dense<0.000000e+00> : vector<128x160xf32>
    %106 = tpu.matmul %97, %99, %cst_76 {dimension_numbers = #tpu.dot_dimension_numbers<[1], [1], [0], [0], [0, 0, 1, 0], [], []>} : vector<128x64xf32>, vector<160x64xf32>, vector<128x160xf32> -> vector<128x160xf32>
    %107 = arith.addf %106, %90 : vector<128x160xf32>
    %cst_77 = arith.constant dense<0.000000e+00> : vector<128x16xf32>
    %108 = tpu.matmul %97, %103, %cst_77 {dimension_numbers = #tpu.dot_dimension_numbers<[1], [1], [0], [0], [0, 0, 1, 0], [], []>} : vector<128x64xf32>, vector<16x64xf32>, vector<128x16xf32> -> vector<128x16xf32>
    %109 = arith.addf %108, %93 : vector<128x16xf32>
    %cst_78 = arith.constant dense<0xFF800000> : vector<128xf32>
    %110 = vector.multi_reduction <maximumf>, %107, %cst_78 [1] : vector<128x160xf32> to vector<128xf32>
    %111 = vector.shape_cast %110 : vector<128xf32> to vector<128x1xf32>
    %cst_79 = arith.constant dense<0xFF800000> : vector<128xf32>
    %112 = vector.multi_reduction <maximumf>, %109, %cst_79 [1] : vector<128x16xf32> to vector<128xf32>
    %113 = vector.shape_cast %112 : vector<128xf32> to vector<128x1xf32>
    %114 = arith.maximumf %111, %113 : vector<128x1xf32>
    %115 = vector.broadcast %114 : vector<128x1xf32> to vector<128x160xf32>
    %116 = arith.subf %107, %115 : vector<128x160xf32>
    %117 = math.exp %116 : vector<128x160xf32>
    %cst_80 = arith.constant dense<0.000000e+00> : vector<128xf32>
    %118 = vector.multi_reduction <add>, %117, %cst_80 [1] : vector<128x160xf32> to vector<128xf32>
    %119 = vector.shape_cast %118 : vector<128xf32> to vector<128x1xf32>
    %cst_81 = arith.constant dense<0.000000e+00> : vector<128x64xf32>
    %120 = tpu.matmul %117, %101, %cst_81 {dimension_numbers = #tpu.dot_dimension_numbers<[1], [0], [0], [1], [0, 0, 1, 1], [], []>} : vector<128x160xf32>, vector<160x64xf32>, vector<128x64xf32> -> vector<128x64xf32>
    %121 = vector.broadcast %114 : vector<128x1xf32> to vector<128x16xf32>
    %122 = arith.subf %109, %121 : vector<128x16xf32>
    %123 = math.exp %122 : vector<128x16xf32>
    %cst_82 = arith.constant dense<0.000000e+00> : vector<128xf32>
    %124 = vector.multi_reduction <add>, %123, %cst_82 [1] : vector<128x16xf32> to vector<128xf32>
    %125 = vector.shape_cast %124 : vector<128xf32> to vector<128x1xf32>
    %126 = arith.addf %119, %125 : vector<128x1xf32>
    %cst_83 = arith.constant dense<0.000000e+00> : vector<128x64xf32>
    %127 = tpu.matmul %123, %105, %cst_83 {dimension_numbers = #tpu.dot_dimension_numbers<[1], [0], [0], [1], [0, 0, 1, 1], [], []>} : vector<128x16xf32>, vector<16x64xf32>, vector<128x64xf32> -> vector<128x64xf32>
    %128 = arith.addf %120, %127 : vector<128x64xf32>
    %129 = tpu.reciprocal %126 {approx = true} : vector<128x1xf32> -> vector<128x1xf32>
    %130 = vector.broadcast %129 : vector<128x1xf32> to vector<128x64xf32>
    %131 = arith.mulf %128, %130 : vector<128x64xf32>
    %c1_84 = arith.constant 1 : index
    %c128_85 = arith.constant 128 : index
    %c0_86 = arith.constant 0 : index
    %132 = vector.load %arg2[%c1_84, %c128_85, %c0_86] : memref<2x256x64xf32, #tpu.memory_space<vmem>>, vector<1x128x64xf32>
    %133 = vector.shape_cast %132 : vector<1x128x64xf32> to vector<128x64xf32>
    %cst_87 = arith.constant 1.250000e-01 : f32
    %134 = vector.broadcast %cst_87 : f32 to vector<128x64xf32>
    %135 = arith.mulf %133, %134 : vector<128x64xf32>
    %c1_88 = arith.constant 1 : index
    %c96_89 = arith.constant 96 : index
    %c0_90 = arith.constant 0 : index
    %136 = vector.load %arg4[%c1_88, %c96_89, %c0_90] : memref<2x256x64xf32, #tpu.memory_space<vmem>>, vector<1x160x64xf32>
    %137 = vector.shape_cast %136 : vector<1x160x64xf32> to vector<160x64xf32>
    %c1_91 = arith.constant 1 : index
    %c96_92 = arith.constant 96 : index
    %c0_93 = arith.constant 0 : index
    %138 = vector.load %arg7[%c1_91, %c96_92, %c0_93] : memref<2x256x64xf32, #tpu.memory_space<vmem>>, vector<1x160x64xf32>
    %139 = vector.shape_cast %138 : vector<1x160x64xf32> to vector<160x64xf32>
    %c1_94 = arith.constant 1 : index
    %c0_95 = arith.constant 0 : index
    %c0_96 = arith.constant 0 : index
    %140 = vector.load %arg5[%c1_94, %c0_95, %c0_96] : memref<2x16x64xf32, #tpu.memory_space<vmem>>, vector<1x16x64xf32>
    %141 = vector.shape_cast %140 : vector<1x16x64xf32> to vector<16x64xf32>
    %c1_97 = arith.constant 1 : index
    %c0_98 = arith.constant 0 : index
    %c0_99 = arith.constant 0 : index
    %142 = vector.load %arg8[%c1_97, %c0_98, %c0_99] : memref<2x16x64xf32, #tpu.memory_space<vmem>>, vector<1x16x64xf32>
    %143 = vector.shape_cast %142 : vector<1x16x64xf32> to vector<16x64xf32>
    %cst_100 = arith.constant dense<0.000000e+00> : vector<128x160xf32>
    %144 = tpu.matmul %135, %137, %cst_100 {dimension_numbers = #tpu.dot_dimension_numbers<[1], [1], [0], [0], [0, 0, 1, 0], [], []>} : vector<128x64xf32>, vector<160x64xf32>, vector<128x160xf32> -> vector<128x160xf32>
    %145 = arith.addf %144, %90 : vector<128x160xf32>
    %cst_101 = arith.constant dense<0.000000e+00> : vector<128x16xf32>
    %146 = tpu.matmul %135, %141, %cst_101 {dimension_numbers = #tpu.dot_dimension_numbers<[1], [1], [0], [0], [0, 0, 1, 0], [], []>} : vector<128x64xf32>, vector<16x64xf32>, vector<128x16xf32> -> vector<128x16xf32>
    %147 = arith.addf %146, %93 : vector<128x16xf32>
    %cst_102 = arith.constant dense<0xFF800000> : vector<128xf32>
    %148 = vector.multi_reduction <maximumf>, %145, %cst_102 [1] : vector<128x160xf32> to vector<128xf32>
    %149 = vector.shape_cast %148 : vector<128xf32> to vector<128x1xf32>
    %cst_103 = arith.constant dense<0xFF800000> : vector<128xf32>
    %150 = vector.multi_reduction <maximumf>, %147, %cst_103 [1] : vector<128x16xf32> to vector<128xf32>
    %151 = vector.shape_cast %150 : vector<128xf32> to vector<128x1xf32>
    %152 = arith.maximumf %149, %151 : vector<128x1xf32>
    %153 = vector.broadcast %152 : vector<128x1xf32> to vector<128x160xf32>
    %154 = arith.subf %145, %153 : vector<128x160xf32>
    %155 = math.exp %154 : vector<128x160xf32>
    %cst_104 = arith.constant dense<0.000000e+00> : vector<128xf32>
    %156 = vector.multi_reduction <add>, %155, %cst_104 [1] : vector<128x160xf32> to vector<128xf32>
    %157 = vector.shape_cast %156 : vector<128xf32> to vector<128x1xf32>
    %cst_105 = arith.constant dense<0.000000e+00> : vector<128x64xf32>
    %158 = tpu.matmul %155, %139, %cst_105 {dimension_numbers = #tpu.dot_dimension_numbers<[1], [0], [0], [1], [0, 0, 1, 1], [], []>} : vector<128x160xf32>, vector<160x64xf32>, vector<128x64xf32> -> vector<128x64xf32>
    %159 = vector.broadcast %152 : vector<128x1xf32> to vector<128x16xf32>
    %160 = arith.subf %147, %159 : vector<128x16xf32>
    %161 = math.exp %160 : vector<128x16xf32>
    %cst_106 = arith.constant dense<0.000000e+00> : vector<128xf32>
    %162 = vector.multi_reduction <add>, %161, %cst_106 [1] : vector<128x16xf32> to vector<128xf32>
    %163 = vector.shape_cast %162 : vector<128xf32> to vector<128x1xf32>
    %164 = arith.addf %157, %163 : vector<128x1xf32>
    %cst_107 = arith.constant dense<0.000000e+00> : vector<128x64xf32>
    %165 = tpu.matmul %161, %143, %cst_107 {dimension_numbers = #tpu.dot_dimension_numbers<[1], [0], [0], [1], [0, 0, 1, 1], [], []>} : vector<128x16xf32>, vector<16x64xf32>, vector<128x64xf32> -> vector<128x64xf32>
    %166 = arith.addf %158, %165 : vector<128x64xf32>
    %167 = tpu.reciprocal %164 {approx = true} : vector<128x1xf32> -> vector<128x1xf32>
    %168 = vector.broadcast %167 : vector<128x1xf32> to vector<128x64xf32>
    %169 = arith.mulf %166, %168 : vector<128x64xf32>
    %170 = tpu.concatenate %131, %169 in 1 : vector<128x64xf32>, vector<128x64xf32> -> vector<128x128xf32>
    %c0_108 = arith.constant 0 : index
    %c128_109 = arith.constant 128 : index
    %c0_110 = arith.constant 0 : index
    %171 = vector.load %arg12[%c0_108, %c128_109, %c0_110] : memref<1x256x128xf32, #tpu.memory_space<vmem>>, vector<1x128x128xf32>
    %172 = vector.shape_cast %171 : vector<1x128x128xf32> to vector<128x128xf32>
    %173 = vector.shape_cast %170 : vector<128x128xf32> to vector<1x128x128xf32>
    tpu.vector_store %arg12[%c0_108, %c128_109, %c0_110], %173 {strides = array<i32>} : memref<1x256x128xf32, #tpu.memory_space<vmem>>, vector<1x128x128xf32>,
    return
  }
  func.func @transform_0(%arg0: i32, %arg1: i32) -> (i32, i32, i32) {
    %c0_i32 = arith.constant 0 : i32
    %c0_i32_0 = arith.constant 0 : i32
    return %arg0, %arg1, %c0_i32 : i32, i32, i32
  }
  func.func @transform_1(%arg0: i32, %arg1: i32) -> (i32, i32, i32) {
    %c16_i32 = arith.constant 16 : i32
    %0 = arith.muli %arg1, %c16_i32 : i32
    %c1_i32 = arith.constant 1 : i32
    %1 = arith.subi %0, %c1_i32 : i32
    %c0_i32 = arith.constant 0 : i32
    %2 = arith.maxsi %1, %c0_i32 : i32
    %c0_i32_0 = arith.constant 0 : i32
    %c0_i32_1 = arith.constant 0 : i32
    return %arg0, %2, %c0_i32_0 : i32, i32, i32
  }
  func.func @transform_2(%arg0: i32, %arg1: i32) -> (i32, i32, i32) {
    %c0_i32 = arith.constant 0 : i32
    %c0_i32_0 = arith.constant 0 : i32
    return %arg0, %arg1, %c0_i32 : i32, i32, i32
  }
  func.func @transform_3(%arg0: i32, %arg1: i32) -> (i32, i32, i32) {
    %c1_i32 = arith.constant 1 : i32
    %0 = arith.addi %arg1, %c1_i32 : i32
    %c16_i32 = arith.constant 16 : i32
    %1 = arith.muli %0, %c16_i32 : i32
    %c47_i32 = arith.constant 47 : i32
    %2 = arith.minsi %1, %c47_i32 : i32
    %c0_i32 = arith.constant 0 : i32
    %c0_i32_0 = arith.constant 0 : i32
    return %arg0, %2, %c0_i32 : i32, i32, i32
  }
  func.func @transform_4(%arg0: i32, %arg1: i32) -> (i32, i32, i32) {
    %c16_i32 = arith.constant 16 : i32
    %0 = arith.muli %arg1, %c16_i32 : i32
    %c1_i32 = arith.constant 1 : i32
    %1 = arith.subi %0, %c1_i32 : i32
    %c0_i32 = arith.constant 0 : i32
    %2 = arith.maxsi %1, %c0_i32 : i32
    %c0_i32_0 = arith.constant 0 : i32
    %c0_i32_1 = arith.constant 0 : i32
    return %arg0, %2, %c0_i32_0 : i32, i32, i32
  }
  func.func @transform_5(%arg0: i32, %arg1: i32) -> (i32, i32, i32) {
    %c0_i32 = arith.constant 0 : i32
    %c0_i32_0 = arith.constant 0 : i32
    return %arg0, %arg1, %c0_i32 : i32, i32, i32
  }
  func.func @transform_6(%arg0: i32, %arg1: i32) -> (i32, i32, i32) {
    %c1_i32 = arith.constant 1 : i32
    %0 = arith.addi %arg1, %c1_i32 : i32
    %c16_i32 = arith.constant 16 : i32
    %1 = arith.muli %0, %c16_i32 : i32
    %c47_i32 = arith.constant 47 : i32
    %2 = arith.minsi %1, %c47_i32 : i32
    %c0_i32 = arith.constant 0 : i32
    %c0_i32_0 = arith.constant 0 : i32
    return %arg0, %2, %c0_i32 : i32, i32, i32
  }
  func.func @transform_7(%arg0: i32, %arg1: i32) -> (i32, i32, i32) {
    %c0_i32 = arith.constant 0 : i32
    %c0_i32_0 = arith.constant 0 : i32
    %c0_i32_1 = arith.constant 0 : i32
    %c0_i32_2 = arith.constant 0 : i32
    return %c0_i32, %c0_i32_0, %c0_i32_1 : i32, i32, i32
  }
  func.func @transform_8(%arg0: i32, %arg1: i32) -> (i32, i32) {
    %c0_i32 = arith.constant 0 : i32
    %c0_i32_0 = arith.constant 0 : i32
    %c0_i32_1 = arith.constant 0 : i32
    return %c0_i32, %c0_i32_0 : i32, i32
  }
  func.func @transform_9(%arg0: i32, %arg1: i32) -> (i32, i32) {
    %c0_i32 = arith.constant 0 : i32
    %c0_i32_0 = arith.constant 0 : i32
    %c0_i32_1 = arith.constant 0 : i32
    return %c0_i32, %c0_i32_0 : i32, i32
  }
  func.func @transform_10(%arg0: i32, %arg1: i32) -> (i32, i32, i32) {
    %c0_i32 = arith.constant 0 : i32
    %c0_i32_0 = arith.constant 0 : i32
    return %arg0, %arg1, %c0_i32 : i32, i32, i32
  }
}

</mosaic_0001>

<bundles_post_ra>
// kernel: tpu_custom_call.1
= control target key start
LH: loop header
LB: loop body
LE: loop exit
PB: predicated region body
PF: predicated region fallthrough
CT: control target
= control target key end

     0   :  { %s12625_s0 = inlined_call_operand.vmem [shape: f32[4,768,64], index: 0, kind: input, shape index: {}]   ;;  %s12626_s1 = inlined_call_operand.vmem [shape: f32[4,768,64], index: 1, kind: input, shape index: {}]   ;;  %s12627_s2 = inlined_call_operand.vmem [shape: f32[4,768,64], index: 2, kind: input, shape index: {}]   ;;  %s12628_s3 = inlined_call_operand.vmem [shape: f32[4,768,64], index: 3, kind: input, shape index: {}]   ;;  %s12629_s4 = inlined_call_operand.vmem [shape: f32[4,768,64], index: 4, kind: input, shape index: {}]   ;;  %s12630_s5 = inlined_call_operand.vmem [shape: f32[4,768,64], index: 5, kind: input, shape index: {}]   ;;  %s12631_s6 = inlined_call_operand.vmem [shape: f32[4,768,64], index: 6, kind: input, shape index: {}]   ;;  %s12632_s7 = inlined_call_operand.vmem [shape: f32[2,128,160], index: 7, kind: input, shape index: {}]   ;;  %s12633_s8 = inlined_call_operand.vmem [shape: f32[128,16], index: 8, kind: input, shape index: {}]   ;;  %s12634_s9 = inlined_call_operand.vmem [shape: f32[128,16], index: 9, kind: input, shape index: {}]   ;;  %s12635_s10 = inlined_call_operand.hbm [shape: f32[2,768,128], index: 10, kind: output, shape index: {}]  }
   0x1   :  { %12771 = sst [smem:[#allocation169_spill]] %s12625_s0 }
   0x2   :  { %12772 = sst [smem:[#allocation170_spill]] %s12626_s1 }
   0x3   :  { %12773 = sst [smem:[#allocation171_spill]] %s12627_s2 }
   0x4   :  { %12774 = sst [smem:[#allocation172_spill]] %s12632_s7 }
   0x5   :  { %12775 = sst [smem:[#allocation173_spill]] %s12633_s8 }
   0x6   :  { %12776 = sst [smem:[#allocation174_spill]] %s12634_s9 }
   0x7   :  { %12777 = sst [smem:[#allocation175_spill]] %s12635_s10 }
   0x8   :  { %15 = vsyncpa [#allocation10], 0 }
   0x9   :  { %17 = vsyncpa [#allocation10 + $0x1], 0  ;;  %s8185_s13 = smov 0   ;;  %s8187_s14 = smov 0  }
   0xa   :  { %s8189_s15 = smov 0   ;;  %s8191_s16 = smov 0  }
   0xb   :  { %s8193_s17 = smov 0   ;;  %s8195_s18 = smov 0  }
   0xc   :  { %s8197_s19 = smov 0   ;;  %s8199_s20 = smov 0  }
   0xd   :  { %s8201_s21 = smov 0   ;;  %s8203_s22 = smov 0  }
   0xe   :  { %s8205_s23 = smov 0   ;;  %s8207_s24 = smov 0  }
   0xf LB: > { %12778 = sst [smem:[#allocation12_spill]] %s8081_s13  ;;  %s32_s27 = sadd.s32 1, %s8117_s22  ;;  %s8125_s24 = sphi %s8207_s24, %s23_s24   ;;  %s8121_s23 = sphi %s8205_s23, %s13341_s23   ;;  %s8117_s22 = sphi %s8203_s22, %s13340_s22   ;;  %s8113_s21 = sphi %s8201_s21, %s13339_s21   ;;  %s8109_s20 = sphi %s8199_s20, %s13338_s20   ;;  %s8105_s19 = sphi %s8197_s19, %s13337_s19   ;;  %s8101_s18 = sphi %s8195_s18, %s13336_s18   ;;  %s8097_s17 = sphi %s8193_s17, %s13335_s17   ;;  %s8093_s16 = sphi %s8191_s16, %s13334_s16   ;;  %s8089_s15 = sphi %s8189_s15, %s13333_s15   ;;  %s8085_s14 = sphi %s8187_s14, %s13332_s14   ;;  %s8081_s13 = sphi %s8185_s13, %s13331_s13  }
  0x10   : > { %12779 = sst [smem:[#allocation13_spill]] %s8093_s16  ;;  %s35_s28 = sadd.s32 1, %s8121_s23 }
  0x11   : > { %12780 = sst [smem:[#allocation14_spill]] %s8109_s20  ;;  %p33_p0 = scmp.ge.s32.totalorder %s32_s27, 3 }
  0x12   : > { %12781 = sst [smem:[#allocation15_spill]] %s8113_s21  ;;  %s44_s29 = sadd.s32 1, %s8105_s19 }
  0x13   : > { %p51_p1 = scmp.ne.s32.totalorder %s8105_s19, %s8101_s18  ;;  %p52_p2 = scmp.eq.s32.totalorder %s8125_s24, 0 }
  0x14   : > { %s13343_s27 = smov (%p33_p0, %s32_s27), 0  ;;  %s13345_s28 = smov (!%p33_p0, %s35_s28), %s8121_s23 }
  0x15   : > { %12782 = sst [smem:[#allocation16_spill]] %s13343_s27  ;;  %s40_s30 = ssub.s32 %s8117_s22, %s13343_s27 }
  0x16   : > { %p8263_p3 = por %p52_p2, %p51_p1  ;;  %p37_p4 = scmp.ge.s32.totalorder %s13345_s28, 2 }
  0x17   : > { %s6662_s12 = sshll.u32 %s8117_s22, 4  ;;  %s6664_s25 = sshll.u32 %s13343_s27, 4 }
  0x18   : > { %s6663_s26 = sadd.s32 4294967295, %s6662_s12  ;;  %s13347_s28 = smov (%p37_p4, %s13345_s28), 0 }
  0x19   : > { %12784 = sst [smem:[#allocation17_spill]] %s13347_s28  ;;  %p69_p5 = scmp.gt.s32.totalorder %s6663_s26, 0 }
  0x1a   : > { %s6665_s10 = sadd.s32 4294967295, %s6664_s25  ;;  %s39_s21 = ssub.s32 %s8121_s23, %s13347_s28 }
  0x1b   : > { %p73_p6 = scmp.gt.s32.totalorder %s6665_s10, 0  ;;  %s41_s9 = sor.u32 %s40_s30, %s39_s21 }
  0x1c   : > { %s80_s8 = sadd.s32 1, %s8097_s17  ;;  %p42_p7 = scmp.eq.s32.totalorder %s41_s9, 0 }
  0x1d   : > { %p87_p8 = scmp.ne.s32.totalorder %s8097_s17, %s8093_s16  ;;  %s13349_s26 = smov (!%p69_p5, %s6663_s26), 0 }
  0x1e   : > { %s8279_s7 = scalar_select %p42_p7, %s8105_s19, %s44_s29  }
  0x1f   : > { %s13351_s10 = smov (!%p73_p6, %s6665_s10), 0  ;;  %p8283_p9 = por %p87_p8, %p52_p2 }
  0x20   : > { %12785 = sst [smem:[#allocation18_spill]] %s8279_s7  ;;  %s7292_s30 = sadd.s32 16, %s6662_s12 }
  0x21   : > { %s76_s28 = ssub.s32 %s13349_s26, %s13351_s10  ;;  %p133_p10 = scmp.lt.s32.totalorder %s7292_s30, 47 }
  0x22   : > { %s77_s9 = sor.u32 %s76_s28, %s39_s21  ;;  %s7294_s20 = sadd.s32 16, %s6664_s25 }
  0x23   : > { %p78_p11 = scmp.eq.s32.totalorder %s77_s9, 0  ;;  %p137_p12 = scmp.lt.s32.totalorder %s7294_s20, 47 }
  0x24   : > { %s13353_s30 = smov (!%p133_p10, %s7292_s30), 47  ;;  %s144_s7 = sadd.s32 1, %s8089_s15 }
  0x25   : > { %s8291_s29 = scalar_select %p78_p11, %s8097_s17, %s80_s8  }
  0x26   : > { %s13355_s20 = smov (!%p137_p12, %s7294_s20), 47  ;;  %p151_p13 = scmp.ne.s32.totalorder %s8089_s15, %s8085_s14 }
  0x27   : > { %12787 = sst [smem:[#allocation19_spill]] %s8291_s29  ;;  %s140_s10 = ssub.s32 %s13353_s30, %s13355_s20 }
  0x28   : > { %s12788_s12 = sadd.s32 4294967295, %s8125_s24   ;;  %s141_s16 = sor.u32 %s140_s10, %s39_s21 }
  0x29   : > { %p346_p0 = scmp.eq.s32.totalorder %s12788_s12, 5  ;;  %p8301_p4 = por %p151_p13, %p52_p2 }
  0x2a   : > { %p142_p5 = scmp.eq.s32.totalorder %s141_s16, 0  ;;  %p351_p7 = scmp.ne.s32.totalorder %s8101_s18, %s8081_s13 }
  0x2b   : > { %p8308_p6 = por %p346_p0, %p51_p1  ;;  %s12791_s8 = sadd.s32 4294967294, %s8125_s24  }
  0x2c   : > { %p352_p8 = scmp.eq.s32.totalorder %s12791_s8, 5  ;;  %p6675_p2 = scmp.ge.s32.totalorder %s8125_s24, 6 }
  0x2d   : > { %s8317_s9 = scalar_select %p142_p5, %s8089_s15, %s144_s7  }
  0x2e   : > { %p8319_p10 = por %p352_p8, %p351_p7  ;;  %377 = sbr.rel (%p6675_p2) target bundleno = 321 (0x141), region = 28 }
  0x2f   : > { %12792 = sst [smem:[#allocation20_spill]] %s8317_s9 }
  0x33   : > { %380 = sbr.rel (!%p8263_p3) target bundleno = 125 (0x7d), region = 32  ;;  %s382_s16 = sand.u32 (%p8263_p3), 1, %s8105_s19  }
  0x34   : > { %s6678_s21 = sshll.u32 (%p8263_p3), %s8117_s22, 5  ;;  %s6676_s10 = sshll.u32 (%p8263_p3), %s382_s16, 9 }
  0x35   : > { %s7309_s12 = smul.u32 (%p8263_p3), 192, %s8121_s23  ;;  %s12794_s0 = sld [smem:[#allocation169_spill]] (%p8263_p3) }
  0x36   : > { %s8337_s16 = scalar_lea.vmem (%p8263_p3), [#allocation2], %s6676_s10 }
  0x37   : > { %s388_s8 = sadd.s32 (%p8263_p3), %s7309_s12, %s6678_s21 }
  0x38   : > { %s6680_s7 = sshll.u32 %s388_s8, 3 }
  0x3b   : > { %s8332_s13 = scalar_lea.vmem %s12794_s0, %s6680_s7 }
  0x3c   : > { %v545_v0 = vld [vmem:[%s8332_s13] sm:$0xff]  ;;  %v547_v1 = vld [vmem:[%s8332_s13 + $0x8] sm:$0xff]  ;;  %v549_v2 = vld [vmem:[%s8332_s13 + $0x10] sm:$0xff] }
  0x3d   : > { %546 = vst [vmem:[%s8337_s16] sm:$0xff] %v545_v0  ;;  %v551_v3 = vld [vmem:[%s8332_s13 + $0x18] sm:$0xff]  ;;  %v553_v4 = vld [vmem:[%s8332_s13 + $0x20] sm:$0xff]  ;;  %v555_v5 = vld [vmem:[%s8332_s13 + $0x28] sm:$0xff] }
  0x3e   : > { %548 = vst [vmem:[%s8337_s16 + $0x8] sm:$0xff] %v547_v1  ;;  %v557_v6 = vld [vmem:[%s8332_s13 + $0x30] sm:$0xff]  ;;  %v559_v7 = vld [vmem:[%s8332_s13 + $0x38] sm:$0xff]  ;;  %v561_v8 = vld [vmem:[%s8332_s13 + $0x40] sm:$0xff] }
  0x3f   : > { %550 = vst [vmem:[%s8337_s16 + $0x10] sm:$0xff] %v549_v2  ;;  %v563_v9 = vld [vmem:[%s8332_s13 + $0x48] sm:$0xff]  ;;  %v565_v10 = vld [vmem:[%s8332_s13 + $0x50] sm:$0xff]  ;;  %v567_v11 = vld [vmem:[%s8332_s13 + $0x58] sm:$0xff] }
  0x40   : > { %552 = vst [vmem:[%s8337_s16 + $0x18] sm:$0xff] %v551_v3  ;;  %v569_v12 = vld [vmem:[%s8332_s13 + $0x60] sm:$0xff]  ;;  %v571_v13 = vld [vmem:[%s8332_s13 + $0x68] sm:$0xff]  ;;  %v573_v14 = vld [vmem:[%s8332_s13 + $0x70] sm:$0xff] }
  0x41   : > { %554 = vst [vmem:[%s8337_s16 + $0x20] sm:$0xff] %v553_v4  ;;  %v575_v15 = vld [vmem:[%s8332_s13 + $0x78] sm:$0xff]  ;;  %v577_v16 = vld [vmem:[%s8332_s13 + $0x80] sm:$0xff]  ;;  %v579_v17 = vld [vmem:[%s8332_s13 + $0x88] sm:$0xff] }
  0x42   : > { %556 = vst [vmem:[%s8337_s16 + $0x28] sm:$0xff] %v555_v5  ;;  %v581_v18 = vld [vmem:[%s8332_s13 + $0x90] sm:$0xff]  ;;  %v583_v19 = vld [vmem:[%s8332_s13 + $0x98] sm:$0xff]  ;;  %v585_v20 = vld [vmem:[%s8332_s13 + $0xa0] sm:$0xff] }
  0x43   : > { %558 = vst [vmem:[%s8337_s16 + $0x30] sm:$0xff] %v557_v6  ;;  %v587_v21 = vld [vmem:[%s8332_s13 + $0xa8] sm:$0xff]  ;;  %v589_v22 = vld [vmem:[%s8332_s13 + $0xb0] sm:$0xff]  ;;  %v591_v23 = vld [vmem:[%s8332_s13 + $0xb8] sm:$0xff] }
  0x44   : > { %560 = vst [vmem:[%s8337_s16 + $0x38] sm:$0xff] %v559_v7  ;;  %v593_v24 = vld [vmem:[%s8332_s13 + $0xc0] sm:$0xff]  ;;  %v595_v25 = vld [vmem:[%s8332_s13 + $0xc8] sm:$0xff]  ;;  %v597_v26 = vld [vmem:[%s8332_s13 + $0xd0] sm:$0xff] }
  0x45   : > { %562 = vst [vmem:[%s8337_s16 + $0x40] sm:$0xff] %v561_v8  ;;  %v599_v27 = vld [vmem:[%s8332_s13 + $0xd8] sm:$0xff]  ;;  %v601_v28 = vld [vmem:[%s8332_s13 + $0xe0] sm:$0xff]  ;;  %v603_v29 = vld [vmem:[%s8332_s13 + $0xe8] sm:$0xff] }
  0x46   : > { %564 = vst [vmem:[%s8337_s16 + $0x48] sm:$0xff] %v563_v9  ;;  %v605_v30 = vld [vmem:[%s8332_s13 + $0xf0] sm:$0xff]  ;;  %v607_v31 = vld [vmem:[%s8332_s13 + $0xf8] sm:$0xff]  ;;  %v609_v32 = vld [vmem:[%s8332_s13 + $0x300] sm:$0xff] }
  0x47   : > { %566 = vst [vmem:[%s8337_s16 + $0x50] sm:$0xff] %v565_v10  ;;  %v611_v33 = vld [vmem:[%s8332_s13 + $0x308] sm:$0xff]  ;;  %v613_v34 = vld [vmem:[%s8332_s13 + $0x310] sm:$0xff]  ;;  %v615_v35 = vld [vmem:[%s8332_s13 + $0x318] sm:$0xff] }
  0x48   : > { %568 = vst [vmem:[%s8337_s16 + $0x58] sm:$0xff] %v567_v11  ;;  %v617_v36 = vld [vmem:[%s8332_s13 + $0x320] sm:$0xff]  ;;  %v619_v37 = vld [vmem:[%s8332_s13 + $0x328] sm:$0xff]  ;;  %v621_v38 = vld [vmem:[%s8332_s13 + $0x330] sm:$0xff] }
  0x49   : > { %570 = vst [vmem:[%s8337_s16 + $0x60] sm:$0xff] %v569_v12  ;;  %v623_v39 = vld [vmem:[%s8332_s13 + $0x338] sm:$0xff]  ;;  %v625_v40 = vld [vmem:[%s8332_s13 + $0x340] sm:$0xff]  ;;  %v627_v41 = vld [vmem:[%s8332_s13 + $0x348] sm:$0xff] }
  0x4a   : > { %572 = vst [vmem:[%s8337_s16 + $0x68] sm:$0xff] %v571_v13  ;;  %v629_v42 = vld [vmem:[%s8332_s13 + $0x350] sm:$0xff]  ;;  %v631_v43 = vld [vmem:[%s8332_s13 + $0x358] sm:$0xff]  ;;  %v633_v44 = vld [vmem:[%s8332_s13 + $0x360] sm:$0xff] }
  0x4b   : > { %574 = vst [vmem:[%s8337_s16 + $0x70] sm:$0xff] %v573_v14  ;;  %v635_v45 = vld [vmem:[%s8332_s13 + $0x368] sm:$0xff]  ;;  %v637_v46 = vld [vmem:[%s8332_s13 + $0x370] sm:$0xff]  ;;  %v639_v47 = vld [vmem:[%s8332_s13 + $0x378] sm:$0xff] }
  0x4c   : > { %576 = vst [vmem:[%s8337_s16 + $0x78] sm:$0xff] %v575_v15  ;;  %v641_v48 = vld [vmem:[%s8332_s13 + $0x380] sm:$0xff]  ;;  %v643_v49 = vld [vmem:[%s8332_s13 + $0x388] sm:$0xff]  ;;  %v645_v50 = vld [vmem:[%s8332_s13 + $0x390] sm:$0xff] }
  0x4d   : > { %578 = vst [vmem:[%s8337_s16 + $0x80] sm:$0xff] %v577_v16  ;;  %v647_v51 = vld [vmem:[%s8332_s13 + $0x398] sm:$0xff]  ;;  %v649_v52 = vld [vmem:[%s8332_s13 + $0x3a0] sm:$0xff]  ;;  %v651_v53 = vld [vmem:[%s8332_s13 + $0x3a8] sm:$0xff] }
  0x4e   : > { %580 = vst [vmem:[%s8337_s16 + $0x88] sm:$0xff] %v579_v17  ;;  %v653_v54 = vld [vmem:[%s8332_s13 + $0x3b0] sm:$0xff]  ;;  %v655_v55 = vld [vmem:[%s8332_s13 + $0x3b8] sm:$0xff]  ;;  %v657_v56 = vld [vmem:[%s8332_s13 + $0x3c0] sm:$0xff] }
  0x4f   : > { %582 = vst [vmem:[%s8337_s16 + $0x90] sm:$0xff] %v581_v18  ;;  %v659_v57 = vld [vmem:[%s8332_s13 + $0x3c8] sm:$0xff]  ;;  %v661_v58 = vld [vmem:[%s8332_s13 + $0x3d0] sm:$0xff]  ;;  %v663_v59 = vld [vmem:[%s8332_s13 + $0x3d8] sm:$0xff] }
  0x50   : > { %584 = vst [vmem:[%s8337_s16 + $0x98] sm:$0xff] %v583_v19  ;;  %v665_v60 = vld [vmem:[%s8332_s13 + $0x3e0] sm:$0xff]  ;;  %v667_v61 = vld [vmem:[%s8332_s13 + $0x3e8] sm:$0xff]  ;;  %v669_v62 = vld [vmem:[%s8332_s13 + $0x3f0] sm:$0xff] }
  0x51   : > { %586 = vst [vmem:[%s8337_s16 + $0xa0] sm:$0xff] %v585_v20  ;;  %v671_v63 = vld [vmem:[%s8332_s13 + $0x3f8] sm:$0xff] }
  0x52   : > { %588 = vst [vmem:[%s8337_s16 + $0xa8] sm:$0xff] %v587_v21 }
  0x53   : > { %590 = vst [vmem:[%s8337_s16 + $0xb0] sm:$0xff] %v589_v22 }
  0x54   : > { %592 = vst [vmem:[%s8337_s16 + $0xb8] sm:$0xff] %v591_v23 }
  0x55   : > { %594 = vst [vmem:[%s8337_s16 + $0xc0] sm:$0xff] %v593_v24 }
  0x56   : > { %596 = vst [vmem:[%s8337_s16 + $0xc8] sm:$0xff] %v595_v25 }
  0x57   : > { %598 = vst [vmem:[%s8337_s16 + $0xd0] sm:$0xff] %v597_v26 }
  0x58   : > { %600 = vst [vmem:[%s8337_s16 + $0xd8] sm:$0xff] %v599_v27 }
  0x59   : > { %602 = vst [vmem:[%s8337_s16 + $0xe0] sm:$0xff] %v601_v28 }
  0x5a   : > { %604 = vst [vmem:[%s8337_s16 + $0xe8] sm:$0xff] %v603_v29 }
  0x5b   : > { %606 = vst [vmem:[%s8337_s16 + $0xf0] sm:$0xff] %v605_v30 }
  0x5c   : > { %608 = vst [vmem:[%s8337_s16 + $0xf8] sm:$0xff] %v607_v31 }
  0x5d   : > { %610 = vst [vmem:[%s8337_s16 + $0x100] sm:$0xff] %v609_v32 }
  0x5e   : > { %612 = vst [vmem:[%s8337_s16 + $0x108] sm:$0xff] %v611_v33 }
  0x5f   : > { %614 = vst [vmem:[%s8337_s16 + $0x110] sm:$0xff] %v613_v34 }
  0x60   : > { %616 = vst [vmem:[%s8337_s16 + $0x118] sm:$0xff] %v615_v35 }
  0x61   : > { %618 = vst [vmem:[%s8337_s16 + $0x120] sm:$0xff] %v617_v36 }
  0x62   : > { %620 = vst [vmem:[%s8337_s16 + $0x128] sm:$0xff] %v619_v37 }
  0x63   : > { %622 = vst [vmem:[%s8337_s16 + $0x130] sm:$0xff] %v621_v38 }
  0x64   : > { %624 = vst [vmem:[%s8337_s16 + $0x138] sm:$0xff] %v623_v39 }
  0x65   : > { %626 = vst [vmem:[%s8337_s16 + $0x140] sm:$0xff] %v625_v40 }
  0x66   : > { %628 = vst [vmem:[%s8337_s16 + $0x148] sm:$0xff] %v627_v41 }
  0x67   : > { %630 = vst [vmem:[%s8337_s16 + $0x150] sm:$0xff] %v629_v42 }
  0x68   : > { %632 = vst [vmem:[%s8337_s16 + $0x158] sm:$0xff] %v631_v43 }
  0x69   : > { %634 = vst [vmem:[%s8337_s16 + $0x160] sm:$0xff] %v633_v44 }
  0x6a   : > { %636 = vst [vmem:[%s8337_s16 + $0x168] sm:$0xff] %v635_v45 }
  0x6b   : > { %638 = vst [vmem:[%s8337_s16 + $0x170] sm:$0xff] %v637_v46 }
  0x6c   : > { %640 = vst [vmem:[%s8337_s16 + $0x178] sm:$0xff] %v639_v47 }
  0x6d   : > { %642 = vst [vmem:[%s8337_s16 + $0x180] sm:$0xff] %v641_v48 }
  0x6e   : > { %644 = vst [vmem:[%s8337_s16 + $0x188] sm:$0xff] %v643_v49 }
  0x6f   : > { %646 = vst [vmem:[%s8337_s16 + $0x190] sm:$0xff] %v645_v50 }
  0x70   : > { %648 = vst [vmem:[%s8337_s16 + $0x198] sm:$0xff] %v647_v51 }
  0x71   : > { %650 = vst [vmem:[%s8337_s16 + $0x1a0] sm:$0xff] %v649_v52 }
  0x72   : > { %652 = vst [vmem:[%s8337_s16 + $0x1a8] sm:$0xff] %v651_v53 }
  0x73   : > { %654 = vst [vmem:[%s8337_s16 + $0x1b0] sm:$0xff] %v653_v54 }
  0x74   : > { %656 = vst [vmem:[%s8337_s16 + $0x1b8] sm:$0xff] %v655_v55 }
  0x75   : > { %658 = vst [vmem:[%s8337_s16 + $0x1c0] sm:$0xff] %v657_v56 }
  0x76   : > { %660 = vst [vmem:[%s8337_s16 + $0x1c8] sm:$0xff] %v659_v57 }
  0x77   : > { %662 = vst [vmem:[%s8337_s16 + $0x1d0] sm:$0xff] %v661_v58 }
  0x78   : > { %664 = vst [vmem:[%s8337_s16 + $0x1d8] sm:$0xff] %v663_v59 }
  0x79   : > { %666 = vst [vmem:[%s8337_s16 + $0x1e0] sm:$0xff] %v665_v60 }
  0x7a   : > { %668 = vst [vmem:[%s8337_s16 + $0x1e8] sm:$0xff] %v667_v61 }
  0x7b   : > { %670 = vst [vmem:[%s8337_s16 + $0x1f0] sm:$0xff] %v669_v62 }
  0x7c   : > { %672 = vst [vmem:[%s8337_s16 + $0x1f8] sm:$0xff] %v671_v63 }
  0x7d PF: > { %678 = sbr.rel (!%p8283_p9) target bundleno = 139 (0x8b), region = 70  ;;  %s680_s29 = sand.u32 (%p8283_p9), 1, %s8097_s17  }
  0x7e   : > { %s6685_s9 = sshll.u32 (%p8283_p9), %s13349_s26, 1  ;;  %s6681_s21 = sshll.u32 (%p8283_p9), %s680_s29, 5 }
  0x7f   : > { %s7310_s10 = smul.u32 (%p8283_p9), 192, %s8121_s23  ;;  %s12795_s1 = sld [smem:[#allocation170_spill]] (%p8283_p9) }
  0x80   : > { %s682_s16 = scalar_lea.vmem (%p8283_p9), [#allocation3], %s6681_s21 }
  0x81   : > { %s690_s12 = sadd.s32 (%p8283_p9), %s7310_s10, %s6685_s9 }
  0x82   : > { %s6687_s8 = sshll.u32 %s690_s12, 3 }
  0x85   : > { %s692_s13 = scalar_lea.vmem %s12795_s1, %s6687_s8 }
  0x86   : > { %v727_v0 = vld [vmem:[%s692_s13] sm:$0xff]  ;;  %v729_v1 = vld [vmem:[%s692_s13 + $0x8] sm:$0xff] }
  0x87   : > { %v731_v2 = vld [vmem:[%s692_s13 + $0x300] sm:$0xff]  ;;  %728 = vst [vmem:[%s682_s16] sm:$0xff] %v727_v0  ;;  %v733_v3 = vld [vmem:[%s692_s13 + $0x308] sm:$0xff] }
  0x88   : > { %730 = vst [vmem:[%s682_s16 + $0x8] sm:$0xff] %v729_v1 }
  0x89   : > { %732 = vst [vmem:[%s682_s16 + $0x10] sm:$0xff] %v731_v2 }
  0x8a   : > { %734 = vst [vmem:[%s682_s16 + $0x18] sm:$0xff] %v733_v3 }
  0x8b PF: > { %740 = sbr.rel (!%p8263_p3) target bundleno = 213 (0xd5), region = 108  ;;  %s742_s29 = sand.u32 (%p8263_p3), 1, %s8105_s19  }
  0x8c   : > { %s6690_s9 = sshll.u32 (%p8263_p3), %s8117_s22, 5  ;;  %s6688_s0 = sshll.u32 (%p8263_p3), %s742_s29, 9 }
  0x8d   : > { %s7311_s10 = smul.u32 (%p8263_p3), 192, %s8121_s23  ;;  %s12796_s2 = sld [smem:[#allocation171_spill]] (%p8263_p3) }
  0x8e   : > { %s8485_s16 = scalar_lea.vmem (%p8263_p3), [#allocation4], %s6688_s0 }
  0x8f   : > { %s748_s12 = sadd.s32 (%p8263_p3), %s7311_s10, %s6690_s9 }
  0x90   : > { %s6692_s8 = sshll.u32 %s748_s12, 3 }
  0x93   : > { %s8480_s13 = scalar_lea.vmem %s12796_s2, %s6692_s8 }
  0x94   : > { %v905_v4 = vld [vmem:[%s8480_s13] sm:$0xff]  ;;  %v907_v5 = vld [vmem:[%s8480_s13 + $0x8] sm:$0xff]  ;;  %v909_v6 = vld [vmem:[%s8480_s13 + $0x10] sm:$0xff] }
  0x95   : > { %906 = vst [vmem:[%s8485_s16] sm:$0xff] %v905_v4  ;;  %v911_v7 = vld [vmem:[%s8480_s13 + $0x18] sm:$0xff]  ;;  %v913_v8 = vld [vmem:[%s8480_s13 + $0x20] sm:$0xff]  ;;  %v915_v9 = vld [vmem:[%s8480_s13 + $0x28] sm:$0xff] }
  0x96   : > { %908 = vst [vmem:[%s8485_s16 + $0x8] sm:$0xff] %v907_v5  ;;  %v917_v10 = vld [vmem:[%s8480_s13 + $0x30] sm:$0xff]  ;;  %v919_v11 = vld [vmem:[%s8480_s13 + $0x38] sm:$0xff]  ;;  %v921_v12 = vld [vmem:[%s8480_s13 + $0x40] sm:$0xff] }
  0x97   : > { %910 = vst [vmem:[%s8485_s16 + $0x10] sm:$0xff] %v909_v6  ;;  %v923_v13 = vld [vmem:[%s8480_s13 + $0x48] sm:$0xff]  ;;  %v925_v14 = vld [vmem:[%s8480_s13 + $0x50] sm:$0xff]  ;;  %v927_v15 = vld [vmem:[%s8480_s13 + $0x58] sm:$0xff] }
  0x98   : > { %912 = vst [vmem:[%s8485_s16 + $0x18] sm:$0xff] %v911_v7  ;;  %v929_v16 = vld [vmem:[%s8480_s13 + $0x60] sm:$0xff]  ;;  %v931_v17 = vld [vmem:[%s8480_s13 + $0x68] sm:$0xff]  ;;  %v933_v18 = vld [vmem:[%s8480_s13 + $0x70] sm:$0xff] }
  0x99   : > { %914 = vst [vmem:[%s8485_s16 + $0x20] sm:$0xff] %v913_v8  ;;  %v935_v19 = vld [vmem:[%s8480_s13 + $0x78] sm:$0xff]  ;;  %v937_v20 = vld [vmem:[%s8480_s13 + $0x80] sm:$0xff]  ;;  %v939_v21 = vld [vmem:[%s8480_s13 + $0x88] sm:$0xff] }
  0x9a   : > { %916 = vst [vmem:[%s8485_s16 + $0x28] sm:$0xff] %v915_v9  ;;  %v941_v22 = vld [vmem:[%s8480_s13 + $0x90] sm:$0xff]  ;;  %v943_v23 = vld [vmem:[%s8480_s13 + $0x98] sm:$0xff]  ;;  %v945_v24 = vld [vmem:[%s8480_s13 + $0xa0] sm:$0xff] }
  0x9b   : > { %918 = vst [vmem:[%s8485_s16 + $0x30] sm:$0xff] %v917_v10  ;;  %v947_v25 = vld [vmem:[%s8480_s13 + $0xa8] sm:$0xff]  ;;  %v949_v26 = vld [vmem:[%s8480_s13 + $0xb0] sm:$0xff]  ;;  %v951_v27 = vld [vmem:[%s8480_s13 + $0xb8] sm:$0xff] }
  0x9c   : > { %920 = vst [vmem:[%s8485_s16 + $0x38] sm:$0xff] %v919_v11  ;;  %v953_v28 = vld [vmem:[%s8480_s13 + $0xc0] sm:$0xff]  ;;  %v955_v29 = vld [vmem:[%s8480_s13 + $0xc8] sm:$0xff]  ;;  %v957_v30 = vld [vmem:[%s8480_s13 + $0xd0] sm:$0xff] }
  0x9d   : > { %922 = vst [vmem:[%s8485_s16 + $0x40] sm:$0xff] %v921_v12  ;;  %v959_v31 = vld [vmem:[%s8480_s13 + $0xd8] sm:$0xff]  ;;  %v961_v32 = vld [vmem:[%s8480_s13 + $0xe0] sm:$0xff]  ;;  %v963_v33 = vld [vmem:[%s8480_s13 + $0xe8] sm:$0xff] }
  0x9e   : > { %924 = vst [vmem:[%s8485_s16 + $0x48] sm:$0xff] %v923_v13  ;;  %v965_v34 = vld [vmem:[%s8480_s13 + $0xf0] sm:$0xff]  ;;  %v967_v35 = vld [vmem:[%s8480_s13 + $0xf8] sm:$0xff]  ;;  %v969_v36 = vld [vmem:[%s8480_s13 + $0x300] sm:$0xff] }
  0x9f   : > { %926 = vst [vmem:[%s8485_s16 + $0x50] sm:$0xff] %v925_v14  ;;  %v971_v37 = vld [vmem:[%s8480_s13 + $0x308] sm:$0xff]  ;;  %v973_v38 = vld [vmem:[%s8480_s13 + $0x310] sm:$0xff]  ;;  %v975_v39 = vld [vmem:[%s8480_s13 + $0x318] sm:$0xff] }
  0xa0   : > { %928 = vst [vmem:[%s8485_s16 + $0x58] sm:$0xff] %v927_v15  ;;  %v977_v40 = vld [vmem:[%s8480_s13 + $0x320] sm:$0xff]  ;;  %v979_v41 = vld [vmem:[%s8480_s13 + $0x328] sm:$0xff]  ;;  %v981_v42 = vld [vmem:[%s8480_s13 + $0x330] sm:$0xff] }
  0xa1   : > { %930 = vst [vmem:[%s8485_s16 + $0x60] sm:$0xff] %v929_v16  ;;  %v983_v43 = vld [vmem:[%s8480_s13 + $0x338] sm:$0xff]  ;;  %v985_v44 = vld [vmem:[%s8480_s13 + $0x340] sm:$0xff]  ;;  %v987_v45 = vld [vmem:[%s8480_s13 + $0x348] sm:$0xff] }
  0xa2   : > { %932 = vst [vmem:[%s8485_s16 + $0x68] sm:$0xff] %v931_v17  ;;  %v989_v46 = vld [vmem:[%s8480_s13 + $0x350] sm:$0xff]  ;;  %v991_v47 = vld [vmem:[%s8480_s13 + $0x358] sm:$0xff]  ;;  %v993_v48 = vld [vmem:[%s8480_s13 + $0x360] sm:$0xff] }
  0xa3   : > { %934 = vst [vmem:[%s8485_s16 + $0x70] sm:$0xff] %v933_v18  ;;  %v995_v49 = vld [vmem:[%s8480_s13 + $0x368] sm:$0xff]  ;;  %v997_v50 = vld [vmem:[%s8480_s13 + $0x370] sm:$0xff]  ;;  %v999_v51 = vld [vmem:[%s8480_s13 + $0x378] sm:$0xff] }
  0xa4   : > { %936 = vst [vmem:[%s8485_s16 + $0x78] sm:$0xff] %v935_v19  ;;  %v1001_v52 = vld [vmem:[%s8480_s13 + $0x380] sm:$0xff]  ;;  %v1003_v53 = vld [vmem:[%s8480_s13 + $0x388] sm:$0xff]  ;;  %v1005_v54 = vld [vmem:[%s8480_s13 + $0x390] sm:$0xff] }
  0xa5   : > { %938 = vst [vmem:[%s8485_s16 + $0x80] sm:$0xff] %v937_v20  ;;  %v1007_v55 = vld [vmem:[%s8480_s13 + $0x398] sm:$0xff]  ;;  %v1009_v56 = vld [vmem:[%s8480_s13 + $0x3a0] sm:$0xff]  ;;  %v1011_v57 = vld [vmem:[%s8480_s13 + $0x3a8] sm:$0xff] }
  0xa6   : > { %940 = vst [vmem:[%s8485_s16 + $0x88] sm:$0xff] %v939_v21  ;;  %v1013_v58 = vld [vmem:[%s8480_s13 + $0x3b0] sm:$0xff]  ;;  %v1015_v59 = vld [vmem:[%s8480_s13 + $0x3b8] sm:$0xff]  ;;  %v1017_v60 = vld [vmem:[%s8480_s13 + $0x3c0] sm:$0xff] }
  0xa7   : > { %942 = vst [vmem:[%s8485_s16 + $0x90] sm:$0xff] %v941_v22  ;;  %v1019_v61 = vld [vmem:[%s8480_s13 + $0x3c8] sm:$0xff]  ;;  %v1021_v62 = vld [vmem:[%s8480_s13 + $0x3d0] sm:$0xff]  ;;  %v1023_v63 = vld [vmem:[%s8480_s13 + $0x3d8] sm:$0xff] }
  0xa8   : > { %944 = vst [vmem:[%s8485_s16 + $0x98] sm:$0xff] %v943_v23  ;;  %v1025_v0 = vld [vmem:[%s8480_s13 + $0x3e0] sm:$0xff]  ;;  %v1027_v1 = vld [vmem:[%s8480_s13 + $0x3e8] sm:$0xff]  ;;  %v1029_v2 = vld [vmem:[%s8480_s13 + $0x3f0] sm:$0xff] }
  0xa9   : > { %946 = vst [vmem:[%s8485_s16 + $0xa0] sm:$0xff] %v945_v24  ;;  %v1031_v3 = vld [vmem:[%s8480_s13 + $0x3f8] sm:$0xff] }
  0xaa   : > { %948 = vst [vmem:[%s8485_s16 + $0xa8] sm:$0xff] %v947_v25 }
  0xab   : > { %950 = vst [vmem:[%s8485_s16 + $0xb0] sm:$0xff] %v949_v26 }
  0xac   : > { %952 = vst [vmem:[%s8485_s16 + $0xb8] sm:$0xff] %v951_v27 }
  0xad   : > { %954 = vst [vmem:[%s8485_s16 + $0xc0] sm:$0xff] %v953_v28 }
  0xae   : > { %956 = vst [vmem:[%s8485_s16 + $0xc8] sm:$0xff] %v955_v29 }
  0xaf   : > { %958 = vst [vmem:[%s8485_s16 + $0xd0] sm:$0xff] %v957_v30 }
  0xb0   : > { %960 = vst [vmem:[%s8485_s16 + $0xd8] sm:$0xff] %v959_v31 }
  0xb1   : > { %962 = vst [vmem:[%s8485_s16 + $0xe0] sm:$0xff] %v961_v32 }
  0xb2   : > { %964 = vst [vmem:[%s8485_s16 + $0xe8] sm:$0xff] %v963_v33 }
  0xb3   : > { %966 = vst [vmem:[%s8485_s16 + $0xf0] sm:$0xff] %v965_v34 }
  0xb4   : > { %968 = vst [vmem:[%s8485_s16 + $0xf8] sm:$0xff] %v967_v35 }
  0xb5   : > { %970 = vst [vmem:[%s8485_s16 + $0x100] sm:$0xff] %v969_v36 }
  0xb6   : > { %972 = vst [vmem:[%s8485_s16 + $0x108] sm:$0xff] %v971_v37 }
  0xb7   : > { %974 = vst [vmem:[%s8485_s16 + $0x110] sm:$0xff] %v973_v38 }
  0xb8   : > { %976 = vst [vmem:[%s8485_s16 + $0x118] sm:$0xff] %v975_v39 }
  0xb9   : > { %978 = vst [vmem:[%s8485_s16 + $0x120] sm:$0xff] %v977_v40 }
  0xba   : > { %980 = vst [vmem:[%s8485_s16 + $0x128] sm:$0xff] %v979_v41 }
  0xbb   : > { %982 = vst [vmem:[%s8485_s16 + $0x130] sm:$0xff] %v981_v42 }
  0xbc   : > { %984 = vst [vmem:[%s8485_s16 + $0x138] sm:$0xff] %v983_v43 }
  0xbd   : > { %986 = vst [vmem:[%s8485_s16 + $0x140] sm:$0xff] %v985_v44 }
  0xbe   : > { %988 = vst [vmem:[%s8485_s16 + $0x148] sm:$0xff] %v987_v45 }
  0xbf   : > { %990 = vst [vmem:[%s8485_s16 + $0x150] sm:$0xff] %v989_v46 }
  0xc0   : > { %992 = vst [vmem:[%s8485_s16 + $0x158] sm:$0xff] %v991_v47 }
  0xc1   : > { %994 = vst [vmem:[%s8485_s16 + $0x160] sm:$0xff] %v993_v48 }
  0xc2   : > { %996 = vst [vmem:[%s8485_s16 + $0x168] sm:$0xff] %v995_v49 }
  0xc3   : > { %998 = vst [vmem:[%s8485_s16 + $0x170] sm:$0xff] %v997_v50 }
  0xc4   : > { %1000 = vst [vmem:[%s8485_s16 + $0x178] sm:$0xff] %v999_v51 }
  0xc5   : > { %1002 = vst [vmem:[%s8485_s16 + $0x180] sm:$0xff] %v1001_v52 }
  0xc6   : > { %1004 = vst [vmem:[%s8485_s16 + $0x188] sm:$0xff] %v1003_v53 }
  0xc7   : > { %1006 = vst [vmem:[%s8485_s16 + $0x190] sm:$0xff] %v1005_v54 }
  0xc8   : > { %1008 = vst [vmem:[%s8485_s16 + $0x198] sm:$0xff] %v1007_v55 }
  0xc9   : > { %1010 = vst [vmem:[%s8485_s16 + $0x1a0] sm:$0xff] %v1009_v56 }
  0xca   : > { %1012 = vst [vmem:[%s8485_s16 + $0x1a8] sm:$0xff] %v1011_v57 }
  0xcb   : > { %1014 = vst [vmem:[%s8485_s16 + $0x1b0] sm:$0xff] %v1013_v58 }
  0xcc   : > { %1016 = vst [vmem:[%s8485_s16 + $0x1b8] sm:$0xff] %v1015_v59 }
  0xcd   : > { %1018 = vst [vmem:[%s8485_s16 + $0x1c0] sm:$0xff] %v1017_v60 }
  0xce   : > { %1020 = vst [vmem:[%s8485_s16 + $0x1c8] sm:$0xff] %v1019_v61 }
  0xcf   : > { %1022 = vst [vmem:[%s8485_s16 + $0x1d0] sm:$0xff] %v1021_v62 }
  0xd0   : > { %1024 = vst [vmem:[%s8485_s16 + $0x1d8] sm:$0xff] %v1023_v63 }
  0xd1   : > { %1026 = vst [vmem:[%s8485_s16 + $0x1e0] sm:$0xff] %v1025_v0 }
  0xd2   : > { %1028 = vst [vmem:[%s8485_s16 + $0x1e8] sm:$0xff] %v1027_v1 }
  0xd3   : > { %1030 = vst [vmem:[%s8485_s16 + $0x1f0] sm:$0xff] %v1029_v2 }
  0xd4   : > { %1032 = vst [vmem:[%s8485_s16 + $0x1f8] sm:$0xff] %v1031_v3 }
  0xd5 PF: > { %1038 = sbr.rel (!%p8301_p4) target bundleno = 225 (0xe1), region = 146  ;;  %s1040_s29 = sand.u32 (%p8301_p4), 1, %s8089_s15  }
  0xd6   : > { %s6696_s9 = sshll.u32 (%p8301_p4), %s13353_s30, 1  ;;  %s6693_s0 = sshll.u32 (%p8301_p4), %s1040_s29, 5 }
  0xd7   : > { %s7312_s10 = smul.u32 (%p8301_p4), 192, %s8121_s23  ;;  %s1042_s16 = scalar_lea.vmem (%p8301_p4), [#allocation5], %s6693_s0 }
  0xd9   : > { %s1050_s12 = sadd.s32 (%p8301_p4), %s7312_s10, %s6696_s9 }
  0xda   : > { %s6698_s8 = sshll.u32 %s1050_s12, 3 }
  0xdb   : > { %s1052_s13 = scalar_lea.vmem %s12628_s3, %s6698_s8 }
  0xdc   : > { %v1087_v4 = vld [vmem:[%s1052_s13] sm:$0xff]  ;;  %v1089_v5 = vld [vmem:[%s1052_s13 + $0x8] sm:$0xff] }
  0xdd   : > { %v1091_v6 = vld [vmem:[%s1052_s13 + $0x300] sm:$0xff]  ;;  %1088 = vst [vmem:[%s1042_s16] sm:$0xff] %v1087_v4  ;;  %v1093_v7 = vld [vmem:[%s1052_s13 + $0x308] sm:$0xff] }
  0xde   : > { %1090 = vst [vmem:[%s1042_s16 + $0x8] sm:$0xff] %v1089_v5 }
  0xdf   : > { %1092 = vst [vmem:[%s1042_s16 + $0x10] sm:$0xff] %v1091_v6 }
  0xe0   : > { %1094 = vst [vmem:[%s1042_s16 + $0x18] sm:$0xff] %v1093_v7 }
  0xe1 PF: > { %1100 = sbr.rel (!%p8283_p9) target bundleno = 237 (0xed), region = 184  ;;  %s1102_s29 = sand.u32 (%p8283_p9), 1, %s8097_s17  }
  0xe2   : > { %s6703_s9 = sshll.u32 (%p8283_p9), %s13349_s26, 1  ;;  %s6699_s10 = sshll.u32 (%p8283_p9), %s1102_s29, 5 }
  0xe3   : > { %s7313_s12 = smul.u32 (%p8283_p9), 192, %s8121_s23  ;;  %s1104_s16 = scalar_lea.vmem (%p8283_p9), [#allocation6], %s6699_s10 }
  0xe5   : > { %s1112_s8 = sadd.s32 (%p8283_p9), %s7313_s12, %s6703_s9 }
  0xe6   : > { %s6705_s7 = sshll.u32 %s1112_s8, 3 }
  0xe7   : > { %s1114_s13 = scalar_lea.vmem %s12629_s4, %s6705_s7 }
  0xe8   : > { %v1149_v8 = vld [vmem:[%s1114_s13] sm:$0xff]  ;;  %v1151_v9 = vld [vmem:[%s1114_s13 + $0x8] sm:$0xff] }
  0xe9   : > { %v1153_v10 = vld [vmem:[%s1114_s13 + $0x300] sm:$0xff]  ;;  %1150 = vst [vmem:[%s1104_s16] sm:$0xff] %v1149_v8  ;;  %v1155_v11 = vld [vmem:[%s1114_s13 + $0x308] sm:$0xff] }
  0xea   : > { %1152 = vst [vmem:[%s1104_s16 + $0x8] sm:$0xff] %v1151_v9 }
  0xeb   : > { %1154 = vst [vmem:[%s1104_s16 + $0x10] sm:$0xff] %v1153_v10 }
  0xec   : > { %1156 = vst [vmem:[%s1104_s16 + $0x18] sm:$0xff] %v1155_v11 }
  0xed PF: > { %1162 = sbr.rel (!%p8263_p3) target bundleno = 309 (0x135), region = 222  ;;  %s1164_s26 = sand.u32 (%p8263_p3), 1, %s8105_s19  }
  0xee   : > { %s6708_s27 = sshll.u32 (%p8263_p3), %s8117_s22, 5  ;;  %s6706_s29 = sshll.u32 (%p8263_p3), %s1164_s26, 9 }
  0xef   : > { %s7314_s9 = smul.u32 (%p8263_p3), 192, %s8121_s23  ;;  %s8641_s11 = scalar_lea.vmem (%p8263_p3), [#allocation7], %s6706_s29 }
  0xf1   : > { %s1170_s12 = sadd.s32 (%p8263_p3), %s7314_s9, %s6708_s27 }
  0xf2   : > { %s6710_s8 = sshll.u32 %s1170_s12, 3 }
  0xf3   : > { %s8636_s21 = scalar_lea.vmem %s12630_s5, %s6710_s8 }
  0xf4   : > { %v1327_v12 = vld [vmem:[%s8636_s21] sm:$0xff]  ;;  %v1329_v13 = vld [vmem:[%s8636_s21 + $0x8] sm:$0xff]  ;;  %v1331_v14 = vld [vmem:[%s8636_s21 + $0x10] sm:$0xff] }
  0xf5   : > { %1328 = vst [vmem:[%s8641_s11] sm:$0xff] %v1327_v12  ;;  %v1333_v15 = vld [vmem:[%s8636_s21 + $0x18] sm:$0xff]  ;;  %v1335_v16 = vld [vmem:[%s8636_s21 + $0x20] sm:$0xff]  ;;  %v1337_v17 = vld [vmem:[%s8636_s21 + $0x28] sm:$0xff] }
  0xf6   : > { %1330 = vst [vmem:[%s8641_s11 + $0x8] sm:$0xff] %v1329_v13  ;;  %v1339_v18 = vld [vmem:[%s8636_s21 + $0x30] sm:$0xff]  ;;  %v1341_v19 = vld [vmem:[%s8636_s21 + $0x38] sm:$0xff]  ;;  %v1343_v20 = vld [vmem:[%s8636_s21 + $0x40] sm:$0xff] }
  0xf7   : > { %1332 = vst [vmem:[%s8641_s11 + $0x10] sm:$0xff] %v1331_v14  ;;  %v1345_v21 = vld [vmem:[%s8636_s21 + $0x48] sm:$0xff]  ;;  %v1347_v22 = vld [vmem:[%s8636_s21 + $0x50] sm:$0xff]  ;;  %v1349_v23 = vld [vmem:[%s8636_s21 + $0x58] sm:$0xff] }
  0xf8   : > { %1334 = vst [vmem:[%s8641_s11 + $0x18] sm:$0xff] %v1333_v15  ;;  %v1351_v24 = vld [vmem:[%s8636_s21 + $0x60] sm:$0xff]  ;;  %v1353_v25 = vld [vmem:[%s8636_s21 + $0x68] sm:$0xff]  ;;  %v1355_v26 = vld [vmem:[%s8636_s21 + $0x70] sm:$0xff] }
  0xf9   : > { %1336 = vst [vmem:[%s8641_s11 + $0x20] sm:$0xff] %v1335_v16  ;;  %v1357_v27 = vld [vmem:[%s8636_s21 + $0x78] sm:$0xff]  ;;  %v1359_v28 = vld [vmem:[%s8636_s21 + $0x80] sm:$0xff]  ;;  %v1361_v29 = vld [vmem:[%s8636_s21 + $0x88] sm:$0xff] }
  0xfa   : > { %1338 = vst [vmem:[%s8641_s11 + $0x28] sm:$0xff] %v1337_v17  ;;  %v1363_v30 = vld [vmem:[%s8636_s21 + $0x90] sm:$0xff]  ;;  %v1365_v31 = vld [vmem:[%s8636_s21 + $0x98] sm:$0xff]  ;;  %v1367_v32 = vld [vmem:[%s8636_s21 + $0xa0] sm:$0xff] }
  0xfb   : > { %1340 = vst [vmem:[%s8641_s11 + $0x30] sm:$0xff] %v1339_v18  ;;  %v1369_v33 = vld [vmem:[%s8636_s21 + $0xa8] sm:$0xff]  ;;  %v1371_v34 = vld [vmem:[%s8636_s21 + $0xb0] sm:$0xff]  ;;  %v1373_v35 = vld [vmem:[%s8636_s21 + $0xb8] sm:$0xff] }
  0xfc   : > { %1342 = vst [vmem:[%s8641_s11 + $0x38] sm:$0xff] %v1341_v19  ;;  %v1375_v36 = vld [vmem:[%s8636_s21 + $0xc0] sm:$0xff]  ;;  %v1377_v37 = vld [vmem:[%s8636_s21 + $0xc8] sm:$0xff]  ;;  %v1379_v38 = vld [vmem:[%s8636_s21 + $0xd0] sm:$0xff] }
  0xfd   : > { %1344 = vst [vmem:[%s8641_s11 + $0x40] sm:$0xff] %v1343_v20  ;;  %v1381_v39 = vld [vmem:[%s8636_s21 + $0xd8] sm:$0xff]  ;;  %v1383_v40 = vld [vmem:[%s8636_s21 + $0xe0] sm:$0xff]  ;;  %v1385_v41 = vld [vmem:[%s8636_s21 + $0xe8] sm:$0xff] }
  0xfe   : > { %1346 = vst [vmem:[%s8641_s11 + $0x48] sm:$0xff] %v1345_v21  ;;  %v1387_v42 = vld [vmem:[%s8636_s21 + $0xf0] sm:$0xff]  ;;  %v1389_v43 = vld [vmem:[%s8636_s21 + $0xf8] sm:$0xff]  ;;  %v1391_v44 = vld [vmem:[%s8636_s21 + $0x300] sm:$0xff] }
  0xff   : > { %1348 = vst [vmem:[%s8641_s11 + $0x50] sm:$0xff] %v1347_v22  ;;  %v1393_v45 = vld [vmem:[%s8636_s21 + $0x308] sm:$0xff]  ;;  %v1395_v46 = vld [vmem:[%s8636_s21 + $0x310] sm:$0xff]  ;;  %v1397_v47 = vld [vmem:[%s8636_s21 + $0x318] sm:$0xff] }
 0x100   : > { %1350 = vst [vmem:[%s8641_s11 + $0x58] sm:$0xff] %v1349_v23  ;;  %v1399_v48 = vld [vmem:[%s8636_s21 + $0x320] sm:$0xff]  ;;  %v1401_v49 = vld [vmem:[%s8636_s21 + $0x328] sm:$0xff]  ;;  %v1403_v50 = vld [vmem:[%s8636_s21 + $0x330] sm:$0xff] }
 0x101   : > { %1352 = vst [vmem:[%s8641_s11 + $0x60] sm:$0xff] %v1351_v24  ;;  %v1405_v51 = vld [vmem:[%s8636_s21 + $0x338] sm:$0xff]  ;;  %v1407_v52 = vld [vmem:[%s8636_s21 + $0x340] sm:$0xff]  ;;  %v1409_v53 = vld [vmem:[%s8636_s21 + $0x348] sm:$0xff] }
 0x102   : > { %1354 = vst [vmem:[%s8641_s11 + $0x68] sm:$0xff] %v1353_v25  ;;  %v1411_v54 = vld [vmem:[%s8636_s21 + $0x350] sm:$0xff]  ;;  %v1413_v55 = vld [vmem:[%s8636_s21 + $0x358] sm:$0xff]  ;;  %v1415_v56 = vld [vmem:[%s8636_s21 + $0x360] sm:$0xff] }
 0x103   : > { %1356 = vst [vmem:[%s8641_s11 + $0x70] sm:$0xff] %v1355_v26  ;;  %v1417_v57 = vld [vmem:[%s8636_s21 + $0x368] sm:$0xff]  ;;  %v1419_v58 = vld [vmem:[%s8636_s21 + $0x370] sm:$0xff]  ;;  %v1421_v59 = vld [vmem:[%s8636_s21 + $0x378] sm:$0xff] }
 0x104   : > { %1358 = vst [vmem:[%s8641_s11 + $0x78] sm:$0xff] %v1357_v27  ;;  %v1423_v60 = vld [vmem:[%s8636_s21 + $0x380] sm:$0xff]  ;;  %v1425_v61 = vld [vmem:[%s8636_s21 + $0x388] sm:$0xff]  ;;  %v1427_v62 = vld [vmem:[%s8636_s21 + $0x390] sm:$0xff] }
 0x105   : > { %1360 = vst [vmem:[%s8641_s11 + $0x80] sm:$0xff] %v1359_v28  ;;  %v1429_v63 = vld [vmem:[%s8636_s21 + $0x398] sm:$0xff]  ;;  %v1431_v0 = vld [vmem:[%s8636_s21 + $0x3a0] sm:$0xff]  ;;  %v1433_v1 = vld [vmem:[%s8636_s21 + $0x3a8] sm:$0xff] }
 0x106   : > { %1362 = vst [vmem:[%s8641_s11 + $0x88] sm:$0xff] %v1361_v29  ;;  %v1435_v2 = vld [vmem:[%s8636_s21 + $0x3b0] sm:$0xff]  ;;  %v1437_v3 = vld [vmem:[%s8636_s21 + $0x3b8] sm:$0xff]  ;;  %v1439_v4 = vld [vmem:[%s8636_s21 + $0x3c0] sm:$0xff] }
 0x107   : > { %1364 = vst [vmem:[%s8641_s11 + $0x90] sm:$0xff] %v1363_v30  ;;  %v1441_v5 = vld [vmem:[%s8636_s21 + $0x3c8] sm:$0xff]  ;;  %v1443_v6 = vld [vmem:[%s8636_s21 + $0x3d0] sm:$0xff]  ;;  %v1445_v7 = vld [vmem:[%s8636_s21 + $0x3d8] sm:$0xff] }
 0x108   : > { %1366 = vst [vmem:[%s8641_s11 + $0x98] sm:$0xff] %v1365_v31  ;;  %v1447_v8 = vld [vmem:[%s8636_s21 + $0x3e0] sm:$0xff]  ;;  %v1449_v9 = vld [vmem:[%s8636_s21 + $0x3e8] sm:$0xff]  ;;  %v1451_v10 = vld [vmem:[%s8636_s21 + $0x3f0] sm:$0xff] }
 0x109   : > { %1368 = vst [vmem:[%s8641_s11 + $0xa0] sm:$0xff] %v1367_v32  ;;  %v1453_v11 = vld [vmem:[%s8636_s21 + $0x3f8] sm:$0xff] }
 0x10a   : > { %1370 = vst [vmem:[%s8641_s11 + $0xa8] sm:$0xff] %v1369_v33 }
 0x10b   : > { %1372 = vst [vmem:[%s8641_s11 + $0xb0] sm:$0xff] %v1371_v34 }
 0x10c   : > { %1374 = vst [vmem:[%s8641_s11 + $0xb8] sm:$0xff] %v1373_v35 }
 0x10d   : > { %1376 = vst [vmem:[%s8641_s11 + $0xc0] sm:$0xff] %v1375_v36 }
 0x10e   : > { %1378 = vst [vmem:[%s8641_s11 + $0xc8] sm:$0xff] %v1377_v37 }
 0x10f   : > { %1380 = vst [vmem:[%s8641_s11 + $0xd0] sm:$0xff] %v1379_v38 }
 0x110   : > { %1382 = vst [vmem:[%s8641_s11 + $0xd8] sm:$0xff] %v1381_v39 }
 0x111   : > { %1384 = vst [vmem:[%s8641_s11 + $0xe0] sm:$0xff] %v1383_v40 }
 0x112   : > { %1386 = vst [vmem:[%s8641_s11 + $0xe8] sm:$0xff] %v1385_v41 }
 0x113   : > { %1388 = vst [vmem:[%s8641_s11 + $0xf0] sm:$0xff] %v1387_v42 }
 0x114   : > { %1390 = vst [vmem:[%s8641_s11 + $0xf8] sm:$0xff] %v1389_v43 }
 0x115   : > { %1392 = vst [vmem:[%s8641_s11 + $0x100] sm:$0xff] %v1391_v44 }
 0x116   : > { %1394 = vst [vmem:[%s8641_s11 + $0x108] sm:$0xff] %v1393_v45 }
 0x117   : > { %1396 = vst [vmem:[%s8641_s11 + $0x110] sm:$0xff] %v1395_v46 }
 0x118   : > { %1398 = vst [vmem:[%s8641_s11 + $0x118] sm:$0xff] %v1397_v47 }
 0x119   : > { %1400 = vst [vmem:[%s8641_s11 + $0x120] sm:$0xff] %v1399_v48 }
 0x11a   : > { %1402 = vst [vmem:[%s8641_s11 + $0x128] sm:$0xff] %v1401_v49 }
 0x11b   : > { %1404 = vst [vmem:[%s8641_s11 + $0x130] sm:$0xff] %v1403_v50 }
 0x11c   : > { %1406 = vst [vmem:[%s8641_s11 + $0x138] sm:$0xff] %v1405_v51 }
 0x11d   : > { %1408 = vst [vmem:[%s8641_s11 + $0x140] sm:$0xff] %v1407_v52 }
 0x11e   : > { %1410 = vst [vmem:[%s8641_s11 + $0x148] sm:$0xff] %v1409_v53 }
 0x11f   : > { %1412 = vst [vmem:[%s8641_s11 + $0x150] sm:$0xff] %v1411_v54 }
 0x120   : > { %1414 = vst [vmem:[%s8641_s11 + $0x158] sm:$0xff] %v1413_v55 }
 0x121   : > { %1416 = vst [vmem:[%s8641_s11 + $0x160] sm:$0xff] %v1415_v56 }
 0x122   : > { %1418 = vst [vmem:[%s8641_s11 + $0x168] sm:$0xff] %v1417_v57 }
 0x123   : > { %1420 = vst [vmem:[%s8641_s11 + $0x170] sm:$0xff] %v1419_v58 }
 0x124   : > { %1422 = vst [vmem:[%s8641_s11 + $0x178] sm:$0xff] %v1421_v59 }
 0x125   : > { %1424 = vst [vmem:[%s8641_s11 + $0x180] sm:$0xff] %v1423_v60 }
 0x126   : > { %1426 = vst [vmem:[%s8641_s11 + $0x188] sm:$0xff] %v1425_v61 }
 0x127   : > { %1428 = vst [vmem:[%s8641_s11 + $0x190] sm:$0xff] %v1427_v62 }
 0x128   : > { %1430 = vst [vmem:[%s8641_s11 + $0x198] sm:$0xff] %v1429_v63 }
 0x129   : > { %1432 = vst [vmem:[%s8641_s11 + $0x1a0] sm:$0xff] %v1431_v0 }
 0x12a   : > { %1434 = vst [vmem:[%s8641_s11 + $0x1a8] sm:$0xff] %v1433_v1 }
 0x12b   : > { %1436 = vst [vmem:[%s8641_s11 + $0x1b0] sm:$0xff] %v1435_v2 }
 0x12c   : > { %1438 = vst [vmem:[%s8641_s11 + $0x1b8] sm:$0xff] %v1437_v3 }
 0x12d   : > { %1440 = vst [vmem:[%s8641_s11 + $0x1c0] sm:$0xff] %v1439_v4 }
 0x12e   : > { %1442 = vst [vmem:[%s8641_s11 + $0x1c8] sm:$0xff] %v1441_v5 }
 0x12f   : > { %1444 = vst [vmem:[%s8641_s11 + $0x1d0] sm:$0xff] %v1443_v6 }
 0x130   : > { %1446 = vst [vmem:[%s8641_s11 + $0x1d8] sm:$0xff] %v1445_v7 }
 0x131   : > { %1448 = vst [vmem:[%s8641_s11 + $0x1e0] sm:$0xff] %v1447_v8 }
 0x132   : > { %1450 = vst [vmem:[%s8641_s11 + $0x1e8] sm:$0xff] %v1449_v9 }
 0x133   : > { %1452 = vst [vmem:[%s8641_s11 + $0x1f0] sm:$0xff] %v1451_v10 }
 0x134   : > { %1454 = vst [vmem:[%s8641_s11 + $0x1f8] sm:$0xff] %v1453_v11 }
 0x135 PF: > { %1460 = sbr.rel (!%p8301_p4) target bundleno = 321 (0x141), region = 260  ;;  %s1462_s0 = sand.u32 (%p8301_p4), 1, %s8089_s15  }
 0x136   : > { %s6714_s13 = sshll.u32 (%p8301_p4), %s13353_s30, 1  ;;  %s6711_s16 = sshll.u32 (%p8301_p4), %s1462_s0, 5 }
 0x137   : > { %s7315_s26 = smul.u32 (%p8301_p4), 192, %s8121_s23  ;;  %s1464_s7 = scalar_lea.vmem (%p8301_p4), [#allocation8], %s6711_s16 }
 0x139   : > { %s1472_s27 = sadd.s32 (%p8301_p4), %s7315_s26, %s6714_s13 }
 0x13a   : > { %s6716_s29 = sshll.u32 %s1472_s27, 3 }
 0x13b   : > { %s1474_s8 = scalar_lea.vmem %s12631_s6, %s6716_s29 }
 0x13c   : > { %v1509_v12 = vld [vmem:[%s1474_s8] sm:$0xff]  ;;  %v1511_v13 = vld [vmem:[%s1474_s8 + $0x8] sm:$0xff] }
 0x13d   : > { %v1513_v14 = vld [vmem:[%s1474_s8 + $0x300] sm:$0xff]  ;;  %1510 = vst [vmem:[%s1464_s7] sm:$0xff] %v1509_v12  ;;  %v1515_v15 = vld [vmem:[%s1474_s8 + $0x308] sm:$0xff] }
 0x13e   : > { %1512 = vst [vmem:[%s1464_s7 + $0x8] sm:$0xff] %v1511_v13 }
 0x13f   : > { %1514 = vst [vmem:[%s1464_s7 + $0x10] sm:$0xff] %v1513_v14 }
 0x140   : > { %1516 = vst [vmem:[%s1464_s7 + $0x18] sm:$0xff] %v1515_v15 }
 0x141 PF: > { %p6717_p1 = scmp.ge.s32.totalorder %s8125_s24, 1  ;;  %p1521_p3 = scmp.lt.s32.totalorder %s8125_s24, 7 }
 0x143   : > { %p1522_p9 = pnand %p6717_p1, %p1521_p3 }
 0x145   : > { %1525 = sbr.rel (%p1522_p9) target bundleno = 2415 (0x96f), region = 298 }
 0x14a   : > { %s12797_s30 = sld [smem:[#allocation13_spill]]  ;;  %s8779_s28 = sand.u32 1, %s8101_s18   ;;  %vm1807_vm0 = vcmask 523264   ;;  %vm2117_vm1 = vcmask 261120   ;;  %vm2182_vm2 = vcmask 130048  }
 0x14b   : > { %s8782_s10 = sshll.u32 %s8779_s28, 9  ;;  %s12798_s26 = sld [smem:[#allocation14_spill]] }
 0x14c   : > { %s8785_s21 = scalar_lea.vmem [#allocation4], %s8782_s10  ;;  %s8817_s16 = scalar_lea.vmem [#allocation2], %s8782_s10 }
 0x14d   : > { %v1778_v16 = vld [vmem:[%s8785_s21 + $0x78] sm:$0xff]  ;;  %v1777_v17 = vld [vmem:[%s8785_s21 + $0x70] sm:$0xff]  ;;  %v1776_v18 = vld [vmem:[%s8785_s21 + $0x68] sm:$0xff]  ;;  %s12799_s9 = sld [smem:[#allocation172_spill]]  ;;  %s1549_s27 = sand.u32 1, %s8085_s14  }
 0x14e   : > { %6726 = vmatpush.xpose.msk.msra.mxu0 %vm1807_vm0, %v1778_v16  ;;  %v1775_v19 = vld [vmem:[%s8785_s21 + $0x60] sm:$0xff]  ;;  %v1782_v20 = vld [vmem:[%s8785_s21 + $0x98] sm:$0xff]  ;;  %v1781_v22 = vld [vmem:[%s8785_s21 + $0x90] sm:$0xff]  ;;  %s12800_s1 = sld [smem:[#allocation173_spill]]  ;;  %s10208_s29 = sshll.u32 %s1549_s27, 5 }
 0x14f   : > { %v1774_v21 = vld [vmem:[%s8785_s21 + $0x58] sm:$0xff]  ;;  %6758 = vmatpush.xpose.msk.msra.mxu1 %vm1807_vm0, %v1782_v20  ;;  %v1773_v24 = vld [vmem:[%s8785_s21 + $0x50] sm:$0xff]  ;;  %v1780_v25 = vld [vmem:[%s8785_s21 + $0x88] sm:$0xff]  ;;  %s10215_s14 = scalar_lea.vmem [#allocation5], %s10208_s29 }
 0x150   : > { %s1535_s11 = sand.u32 1, %s12797_s30   ;;  %v1772_v27 = vld [vmem:[%s8785_s21 + $0x48] sm:$0xff]  ;;  %v1731_v28 = vld [vmem:[%s8817_s16] sm:$0xff]  ;;  %v1770_v32 = vld [vmem:[%s8785_s21 + $0x38] sm:$0xff] }
 0x151   : > { %s8795_s0 = sshll.u32 %s1535_s11, 5  ;;  %v1747_v29 = vmul.f32 0.125, %v1731_v28  ;;  %v1779_v30 = vld [vmem:[%s8785_s21 + $0x80] sm:$0xff]  ;;  %v1732_v33 = vld [vmem:[%s8817_s16 + $0x8] sm:$0xff]  ;;  %v1769_v35 = vld [vmem:[%s8785_s21 + $0x30] sm:$0xff]  ;;  %p1662_p11 = scmp.eq.s32.totalorder %s12798_s26, 0 }
 0x152   : > { %6727 = vmatpush.xpose.msk.msra.mxu0 %vm1807_vm0, %v1777_v17  ;;  %s8804_s13 = scalar_lea.vmem [#allocation3], %s8795_s0  ;;  %v1771_v31 = vld [vmem:[%s8785_s21 + $0x40] sm:$0xff]  ;;  %v1748_v34 = vmul.f32 0.125, %v1732_v33  ;;  %v1768_v36 = vld [vmem:[%s8785_s21 + $0x28] sm:$0xff]  ;;  %v1733_v37 = vld [vmem:[%s8817_s16 + $0x10] sm:$0xff]  ;;  %s9279_s2 = scalar_lea.vmem [#allocation6], %s8795_s0 }
 0x153   : > { %v1804_v23 = vld [vmem:[%s8804_s13 + $0x8] sm:$0xff]  ;;  %6759 = vmatpush.xpose.msk.msra.mxu1 %vm1807_vm0, %v1781_v22  ;;  %v1803_v26 = vld [vmem:[%s8804_s13] sm:$0xff]  ;;  %v1749_v38 = vmul.f32 0.125, %v1733_v37  ;;  %v1766_v40 = vld [vmem:[%s8785_s21 + $0x18] sm:$0xff]  ;;  %s9306_s0 = scalar_lea.vmem [#allocation7], %s8782_s10  ;;  %p1664_p12 = scmp.eq.s32.totalorder %s12798_s26, 2 }
 0x154   : > { %6778 = vmatpush.xpose.msk.msra.mxu2 %vm1807_vm0, %v1804_v23  ;;  %v1767_v39 = vld [vmem:[%s8785_s21 + $0x20] sm:$0xff]  ;;  %v1734_v41 = vld [vmem:[%s8817_s16 + $0x18] sm:$0xff]  ;;  %v1765_v43 = vld [vmem:[%s8785_s21 + $0x10] sm:$0xff]  ;;  %s1663_s12 = scalar_select %p1662_p11, -1e+09, 0.0 }
 0x155   : > { %v1750_v42 = vmul.f32 0.125, %v1734_v41  ;;  %v1764_v44 = vld [vmem:[%s8785_s21 + $0x8] sm:$0xff]  ;;  %v1735_v45 = vld [vmem:[%s8817_s16 + $0x20] sm:$0xff]  ;;  %v1737_v50 = vld [vmem:[%s8817_s16 + $0x30] sm:$0xff]  ;;  %s10616_s10 = scalar_lea.vmem [#allocation8], %s10208_s29  ;;  %s7287_s29 = sshll.u32 %s12798_s26, 5 }
 0x156   : > { %6728 = vmatpush.xpose.msk.msra.mxu0 %vm1807_vm0, %v1776_v18  ;;  %v1751_v46 = vmul.f32 0.125, %v1735_v45  ;;  %v1763_v47 = vld [vmem:[%s8785_s21] sm:$0xff]  ;;  %v1736_v48 = vld [vmem:[%s8817_s16 + $0x28] sm:$0xff]  ;;  %v1753_v51 = vmul.f32 0.125, %v1737_v50  ;;  %v1738_v52 = vld [vmem:[%s8817_s16 + $0x38] sm:$0xff]  ;;  %s6432_s26 = scalar_lea.sflag [#allocation10], %s8779_s28 }
 0x157   : > { %6760 = vmatpush.xpose.msk.msra.mxu1 %vm1807_vm0, %v1780_v25  ;;  %v1752_v49 = vmul.f32 0.125, %v1736_v48  ;;  %v1754_v53 = vmul.f32 0.125, %v1738_v52  ;;  %v1739_v54 = vld [vmem:[%s8817_s16 + $0x40] sm:$0xff]  ;;  %v1740_v56 = vld [vmem:[%s8817_s16 + $0x48] sm:$0xff]  ;;  %v1741_v58 = vld [vmem:[%s8817_s16 + $0x50] sm:$0xff] }
 0x158   : > { %6779 = vmatpush.xpose.msk.msra.mxu2 %vm1807_vm0, %v1803_v26  ;;  %v1755_v55 = vmul.f32 0.125, %v1739_v54  ;;  %v1756_v57 = vmul.f32 0.125, %v1740_v56  ;;  %v1757_v59 = vmul.f32 0.125, %v1741_v58  ;;  %v1742_v60 = vld [vmem:[%s8817_s16 + $0x58] sm:$0xff]  ;;  %v1743_v62 = vld [vmem:[%s8817_s16 + $0x60] sm:$0xff]  ;;  %v1744_v0 = vld [vmem:[%s8817_s16 + $0x68] sm:$0xff]  ;;  %v8930_v26 = vstv %s1663_s12 }
 0x159   : > { %v1758_v61 = vmul.f32 0.125, %v1742_v60  ;;  %v1759_v63 = vmul.f32 0.125, %v1743_v62  ;;  %v1760_v1 = vmul.f32 0.125, %v1744_v0  ;;  %v1745_v2 = vld [vmem:[%s8817_s16 + $0x70] sm:$0xff]  ;;  %v1746_v4 = vld [vmem:[%s8817_s16 + $0x78] sm:$0xff]  ;;  %v1671_v18 = vld [vmem:[%s12799_s9 + $0x28] sm:$0xff] }
 0x15a   : > { %6729 = vmatpush.xpose.msk.msra.mxu0 %vm1807_vm0, %v1775_v19  ;;  %v1761_v3 = vmul.f32 0.125, %v1745_v2  ;;  %v1762_v5 = vmul.f32 0.125, %v1746_v4  ;;  %v1700_v22 = vld [vmem:[%s12800_s1 + $0x10] sm:$0xff]  ;;  %v1673_v28 = vld [vmem:[%s12799_s9 + $0x38] sm:$0xff]  ;;  %v1703_v48 = vld [vmem:[%s12800_s1 + $0x28] sm:$0xff] }
 0x15b   : > { %6761 = vmatpush.xpose.msk.msra.mxu1 %vm1807_vm0, %v1779_v30  ;;  %6780 = vmatmul.msk.f32.vlgmr.msra.gmra.mxu2 %vm1807_vm0, %v1747_v29  ;;  %v1672_v33 = vld [vmem:[%s12799_s9 + $0x30] sm:$0xff]  ;;  %v1677_v52 = vld [vmem:[%s12799_s9 + $0x58] sm:$0xff]  ;;  %v8992_v56 = vadd.f32 %v8930_v26, %v1703_v48  ;;  %s1665_s8 = scalar_select %p1664_p12, -1e+09, 0.0 }
 0x15d   : > { %12804 = vst [vmem:[#allocation24_spill] sm:$0xff] %v8992_v56 }
 0x15e   : > { %6730 = vmatpush.xpose.msk.msra.mxu0 %vm1807_vm0, %v1774_v21  ;;  %6762 = vmatmul.msk.f32.vlgmr.msra.gmra.mxu1 %vm1807_vm0, %v1747_v29  ;;  %v1670_v21 = vld [vmem:[%s12799_s9 + $0x20] sm:$0xff] }
 0x162   : > { %6731 = vmatpush.xpose.msk.msra.mxu0 %vm1807_vm0, %v1773_v24 }
 0x163   : > { %6781 = vmatmul.msk.f32.gmra.mxu2 %vm1807_vm0, %v1748_v34 }
 0x166   : > { %6732 = vmatpush.xpose.msk.msra.mxu0 %vm1807_vm0, %v1772_v27  ;;  %6763 = vmatmul.msk.f32.gmra.mxu1 %vm1807_vm0, %v1748_v34 }
 0x16a   : > { %6733 = vmatpush.xpose.msk.msra.mxu0 %vm1807_vm0, %v1771_v31 }
 0x16b   : > { %6782 = vmatmul.msk.f32.gmra.mxu2 %vm1807_vm0, %v1749_v38 }
 0x16e   : > { %6734 = vmatpush.xpose.msk.msra.mxu0 %vm1807_vm0, %v1770_v32  ;;  %6764 = vmatmul.msk.f32.gmra.mxu1 %vm1807_vm0, %v1749_v38 }
 0x172   : > { %6735 = vmatpush.xpose.msk.msra.mxu0 %vm1807_vm0, %v1769_v35 }
 0x173   : > { %6783 = vmatmul.msk.f32.gmra.mxu2 %vm1807_vm0, %v1750_v42 }
 0x176   : > { %6736 = vmatpush.xpose.msk.msra.mxu0 %vm1807_vm0, %v1768_v36  ;;  %6765 = vmatmul.msk.f32.gmra.mxu1 %vm1807_vm0, %v1750_v42 }
 0x17a   : > { %6737 = vmatpush.xpose.msk.msra.mxu0 %vm1807_vm0, %v1767_v39  ;;  %v1675_v39 = vld [vmem:[%s12799_s9 + $0x48] sm:$0xff] }
 0x17b   : > { %6784 = vmatmul.msk.f32.gmra.mxu2 %vm1807_vm0, %v1751_v46 }
 0x17e   : > { %6738 = vmatpush.xpose.msk.msra.mxu0 %vm1807_vm0, %v1766_v40  ;;  %6766 = vmatmul.msk.f32.gmra.mxu1 %vm1807_vm0, %v1751_v46 }
 0x182   : > { %6739 = vmatpush.xpose.msk.msra.mxu0 %vm1807_vm0, %v1765_v43 }
 0x183   : > { %6785 = vmatmul.msk.f32.gmra.mxu2 %vm1807_vm0, %v1752_v49 }
 0x186   : > { %6740 = vmatpush.xpose.msk.msra.mxu0 %vm1807_vm0, %v1764_v44  ;;  %6767 = vmatmul.msk.f32.gmra.mxu1 %vm1807_vm0, %v1752_v49 }
 0x18a   : > { %6741 = vmatpush.xpose.msk.msra.mxu0 %vm1807_vm0, %v1763_v47  ;;  %v1702_v47 = vld [vmem:[%s12800_s1 + $0x20] sm:$0xff] }
 0x18b   : > { %6786 = vmatmul.msk.f32.gmra.mxu2 %vm1807_vm0, %v1753_v51  ;;  %v8987_v54 = vadd.f32 %v8930_v26, %v1702_v47 }
 0x18d   : > { %6742 = vmatmul.msk.f32.vlgmr.msra.gmra.mxu0 %vm1807_vm0, %v1747_v29  ;;  %v8938_v29 = vadd.f32 %v8930_v26, %v1700_v22  ;;  %12803 = vst [vmem:[#allocation23_spill] sm:$0xff] %v8987_v54 }
 0x18e   : > { %6768 = vmatmul.msk.f32.gmra.mxu1 %vm1807_vm0, %v1753_v51 }
 0x18f   : > { %12801 = vst [vmem:[#allocation21_spill] sm:$0xff] %v8938_v29 }
 0x193   : > { %6787 = vmatmul.msk.f32.gmra.mxu2 %vm1807_vm0, %v1754_v53 }
 0x195   : > { %6743 = vmatmul.msk.f32.gmra.mxu0 %vm1807_vm0, %v1748_v34  ;;  %v1701_v34 = vld [vmem:[%s12800_s1 + $0x18] sm:$0xff] }
 0x196   : > { %6769 = vmatmul.msk.f32.gmra.mxu1 %vm1807_vm0, %v1754_v53  ;;  %v8960_v41 = vadd.f32 %v8930_v26, %v1701_v34 }
 0x198   : > { %12802 = vst [vmem:[#allocation22_spill] sm:$0xff] %v8960_v41 }
 0x19b   : > { %6788 = vmatmul.msk.f32.gmra.mxu2 %vm1807_vm0, %v1755_v55 }
 0x19d   : > { %6744 = vmatmul.msk.f32.gmra.mxu0 %vm1807_vm0, %v1749_v38 }
 0x19e   : > { %6770 = vmatmul.msk.f32.gmra.mxu1 %vm1807_vm0, %v1755_v55 }
 0x1a3   : > { %6789 = vmatmul.msk.f32.gmra.mxu2 %vm1807_vm0, %v1756_v57 }
 0x1a5   : > { %6745 = vmatmul.msk.f32.gmra.mxu0 %vm1807_vm0, %v1750_v42 }
 0x1a6   : > { %6771 = vmatmul.msk.f32.gmra.mxu1 %vm1807_vm0, %v1756_v57 }
 0x1ab   : > { %6790 = vmatmul.msk.f32.gmra.mxu2 %vm1807_vm0, %v1757_v59 }
 0x1ad   : > { %6746 = vmatmul.msk.f32.gmra.mxu0 %vm1807_vm0, %v1751_v46  ;;  %v1674_v46 = vld [vmem:[%s12799_s9 + $0x40] sm:$0xff] }
 0x1ae   : > { %6772 = vmatmul.msk.f32.gmra.mxu1 %vm1807_vm0, %v1757_v59 }
 0x1b3   : > { %6791 = vmatmul.msk.f32.gmra.mxu2 %vm1807_vm0, %v1758_v61 }
 0x1b5   : > { %6747 = vmatmul.msk.f32.gmra.mxu0 %vm1807_vm0, %v1752_v49 }
 0x1b6   : > { %6773 = vmatmul.msk.f32.gmra.mxu1 %vm1807_vm0, %v1758_v61 }
 0x1bb   : > { %6792 = vmatmul.msk.f32.gmra.mxu2 %vm1807_vm0, %v1759_v63 }
 0x1bd   : > { %6748 = vmatmul.msk.f32.gmra.mxu0 %vm1807_vm0, %v1753_v51 }
 0x1be   : > { %6774 = vmatmul.msk.f32.gmra.mxu1 %vm1807_vm0, %v1759_v63 }
 0x1c3   : > { %6793 = vmatmul.msk.f32.gmra.mxu2 %vm1807_vm0, %v1760_v1 }
 0x1c5   : > { %6749 = vmatmul.msk.f32.gmra.mxu0 %vm1807_vm0, %v1754_v53 }
 0x1c6   : > { %6775 = vmatmul.msk.f32.gmra.mxu1 %vm1807_vm0, %v1760_v1 }
 0x1cb   : > { %6794 = vmatmul.msk.f32.gmra.mxu2 %vm1807_vm0, %v1761_v3 }
 0x1cd   : > { %6750 = vmatmul.msk.f32.gmra.mxu0 %vm1807_vm0, %v1755_v55 }
 0x1ce   : > { %6776 = vmatmul.msk.f32.gmra.mxu1 %vm1807_vm0, %v1761_v3 }
 0x1d3   : > { %6795 = vmatmul.msk.f32.gmra.mxu2 %vm1807_vm0, %v1762_v5 }
 0x1d5   : > { %6751 = vmatmul.msk.f32.gmra.mxu0 %vm1807_vm0, %v1756_v57 }
 0x1d6   : > { %6777 = vmatmul.msk.f32.gmra.mxu1 %vm1807_vm0, %v1762_v5 }
 0x1db   : > { %v8900_v6 = vpop.f32.mrf.mxu1 }
 0x1dd   : > { %6752 = vmatmul.msk.f32.gmra.mxu0 %vm1807_vm0, %v1757_v59 }
 0x1de   : > { %v8902_v7 = vpop.f32.mrf.mxu2 }
 0x1e3   : > { %v8905_v8 = vpop.f32.mrf.mxu1 }
 0x1e5   : > { %6753 = vmatmul.msk.f32.gmra.mxu0 %vm1807_vm0, %v1758_v61  ;;  %v1676_v61 = vld [vmem:[%s12799_s9 + $0x50] sm:$0xff] }
 0x1e6   : > { %v8907_v9 = vpop.f32.mrf.mxu2 }
 0x1eb   : > { %v2004_v10 = vpop.f32.mrf.mxu1 }
 0x1ec   : > { %v8920_v19 = vadd.f32 %v2004_v10, %v1671_v18 }
 0x1ed   : > { %6754 = vmatmul.msk.f32.gmra.mxu0 %vm1807_vm0, %v1759_v63 }
 0x1ee   : > { %v2075_v11 = vpop.f32.mrf.mxu2  ;;  %v2126_v25 = vsel %vm2117_vm1, %v8920_v19, -inf }
 0x1ef   : > { %v8944_v32 = vadd.f32 %v2075_v11, %v8938_v29 }
 0x1f1   : > { %v2189_v42 = vsel %vm2182_vm2, %v8944_v32, -inf }
 0x1f3   : > { %v2007_v12 = vpop.f32.mrf.mxu1 }
 0x1f4   : > { %v8941_v31 = vadd.f32 %v2007_v12, %v1673_v28 }
 0x1f5   : > { %6755 = vmatmul.msk.f32.gmra.mxu0 %vm1807_vm0, %v1760_v1  ;;  %v1704_v1 = vld [vmem:[%s12800_s1 + $0x30] sm:$0xff] }
 0x1f6   : > { %v2078_v13 = vpop.f32.mrf.mxu2  ;;  %v2130_v37 = vsel %vm2117_vm1, %v8941_v31, -inf  ;;  %v9022_v11 = vadd.f32 %v8930_v26, %v1704_v1 }
 0x1f7   : > { %v8968_v45 = vadd.f32 %v2078_v13, %v8960_v41 }
 0x1f8   : > { %12805 = vst [vmem:[#allocation25_spill] sm:$0xff] %v9022_v11 }
 0x1f9   : > { %v2192_v55 = vsel %vm2182_vm2, %v8968_v45, -inf }
 0x1fb   : > { %v2010_v15 = vpop.f32.mrf.mxu1 }
 0x1fc   : > { %v8965_v44 = vadd.f32 %v2010_v15, %v1675_v39 }
 0x1fd   : > { %6756 = vmatmul.msk.f32.gmra.mxu0 %vm1807_vm0, %v1761_v3  ;;  %v1679_v3 = vld [vmem:[%s12799_s9 + $0x68] sm:$0xff] }
 0x1fe   : > { %v2081_v16 = vpop.f32.mrf.mxu2  ;;  %v2134_v50 = vsel %vm2117_vm1, %v8965_v44, -inf }
 0x1ff   : > { %v8998_v60 = vadd.f32 %v2081_v16, %v8987_v54  ;;  %v1678_v16 = vld [vmem:[%s12799_s9 + $0x60] sm:$0xff] }
 0x200   : > { %v1805_v54 = vld [vmem:[%s9279_s2] sm:$0xff] }
 0x201   : > { %v2195_v4 = vsel %vm2182_vm2, %v8998_v60, -inf }
 0x203   : > { %v2013_v20 = vpop.f32.mrf.mxu1 }
 0x204   : > { %v8995_v59 = vadd.f32 %v2013_v20, %v1677_v52  ;;  %v1705_v20 = vld [vmem:[%s12800_s1 + $0x38] sm:$0xff]  ;;  %v1682_v52 = vld [vmem:[%s12799_s9 + $0x80] sm:$0xff] }
 0x205   : > { %6757 = vmatmul.msk.f32.gmra.mxu0 %vm1807_vm0, %v1762_v5 }
 0x206   : > { %v2084_v23 = vpop.f32.mrf.mxu2  ;;  %v2138_v0 = vsel %vm2117_vm1, %v8995_v59, -inf }
 0x207   : > { %v9004_v62 = vadd.f32 %v2084_v23, %v8992_v56 }
 0x209   : > { %v2198_v5 = vsel %vm2182_vm2, %v9004_v62, -inf }
 0x20a   : > { %v8912_v14 = vpop.f32.mrf.mxu0 }
 0x20b   : > { %v2016_v35 = vpop.f32.mrf.mxu1 }
 0x20c   : > { %v9024_v13 = vadd.f32 %v2016_v35, %v1679_v3  ;;  %v1680_v35 = vld [vmem:[%s12799_s9 + $0x70] sm:$0xff] }
 0x20e   : > { %v2087_v40 = vpop.f32.mrf.mxu2  ;;  %v2142_v22 = vsel %vm2117_vm1, %v9024_v13, -inf }
 0x20f   : > { %v9030_v18 = vadd.f32 %v2087_v40, %v9022_v11  ;;  %v1668_v11 = vld [vmem:[%s12799_s9 + $0x10] sm:$0xff] }
 0x212   : > { %v8914_v17 = vpop.f32.mrf.mxu0 }
 0x213   : > { %v2019_v53 = vpop.f32.mrf.mxu1 }
 0x216   : > { %v2090_v58 = vpop.f32.mrf.mxu2 }
 0x21a   : > { %v1939_v24 = vpop.f32.mrf.mxu0 }
 0x21b   : > { %v8932_v27 = vadd.f32 %v1939_v24, %v1670_v21  ;;  %v2022_v12 = vpop.f32.mrf.mxu1  ;;  %v1681_v24 = vld [vmem:[%s12799_s9 + $0x78] sm:$0xff] }
 0x21d   : > { %v2127_v30 = vmax.f32 %v8932_v27, %v2126_v25  ;;  %v9043_v25 = vadd.f32 %v8930_v26, %v1705_v20 }
 0x21e   : > { %v2093_v15 = vpop.f32.mrf.mxu2 }
 0x21f   : > { %2128 = vmax.xlane.f32.xlu0 %v2127_v30  ;;  %12806 = vst [vmem:[#allocation26_spill] sm:$0xff] %v9043_v25  ;;  %v2201_v30 = vsel %vm2182_vm2, %v9030_v18, -inf }
 0x222   : > { %v1942_v36 = vpop.f32.mrf.mxu0 }
 0x223   : > { %v8954_v38 = vadd.f32 %v1942_v36, %v1672_v33  ;;  %v9048_v33 = vadd.f32 %v2019_v53, %v1681_v24  ;;  %v2025_v34 = vpop.f32.mrf.mxu1  ;;  %v9054_v36 = vadd.f32 %v2090_v58, %v9043_v25  ;;  %v1687_v24 = vld [vmem:[%s12799_s9 + $0xa8] sm:$0xff] }
 0x225   : > { %v2131_v43 = vmax.f32 %v8954_v38, %v2130_v37  ;;  %v1706_v37 = vld [vmem:[%s12800_s1 + $0x40] sm:$0xff]  ;;  %v2204_v47 = vsel %vm2182_vm2, %v9054_v36, -inf }
 0x226   : > { %v2096_v39 = vpop.f32.mrf.mxu2  ;;  %v9069_v48 = vadd.f32 %v8930_v26, %v1706_v37 }
 0x227   : > { %2132 = vmax.xlane.f32.xlu1 %v2131_v43  ;;  %2190 = vmax.xlane.f32.xlu0 %v2189_v42  ;;  %v2146_v42 = vsel %vm2117_vm1, %v9048_v33, -inf }
 0x228   : > { %12807 = vst [vmem:[#allocation27_spill] sm:$0xff] %v9069_v48  ;;  %v9078_v53 = vadd.f32 %v2093_v15, %v9069_v48  ;;  %v1666_v48 = vld [vmem:[%s12799_s9] sm:$0xff] }
 0x22a   : > { %v1945_v49 = vpop.f32.mrf.mxu0  ;;  %v2207_v3 = vsel %vm2182_vm2, %v9078_v53, -inf }
 0x22b   : > { %v8981_v51 = vadd.f32 %v1945_v49, %v1674_v46  ;;  %v1683_v46 = vld [vmem:[%s12799_s9 + $0x88] sm:$0xff] }
 0x22d   : > { %v2135_v57 = vmax.f32 %v8981_v51, %v2134_v50  ;;  %v9072_v50 = vadd.f32 %v2022_v12, %v1683_v46  ;;  %v1684_v12 = vld [vmem:[%s12799_s9 + $0x90] sm:$0xff]  ;;  %v1709_v46 = vld [vmem:[%s12800_s1 + $0x58] sm:$0xff] }
 0x22e   : > { %v2099_v1 = vpop.f32.mrf.mxu2 }
 0x22f   : > { %2136 = vmax.xlane.f32.xlu2 %v2135_v57  ;;  %2193 = vmax.xlane.f32.xlu1 %v2192_v55  ;;  %v1707_v55 = vld [vmem:[%s12800_s1 + $0x48] sm:$0xff]  ;;  %v2028_v57 = vpop.f32.mrf.mxu1 }
 0x232   : > { %v1948_v63 = vpop.f32.mrf.mxu0 }
 0x233   : > { %v9011_v2 = vadd.f32 %v1948_v63, %v1676_v61  ;;  %v2150_v61 = vsel %vm2117_vm1, %v9072_v50, -inf }
 0x235   : > { %v2139_v10 = vmax.f32 %v9011_v2, %v2138_v0  ;;  %v1685_v0 = vld [vmem:[%s12799_s9 + $0x98] sm:$0xff] }
 0x236   : > { %v2102_v37 = vpop.f32.mrf.mxu2 }
 0x237   : > { %2196 = vmax.xlane.f32.xlu2 %v2195_v4  ;;  %2199 = vmax.xlane.f32.xlu1 %v2198_v5  ;;  %v9093_v4 = vadd.f32 %v8930_v26, %v1707_v55  ;;  %v1689_v55 = vld [vmem:[%s12799_s9 + $0xb8] sm:$0xff] }
 0x238   : > { %2140 = vmax.xlane.f32.xlu0 %v2139_v10  ;;  %v9096_v10 = vadd.f32 %v2025_v34, %v1685_v0 }
 0x239   : > { %12808 = vst [vmem:[#allocation28_spill] sm:$0xff] %v9093_v4  ;;  %v9102_v15 = vadd.f32 %v2096_v39, %v9093_v4  ;;  %v9120_v39 = vadd.f32 %v2028_v57, %v1687_v24 }
 0x23a   : > { %v1951_v21 = vpop.f32.mrf.mxu0 }
 0x23b   : > { %v9037_v23 = vadd.f32 %v1951_v21, %v1678_v16  ;;  %v1708_v16 = vld [vmem:[%s12800_s1 + $0x50] sm:$0xff]  ;;  %v2154_v21 = vsel %vm2117_vm1, %v9096_v10, -inf }
 0x23c   : > { %v9117_v34 = vadd.f32 %v8930_v26, %v1708_v16  ;;  %v1710_v16 = vld [vmem:[%s12800_s1 + $0x60] sm:$0xff] }
 0x23d   : > { %v2143_v28 = vmax.f32 %v9037_v23, %v2142_v22 }
 0x23e   : > { %12809 = vst [vmem:[#allocation29_spill] sm:$0xff] %v9117_v34 }
 0x23f   : > { %2144 = vmax.xlane.f32.xlu2 %v2143_v28  ;;  %v2031_v28 = vpop.f32.mrf.mxu1 }
 0x240   : > { %2202 = vmax.xlane.f32.xlu0 %v2201_v30  ;;  %v2210_v30 = vsel %vm2182_vm2, %v9102_v15, -inf }
 0x242   : > { %v1954_v40 = vpop.f32.mrf.mxu0 }
 0x243   : > { %v9061_v43 = vadd.f32 %v1954_v40, %v1680_v35  ;;  %v1686_v40 = vld [vmem:[%s12799_s9 + $0xa0] sm:$0xff] }
 0x245   : > { %v2147_v49 = vmax.f32 %v9061_v43, %v2146_v42  ;;  %v9126_v42 = vadd.f32 %v2099_v1, %v9117_v34  ;;  %v9144_v1 = vadd.f32 %v2031_v28, %v1689_v55  ;;  %v1691_v28 = vld [vmem:[%s12799_s9 + $0xc8] sm:$0xff] }
 0x246   : > { %v1711_v55 = vld [vmem:[%s12800_s1 + $0x68] sm:$0xff] }
 0x247   : > { %2205 = vmax.xlane.f32.xlu2 %v2204_v47  ;;  %2148 = vmax.xlane.f32.xlu1 %v2147_v49  ;;  %v2158_v49 = vsel %vm2117_vm1, %v9120_v39, -inf  ;;  %v2213_v57 = vsel %vm2182_vm2, %v9126_v42, -inf  ;;  %v2034_v0 = vpop.f32.mrf.mxu1 }
 0x24a   : > { %v1957_v58 = vpop.f32.mrf.mxu0 }
 0x24b   : > { %v9085_v63 = vadd.f32 %v1957_v58, %v1682_v52  ;;  %v9141_v58 = vadd.f32 %v8930_v26, %v1709_v46 }
 0x24d   : > { %v2151_v5 = vmax.f32 %v9085_v63, %v2150_v61  ;;  %12810 = vst [vmem:[#allocation30_spill] sm:$0xff] %v9141_v58 }
 0x24f   : > { %2208 = vmax.xlane.f32.xlu1 %v2207_v3  ;;  %2152 = vmax.xlane.f32.xlu0 %v2151_v5  ;;  %v2105_v3 = vpop.f32.mrf.mxu2  ;;  %v1688_v5 = vld [vmem:[%s12799_s9 + $0xb0] sm:$0xff]  ;;  %v2037_v46 = vpop.f32.mrf.mxu1 }
 0x252   : > { %v1960_v20 = vpop.f32.mrf.mxu0 }
 0x253   : > { %v9109_v22 = vadd.f32 %v1960_v20, %v1684_v12  ;;  %v9150_v12 = vadd.f32 %v2102_v37, %v9141_v58  ;;  %v1713_v58 = vld [vmem:[%s12800_s1 + $0x78] sm:$0xff] }
 0x255   : > { %v2155_v35 = vmax.f32 %v9109_v22, %v2154_v21  ;;  %v2162_v21 = vsel %vm2117_vm1, %v9144_v1, -inf }
 0x257   : > { %2156 = vmax.xlane.f32.xlu2 %v2155_v35  ;;  %2211 = vmax.xlane.f32.xlu0 %v2210_v30  ;;  %v2216_v30 = vsel %vm2182_vm2, %v9150_v12, -inf  ;;  %v9165_v35 = vadd.f32 %v8930_v26, %v1710_v16  ;;  %v1693_v16 = vld [vmem:[%s12799_s9 + $0xd8] sm:$0xff] }
 0x259   : > { %12811 = vst [vmem:[#allocation31_spill] sm:$0xff] %v9165_v35 }
 0x25a   : > { %v1963_v47 = vpop.f32.mrf.mxu0 }
 0x25b   : > { %v9133_v52 = vadd.f32 %v1963_v47, %v1686_v40  ;;  %v9168_v40 = vadd.f32 %v2034_v0, %v1691_v28  ;;  %v1690_v47 = vld [vmem:[%s12799_s9 + $0xc0] sm:$0xff]  ;;  %v9192_v28 = vadd.f32 %v2037_v46, %v1693_v16  ;;  %v1695_v16 = vld [vmem:[%s12799_s9 + $0xe8] sm:$0xff] }
 0x25d   : > { %v2159_v61 = vmax.f32 %v9133_v52, %v2158_v49  ;;  %v9174_v49 = vadd.f32 %v2105_v3, %v9165_v35  ;;  %v2166_v0 = vsel %vm2117_vm1, %v9168_v40, -inf  ;;  %v9189_v3 = vadd.f32 %v8930_v26, %v1711_v55 }
 0x25f   : > { %2214 = vmax.xlane.f32.xlu2 %v2213_v57  ;;  %2160 = vmax.xlane.f32.xlu1 %v2159_v61  ;;  %v2108_v57 = vpop.f32.mrf.mxu2  ;;  %12812 = vst [vmem:[#allocation32_spill] sm:$0xff] %v9189_v3 }
 0x262   : > { %v1966_v20 = vpop.f32.mrf.mxu0 }
 0x263   : > { %v9157_v24 = vadd.f32 %v1966_v20, %v1688_v5  ;;  %v2219_v20 = vsel %vm2182_vm2, %v9174_v49, -inf }
 0x265   : > { %v2163_v37 = vmax.f32 %v9157_v24, %v2162_v21 }
 0x267   : > { %2217 = vmax.xlane.f32.xlu1 %v2216_v30  ;;  %2164 = vmax.xlane.f32.xlu0 %v2163_v37  ;;  %v1692_v30 = vld [vmem:[%s12799_s9 + $0xd0] sm:$0xff]  ;;  %v9198_v37 = vadd.f32 %v2108_v57, %v9189_v3 }
 0x269   : > { %v2222_v57 = vsel %vm2182_vm2, %v9198_v37, -inf }
 0x26a   : > { %v1969_v61 = vpop.f32.mrf.mxu0 }
 0x26b   : > { %v9181_v5 = vadd.f32 %v1969_v61, %v1690_v47  ;;  %v2040_v47 = vpop.f32.mrf.mxu1  ;;  %v1712_v61 = vld [vmem:[%s12800_s1 + $0x70] sm:$0xff] }
 0x26c   : > { %v9216_v35 = vadd.f32 %v2040_v47, %v1695_v16  ;;  %v1667_v16 = vld [vmem:[%s12799_s9 + $0x8] sm:$0xff] }
 0x26d   : > { %v2167_v21 = vmax.f32 %v9181_v5, %v2166_v0  ;;  %v2170_v0 = vsel %vm2117_vm1, %v9192_v28, -inf }
 0x26f   : > { %2168 = vmax.xlane.f32.xlu2 %v2167_v21  ;;  %2220 = vmax.xlane.f32.xlu0 %v2219_v20  ;;  %v2111_v20 = vpop.f32.mrf.mxu2  ;;  %v9213_v21 = vadd.f32 %v8930_v26, %v1712_v61  ;;  %v2174_v61 = vsel %vm2117_vm1, %v9216_v35, -inf }
 0x271   : > { %12813 = vst [vmem:[#allocation33_spill] sm:$0xff] %v9213_v21 }
 0x272   : > { %v1972_v55 = vpop.f32.mrf.mxu0 }
 0x273   : > { %v9205_v46 = vadd.f32 %v1972_v55, %v1692_v30  ;;  %v1694_v30 = vld [vmem:[%s12799_s9 + $0xe0] sm:$0xff]  ;;  %v9222_v55 = vadd.f32 %v2111_v20, %v9213_v21  ;;  %v2043_v47 = vpop.f32.mrf.mxu1 }
 0x275   : > { %v2171_v3 = vmax.f32 %v9205_v46, %v2170_v0  ;;  %v2225_v20 = vsel %vm2182_vm2, %v9222_v55, -inf }
 0x277   : > { %2223 = vmax.xlane.f32.xlu2 %v2222_v57  ;;  %2172 = vmax.xlane.f32.xlu1 %v2171_v3  ;;  %v1697_v3 = vld [vmem:[%s12799_s9 + $0xf8] sm:$0xff]  ;;  %v9240_v57 = vadd.f32 %v8930_v26, %v1713_v58  ;;  %v2114_v4 = vpop.f32.mrf.mxu2  ;;  %v1696_v58 = vld [vmem:[%s12799_s9 + $0xf0] sm:$0xff] }
 0x279   : > { %12814 = vst [vmem:[#allocation34_spill] sm:$0xff] %v9240_v57  ;;  %v9255_v25 = vadd.f32 %v2114_v4, %v9240_v57  ;;  %v1806_v57 = vld [vmem:[%s9279_s2 + $0x8] sm:$0xff] }
 0x27a   : > { %v1975_v34 = vpop.f32.mrf.mxu0  ;;  %7303 = vmatpush.msra.mxu3 %v1806_v57  ;;  %2581 = vmatpush.msrb.mxu2 %v1806_v57  ;;  %v1797_v57 = vld [vmem:[%s9306_s0 + $0x70] sm:$0xff] }
 0x27b   : > { %v9229_v0 = vadd.f32 %v1975_v34, %v1694_v30  ;;  %v9243_v34 = vadd.f32 %v2043_v47, %v1697_v3  ;;  %v9246_v30 = vadd.f32 %v8900_v6, %v1667_v16  ;;  %v1698_v47 = vld [vmem:[%s12800_s1] sm:$0xff] }
 0x27c   : > { %7304 = vmatpush.msra.mxu3 %v1805_v54  ;;  %2582 = vmatpush.msrb.mxu2 %v1805_v54 }
 0x27d   : > { %v2175_v21 = vmax.f32 %v9229_v0, %v2174_v61  ;;  %v9258_v61 = vadd.f32 %v8912_v14, %v1666_v48  ;;  %v2178_v6 = vsel %vm2117_vm1, %v9243_v34, -inf  ;;  %v2118_v4 = vsel %vm2117_vm1, %v9246_v30, -inf  ;;  %v1699_v14 = vld [vmem:[%s12800_s1 + $0x8] sm:$0xff] }
 0x27e   : > { %v2228_v48 = vsel %vm2182_vm2, %v9255_v25, -inf }
 0x27f   : > { %2226 = vmax.xlane.f32.xlu1 %v2225_v20  ;;  %2176 = vmax.xlane.f32.xlu0 %v2175_v21  ;;  %v1669_v21 = vld [vmem:[%s12799_s9 + $0x18] sm:$0xff]  ;;  %v2119_v56 = vmax.f32 %v9258_v61, %v2118_v4 }
 0x282   : > { %v1978_v3 = vpop.f32.mrf.mxu0 }
 0x283   : > { %v9268_v16 = vadd.f32 %v1978_v3, %v1696_v58  ;;  %v9283_v58 = vadd.f32 %v8930_v26, %v1698_v47  ;;  %v9286_v3 = vadd.f32 %v8905_v8, %v1669_v21  ;;  %v9297_v47 = vadd.f32 %v8914_v17, %v1668_v11 }
 0x285   : > { %v2179_v20 = vmax.f32 %v9268_v16, %v2178_v6  ;;  %12815 = vst [vmem:[#allocation35_spill] sm:$0xff] %v9283_v58  ;;  %v9293_v6 = vadd.f32 %v8930_v26, %v1699_v14  ;;  %v9301_v8 = vadd.f32 %v8902_v7, %v9283_v58  ;;  %v2122_v21 = vsel %vm2117_vm1, %v9286_v3, -inf  ;;  %v1798_v26 = vld [vmem:[%s9306_s0 + $0x78] sm:$0xff]  ;;  %v6852_v58 = vld [vmem:[%s8785_s21 + $0x140] sm:$0xff] }
 0x286   : > { %2680 = vmatpush.msrb.mxu3 %v1798_v26  ;;  %v2123_v17 = vmax.f32 %v9297_v47, %v2122_v21 }
 0x287   : > { %12816 = vst [vmem:[#allocation36_spill] sm:$0xff] %v9293_v6  ;;  %2180 = vmax.xlane.f32.xlu2 %v2179_v20  ;;  %2229 = vmax.xlane.f32.xlu0 %v2228_v48  ;;  %v2183_v7 = vsel %vm2182_vm2, %v9301_v8, -inf  ;;  %v1796_v48 = vld [vmem:[%s9306_s0 + $0x68] sm:$0xff] }
 0x288   : > { %2120 = vmax.xlane.f32.xlu1 %v2119_v56  ;;  %v9311_v56 = vadd.f32 %v8907_v9, %v9293_v6  ;;  %2681 = vmatpush.msrb.mxu3 %v1797_v57 }
 0x28a   : > { %v2186_v54 = vsel %vm2182_vm2, %v9311_v56, -inf  ;;  %2682 = vmatpush.msrb.mxu3 %v1796_v48 }
 0x28f   : > { %2184 = vmax.xlane.f32.xlu2 %v2183_v7  ;;  %2124 = vmax.xlane.f32.xlu0 %v2123_v17  ;;  %v1795_v7 = vld [vmem:[%s9306_s0 + $0x60] sm:$0xff] }
 0x290   : > { %2187 = vmax.xlane.f32.xlu1 %v2186_v54  ;;  %2683 = vmatpush.msrb.mxu3 %v1795_v7 }
 0x292   : > { %v2129_v11 = vpop.xlane.xlu0 %2128 }
 0x29a   : > { %v2133_v4 = vpop.xlane.xlu1 %2132  ;;  %v2191_v14 = vpop.xlane.xlu0 %2190 }
 0x29b   : > { %v9319_v9 = vmax.f32 %v2129_v11, %v2191_v14  ;;  %v1794_v14 = vld [vmem:[%s9306_s0 + $0x58] sm:$0xff] }
 0x29c   : > { %2684 = vmatpush.msrb.mxu3 %v1794_v14 }
 0x29d   : > { %v2409_v20 = vsub.f32 %v8944_v32, %v9319_v9 }
 0x29f   : > { %v2427_v21 = vmul.f32 1.442695, %v2409_v20 }
 0x2a1   : > { %7423 = vpow2.f32 %v2427_v21 }
 0x2a2   : > { %v2137_v26 = vpop.xlane.xlu2 %2136  ;;  %v2194_v17 = vpop.xlane.xlu1 %2193 }
 0x2a3   : > { %v9325_v41 = vmax.f32 %v2133_v4, %v2194_v17 }
 0x2a5   : > { %v2410_v54 = vsub.f32 %v8968_v45, %v9325_v41 }
 0x2a7   : > { %v2429_v57 = vmul.f32 1.442695, %v2410_v54  ;;  %v9329_v11 = vpop.eup %7423 }
 0x2a8   : > { %12817 = vst [vmem:[#allocation37_spill] sm:$0xff] %v9329_v11  ;;  %6798 = vmatmul.msk.f32.vlgmr.msra.gmra.mxu3 %vm2182_vm2, %v9329_v11  ;;  %v1791_v11 = vld [vmem:[%s9306_s0 + $0x40] sm:$0xff] }
 0x2a9   : > { %7425 = vpow2.f32 %v2429_v57  ;;  %v1793_v57 = vld [vmem:[%s9306_s0 + $0x50] sm:$0xff] }
 0x2aa   : > { %v2197_v32 = vpop.xlane.xlu2 %2196  ;;  %v2200_v20 = vpop.xlane.xlu1 %2199  ;;  %2685 = vmatpush.msrb.mxu3 %v1793_v57 }
 0x2ab   : > { %v9334_v48 = vmax.f32 %v2137_v26, %v2197_v32  ;;  %v2141_v4 = vpop.xlane.xlu0 %2140  ;;  %v1792_v32 = vld [vmem:[%s9306_s0 + $0x48] sm:$0xff] }
 0x2ac   : > { %v9338_v45 = vmax.f32 %v2141_v4, %v2200_v20  ;;  %2686 = vmatpush.msrb.mxu3 %v1792_v32 }
 0x2ad   : > { %v2411_v21 = vsub.f32 %v8998_v60, %v9334_v48 }
 0x2ae   : > { %v2412_v26 = vsub.f32 %v9004_v62, %v9338_v45  ;;  %2687 = vmatpush.msrb.mxu3 %v1791_v11 }
 0x2af   : > { %v2431_v17 = vmul.f32 1.442695, %v2411_v21  ;;  %v9340_v7 = vpop.eup %7425 }
 0x2b0   : > { %12818 = vst [vmem:[#allocation38_spill] sm:$0xff] %v9340_v7  ;;  %6799 = vmatmul.msk.f32.gmra.mxu3 %vm2182_vm2, %v9340_v7  ;;  %v2433_v60 = vmul.f32 1.442695, %v2412_v26 }
 0x2b1   : > { %7427 = vpow2.f32 %v2431_v17 }
 0x2b2   : > { %v2145_v54 = vpop.xlane.xlu2 %2144  ;;  %7429 = vpow2.f32 %v2433_v60 }
 0x2b3   : > { %v2203_v14 = vpop.xlane.xlu0 %2202 }
 0x2b4   : > { %v9348_v20 = vmax.f32 %v2145_v54, %v2203_v14 }
 0x2b6   : > { %v2413_v21 = vsub.f32 %v9030_v18, %v9348_v20  ;;  %v1790_v18 = vld [vmem:[%s9306_s0 + $0x38] sm:$0xff] }
 0x2b7   : > { %v9350_v4 = vpop.eup %7427  ;;  %2688 = vmatpush.msrb.mxu3 %v1790_v18 }
 0x2b8   : > { %12819 = vst [vmem:[#allocation39_spill] sm:$0xff] %v9350_v4  ;;  %6800 = vmatmul.msk.f32.gmra.mxu3 %vm2182_vm2, %v9350_v4  ;;  %v2435_v7 = vmul.f32 1.442695, %v2413_v21  ;;  %v9359_v26 = vpop.eup %7429 }
 0x2b9   : > { %12820 = vst [vmem:[#allocation40_spill] sm:$0xff] %v9359_v26 }
 0x2ba   : > { %v2149_v62 = vpop.xlane.xlu1 %2148  ;;  %v2206_v17 = vpop.xlane.xlu2 %2205  ;;  %7431 = vpow2.f32 %v2435_v7 }
 0x2bb   : > { %v9357_v57 = vmax.f32 %v2149_v62, %v2206_v17 }
 0x2bd   : > { %v2414_v54 = vsub.f32 %v9054_v36, %v9357_v57  ;;  %v1789_v36 = vld [vmem:[%s9306_s0 + $0x30] sm:$0xff] }
 0x2be   : > { %2689 = vmatpush.msrb.mxu3 %v1789_v36 }
 0x2bf   : > { %v2437_v60 = vmul.f32 1.442695, %v2414_v54 }
 0x2c0   : > { %6801 = vmatmul.msk.f32.gmra.mxu3 %vm2182_vm2, %v9359_v26  ;;  %v9368_v11 = vpop.eup %7431 }
 0x2c1   : > { %12821 = vst [vmem:[#allocation41_spill] sm:$0xff] %v9368_v11  ;;  %7433 = vpow2.f32 %v2437_v60 }
 0x2c2   : > { %v2153_v32 = vpop.xlane.xlu0 %2152  ;;  %v2209_v14 = vpop.xlane.xlu1 %2208 }
 0x2c3   : > { %v9366_v4 = vmax.f32 %v2153_v32, %v2209_v14 }
 0x2c5   : > { %v2415_v7 = vsub.f32 %v9078_v53, %v9366_v4  ;;  %v1788_v53 = vld [vmem:[%s9306_s0 + $0x28] sm:$0xff] }
 0x2c6   : > { %2690 = vmatpush.msrb.mxu3 %v1788_v53  ;;  %v1786_v53 = vld [vmem:[%s9306_s0 + $0x18] sm:$0xff] }
 0x2c7   : > { %v2439_v17 = vmul.f32 1.442695, %v2415_v7  ;;  %v9377_v54 = vpop.eup %7433 }
 0x2c8   : > { %6802 = vmatmul.msk.f32.gmra.mxu3 %vm2182_vm2, %v9368_v11  ;;  %12822 = vst [vmem:[#allocation42_spill] sm:$0xff] %v9377_v54 }
 0x2c9   : > { %7435 = vpow2.f32 %v2439_v17 }
 0x2ca   : > { %v2157_v21 = vpop.xlane.xlu2 %2156  ;;  %v2212_v62 = vpop.xlane.xlu0 %2211 }
 0x2cb   : > { %v9375_v26 = vmax.f32 %v2157_v21, %v2212_v62 }
 0x2cd   : > { %v2416_v32 = vsub.f32 %v9102_v15, %v9375_v26  ;;  %v1787_v15 = vld [vmem:[%s9306_s0 + $0x20] sm:$0xff] }
 0x2ce   : > { %2691 = vmatpush.msrb.mxu3 %v1787_v15 }
 0x2cf   : > { %v2441_v60 = vmul.f32 1.442695, %v2416_v32  ;;  %v9386_v7 = vpop.eup %7435 }
 0x2d0   : > { %6803 = vmatmul.msk.f32.gmra.mxu3 %vm2182_vm2, %v9377_v54  ;;  %12823 = vst [vmem:[#allocation43_spill] sm:$0xff] %v9386_v7 }
 0x2d1   : > { %7437 = vpow2.f32 %v2441_v60  ;;  %2692 = vmatpush.msrb.mxu3 %v1786_v53  ;;  %v1785_v53 = vld [vmem:[%s9306_s0 + $0x10] sm:$0xff] }
 0x2d2   : > { %v2161_v14 = vpop.xlane.xlu1 %2160  ;;  %v2215_v18 = vpop.xlane.xlu2 %2214 }
 0x2d3   : > { %v9384_v11 = vmax.f32 %v2161_v14, %v2215_v18  ;;  %2693 = vmatpush.msrb.mxu3 %v1785_v53 }
 0x2d5   : > { %v2417_v21 = vsub.f32 %v9126_v42, %v9384_v11 }
 0x2d7   : > { %v2443_v17 = vmul.f32 1.442695, %v2417_v21  ;;  %v9395_v32 = vpop.eup %7437 }
 0x2d8   : > { %6804 = vmatmul.msk.f32.gmra.mxu3 %vm2182_vm2, %v9386_v7  ;;  %12824 = vst [vmem:[#allocation44_spill] sm:$0xff] %v9395_v32 }
 0x2d9   : > { %7439 = vpow2.f32 %v2443_v17  ;;  %v6859_v17 = vld [vmem:[%s8785_s21 + $0x178] sm:$0xff] }
 0x2da   : > { %v2165_v62 = vpop.xlane.xlu0 %2164  ;;  %v2218_v36 = vpop.xlane.xlu1 %2217  ;;  %6888 = vmatpush.xpose.msk.msrb.mxu1 %vm1807_vm0, %v6859_v17 }
 0x2db   : > { %v9393_v54 = vmax.f32 %v2165_v62, %v2218_v36 }
 0x2dd   : > { %v2418_v14 = vsub.f32 %v9150_v12, %v9393_v54 }
 0x2df   : > { %v2445_v60 = vmul.f32 1.442695, %v2418_v14  ;;  %v9404_v62 = vpop.eup %7439  ;;  %v1784_v14 = vld [vmem:[%s9306_s0 + $0x8] sm:$0xff] }
 0x2e0   : > { %6805 = vmatmul.msk.f32.gmra.mxu3 %vm2182_vm2, %v9395_v32  ;;  %12825 = vst [vmem:[#allocation45_spill] sm:$0xff] %v9404_v62 }
 0x2e1   : > { %7441 = vpow2.f32 %v2445_v60  ;;  %2694 = vmatpush.msrb.mxu3 %v1784_v14 }
 0x2e2   : > { %v2169_v42 = vpop.xlane.xlu2 %2168  ;;  %v2221_v18 = vpop.xlane.xlu0 %2220 }
 0x2e3   : > { %v9402_v21 = vmax.f32 %v2169_v42, %v2221_v18  ;;  %v6858_v42 = vld [vmem:[%s8785_s21 + $0x170] sm:$0xff] }
 0x2e4   : > { %6889 = vmatpush.xpose.msk.msrb.mxu1 %vm1807_vm0, %v6858_v42 }
 0x2e5   : > { %v2419_v36 = vsub.f32 %v9174_v49, %v9402_v21 }
 0x2e7   : > { %v2447_v18 = vmul.f32 1.442695, %v2419_v36  ;;  %v9417_v7 = vpop.eup %7441  ;;  %v6857_v36 = vld [vmem:[%s8785_s21 + $0x168] sm:$0xff] }
 0x2e8   : > { %6806 = vmatmul.msk.f32.gmra.mxu3 %vm2182_vm2, %v9404_v62  ;;  %12826 = vst [vmem:[#allocation46_spill] sm:$0xff] %v9417_v7  ;;  %6890 = vmatpush.xpose.msk.msrb.mxu1 %vm1807_vm0, %v6857_v36  ;;  %v1799_v62 = vld [vmem:[%s9306_s0 + $0x80] sm:$0xff] }
 0x2e9   : > { %7443 = vpow2.f32 %v2447_v18 }
 0x2ea   : > { %v2173_v15 = vpop.xlane.xlu1 %2172  ;;  %v2224_v12 = vpop.xlane.xlu2 %2223 }
 0x2eb   : > { %v9415_v32 = vmax.f32 %v2173_v15, %v2224_v12  ;;  %v1783_v15 = vld [vmem:[%s9306_s0] sm:$0xff] }
 0x2ec   : > { %2695 = vmatpush.msrb.mxu3 %v1783_v15  ;;  %v6856_v12 = vld [vmem:[%s8785_s21 + $0x160] sm:$0xff]  ;;  %v6855_v15 = vld [vmem:[%s8785_s21 + $0x158] sm:$0xff] }
 0x2ed   : > { %v2420_v49 = vsub.f32 %v9198_v37, %v9415_v32  ;;  %6891 = vmatpush.xpose.msk.msrb.mxu1 %vm1807_vm0, %v6856_v12 }
 0x2ef   : > { %v2449_v53 = vmul.f32 1.442695, %v2420_v49  ;;  %v9430_v42 = vpop.eup %7443  ;;  %v6863_v49 = vld [vmem:[%s8785_s21 + $0x198] sm:$0xff] }
 0x2f0   : > { %6807 = vmatmul.msk.f32.gmra.mxu3 %vm2182_vm2, %v9417_v7  ;;  %12827 = vst [vmem:[#allocation47_spill] sm:$0xff] %v9430_v42  ;;  %v1801_v7 = vld [vmem:[%s9306_s0 + $0x90] sm:$0xff]  ;;  %6920 = vmatpush.xpose.msk.msrb.mxu0 %vm1807_vm0, %v6863_v49 }
 0x2f1   : > { %7445 = vpow2.f32 %v2449_v53  ;;  %7305 = vmatpush.xpose.msk.msra.mxu3 %vm1807_vm0, %v6863_v49  ;;  %6892 = vmatpush.xpose.msk.msrb.mxu1 %vm1807_vm0, %v6855_v15  ;;  %v1800_v53 = vld [vmem:[%s9306_s0 + $0x88] sm:$0xff] }
 0x2f2   : > { %v2227_v60 = vpop.xlane.xlu1 %2226  ;;  %v2177_v17 = vpop.xlane.xlu0 %2176 }
 0x2f3   : > { %v9428_v14 = vmax.f32 %v2177_v17, %v2227_v60  ;;  %v1802_v60 = vld [vmem:[%s9306_s0 + $0x98] sm:$0xff] }
 0x2f4   : > { %2757 = vmatpush.msra.mxu2 %v1802_v60 }
 0x2f5   : > { %v2421_v37 = vsub.f32 %v9222_v55, %v9428_v14  ;;  %v6854_v55 = vld [vmem:[%s8785_s21 + $0x150] sm:$0xff] }
 0x2f6   : > { %2758 = vmatpush.msra.mxu2 %v1801_v7  ;;  %6893 = vmatpush.xpose.msk.msrb.mxu1 %vm1807_vm0, %v6854_v55  ;;  %v6853_v7 = vld [vmem:[%s8785_s21 + $0x148] sm:$0xff] }
 0x2f7   : > { %v9449_v29 = vpop.eup %7445 }
 0x2f8   : > { %6808 = vmatmul.msk.f32.gmra.mxu3 %vm2182_vm2, %v9430_v42  ;;  %v2451_v42 = vmul.f32 1.442695, %v2421_v37  ;;  %2759 = vmatpush.msra.mxu2 %v1800_v53  ;;  %12828 = vst [vmem:[#allocation48_spill] sm:$0xff] %v9449_v29 }
 0x2fa   : > { %v2181_v18 = vpop.xlane.xlu2 %2180  ;;  %v2230_v36 = vpop.xlane.xlu0 %2229  ;;  %2760 = vmatpush.msra.mxu2 %v1799_v62  ;;  %7447 = vpow2.f32 %v2451_v42  ;;  %6894 = vmatpush.xpose.msk.msrb.mxu1 %vm1807_vm0, %v6853_v7 }
 0x2fb   : > { %v2121_v17 = vpop.xlane.xlu1 %2120  ;;  %v9442_v12 = vmax.f32 %v2181_v18, %v2230_v36 }
 0x2fd   : > { %v2422_v6 = vsub.f32 %v9255_v25, %v9442_v12 }
 0x2fe   : > { %6895 = vmatpush.xpose.msk.msrb.mxu1 %vm1807_vm0, %v6852_v58 }
 0x2ff   : > { %v2453_v49 = vmul.f32 1.442695, %v2422_v6 }
 0x300   : > { %6809 = vmatmul.msk.f32.gmra.mxu3 %vm2182_vm2, %v9449_v29  ;;  %v9464_v6 = vpop.eup %7447 }
 0x301   : > { %12829 = vst [vmem:[#allocation49_spill] sm:$0xff] %v9464_v6  ;;  %7449 = vpow2.f32 %v2453_v49  ;;  %v6849_v49 = vld [vmem:[%s8785_s21 + $0x128] sm:$0xff] }
 0x302   : > { %v2185_v18 = vpop.xlane.xlu2 %2184  ;;  %v2125_v36 = vpop.xlane.xlu0 %2124 }
 0x303   : > { %v2231_v15 = vmax.f32 %v2121_v17, %v2185_v18  ;;  %v2188_v37 = vpop.xlane.xlu1 %2187 }
 0x304   : > { %v2232_v60 = vmax.f32 %v2125_v36, %v2188_v37 }
 0x305   : > { %v2247_v53 = vsub.f32 %v9258_v61, %v2231_v15  ;;  %v2248_v25 = vsub.f32 %v9246_v30, %v2231_v15  ;;  %v2407_v55 = vsub.f32 %v9301_v8, %v2231_v15  ;;  %v6851_v61 = vld [vmem:[%s8785_s21 + $0x138] sm:$0xff] }
 0x306   : > { %v2249_v62 = vsub.f32 %v9297_v47, %v2232_v60  ;;  %v2250_v42 = vsub.f32 %v9286_v3, %v2232_v60  ;;  %v2408_v3 = vsub.f32 %v9311_v56, %v2232_v60  ;;  %6896 = vmatpush.xpose.msk.msrb.mxu1 %vm1807_vm0, %v6851_v61  ;;  %v6850_v47 = vld [vmem:[%s8785_s21 + $0x130] sm:$0xff] }
 0x307   : > { %v2279_v29 = vmul.f32 1.442695, %v2247_v53  ;;  %v2281_v17 = vmul.f32 1.442695, %v2248_v25  ;;  %v2423_v18 = vmul.f32 1.442695, %v2407_v55  ;;  %v9473_v8 = vpop.eup %7449 }
 0x308   : > { %v2285_v36 = vmul.f32 1.442695, %v2250_v42  ;;  %6810 = vmatmul.msk.f32.gmra.mxu3 %vm2182_vm2, %v9464_v6  ;;  %v2283_v30 = vmul.f32 1.442695, %v2249_v62  ;;  %12830 = vst [vmem:[#allocation50_spill] sm:$0xff] %v9473_v8  ;;  %v6848_v55 = vld [vmem:[%s8785_s21 + $0x120] sm:$0xff] }
 0x309   : > { %7451 = vpow2.f32 %v2279_v29  ;;  %v2425_v29 = vmul.f32 1.442695, %v2408_v3  ;;  %v6845_v3 = vld [vmem:[%s8785_s21 + $0x108] sm:$0xff] }
 0x30a   : > { %7453 = vpow2.f32 %v2281_v17  ;;  %6897 = vmatpush.xpose.msk.msrb.mxu1 %vm1807_vm0, %v6850_v47  ;;  %v2251_v17 = vsub.f32 %v8932_v27, %v9319_v9  ;;  %v2253_v27 = vsub.f32 %v8954_v38, %v9325_v41  ;;  %v2252_v47 = vsub.f32 %v8920_v19, %v9319_v9 }
 0x30b   : > { %7455 = vpow2.f32 %v2423_v18  ;;  %v6847_v18 = vld [vmem:[%s8785_s21 + $0x118] sm:$0xff]  ;;  %v2255_v38 = vsub.f32 %v8981_v51, %v9334_v48  ;;  %v2254_v19 = vsub.f32 %v8941_v31, %v9325_v41  ;;  %v2257_v31 = vsub.f32 %v9011_v2, %v9338_v45 }
 0x30c   : > { %7457 = vpow2.f32 %v2285_v36  ;;  %v6862_v36 = vld [vmem:[%s8785_s21 + $0x190] sm:$0xff]  ;;  %v2287_v61 = vmul.f32 1.442695, %v2251_v17  ;;  %v2256_v41 = vsub.f32 %v8965_v44, %v9334_v48  ;;  %v2259_v44 = vsub.f32 %v9037_v23, %v9348_v20  ;;  %v6861_v48 = vld [vmem:[%s8785_s21 + $0x188] sm:$0xff] }
 0x30d   : > { %7459 = vpow2.f32 %v2283_v30  ;;  %7306 = vmatpush.xpose.msk.msra.mxu3 %vm1807_vm0, %v6862_v36  ;;  %6921 = vmatpush.xpose.msk.msrb.mxu0 %vm1807_vm0, %v6862_v36  ;;  %v6846_v30 = vld [vmem:[%s8785_s21 + $0x110] sm:$0xff]  ;;  %v2293_v17 = vmul.f32 1.442695, %v2254_v19 }
 0x30e   : > { %7461 = vpow2.f32 %v2425_v29  ;;  %6898 = vmatpush.xpose.msk.msrb.mxu1 %vm1807_vm0, %v6849_v49  ;;  %v6844_v29 = vld [vmem:[%s8785_s21 + $0x100] sm:$0xff]  ;;  %v2289_v49 = vmul.f32 1.442695, %v2252_v47  ;;  %v2303_v23 = vmul.f32 1.442695, %v2259_v44  ;;  %v6833_v44 = vld [vmem:[%s8817_s16 + $0x128] sm:$0xff] }
 0x30f   : > { %v7452_v58 = vpop.eup %7451  ;;  %7463 = vpow2.f32 %v2287_v61  ;;  %v2299_v61 = vmul.f32 1.442695, %v2257_v31 }
 0x310   : > { %v7454_v7 = vpop.eup %7453  ;;  %6811 = vmatmul.msk.f32.gmra.mxu3 %vm2182_vm2, %v9473_v8  ;;  %v12869_v8 = vld [vmem:[#allocation22_spill] sm:$0xff] }
 0x311   : > { %v9476_v15 = vpop.eup %7455  ;;  %v2343_v56 = vsel %vm2117_vm1, %v7454_v7, 0.0  ;;  %7307 = vmatpush.xpose.msk.msra.mxu3 %vm1807_vm0, %v6861_v48  ;;  %6922 = vmatpush.xpose.msk.msrb.mxu0 %vm1807_vm0, %v6861_v48 }
 0x312   : > { %12831 = vst [vmem:[#allocation51_spill] sm:$0xff] %v9476_v15  ;;  %v7458_v37 = vpop.eup %7457  ;;  %6796 = vmatmul.msk.f32.vlgmr.msrb.gmra.mxu2 %vm2182_vm2, %v9476_v15  ;;  %v9484_v60 = vadd.f32 %v7452_v58, %v2343_v56  ;;  %6899 = vmatpush.xpose.msk.msrb.mxu1 %vm1807_vm0, %v6848_v55  ;;  %v2291_v56 = vmul.f32 1.442695, %v2253_v27  ;;  %v2295_v55 = vmul.f32 1.442695, %v2255_v38 }
 0x313   : > { %v2347_v53 = vsel %vm2117_vm1, %v7458_v37, 0.0  ;;  %v7460_v25 = vpop.eup %7459  ;;  %v2297_v27 = vmul.f32 1.442695, %v2256_v41 }
 0x314   : > { %v9489_v62 = vadd.f32 %v7460_v25, %v2347_v53  ;;  %v9492_v42 = vpop.eup %7461  ;;  %7465 = vpow2.f32 %v2291_v56  ;;  %v6831_v56 = vld [vmem:[%s8817_s16 + $0x118] sm:$0xff] }
 0x315   : > { %12832 = vst [vmem:[#allocation52_spill] sm:$0xff] %v9492_v42  ;;  %7467 = vpow2.f32 %v2289_v49  ;;  %v9569_v38 = vmul.f32 0.125, %v6831_v56  ;;  %v9605_v56 = vmul.f32 0.125, %v6833_v44  ;;  %v6835_v44 = vld [vmem:[%s8817_s16 + $0x138] sm:$0xff] }
 0x316   : > { %6900 = vmatpush.xpose.msk.msrb.mxu1 %vm1807_vm0, %v6847_v18  ;;  %7469 = vpow2.f32 %v2295_v55 }
 0x317   : > { %7471 = vpow2.f32 %v2293_v17  ;;  %v6832_v17 = vld [vmem:[%s8817_s16 + $0x120] sm:$0xff] }
 0x318   : > { %2696 = vmatmul.f32.vlgmr.msrb.gmra.mxu3 %v7452_v58  ;;  %v6828_v58 = vld [vmem:[%s8817_s16 + $0x100] sm:$0xff]  ;;  %7473 = vpow2.f32 %v2299_v61 }
 0x319   : > { %v9514_v53 = vmul.f32 0.125, %v6828_v58  ;;  %7475 = vpow2.f32 %v2297_v27  ;;  %v2258_v58 = vsub.f32 %v8995_v59, %v9338_v45  ;;  %v2261_v59 = vsub.f32 %v9061_v43, %v9357_v57 }
 0x31a   : > { %6797 = vmatmul.msk.f32.gmra.mxu2 %vm2182_vm2, %v9492_v42  ;;  %6901 = vmatpush.xpose.msk.msrb.mxu1 %vm1807_vm0, %v6846_v30  ;;  %v6830_v30 = vld [vmem:[%s8817_s16 + $0x110] sm:$0xff]  ;;  %7477 = vpow2.f32 %v2303_v23  ;;  %v2260_v45 = vsub.f32 %v9024_v13, %v9348_v20  ;;  %v2263_v13 = vsub.f32 %v9085_v63, %v9366_v4  ;;  %v2262_v20 = vsub.f32 %v9048_v33, %v9357_v57 }
 0x31b   : > { %v2301_v49 = vmul.f32 1.442695, %v2258_v58  ;;  %v2307_v31 = vmul.f32 1.442695, %v2261_v59  ;;  %v2265_v33 = vsub.f32 %v9109_v22, %v9375_v26  ;;  %v2264_v57 = vsub.f32 %v9072_v50, %v9366_v4  ;;  %v6834_v59 = vld [vmem:[%s8817_s16 + $0x130] sm:$0xff]  ;;  %v6860_v4 = vld [vmem:[%s8785_s21 + $0x180] sm:$0xff] }
 0x31c   : > { %v2305_v41 = vmul.f32 1.442695, %v2260_v45  ;;  %v2311_v48 = vmul.f32 1.442695, %v2263_v13  ;;  %v2309_v58 = vmul.f32 1.442695, %v2262_v20  ;;  %v2267_v50 = vsub.f32 %v9133_v52, %v9384_v11  ;;  %7308 = vmatpush.xpose.msk.msra.mxu3 %vm1807_vm0, %v6860_v4  ;;  %6923 = vmatpush.xpose.msk.msrb.mxu0 %vm1807_vm0, %v6860_v4 }
 0x31d   : > { %7479 = vpow2.f32 %v2301_v49  ;;  %v2315_v45 = vmul.f32 1.442695, %v2265_v33  ;;  %v2266_v13 = vsub.f32 %v9096_v10, %v9375_v26  ;;  %v2269_v26 = vsub.f32 %v9157_v24, %v9393_v54  ;;  %v12871_v42 = vld [vmem:[#allocation23_spill] sm:$0xff] }
 0x31e   : > { %6902 = vmatpush.xpose.msk.msrb.mxu1 %vm1807_vm0, %v6845_v3  ;;  %v9548_v3 = vmul.f32 0.125, %v6830_v30  ;;  %v9587_v30 = vmul.f32 0.125, %v6832_v17  ;;  %7481 = vpow2.f32 %v2307_v31  ;;  %v2313_v17 = vmul.f32 1.442695, %v2264_v57 }
 0x31f   : > { %7483 = vpow2.f32 %v2305_v41  ;;  %v9623_v31 = vmul.f32 0.125, %v6834_v59  ;;  %v2319_v52 = vmul.f32 1.442695, %v2267_v50  ;;  %6924 = vmatmul.msk.f32.vlgmr.msrb.gmra.mxu0 %vm1807_vm0, %v9514_v53  ;;  %v2268_v57 = vsub.f32 %v9120_v39, %v9384_v11 }
 0x320   : > { %2699 = vmatmul.f32.gmra.mxu3 %v7460_v25  ;;  %v9516_v25 = vpop.eup %7463  ;;  %7485 = vpow2.f32 %v2311_v48  ;;  %v2317_v48 = vmul.f32 1.442695, %v2266_v13  ;;  %v2271_v39 = vsub.f32 %v9181_v5, %v9402_v21  ;;  %v2270_v11 = vsub.f32 %v9144_v1, %v9393_v54 }
 0x321   : > { %v9532_v36 = vpop.eup %7465  ;;  %7487 = vpow2.f32 %v2309_v58  ;;  %v9644_v58 = vmul.f32 0.125, %v6835_v44  ;;  %v2321_v50 = vmul.f32 1.442695, %v2268_v57  ;;  %v2273_v1 = vsub.f32 %v9205_v46, %v9415_v32 }
 0x322   : > { %6812 = vmatmul.msk.f32.vlgmr.msra.gmra.mxu2 %vm2117_vm1, %v7454_v7  ;;  %6903 = vmatpush.xpose.msk.msrb.mxu1 %vm1807_vm0, %v6844_v29  ;;  %v6829_v7 = vld [vmem:[%s8817_s16 + $0x108] sm:$0xff]  ;;  %v9534_v51 = vpop.eup %7467  ;;  %7489 = vpow2.f32 %v2315_v45  ;;  %v6836_v45 = vld [vmem:[%s8817_s16 + $0x140] sm:$0xff]  ;;  %v2272_v54 = vsub.f32 %v9168_v40, %v9402_v21  ;;  %v2275_v40 = vsub.f32 %v9229_v0, %v9428_v14  ;;  %v6885_v21 = vld [vmem:[%s8804_s13 + $0x18] sm:$0xff] }
 0x323   : > { %v9530_v18 = vmul.f32 0.125, %v6829_v7  ;;  %v9550_v2 = vpop.eup %7469  ;;  %7491 = vpow2.f32 %v2313_v17  ;;  %v2323_v17 = vmul.f32 1.442695, %v2269_v26  ;;  %v9664_v4 = vmul.f32 0.125, %v6836_v45  ;;  %6940 = vmatpush.xpose.msk.msrb.mxu3 %vm1807_vm0, %v6885_v21 }
 0x324   : > { %v9552_v47 = vpop.eup %7471  ;;  %7493 = vpow2.f32 %v2319_v52  ;;  %v6837_v52 = vld [vmem:[%s8817_s16 + $0x148] sm:$0xff]  ;;  %v2325_v26 = vmul.f32 1.442695, %v2270_v11  ;;  %v2329_v11 = vmul.f32 1.442695, %v2272_v54 }
 0x325   : > { %6904 = vmatmul.msk.f32.vlgmr.msrb.gmra.mxu1 %vm1807_vm0, %v9514_v53  ;;  %v9571_v19 = vpop.eup %7473  ;;  %7495 = vpow2.f32 %v2317_v48  ;;  %v2327_v48 = vmul.f32 1.442695, %v2271_v39  ;;  %v9684_v57 = vmul.f32 0.125, %v6837_v52  ;;  %v2331_v39 = vmul.f32 1.442695, %v2273_v1 }
 0x326   : > { %v9573_v7 = vpop.eup %7475  ;;  %7497 = vpow2.f32 %v2323_v17  ;;  %v2335_v54 = vmul.f32 1.442695, %v2275_v40  ;;  %v2276_v40 = vsub.f32 %v9216_v35, %v9428_v14  ;;  %v2278_v14 = vsub.f32 %v9243_v34, %v9442_v12 }
 0x327   : > { %v9589_v43 = vpop.eup %7477  ;;  %6925 = vmatmul.msk.f32.gmra.mxu0 %vm1807_vm0, %v9530_v18  ;;  %7499 = vpow2.f32 %v2321_v50  ;;  %v6838_v50 = vld [vmem:[%s8817_s16 + $0x150] sm:$0xff] }
 0x328   : > { %2702 = vmatmul.f32.gmra.mxu3 %v9516_v25  ;;  %v9591_v61 = vpop.eup %7479  ;;  %7501 = vpow2.f32 %v2327_v48  ;;  %v9704_v52 = vmul.f32 0.125, %v6838_v50  ;;  %v6839_v50 = vld [vmem:[%s8817_s16 + $0x158] sm:$0xff] }
 0x329   : > { %v9607_v63 = vpop.eup %7481  ;;  %7503 = vpow2.f32 %v2325_v26  ;;  %v2274_v26 = vsub.f32 %v9192_v28, %v9415_v32  ;;  %v9733_v28 = vmul.f32 0.125, %v6839_v50  ;;  %v2277_v32 = vsub.f32 %v9268_v16, %v9442_v12  ;;  %v6840_v50 = vld [vmem:[%s8817_s16 + $0x160] sm:$0xff] }
 0x32a   : > { %6813 = vmatmul.msk.f32.gmra.mxu2 %vm2117_vm1, %v7458_v37  ;;  %v9609_v23 = vpop.eup %7483  ;;  %7505 = vpow2.f32 %v2331_v39  ;;  %v9753_v35 = vmul.f32 0.125, %v6840_v50 }
 0x32b   : > { %v9527_v9 = vpop.f32.mrf.mxu3  ;;  %v9625_v22 = vpop.eup %7485  ;;  %7507 = vpow2.f32 %v2329_v11  ;;  %v2333_v39 = vmul.f32 1.442695, %v2274_v26  ;;  %v2339_v26 = vmul.f32 1.442695, %v2277_v32  ;;  %v6841_v32 = vld [vmem:[%s8817_s16 + $0x168] sm:$0xff] }
 0x32c   : > { %12833 = vst [vmem:[#allocation53_spill] sm:$0xff] %v9527_v9  ;;  %v9627_v41 = vpop.eup %7487  ;;  %7509 = vpow2.f32 %v2335_v54  ;;  %v2337_v54 = vmul.f32 1.442695, %v2276_v40  ;;  %v6884_v40 = vld [vmem:[%s8804_s13 + $0x10] sm:$0xff]  ;;  %v9773_v34 = vmul.f32 0.125, %v6841_v32  ;;  %s13323_s13 = sld [smem:[#allocation175_spill]] }
 0x32d   : > { %6905 = vmatmul.msk.f32.gmra.mxu1 %vm1807_vm0, %v9530_v18  ;;  %v9648_v33 = vpop.eup %7489  ;;  %7511 = vpow2.f32 %v2333_v39  ;;  %6941 = vmatpush.xpose.msk.msrb.mxu3 %vm1807_vm0, %v6884_v40  ;;  %v6843_v40 = vld [vmem:[%s8817_s16 + $0x178] sm:$0xff] }
 0x32e   : > { %v9650_v10 = vpop.eup %7491  ;;  %7513 = vpow2.f32 %v2339_v26 }
 0x32f   : > { %v9668_v24 = vpop.eup %7493  ;;  %6926 = vmatmul.msk.f32.gmra.mxu0 %vm1807_vm0, %v9548_v3  ;;  %7515 = vpow2.f32 %v2337_v54  ;;  %v6842_v54 = vld [vmem:[%s8817_s16 + $0x170] sm:$0xff] }
 0x330   : > { %2705 = vmatmul.f32.gmra.mxu3 %v9532_v36  ;;  %v9670_v13 = vpop.eup %7495  ;;  %v9788_v32 = vmul.f32 0.125, %v6842_v54 }
 0x331   : > { %v9688_v5 = vpop.eup %7497 }
 0x332   : > { %6814 = vmatmul.msk.f32.gmra.mxu2 %vm2117_vm1, %v9534_v51  ;;  %v9690_v45 = vpop.eup %7499  ;;  %s13324_s12 = smov %s13323_s13 }
 0x333   : > { %v9545_v37 = vpop.f32.mrf.mxu3  ;;  %v9708_v46 = vpop.eup %7501 }
 0x334   : > { %12834 = vst [vmem:[#allocation54_spill] sm:$0xff] %v9545_v37  ;;  %v9710_v48 = vpop.eup %7503  ;;  %v12868_v37 = vld [vmem:[#allocation21_spill] sm:$0xff] }
 0x335   : > { %6906 = vmatmul.msk.f32.gmra.mxu1 %vm1807_vm0, %v9548_v3  ;;  %v9728_v0 = vpop.eup %7505 }
 0x336   : > { %v9730_v11 = vpop.eup %7507 }
 0x337   : > { %6927 = vmatmul.msk.f32.gmra.mxu0 %vm1807_vm0, %v9569_v38  ;;  %v9748_v16 = vpop.eup %7509 }
 0x338   : > { %2708 = vmatmul.f32.gmra.mxu3 %v9550_v2  ;;  %12845 = vst [vmem:[#allocation65_spill] sm:$0xff] %v9748_v16 }
 0x33a   : > { %6815 = vmatmul.msk.f32.gmra.mxu2 %vm2117_vm1, %v9552_v47 }
 0x33b   : > { %v9565_v29 = vpop.f32.mrf.mxu3 }
 0x33c   : > { %12835 = vst [vmem:[#allocation55_spill] sm:$0xff] %v9565_v29 }
 0x33d   : > { %6907 = vmatmul.msk.f32.gmra.mxu1 %vm1807_vm0, %v9569_v38 }
 0x33f   : > { %6928 = vmatmul.msk.f32.gmra.mxu0 %vm1807_vm0, %v9587_v30 }
 0x340   : > { %2711 = vmatmul.f32.gmra.mxu3 %v9571_v19 }
 0x342   : > { %6816 = vmatmul.msk.f32.gmra.mxu2 %vm2117_vm1, %v9573_v7 }
 0x343   : > { %v9584_v55 = vpop.f32.mrf.mxu3 }
 0x344   : > { %12836 = vst [vmem:[#allocation56_spill] sm:$0xff] %v9584_v55 }
 0x345   : > { %6908 = vmatmul.msk.f32.gmra.mxu1 %vm1807_vm0, %v9587_v30 }
 0x347   : > { %6929 = vmatmul.msk.f32.gmra.mxu0 %vm1807_vm0, %v9605_v56 }
 0x348   : > { %2714 = vmatmul.f32.gmra.mxu3 %v9589_v43 }
 0x34a   : > { %6817 = vmatmul.msk.f32.gmra.mxu2 %vm2117_vm1, %v9591_v61 }
 0x34b   : > { %v9602_v27 = vpop.f32.mrf.mxu3 }
 0x34c   : > { %12837 = vst [vmem:[#allocation57_spill] sm:$0xff] %v9602_v27  ;;  %v7941_v27 = vld [vmem:[%s12799_s9 + $0x38] sm:$0xff] }
 0x34d   : > { %6909 = vmatmul.msk.f32.gmra.mxu1 %vm1807_vm0, %v9605_v56 }
 0x34f   : > { %6930 = vmatmul.msk.f32.gmra.mxu0 %vm1807_vm0, %v9623_v31 }
 0x350   : > { %2717 = vmatmul.f32.gmra.mxu3 %v9607_v63 }
 0x352   : > { %6818 = vmatmul.msk.f32.gmra.mxu2 %vm2117_vm1, %v9609_v23 }
 0x353   : > { %v9620_v49 = vpop.f32.mrf.mxu3 }
 0x354   : > { %12838 = vst [vmem:[#allocation58_spill] sm:$0xff] %v9620_v49 }
 0x355   : > { %6910 = vmatmul.msk.f32.gmra.mxu1 %vm1807_vm0, %v9623_v31 }
 0x357   : > { %6931 = vmatmul.msk.f32.gmra.mxu0 %vm1807_vm0, %v9644_v58 }
 0x358   : > { %2720 = vmatmul.f32.gmra.mxu3 %v9625_v22 }
 0x35a   : > { %6819 = vmatmul.msk.f32.gmra.mxu2 %vm2117_vm1, %v9627_v41 }
 0x35b   : > { %v9640_v20 = vpop.f32.mrf.mxu3 }
 0x35c   : > { %12839 = vst [vmem:[#allocation59_spill] sm:$0xff] %v9640_v20 }
 0x35d   : > { %6911 = vmatmul.msk.f32.gmra.mxu1 %vm1807_vm0, %v9644_v58 }
 0x35f   : > { %6932 = vmatmul.msk.f32.gmra.mxu0 %vm1807_vm0, %v9664_v4 }
 0x360   : > { %2723 = vmatmul.f32.gmra.mxu3 %v9648_v33 }
 0x362   : > { %6820 = vmatmul.msk.f32.gmra.mxu2 %vm2117_vm1, %v9650_v10 }
 0x363   : > { %v9661_v59 = vpop.f32.mrf.mxu3 }
 0x364   : > { %12840 = vst [vmem:[#allocation60_spill] sm:$0xff] %v9661_v59 }
 0x365   : > { %6912 = vmatmul.msk.f32.gmra.mxu1 %vm1807_vm0, %v9664_v4 }
 0x367   : > { %6933 = vmatmul.msk.f32.gmra.mxu0 %vm1807_vm0, %v9684_v57 }
 0x368   : > { %2726 = vmatmul.f32.gmra.mxu3 %v9668_v24 }
 0x36a   : > { %6821 = vmatmul.msk.f32.gmra.mxu2 %vm2117_vm1, %v9670_v13 }
 0x36b   : > { %v9681_v44 = vpop.f32.mrf.mxu3 }
 0x36c   : > { %12841 = vst [vmem:[#allocation61_spill] sm:$0xff] %v9681_v44 }
 0x36d   : > { %6913 = vmatmul.msk.f32.gmra.mxu1 %vm1807_vm0, %v9684_v57 }
 0x36f   : > { %6934 = vmatmul.msk.f32.gmra.mxu0 %vm1807_vm0, %v9704_v52 }
 0x370   : > { %2729 = vmatmul.f32.gmra.mxu3 %v9688_v5 }
 0x372   : > { %6822 = vmatmul.msk.f32.gmra.mxu2 %vm2117_vm1, %v9690_v45 }
 0x373   : > { %v9701_v17 = vpop.f32.mrf.mxu3 }
 0x374   : > { %12842 = vst [vmem:[#allocation62_spill] sm:$0xff] %v9701_v17  ;;  %v9750_v17 = vpop.eup %7511 }
 0x375   : > { %6914 = vmatmul.msk.f32.gmra.mxu1 %vm1807_vm0, %v9704_v52  ;;  %v9768_v26 = vpop.eup %7513 }
 0x376   : > { %12847 = vst [vmem:[#allocation67_spill] sm:$0xff] %v9768_v26  ;;  %v9770_v50 = vpop.eup %7515 }
 0x378   : > { %2732 = vmatmul.f32.gmra.mxu3 %v9708_v46 }
 0x37a   : > { %6823 = vmatmul.msk.f32.gmra.mxu2 %vm2117_vm1, %v9710_v48 }
 0x37b   : > { %v9723_v1 = vpop.f32.mrf.mxu3 }
 0x37c   : > { %12843 = vst [vmem:[#allocation63_spill] sm:$0xff] %v9723_v1 }
 0x37d   : > { %6915 = vmatmul.msk.f32.gmra.mxu1 %vm1807_vm0, %v9733_v28 }
 0x380   : > { %2735 = vmatmul.f32.gmra.mxu3 %v9728_v0 }
 0x382   : > { %6824 = vmatmul.msk.f32.gmra.mxu2 %vm2117_vm1, %v9730_v11 }
 0x383   : > { %v9743_v21 = vpop.f32.mrf.mxu3 }
 0x384   : > { %12844 = vst [vmem:[#allocation64_spill] sm:$0xff] %v9743_v21  ;;  %v2341_v21 = vmul.f32 1.442695, %v2278_v14 }
 0x385   : > { %6916 = vmatmul.msk.f32.gmra.mxu1 %vm1807_vm0, %v9753_v35 }
 0x386   : > { %7517 = vpow2.f32 %v2341_v21 }
 0x388   : > { %2738 = vmatmul.f32.gmra.mxu3 %v9748_v16  ;;  %v12874_v16 = vld [vmem:[#allocation24_spill] sm:$0xff] }
 0x38a   : > { %6825 = vmatmul.msk.f32.gmra.mxu2 %vm2117_vm1, %v9750_v17 }
 0x38b   : > { %v9761_v39 = vpop.f32.mrf.mxu3 }
 0x38c   : > { %12846 = vst [vmem:[#allocation66_spill] sm:$0xff] %v9761_v39  ;;  %v9784_v14 = vpop.eup %7517  ;;  %v9801_v39 = vmul.f32 0.125, %v6843_v40 }
 0x38d   : > { %6917 = vmatmul.msk.f32.gmra.mxu1 %vm1807_vm0, %v9773_v34  ;;  %12849 = vst [vmem:[#allocation69_spill] sm:$0xff] %v9784_v14 }
 0x390   : > { %2741 = vmatmul.f32.gmra.mxu3 %v9768_v26 }
 0x392   : > { %6826 = vmatmul.msk.f32.gmra.mxu2 %vm2117_vm1, %v9770_v50 }
 0x393   : > { %v9779_v12 = vpop.f32.mrf.mxu3 }
 0x394   : > { %12848 = vst [vmem:[#allocation68_spill] sm:$0xff] %v9779_v12 }
 0x395   : > { %6918 = vmatmul.msk.f32.gmra.mxu1 %vm1807_vm0, %v9788_v32 }
 0x398   : > { %6935 = vmatmul.msk.f32.vlgmr.msra.gmra.mxu3 %vm1807_vm0, %v9733_v28 }
 0x39a   : > { %6827 = vmatmul.msk.f32.gmra.mxu2 %vm2117_vm1, %v9784_v14 }
 0x39b   : > { %v9794_v21 = vpop.f32.mrf.mxu3 }
 0x39c   : > { %12850 = vst [vmem:[#allocation70_spill] sm:$0xff] %v9794_v21  ;;  %v12867_v21 = vld [vmem:[#allocation36_spill] sm:$0xff] }
 0x39d   : > { %6919 = vmatmul.msk.f32.gmra.mxu1 %vm1807_vm0, %v9801_v39 }
 0x3a0   : > { %6936 = vmatmul.msk.f32.gmra.mxu3 %vm1807_vm0, %v9753_v35 }
 0x3a3   : > { %v9805_v54 = vpop.f32.mrf.mxu3 }
 0x3a4   : > { %12851 = vst [vmem:[#allocation71_spill] sm:$0xff] %v9805_v54 }
 0x3a8   : > { %6937 = vmatmul.msk.f32.gmra.mxu3 %vm1807_vm0, %v9773_v34 }
 0x3ab   : > { %v9811_v44 = vpop.f32.mrf.mxu3 }
 0x3ac   : > { %12852 = vst [vmem:[#allocation72_spill] sm:$0xff] %v9811_v44 }
 0x3b0   : > { %6938 = vmatmul.msk.f32.gmra.mxu3 %vm1807_vm0, %v9788_v32 }
 0x3b3   : > { %v9817_v40 = vpop.f32.mrf.mxu3 }
 0x3b4   : > { %12853 = vst [vmem:[#allocation73_spill] sm:$0xff] %v9817_v40 }
 0x3b8   : > { %6939 = vmatmul.msk.f32.gmra.mxu3 %vm1807_vm0, %v9801_v39 }
 0x3bb   : > { %v9821_v20 = vpop.f32.mrf.mxu3 }
 0x3bc   : > { %12854 = vst [vmem:[#allocation74_spill] sm:$0xff] %v9821_v20  ;;  %v6879_v20 = vld [vmem:[%s9306_s0 + $0x178] sm:$0xff] }
 0x3bd   : > { %3793 = vmatpush.msra.mxu1 %v6879_v20 }
 0x3c0   : > { %6942 = vmatmul.msk.f32.vlgmr.msrb.gmra.mxu3 %vm1807_vm0, %v9514_v53 }
 0x3c3   : > { %v9825_v49 = vpop.f32.mrf.mxu3 }
 0x3c4   : > { %12855 = vst [vmem:[#allocation75_spill] sm:$0xff] %v9825_v49 }
 0x3c8   : > { %6943 = vmatmul.msk.f32.gmra.mxu3 %vm1807_vm0, %v9530_v18 }
 0x3cb   : > { %v9829_v12 = vpop.f32.mrf.mxu3 }
 0x3cc   : > { %12856 = vst [vmem:[#allocation76_spill] sm:$0xff] %v9829_v12 }
 0x3d0   : > { %6944 = vmatmul.msk.f32.gmra.mxu3 %vm1807_vm0, %v9548_v3 }
 0x3d3   : > { %v9833_v55 = vpop.f32.mrf.mxu3 }
 0x3d4   : > { %12857 = vst [vmem:[#allocation77_spill] sm:$0xff] %v9833_v55  ;;  %v6887_v55 = vld [vmem:[%s9279_s2 + $0x18] sm:$0xff] }
 0x3d5   : > { %3694 = vmatpush.msrb.mxu2 %v6887_v55 }
 0x3d8   : > { %6945 = vmatmul.msk.f32.gmra.mxu3 %vm1807_vm0, %v9569_v38 }
 0x3db   : > { %v9837_v29 = vpop.f32.mrf.mxu3 }
 0x3dc   : > { %12858 = vst [vmem:[#allocation78_spill] sm:$0xff] %v9837_v29 }
 0x3e0   : > { %6946 = vmatmul.msk.f32.gmra.mxu3 %vm1807_vm0, %v9587_v30 }
 0x3e3   : > { %v9841_v53 = vpop.f32.mrf.mxu3 }
 0x3e4   : > { %12859 = vst [vmem:[#allocation79_spill] sm:$0xff] %v9841_v53 }
 0x3e8   : > { %6947 = vmatmul.msk.f32.gmra.mxu3 %vm1807_vm0, %v9605_v56 }
 0x3eb   : > { %v9845_v18 = vpop.f32.mrf.mxu3 }
 0x3ec   : > { %12860 = vst [vmem:[#allocation80_spill] sm:$0xff] %v9845_v18 }
 0x3f0   : > { %6948 = vmatmul.msk.f32.gmra.mxu3 %vm1807_vm0, %v9623_v31 }
 0x3f3   : > { %v9849_v3 = vpop.f32.mrf.mxu3 }
 0x3f4   : > { %12861 = vst [vmem:[#allocation81_spill] sm:$0xff] %v9849_v3  ;;  %v3048_v3 = vpop.f32.mrf.mxu1 }
 0x3f8   : > { %6949 = vmatmul.msk.f32.gmra.mxu3 %vm1807_vm0, %v9644_v58 }
 0x3fb   : > { %v9853_v38 = vpop.f32.mrf.mxu3 }
 0x3fc   : > { %12862 = vst [vmem:[#allocation82_spill] sm:$0xff] %v9853_v38  ;;  %v3051_v18 = vpop.f32.mrf.mxu1  ;;  %v6878_v38 = vld [vmem:[%s9306_s0 + $0x170] sm:$0xff] }
 0x3fd   : > { %3794 = vmatpush.msra.mxu1 %v6878_v38  ;;  %v6877_v38 = vld [vmem:[%s9306_s0 + $0x168] sm:$0xff] }
 0x3ff   : > { %3795 = vmatpush.msra.mxu1 %v6877_v38 }
 0x400   : > { %6950 = vmatmul.msk.f32.gmra.mxu3 %vm1807_vm0, %v9664_v4  ;;  %v3113_v4 = vpop.f32.mrf.mxu0 }
 0x403   : > { %v9857_v30 = vpop.f32.mrf.mxu3 }
 0x404   : > { %12863 = vst [vmem:[#allocation83_spill] sm:$0xff] %v9857_v30 }
 0x408   : > { %6951 = vmatmul.msk.f32.gmra.mxu3 %vm1807_vm0, %v9684_v57  ;;  %v7935_v57 = vld [vmem:[%s12799_s9 + $0x8] sm:$0xff] }
 0x40b   : > { %v9861_v56 = vpop.f32.mrf.mxu3 }
 0x40c   : > { %12864 = vst [vmem:[#allocation84_spill] sm:$0xff] %v9861_v56  ;;  %v9876_v56 = vadd.f32 %v7935_v57, %v3113_v4  ;;  %v7938_v57 = vld [vmem:[%s12799_s9 + $0x10] sm:$0xff] }
 0x40e   : > { %v3232_v29 = vsel %vm2117_vm1, %v9876_v56, -inf }
 0x410   : > { %6952 = vmatmul.msk.f32.gmra.mxu3 %vm1807_vm0, %v9704_v52  ;;  %v7936_v52 = vld [vmem:[%s12799_s9] sm:$0xff] }
 0x411   : > { %v9881_v30 = vadd.f32 %v7936_v52, %v3048_v3  ;;  %v7937_v3 = vld [vmem:[%s12799_s9 + $0x18] sm:$0xff] }
 0x413   : > { %v9865_v31 = vpop.f32.mrf.mxu3 }
 0x414   : > { %12865 = vst [vmem:[#allocation85_spill] sm:$0xff] %v9865_v31  ;;  %v3116_v31 = vpop.f32.mrf.mxu0 }
 0x415   : > { %v9894_v4 = vadd.f32 %v7937_v3, %v3116_v31 }
 0x418   : > { %6953 = vmatmul.msk.f32.gmra.mxu3 %vm1807_vm0, %v9733_v28 }
 0x41b   : > { %v9869_v58 = vpop.f32.mrf.mxu3 }
 0x41c   : > { %v3119_v31 = vpop.f32.mrf.mxu0 }
 0x420   : > { %6954 = vmatmul.msk.f32.gmra.mxu3 %vm1807_vm0, %v9753_v35  ;;  %v3233_v35 = vmax.f32 %v9881_v30, %v3232_v29  ;;  %v9899_v29 = vadd.f32 %v7938_v57, %v3051_v18 }
 0x422   : > { %3234 = vmax.xlane.f32.xlu2 %v3233_v35  ;;  %v3054_v35 = vpop.f32.mrf.mxu1 }
 0x423   : > { %v9883_v28 = vpop.f32.mrf.mxu3 }
 0x424   : > { %v3122_v57 = vpop.f32.mrf.mxu0 }
 0x428   : > { %6955 = vmatmul.msk.f32.gmra.mxu3 %vm1807_vm0, %v9773_v34  ;;  %v3236_v34 = vsel %vm2117_vm1, %v9894_v4, -inf }
 0x429   : > { %v3237_v55 = vmax.f32 %v9899_v29, %v3236_v34 }
 0x42a   : > { %v3057_v49 = vpop.f32.mrf.mxu1 }
 0x42b   : > { %v9901_v52 = vpop.f32.mrf.mxu3  ;;  %3238 = vmax.xlane.f32.xlu1 %v3237_v55  ;;  %v12866_v55 = vld [vmem:[#allocation35_spill] sm:$0xff] }
 0x42c   : > { %v3125_v53 = vpop.f32.mrf.mxu0 }
 0x430   : > { %6956 = vmatmul.msk.f32.gmra.mxu3 %vm1807_vm0, %v9788_v32  ;;  %v7939_v32 = vld [vmem:[%s12799_s9 + $0x28] sm:$0xff] }
 0x431   : > { %v9922_v9 = vadd.f32 %v7939_v32, %v3119_v31 }
 0x432   : > { %v3060_v1 = vpop.f32.mrf.mxu1 }
 0x433   : > { %v9908_v3 = vpop.f32.mrf.mxu3 }
 0x438   : > { %6957 = vmatmul.msk.f32.gmra.mxu3 %vm1807_vm0, %v9801_v39  ;;  %v7940_v39 = vld [vmem:[%s12799_s9 + $0x20] sm:$0xff] }
 0x439   : > { %v9929_v59 = vadd.f32 %v7940_v39, %v3054_v35  ;;  %v9941_v35 = vadd.f32 %v7941_v27, %v3122_v57  ;;  %v7942_v39 = vld [vmem:[%s12799_s9 + $0x30] sm:$0xff] }
 0x43a   : > { %v9948_v38 = vadd.f32 %v7942_v39, %v3057_v49  ;;  %v7943_v49 = vld [vmem:[%s12799_s9 + $0x48] sm:$0xff]  ;;  %v7944_v39 = vld [vmem:[%s12799_s9 + $0x40] sm:$0xff] }
 0x43b   : > { %v9913_v18 = vpop.f32.mrf.mxu3 }
 0x443   : > { %v3184_v34 = vpop.f32.mrf.mxu3 }
 0x444   : > { %v9917_v44 = vadd.f32 %v3184_v34, %v12866_v55  ;;  %v3240_v34 = vsel %vm2117_vm1, %v9922_v9, -inf  ;;  %v3063_v55 = vpop.f32.mrf.mxu1 }
 0x445   : > { %v3241_v32 = vmax.f32 %v9929_v59, %v3240_v34  ;;  %v6876_v34 = vld [vmem:[%s9306_s0 + $0x160] sm:$0xff] }
 0x446   : > { %v3296_v20 = vsel %vm2182_vm2, %v9917_v44, -inf  ;;  %3796 = vmatpush.msra.mxu1 %v6876_v34  ;;  %v9967_v34 = vadd.f32 %v7944_v39, %v3060_v1  ;;  %v7945_v1 = vld [vmem:[%s12799_s9 + $0x58] sm:$0xff] }
 0x447   : > { %3297 = vmax.xlane.f32.xlu0 %v3296_v20 }
 0x44b   : > { %v3187_v31 = vpop.f32.mrf.mxu3 }
 0x44c   : > { %v9936_v12 = vadd.f32 %v3187_v31, %v12867_v21  ;;  %v3128_v21 = vpop.f32.mrf.mxu0  ;;  %v3244_v31 = vsel %vm2117_vm1, %v9941_v35, -inf  ;;  %v3066_v40 = vpop.f32.mrf.mxu1 }
 0x44d   : > { %v3245_v57 = vmax.f32 %v9948_v38, %v3244_v31  ;;  %v9979_v39 = vadd.f32 %v7945_v1, %v3128_v21 }
 0x44e   : > { %v3299_v20 = vsel %vm2182_vm2, %v9936_v12, -inf }
 0x44f   : > { %3300 = vmax.xlane.f32.xlu2 %v3299_v20  ;;  %3242 = vmax.xlane.f32.xlu0 %v3241_v32  ;;  %v9960_v20 = vadd.f32 %v7943_v49, %v3125_v53  ;;  %12870 = vst [vmem:[#allocation35_spill] sm:$0xff] %v9979_v39 }
 0x451   : > { %v3248_v31 = vsel %vm2117_vm1, %v9960_v20, -inf }
 0x452   : > { %v3249_v49 = vmax.f32 %v9967_v34, %v3248_v31  ;;  %v3252_v31 = vsel %vm2117_vm1, %v9979_v39, -inf }
 0x453   : > { %v3190_v27 = vpop.f32.mrf.mxu3 }
 0x454   : > { %v9955_v54 = vadd.f32 %v3190_v27, %v12868_v37  ;;  %v6875_v37 = vld [vmem:[%s9306_s0 + $0x158] sm:$0xff]  ;;  %v3131_v27 = vpop.f32.mrf.mxu0 }
 0x455   : > { %3797 = vmatpush.msra.mxu1 %v6875_v37  ;;  %v7946_v37 = vld [vmem:[%s12799_s9 + $0x50] sm:$0xff] }
 0x456   : > { %v3302_v32 = vsel %vm2182_vm2, %v9955_v54, -inf  ;;  %v9986_v15 = vadd.f32 %v7946_v37, %v3063_v55  ;;  %v7947_v55 = vld [vmem:[%s12799_s9 + $0x68] sm:$0xff]  ;;  %v7948_v37 = vld [vmem:[%s12799_s9 + $0x60] sm:$0xff] }
 0x457   : > { %3303 = vmax.xlane.f32.xlu1 %v3302_v32  ;;  %3246 = vmax.xlane.f32.xlu2 %v3245_v57  ;;  %v3069_v57 = vpop.f32.mrf.mxu1 }
 0x45b   : > { %v3193_v53 = vpop.f32.mrf.mxu3 }
 0x45c   : > { %v9974_v6 = vadd.f32 %v3193_v53, %v12869_v8  ;;  %v6874_v8 = vld [vmem:[%s9306_s0 + $0x150] sm:$0xff]  ;;  %v3253_v53 = vmax.f32 %v9986_v15, %v3252_v31  ;;  %v3134_v1 = vpop.f32.mrf.mxu0 }
 0x45d   : > { %3798 = vmatpush.msra.mxu1 %v6874_v8  ;;  %v10005_v8 = vadd.f32 %v7948_v37, %v3066_v40  ;;  %v6886_v31 = vld [vmem:[%s9279_s2 + $0x10] sm:$0xff]  ;;  %v7949_v40 = vld [vmem:[%s12799_s9 + $0x78] sm:$0xff]  ;;  %s12983_s2 = sld [smem:[#allocation174_spill]] }
 0x45e   : > { %v3305_v32 = vsel %vm2182_vm2, %v9974_v6, -inf  ;;  %3695 = vmatpush.msrb.mxu2 %v6886_v31  ;;  %v7950_v31 = vld [vmem:[%s12799_s9 + $0x70] sm:$0xff] }
 0x45f   : > { %3306 = vmax.xlane.f32.xlu0 %v3305_v32  ;;  %3250 = vmax.xlane.f32.xlu1 %v3249_v49  ;;  %v9998_v32 = vadd.f32 %v7947_v55, %v3131_v27  ;;  %12873 = vst [vmem:[#allocation21_spill] sm:$0xff] %v10005_v8 }
 0x461   : > { %12872 = vst [vmem:[#allocation36_spill] sm:$0xff] %v9998_v32  ;;  %v3256_v14 = vsel %vm2117_vm1, %v9998_v32, -inf  ;;  %v12877_v32 = vld [vmem:[#allocation25_spill] sm:$0xff] }
 0x462   : > { %v3257_v55 = vmax.f32 %v10005_v8, %v3256_v14 }
 0x463   : > { %v3196_v21 = vpop.f32.mrf.mxu3 }
 0x464   : > { %v9993_v26 = vadd.f32 %v3196_v21, %v12871_v42  ;;  %v6873_v42 = vld [vmem:[%s9306_s0 + $0x148] sm:$0xff]  ;;  %v3072_v21 = vpop.f32.mrf.mxu1 }
 0x465   : > { %3799 = vmatpush.msra.mxu1 %v6873_v42  ;;  %v10025_v42 = vadd.f32 %v7950_v31, %v3069_v57  ;;  %v7951_v57 = vld [vmem:[%s12799_s9 + $0x88] sm:$0xff] }
 0x466   : > { %v3308_v49 = vsel %vm2182_vm2, %v9993_v26, -inf }
 0x467   : > { %3309 = vmax.xlane.f32.xlu2 %v3308_v49  ;;  %3254 = vmax.xlane.f32.xlu0 %v3253_v53  ;;  %v10018_v53 = vadd.f32 %v7949_v40, %v3134_v1  ;;  %v3137_v49 = vpop.f32.mrf.mxu0  ;;  %12876 = vst [vmem:[#allocation23_spill] sm:$0xff] %v10025_v42 }
 0x468   : > { %v10037_v31 = vadd.f32 %v7951_v57, %v3137_v49 }
 0x469   : > { %12875 = vst [vmem:[#allocation22_spill] sm:$0xff] %v10018_v53  ;;  %v3260_v14 = vsel %vm2117_vm1, %v10018_v53, -inf }
 0x46a   : > { %v3261_v40 = vmax.f32 %v10025_v42, %v3260_v14  ;;  %12879 = vst [vmem:[#allocation25_spill] sm:$0xff] %v10037_v31  ;;  %v6871_v14 = vld [vmem:[%s9306_s0 + $0x138] sm:$0xff]  ;;  %v12881_v42 = vld [vmem:[#allocation26_spill] sm:$0xff] }
 0x46b   : > { %v3199_v27 = vpop.f32.mrf.mxu3 }
 0x46c   : > { %v10013_v39 = vadd.f32 %v3199_v27, %v12874_v16  ;;  %v6872_v16 = vld [vmem:[%s9306_s0 + $0x140] sm:$0xff]  ;;  %v3075_v1 = vpop.f32.mrf.mxu1 }
 0x46d   : > { %3800 = vmatpush.msra.mxu1 %v6872_v16 }
 0x46e   : > { %v3311_v37 = vsel %vm2182_vm2, %v10013_v39, -inf }
 0x46f   : > { %3312 = vmax.xlane.f32.xlu1 %v3311_v37  ;;  %3258 = vmax.xlane.f32.xlu2 %v3257_v55  ;;  %v7952_v37 = vld [vmem:[%s12799_s9 + $0x80] sm:$0xff] }
 0x470   : > { %v10044_v16 = vadd.f32 %v7952_v37, %v3072_v21  ;;  %3801 = vmatpush.msra.mxu1 %v6871_v14  ;;  %v7953_v21 = vld [vmem:[%s12799_s9 + $0x98] sm:$0xff]  ;;  %v7954_v37 = vld [vmem:[%s12799_s9 + $0x90] sm:$0xff] }
 0x471   : > { %v10063_v14 = vadd.f32 %v7954_v37, %v3075_v1  ;;  %v7955_v1 = vld [vmem:[%s12799_s9 + $0xa8] sm:$0xff] }
 0x472   : > { %12880 = vst [vmem:[#allocation86_spill] sm:$0xff] %v10044_v16 }
 0x473   : > { %v3202_v27 = vpop.f32.mrf.mxu3  ;;  %12883 = vst [vmem:[#allocation87_spill] sm:$0xff] %v10063_v14 }
 0x474   : > { %v10032_v8 = vadd.f32 %v3202_v27, %v12877_v32  ;;  %v3140_v32 = vpop.f32.mrf.mxu0  ;;  %v3264_v27 = vsel %vm2117_vm1, %v10037_v31, -inf  ;;  %v3078_v53 = vpop.f32.mrf.mxu1  ;;  %v12884_v31 = vld [vmem:[#allocation27_spill] sm:$0xff] }
 0x475   : > { %v3265_v57 = vmax.f32 %v10044_v16, %v3264_v27 }
 0x476   : > { %12878 = vst [vmem:[#allocation24_spill] sm:$0xff] %v10032_v8  ;;  %v3314_v55 = vsel %vm2182_vm2, %v10032_v8, -inf }
 0x477   : > { %3315 = vmax.xlane.f32.xlu0 %v3314_v55  ;;  %3262 = vmax.xlane.f32.xlu1 %v3261_v40  ;;  %v10056_v55 = vadd.f32 %v7953_v21, %v3140_v32 }
 0x479   : > { %12882 = vst [vmem:[#allocation26_spill] sm:$0xff] %v10056_v55  ;;  %v3268_v27 = vsel %vm2117_vm1, %v10056_v55, -inf }
 0x47a   : > { %v3269_v21 = vmax.f32 %v10063_v14, %v3268_v27 }
 0x47b   : > { %v3205_v49 = vpop.f32.mrf.mxu3 }
 0x47c   : > { %v10051_v8 = vadd.f32 %v3205_v49, %v12881_v42  ;;  %v6870_v42 = vld [vmem:[%s9306_s0 + $0x130] sm:$0xff]  ;;  %v3143_v49 = vpop.f32.mrf.mxu0 }
 0x47d   : > { %3802 = vmatpush.msra.mxu1 %v6870_v42  ;;  %v10075_v37 = vadd.f32 %v7955_v1, %v3143_v49  ;;  %v7956_v42 = vld [vmem:[%s12799_s9 + $0xa0] sm:$0xff]  ;;  %v12886_v1 = vld [vmem:[#allocation28_spill] sm:$0xff] }
 0x47e   : > { %v3317_v40 = vsel %vm2182_vm2, %v10051_v8, -inf  ;;  %v10082_v55 = vadd.f32 %v7956_v42, %v3078_v53 }
 0x47f   : > { %3318 = vmax.xlane.f32.xlu2 %v3317_v40  ;;  %3266 = vmax.xlane.f32.xlu0 %v3265_v57  ;;  %v3081_v57 = vpop.f32.mrf.mxu1  ;;  %v3272_v27 = vsel %vm2117_vm1, %v10075_v37, -inf }
 0x483   : > { %v3208_v32 = vpop.f32.mrf.mxu3 }
 0x484   : > { %v10070_v16 = vadd.f32 %v3208_v32, %v12884_v31  ;;  %v6869_v31 = vld [vmem:[%s9306_s0 + $0x128] sm:$0xff]  ;;  %v3273_v32 = vmax.f32 %v10082_v55, %v3272_v27 }
 0x485   : > { %3803 = vmatpush.msra.mxu1 %v6869_v31  ;;  %v7958_v31 = vld [vmem:[%s12799_s9 + $0xb0] sm:$0xff] }
 0x486   : > { %12885 = vst [vmem:[#allocation27_spill] sm:$0xff] %v10070_v16  ;;  %v3320_v40 = vsel %vm2182_vm2, %v10070_v16, -inf  ;;  %v7957_v16 = vld [vmem:[%s12799_s9 + $0xb8] sm:$0xff]  ;;  %v10103_v27 = vadd.f32 %v7958_v31, %v3081_v57 }
 0x487   : > { %3321 = vmax.xlane.f32.xlu1 %v3320_v40  ;;  %3270 = vmax.xlane.f32.xlu2 %v3269_v21  ;;  %v10095_v53 = vadd.f32 %v7957_v16, %v9869_v58  ;;  %v6868_v40 = vld [vmem:[%s9306_s0 + $0x120] sm:$0xff]  ;;  %v3084_v42 = vpop.f32.mrf.mxu1  ;;  %v6867_v31 = vld [vmem:[%s9306_s0 + $0x118] sm:$0xff] }
 0x488   : > { %3804 = vmatpush.msra.mxu1 %v6868_v40  ;;  %12888 = vst [vmem:[#allocation88_spill] sm:$0xff] %v10103_v27  ;;  %v12889_v16 = vld [vmem:[#allocation29_spill] sm:$0xff] }
 0x489   : > { %12887 = vst [vmem:[#allocation28_spill] sm:$0xff] %v10095_v53 }
 0x48a   : > { %3805 = vmatpush.msra.mxu1 %v6867_v31  ;;  %v7961_v31 = vld [vmem:[%s12799_s9 + $0xd8] sm:$0xff] }
 0x48b   : > { %v3211_v49 = vpop.f32.mrf.mxu3 }
 0x48c   : > { %v10089_v14 = vadd.f32 %v3211_v49, %v12886_v1  ;;  %v3276_v49 = vsel %vm2117_vm1, %v10095_v53, -inf }
 0x48e   : > { %v3323_v21 = vsel %vm2182_vm2, %v10089_v14, -inf }
 0x48f   : > { %3324 = vmax.xlane.f32.xlu0 %v3323_v21  ;;  %3274 = vmax.xlane.f32.xlu1 %v3273_v32  ;;  %v3277_v21 = vmax.f32 %v10103_v27, %v3276_v49  ;;  %v7959_v32 = vld [vmem:[%s12799_s9 + $0xc8] sm:$0xff]  ;;  %v3087_v49 = vpop.f32.mrf.mxu1 }
 0x490   : > { %v10115_v40 = vadd.f32 %v7959_v32, %v9883_v28  ;;  %v10127_v32 = vpop.f32.mrf.mxu2  ;;  %v12893_v27 = vld [vmem:[#allocation30_spill] sm:$0xff] }
 0x491   : > { %12892 = vst [vmem:[#allocation90_spill] sm:$0xff] %v10127_v32 }
 0x492   : > { %12890 = vst [vmem:[#allocation29_spill] sm:$0xff] %v10115_v40  ;;  %v3280_v28 = vsel %vm2117_vm1, %v10115_v40, -inf  ;;  %v6866_v40 = vld [vmem:[%s9306_s0 + $0x110] sm:$0xff] }
 0x493   : > { %v3214_v58 = vpop.f32.mrf.mxu3  ;;  %3806 = vmatpush.msra.mxu1 %v6866_v40  ;;  %v6865_v40 = vld [vmem:[%s9306_s0 + $0x108] sm:$0xff] }
 0x494   : > { %v10108_v1 = vadd.f32 %v3214_v58, %v12889_v16  ;;  %v7960_v58 = vld [vmem:[%s12799_s9 + $0xc0] sm:$0xff] }
 0x495   : > { %v10123_v16 = vadd.f32 %v7960_v58, %v3084_v42  ;;  %v10137_v42 = vadd.f32 %v7961_v31, %v9901_v52  ;;  %v6883_v52 = vld [vmem:[%s9306_s0 + $0x198] sm:$0xff]  ;;  %3807 = vmatpush.msra.mxu1 %v6865_v40 }
 0x496   : > { %v3326_v57 = vsel %vm2182_vm2, %v10108_v1, -inf  ;;  %3870 = vmatpush.msra.mxu0 %v6883_v52  ;;  %v7965_v40 = vld [vmem:[%s12799_s9 + $0xf8] sm:$0xff] }
 0x497   : > { %3327 = vmax.xlane.f32.xlu2 %v3326_v57  ;;  %3278 = vmax.xlane.f32.xlu0 %v3277_v21  ;;  %12891 = vst [vmem:[#allocation89_spill] sm:$0xff] %v10123_v16  ;;  %v3281_v21 = vmax.f32 %v10123_v16, %v3280_v28  ;;  %v3284_v28 = vsel %vm2117_vm1, %v10137_v42, -inf  ;;  %v3090_v31 = vpop.f32.mrf.mxu1  ;;  %v12897_v16 = vld [vmem:[#allocation31_spill] sm:$0xff] }
 0x498   : > { %12895 = vst [vmem:[#allocation91_spill] sm:$0xff] %v10137_v42 }
 0x49b   : > { %v3217_v53 = vpop.f32.mrf.mxu3 }
 0x49c   : > { %v10130_v57 = vadd.f32 %v3217_v53, %v12893_v27  ;;  %v7962_v53 = vld [vmem:[%s12799_s9 + $0xd0] sm:$0xff] }
 0x49d   : > { %v10144_v27 = vadd.f32 %v7962_v53, %v3087_v49 }
 0x49e   : > { %12894 = vst [vmem:[#allocation30_spill] sm:$0xff] %v10130_v57  ;;  %v3329_v58 = vsel %vm2182_vm2, %v10130_v57, -inf }
 0x49f   : > { %3330 = vmax.xlane.f32.xlu1 %v3329_v58  ;;  %3282 = vmax.xlane.f32.xlu2 %v3281_v21  ;;  %12896 = vst [vmem:[#allocation92_spill] sm:$0xff] %v10144_v27  ;;  %v10153_v21 = vpop.f32.mrf.mxu2  ;;  %v3285_v49 = vmax.f32 %v10144_v27, %v3284_v28  ;;  %v7963_v58 = vld [vmem:[%s12799_s9 + $0xe8] sm:$0xff]  ;;  %v7964_v28 = vld [vmem:[%s12799_s9 + $0xe0] sm:$0xff] }
 0x4a0   : > { %12899 = vst [vmem:[#allocation93_spill] sm:$0xff] %v10153_v21  ;;  %v10160_v53 = vadd.f32 %v7963_v58, %v9908_v3  ;;  %v10170_v52 = vadd.f32 %v7964_v28, %v3090_v31  ;;  %v6864_v58 = vld [vmem:[%s9306_s0 + $0x100] sm:$0xff]  ;;  %v3093_v28 = vpop.f32.mrf.mxu1 }
 0x4a1   : > { %v6880_v21 = vld [vmem:[%s9306_s0 + $0x180] sm:$0xff]  ;;  %3808 = vmatpush.msra.mxu1 %v6864_v58 }
 0x4a2   : > { %12900 = vst [vmem:[#allocation94_spill] sm:$0xff] %v10160_v53  ;;  %v3288_v3 = vsel %vm2117_vm1, %v10160_v53, -inf }
 0x4a3   : > { %v3220_v32 = vpop.f32.mrf.mxu3  ;;  %v3289_v31 = vmax.f32 %v10170_v52, %v3288_v3 }
 0x4a4   : > { %v10151_v57 = vadd.f32 %v3220_v32, %v12897_v16  ;;  %v6882_v16 = vld [vmem:[%s9306_s0 + $0x190] sm:$0xff]  ;;  %v6881_v32 = vld [vmem:[%s9306_s0 + $0x188] sm:$0xff] }
 0x4a5   : > { %3871 = vmatpush.msra.mxu0 %v6882_v16  ;;  %v12901_v16 = vld [vmem:[#allocation32_spill] sm:$0xff] }
 0x4a6   : > { %12898 = vst [vmem:[#allocation31_spill] sm:$0xff] %v10151_v57  ;;  %v3332_v42 = vsel %vm2182_vm2, %v10151_v57, -inf }
 0x4a7   : > { %3286 = vmax.xlane.f32.xlu1 %v3285_v49  ;;  %3333 = vmax.xlane.f32.xlu0 %v3332_v42  ;;  %v4168_v49 = vld [vmem:[%s8785_s21 + $0xf8] sm:$0xff]  ;;  %v10192_v58 = vpop.f32.mrf.mxu2 }
 0x4a8   : > { %3872 = vmatpush.msra.mxu0 %v6881_v32  ;;  %v4164_v42 = vld [vmem:[%s8785_s21 + $0xd8] sm:$0xff]  ;;  %7054 = vmatpush.xpose.msk.msra.mxu2 %vm1807_vm0, %v4168_v49  ;;  %v10188_v32 = vadd.f32 %v7965_v40, %v9913_v18  ;;  %12903 = vst [vmem:[#allocation95_spill] sm:$0xff] %v10192_v58 }
 0x4a9   : > { %7022 = vmatpush.xpose.msk.msra.mxu3 %vm1807_vm0, %v4164_v42  ;;  %v4163_v42 = vld [vmem:[%s8785_s21 + $0xd0] sm:$0xff] }
 0x4aa   : > { %3873 = vmatpush.msra.mxu0 %v6880_v21  ;;  %12902 = vst [vmem:[#allocation32_spill] sm:$0xff] %v10188_v32  ;;  %v7966_v21 = vld [vmem:[%s12799_s9 + $0xf0] sm:$0xff]  ;;  %v3292_v49 = vsel %vm2117_vm1, %v10188_v32, -inf }
 0x4ab   : > { %v3223_v27 = vpop.f32.mrf.mxu3  ;;  %v10197_v3 = vadd.f32 %v7966_v21, %v3093_v28 }
 0x4ac   : > { %v10179_v57 = vadd.f32 %v3223_v27, %v12901_v16  ;;  %v12905_v16 = vld [vmem:[#allocation33_spill] sm:$0xff] }
 0x4ad   : > { %12904 = vst [vmem:[#allocation96_spill] sm:$0xff] %v10197_v3  ;;  %7023 = vmatpush.xpose.msk.msra.mxu3 %vm1807_vm0, %v4163_v42  ;;  %v4162_v42 = vld [vmem:[%s8785_s21 + $0xc8] sm:$0xff] }
 0x4ae   : > { %v3335_v27 = vsel %vm2182_vm2, %v10179_v57, -inf }
 0x4af   : > { %3336 = vmax.xlane.f32.xlu2 %v3335_v27  ;;  %3290 = vmax.xlane.f32.xlu0 %v3289_v31  ;;  %v3293_v31 = vmax.f32 %v10197_v3, %v3292_v49  ;;  %v3235_v27 = vpop.xlane.xlu2 %3234  ;;  %v10212_v21 = vpop.f32.mrf.mxu2  ;;  %v12908_v49 = vld [vmem:[#allocation34_spill] sm:$0xff] }
 0x4b0   : > { %12907 = vst [vmem:[#allocation97_spill] sm:$0xff] %v10212_v21 }
 0x4b1   : > { %7024 = vmatpush.xpose.msk.msra.mxu3 %vm1807_vm0, %v4162_v42 }
 0x4b3   : > { %v3226_v18 = vpop.f32.mrf.mxu3 }
 0x4b4   : > { %v10204_v40 = vadd.f32 %v3226_v18, %v12905_v16  ;;  %v4190_v18 = vld [vmem:[%s10215_s14 + $0x8] sm:$0xff] }
 0x4b5   : > { %7074 = vmatpush.xpose.msk.msrb.mxu1 %vm1807_vm0, %v4190_v18 }
 0x4b6   : > { %12906 = vst [vmem:[#allocation33_spill] sm:$0xff] %v10204_v40  ;;  %v3338_v28 = vsel %vm2182_vm2, %v10204_v40, -inf }
 0x4b7   : > { %3339 = vmax.xlane.f32.xlu1 %v3338_v28  ;;  %3294 = vmax.xlane.f32.xlu2 %v3293_v31 }
 0x4ba   : > { %v3298_v58 = vpop.xlane.xlu0 %3297 }
 0x4bb   : > { %v3344_v32 = vmax.f32 %v3235_v27, %v3298_v58  ;;  %v3229_v53 = vpop.f32.mrf.mxu3 }
 0x4bc   : > { %v10220_v16 = vadd.f32 %v3229_v53, %v12908_v49  ;;  %v3239_v53 = vpop.xlane.xlu1 %3238 }
 0x4bd   : > { %v3360_v31 = vsub.f32 %v9881_v30, %v3344_v32  ;;  %v3361_v28 = vsub.f32 %v9876_v56, %v3344_v32  ;;  %v3520_v21 = vsub.f32 %v9917_v44, %v3344_v32  ;;  %v2351_v30 = vsel %vm2117_vm1, %v9534_v51, 0.0  ;;  %v10235_v32 = vpop.f32.mrf.mxu2 }
 0x4be   : > { %v3341_v58 = vsel %vm2182_vm2, %v10220_v16, -inf  ;;  %v2355_v44 = vsel %vm2117_vm1, %v9552_v47, 0.0  ;;  %12909 = vst [vmem:[#allocation34_spill] sm:$0xff] %v10235_v32  ;;  %v4184_v32 = vld [vmem:[%s9306_s0 + $0xd8] sm:$0xff] }
 0x4bf   : > { %v3392_v27 = vmul.f32 1.442695, %v3360_v31  ;;  %v3394_v3 = vmul.f32 1.442695, %v3361_v28  ;;  %v3536_v40 = vmul.f32 1.442695, %v3520_v21  ;;  %2345 = vadd.xlane.f32.xlu1 %v9484_v60  ;;  %3342 = vmax.xlane.f32.xlu0 %v3341_v58  ;;  %v2356_v47 = vadd.f32 %v9532_v36, %v2355_v44 }
 0x4c0   : > { %2349 = vadd.xlane.f32.xlu2 %v9489_v62  ;;  %v2359_v60 = vsel %vm2117_vm1, %v9573_v7, 0.0  ;;  %v4161_v21 = vld [vmem:[%s8785_s21 + $0xc0] sm:$0xff]  ;;  %v2352_v62 = vadd.f32 %v9516_v25, %v2351_v30  ;;  %v2363_v36 = vsel %vm2117_vm1, %v9591_v61, 0.0  ;;  %v2371_v30 = vsel %vm2117_vm1, %v9627_v41, 0.0  ;;  %v4160_v44 = vld [vmem:[%s8785_s21 + $0xb8] sm:$0xff] }
 0x4c1   : > { %7519 = vpow2.f32 %v3392_v27  ;;  %7025 = vmatpush.xpose.msk.msra.mxu3 %vm1807_vm0, %v4161_v21  ;;  %v2360_v49 = vadd.f32 %v9550_v2, %v2359_v60  ;;  %v2364_v61 = vadd.f32 %v9571_v19, %v2363_v36  ;;  %v2372_v41 = vadd.f32 %v9607_v63, %v2371_v30 }
 0x4c2   : > { %7521 = vpow2.f32 %v3394_v3  ;;  %v3301_v56 = vpop.xlane.xlu2 %3300  ;;  %v3243_v25 = vpop.xlane.xlu0 %3242 }
 0x4c3   : > { %7523 = vpow2.f32 %v3536_v40  ;;  %v3345_v18 = vmax.f32 %v3239_v53, %v3301_v56  ;;  %v4167_v56 = vld [vmem:[%s8785_s21 + $0xf0] sm:$0xff] }
 0x4c4   : > { %7055 = vmatpush.xpose.msk.msra.mxu2 %vm1807_vm0, %v4167_v56  ;;  %v2391_v56 = vsel %vm2117_vm1, %v9730_v11, 0.0 }
 0x4c5   : > { %v3362_v42 = vsub.f32 %v9899_v29, %v3345_v18  ;;  %v3363_v51 = vsub.f32 %v9894_v4, %v3345_v18  ;;  %v3521_v3 = vsub.f32 %v9936_v12, %v3345_v18  ;;  %v2367_v4 = vsel %vm2117_vm1, %v9609_v23, 0.0  ;;  %7026 = vmatpush.xpose.msk.msra.mxu3 %vm1807_vm0, %v4160_v44  ;;  %v10266_v18 = vpop.f32.mrf.mxu2 }
 0x4c6   : > { %12910 = vst [vmem:[#allocation98_spill] sm:$0xff] %v10266_v18  ;;  %v2392_v11 = vadd.f32 %v9708_v46, %v2391_v56 }
 0x4c7   : > { %v7520_v40 = vpop.eup %7519  ;;  %v3396_v31 = vmul.f32 1.442695, %v3362_v42  ;;  %v3398_v28 = vmul.f32 1.442695, %v3363_v51  ;;  %v3538_v58 = vmul.f32 1.442695, %v3521_v3  ;;  %2357 = vadd.xlane.f32.xlu1 %v2356_v47  ;;  %2353 = vadd.xlane.f32.xlu0 %v2352_v62  ;;  %v2368_v62 = vadd.f32 %v9589_v43, %v2367_v4 }
 0x4c8   : > { %v7522_v7 = vpop.eup %7521  ;;  %2361 = vadd.xlane.f32.xlu2 %v2360_v49  ;;  %3809 = vmatmul.f32.vlgmr.msra.gmra.mxu1 %v7520_v40 }
 0x4c9   : > { %v10247_v29 = vpop.eup %7523  ;;  %7525 = vpow2.f32 %v3396_v31  ;;  %6974 = vmatmul.msk.f32.vlgmr.msra.gmra.mxu0 %vm2117_vm1, %v7522_v7  ;;  %v3456_v2 = vsel %vm2117_vm1, %v7522_v7, 0.0 }
 0x4ca   : > { %7527 = vpow2.f32 %v3398_v28  ;;  %6958 = vmatmul.msk.f32.vlgmr.msrb.gmra.mxu2 %vm2182_vm2, %v10247_v29  ;;  %v3304_v12 = vpop.xlane.xlu1 %3303  ;;  %v10257_v27 = vadd.f32 %v7520_v40, %v3456_v2  ;;  %v3247_v49 = vpop.xlane.xlu2 %3246  ;;  %v2375_v28 = vsel %vm2117_vm1, %v9650_v10, 0.0 }
 0x4cb   : > { %7529 = vpow2.f32 %v3538_v58  ;;  %v3346_v53 = vmax.f32 %v3243_v25, %v3304_v12  ;;  %v4159_v58 = vld [vmem:[%s8785_s21 + $0xb0] sm:$0xff]  ;;  %v2376_v2 = vadd.f32 %v9625_v22, %v2375_v28 }
 0x4cc   : > { %7027 = vmatpush.xpose.msk.msra.mxu3 %vm1807_vm0, %v4159_v58  ;;  %v12915_v58 = vld [vmem:[#allocation65_spill] sm:$0xff] }
 0x4cd   : > { %v3364_v60 = vsub.f32 %v9929_v59, %v3346_v53  ;;  %v3365_v23 = vsub.f32 %v9922_v9, %v3346_v53  ;;  %v3522_v21 = vsub.f32 %v9955_v54, %v3346_v53  ;;  %v2379_v9 = vsel %vm2117_vm1, %v9670_v13, 0.0  ;;  %v10295_v4 = vpop.f32.mrf.mxu2 }
 0x4ce   : > { %v2387_v54 = vsel %vm2117_vm1, %v9710_v48, 0.0  ;;  %v2380_v13 = vadd.f32 %v9648_v33, %v2379_v9  ;;  %12911 = vst [vmem:[#allocation99_spill] sm:$0xff] %v10295_v4  ;;  %v2399_v9 = vsel %vm2117_vm1, %v9770_v50, 0.0 }
 0x4cf   : > { %v7526_v42 = vpop.eup %7525  ;;  %v3400_v51 = vmul.f32 1.442695, %v3364_v60  ;;  %v3402_v3 = vmul.f32 1.442695, %v3365_v23  ;;  %v3540_v19 = vmul.f32 1.442695, %v3522_v21  ;;  %2369 = vadd.xlane.f32.xlu1 %v2368_v62  ;;  %2365 = vadd.xlane.f32.xlu0 %v2364_v61  ;;  %v2388_v48 = vadd.f32 %v9688_v5, %v2387_v54 }
 0x4d0   : > { %v7528_v47 = vpop.eup %7527  ;;  %2373 = vadd.xlane.f32.xlu2 %v2372_v41  ;;  %3812 = vmatmul.f32.gmra.mxu1 %v7526_v42  ;;  %v2395_v60 = vsel %vm2117_vm1, %v9750_v17, 0.0  ;;  %v4158_v23 = vld [vmem:[%s8785_s21 + $0xa8] sm:$0xff]  ;;  %v12914_v54 = vld [vmem:[#allocation35_spill] sm:$0xff] }
 0x4d1   : > { %v10273_v59 = vpop.eup %7529  ;;  %7531 = vpow2.f32 %v3400_v51  ;;  %6975 = vmatmul.msk.f32.gmra.mxu0 %vm2117_vm1, %v7528_v47  ;;  %v3460_v43 = vsel %vm2117_vm1, %v7528_v47, 0.0  ;;  %7028 = vmatpush.xpose.msk.msra.mxu3 %vm1807_vm0, %v4158_v23 }
 0x4d2   : > { %7533 = vpow2.f32 %v3402_v3  ;;  %6959 = vmatmul.msk.f32.gmra.mxu2 %vm2182_vm2, %v10273_v59  ;;  %v3307_v63 = vpop.xlane.xlu0 %3306  ;;  %v10283_v40 = vadd.f32 %v7526_v42, %v3460_v43  ;;  %v2396_v42 = vadd.f32 %v9728_v0, %v2395_v60  ;;  %v4157_v43 = vld [vmem:[%s8785_s21 + $0xa0] sm:$0xff] }
 0x4d3   : > { %7535 = vpow2.f32 %v3540_v19  ;;  %v3347_v31 = vmax.f32 %v3247_v49, %v3307_v63 }
 0x4d5   : > { %v3366_v7 = vsub.f32 %v9948_v38, %v3347_v31  ;;  %v3367_v25 = vsub.f32 %v9941_v35, %v3347_v31  ;;  %v3523_v36 = vsub.f32 %v9974_v6, %v3347_v31  ;;  %v3251_v38 = vpop.xlane.xlu1 %3250  ;;  %v2383_v6 = vsel %vm2117_vm1, %v9690_v45, 0.0  ;;  %7029 = vmatpush.xpose.msk.msra.mxu3 %vm1807_vm0, %v4157_v43 }
 0x4d6   : > { %v2384_v45 = vadd.f32 %v9668_v24, %v2383_v6  ;;  %v12918_v6 = vld [vmem:[#allocation21_spill] sm:$0xff] }
 0x4d7   : > { %v7532_v12 = vpop.eup %7531  ;;  %v3404_v53 = vmul.f32 1.442695, %v3366_v7  ;;  %v3406_v10 = vmul.f32 1.442695, %v3367_v25  ;;  %v3542_v30 = vmul.f32 1.442695, %v3523_v36  ;;  %2381 = vadd.xlane.f32.xlu1 %v2380_v13  ;;  %2389 = vadd.xlane.f32.xlu0 %v2388_v48  ;;  %v2400_v13 = vadd.f32 %v12915_v58, %v2399_v9 }
 0x4d8   : > { %v7534_v33 = vpop.eup %7533  ;;  %2377 = vadd.xlane.f32.xlu2 %v2376_v2  ;;  %3815 = vmatmul.f32.gmra.mxu1 %v7532_v12 }
 0x4d9   : > { %v10297_v35 = vpop.eup %7535  ;;  %7537 = vpow2.f32 %v3404_v53  ;;  %6976 = vmatmul.msk.f32.gmra.mxu0 %vm2117_vm1, %v7534_v33  ;;  %v3464_v22 = vsel %vm2117_vm1, %v7534_v33, 0.0  ;;  %v4166_v33 = vld [vmem:[%s8785_s21 + $0xe8] sm:$0xff] }
 0x4da   : > { %7539 = vpow2.f32 %v3406_v10  ;;  %6960 = vmatmul.msk.f32.gmra.mxu2 %vm2182_vm2, %v10297_v35  ;;  %v3310_v5 = vpop.xlane.xlu2 %3309  ;;  %v10307_v44 = vadd.f32 %v7532_v12, %v3464_v22  ;;  %v3255_v24 = vpop.xlane.xlu0 %3254 }
 0x4db   : > { %7541 = vpow2.f32 %v3542_v30  ;;  %v3348_v61 = vmax.f32 %v3251_v38, %v3310_v5  ;;  %v4156_v38 = vld [vmem:[%s8785_s21 + $0x98] sm:$0xff]  ;;  %7056 = vmatpush.xpose.msk.msra.mxu2 %vm1807_vm0, %v4166_v33 }
 0x4dc   : > { %7030 = vmatpush.xpose.msk.msra.mxu3 %vm1807_vm0, %v4156_v38  ;;  %v12919_v5 = vld [vmem:[#allocation36_spill] sm:$0xff]  ;;  %v12928_v38 = vld [vmem:[#allocation27_spill] sm:$0xff] }
 0x4dd   : > { %v3368_v21 = vsub.f32 %v9967_v34, %v3348_v61  ;;  %v3369_v62 = vsub.f32 %v9960_v20, %v3348_v61  ;;  %v3524_v41 = vsub.f32 %v9993_v26, %v3348_v61  ;;  %v10321_v20 = vpop.f32.mrf.mxu2  ;;  %v12920_v61 = vld [vmem:[#allocation24_spill] sm:$0xff] }
 0x4de   : > { %12913 = vst [vmem:[#allocation101_spill] sm:$0xff] %v10321_v20 }
 0x4df   : > { %v7538_v51 = vpop.eup %7537  ;;  %v3408_v3 = vmul.f32 1.442695, %v3368_v21  ;;  %v3410_v19 = vmul.f32 1.442695, %v3369_v62  ;;  %v3544_v47 = vmul.f32 1.442695, %v3524_v41  ;;  %2385 = vadd.xlane.f32.xlu1 %v2384_v45  ;;  %2393 = vadd.xlane.f32.xlu0 %v2392_v11 }
 0x4e0   : > { %v7540_v17 = vpop.eup %7539  ;;  %2397 = vadd.xlane.f32.xlu2 %v2396_v42  ;;  %3818 = vmatmul.f32.gmra.mxu1 %v7538_v51 }
 0x4e1   : > { %v10319_v34 = vpop.eup %7541  ;;  %7543 = vpow2.f32 %v3408_v3  ;;  %6977 = vmatmul.msk.f32.gmra.mxu0 %vm2117_vm1, %v7540_v17  ;;  %v3468_v46 = vsel %vm2117_vm1, %v7540_v17, 0.0  ;;  %v4155_v17 = vld [vmem:[%s8785_s21 + $0x90] sm:$0xff] }
 0x4e2   : > { %12912 = vst [vmem:[#allocation100_spill] sm:$0xff] %v10319_v34  ;;  %7545 = vpow2.f32 %v3410_v19  ;;  %6961 = vmatmul.msk.f32.gmra.mxu2 %vm2182_vm2, %v10319_v34  ;;  %v3313_v0 = vpop.xlane.xlu1 %3312  ;;  %v10327_v26 = vadd.f32 %v7538_v51, %v3468_v46  ;;  %v3259_v50 = vpop.xlane.xlu2 %3258  ;;  %7031 = vmatpush.xpose.msk.msra.mxu3 %vm1807_vm0, %v4155_v17  ;;  %v12923_v46 = vld [vmem:[#allocation23_spill] sm:$0xff] }
 0x4e3   : > { %7547 = vpow2.f32 %v3544_v47  ;;  %v3349_v49 = vmax.f32 %v3255_v24, %v3313_v0 }
 0x4e5   : > { %v3370_v63 = vsub.f32 %v9986_v15, %v3349_v49  ;;  %v3371_v31 = vsub.f32 %v12914_v54, %v3349_v49  ;;  %v3525_v28 = vsub.f32 %v10013_v39, %v3349_v49  ;;  %v10345_v10 = vpop.f32.mrf.mxu2  ;;  %v12924_v49 = vld [vmem:[#allocation22_spill] sm:$0xff] }
 0x4e6   : > { %12917 = vst [vmem:[#allocation65_spill] sm:$0xff] %v10345_v10  ;;  %v10627_v10 = vstv %s1665_s8 }
 0x4e7   : > { %v7544_v7 = vpop.eup %7543  ;;  %v3412_v25 = vmul.f32 1.442695, %v3370_v63  ;;  %v3414_v36 = vmul.f32 1.442695, %v3371_v31  ;;  %v3546_v48 = vmul.f32 1.442695, %v3525_v28 }
 0x4e8   : > { %v7546_v2 = vpop.eup %7545  ;;  %2401 = vadd.xlane.f32.xlu2 %v2400_v13  ;;  %3821 = vmatmul.f32.gmra.mxu1 %v7544_v7 }
 0x4e9   : > { %v10337_v12 = vpop.eup %7547  ;;  %7549 = vpow2.f32 %v3412_v25  ;;  %6978 = vmatmul.msk.f32.gmra.mxu0 %vm2117_vm1, %v7546_v2  ;;  %v3472_v15 = vsel %vm2117_vm1, %v7546_v2, 0.0  ;;  %v4189_v2 = vld [vmem:[%s10215_s14] sm:$0xff] }
 0x4ea   : > { %12916 = vst [vmem:[#allocation35_spill] sm:$0xff] %v10337_v12  ;;  %7551 = vpow2.f32 %v3414_v36  ;;  %6962 = vmatmul.msk.f32.gmra.mxu2 %vm2182_vm2, %v10337_v12  ;;  %v3316_v39 = vpop.xlane.xlu0 %3315  ;;  %v10343_v53 = vadd.f32 %v7544_v7, %v3472_v15  ;;  %v3263_v11 = vpop.xlane.xlu1 %3262  ;;  %7075 = vmatpush.xpose.msk.msrb.mxu1 %vm1807_vm0, %v4189_v2  ;;  %v12926_v15 = vld [vmem:[#allocation86_spill] sm:$0xff]  ;;  %v4165_v2 = vld [vmem:[%s8785_s21 + $0xe0] sm:$0xff] }
 0x4eb   : > { %7553 = vpow2.f32 %v3546_v48  ;;  %v3350_v30 = vmax.f32 %v3259_v50, %v3316_v39  ;;  %v4154_v50 = vld [vmem:[%s8785_s21 + $0x88] sm:$0xff]  ;;  %7057 = vmatpush.xpose.msk.msra.mxu2 %vm1807_vm0, %v4165_v2 }
 0x4ec   : > { %7032 = vmatpush.xpose.msk.msra.mxu3 %vm1807_vm0, %v4154_v50  ;;  %v4152_v50 = vld [vmem:[%s8785_s21 + $0x78] sm:$0xff]  ;;  %v4150_v2 = vld [vmem:[%s8785_s21 + $0x68] sm:$0xff] }
 0x4ed   : > { %v3372_v22 = vsub.f32 %v12918_v6, %v3350_v30  ;;  %v3373_v56 = vsub.f32 %v12919_v5, %v3350_v30  ;;  %v3526_v60 = vsub.f32 %v12920_v61, %v3350_v30  ;;  %v10364_v24 = vpop.f32.mrf.mxu2  ;;  %v12927_v30 = vld [vmem:[#allocation25_spill] sm:$0xff] }
 0x4ee   : > { %12922 = vst [vmem:[#allocation36_spill] sm:$0xff] %v10364_v24 }
 0x4ef   : > { %v7550_v23 = vpop.eup %7549  ;;  %v3416_v45 = vmul.f32 1.442695, %v3372_v22  ;;  %v3418_v21 = vmul.f32 1.442695, %v3373_v56  ;;  %v3548_v62 = vmul.f32 1.442695, %v3526_v60 }
 0x4f0   : > { %v7552_v41 = vpop.eup %7551  ;;  %3824 = vmatmul.f32.gmra.mxu1 %v7550_v23 }
 0x4f1   : > { %v10354_v42 = vpop.eup %7553  ;;  %7555 = vpow2.f32 %v3416_v45  ;;  %6979 = vmatmul.msk.f32.gmra.mxu0 %vm2117_vm1, %v7552_v41  ;;  %v3476_v51 = vsel %vm2117_vm1, %v7552_v41, 0.0 }
 0x4f2   : > { %12921 = vst [vmem:[#allocation21_spill] sm:$0xff] %v10354_v42  ;;  %7557 = vpow2.f32 %v3418_v21  ;;  %6963 = vmatmul.msk.f32.gmra.mxu2 %vm2182_vm2, %v10354_v42  ;;  %v3319_v3 = vpop.xlane.xlu2 %3318  ;;  %v10360_v19 = vadd.f32 %v7550_v23, %v3476_v51  ;;  %v3267_v13 = vpop.xlane.xlu0 %3266  ;;  %v4173_v42 = vld [vmem:[%s9306_s0 + $0x80] sm:$0xff] }
 0x4f3   : > { %7559 = vpow2.f32 %v3548_v62  ;;  %v3351_v47 = vmax.f32 %v3263_v11, %v3319_v3  ;;  %v4153_v3 = vld [vmem:[%s8785_s21 + $0x80] sm:$0xff] }
 0x4f4   : > { %7033 = vmatpush.xpose.msk.msra.mxu3 %vm1807_vm0, %v4153_v3  ;;  %v12938_v3 = vld [vmem:[#allocation28_spill] sm:$0xff] }
 0x4f5   : > { %v3374_v0 = vsub.f32 %v12923_v46, %v3351_v47  ;;  %v3375_v9 = vsub.f32 %v12924_v49, %v3351_v47  ;;  %v3527_v43 = vsub.f32 %v10051_v8, %v3351_v47  ;;  %v10384_v5 = vpop.f32.mrf.mxu2  ;;  %v12931_v47 = vld [vmem:[#allocation87_spill] sm:$0xff]  ;;  %v12932_v46 = vld [vmem:[#allocation26_spill] sm:$0xff] }
 0x4f6   : > { %12929 = vst [vmem:[#allocation23_spill] sm:$0xff] %v10384_v5 }
 0x4f7   : > { %v7556_v63 = vpop.eup %7555  ;;  %v3420_v54 = vmul.f32 1.442695, %v3374_v0  ;;  %v3422_v31 = vmul.f32 1.442695, %v3375_v9  ;;  %v3550_v28 = vmul.f32 1.442695, %v3527_v43 }
 0x4f8   : > { %v7558_v58 = vpop.eup %7557  ;;  %3827 = vmatmul.f32.gmra.mxu1 %v7556_v63  ;;  %7034 = vmatpush.xpose.msk.msra.mxu3 %vm1807_vm0, %v4152_v50 }
 0x4f9   : > { %v10369_v7 = vpop.eup %7559  ;;  %7561 = vpow2.f32 %v3420_v54  ;;  %6980 = vmatmul.msk.f32.gmra.mxu0 %vm2117_vm1, %v7558_v58  ;;  %v3480_v25 = vsel %vm2117_vm1, %v7558_v58, 0.0 }
 0x4fa   : > { %12925 = vst [vmem:[#allocation24_spill] sm:$0xff] %v10369_v7  ;;  %7563 = vpow2.f32 %v3422_v31  ;;  %6964 = vmatmul.msk.f32.gmra.mxu2 %vm2182_vm2, %v10369_v7  ;;  %v3322_v8 = vpop.xlane.xlu1 %3321  ;;  %v10375_v36 = vadd.f32 %v7556_v63, %v3480_v25  ;;  %v3271_v45 = vpop.xlane.xlu2 %3270 }
 0x4fb   : > { %7565 = vpow2.f32 %v3550_v28  ;;  %v3352_v48 = vmax.f32 %v3267_v13, %v3322_v8 }
 0x4fd   : > { %v3376_v39 = vsub.f32 %v12926_v15, %v3352_v48  ;;  %v3377_v33 = vsub.f32 %v12927_v30, %v3352_v48  ;;  %v3528_v6 = vsub.f32 %v12928_v38, %v3352_v48  ;;  %v10401_v13 = vpop.f32.mrf.mxu2 }
 0x4fe   : > { %12934 = vst [vmem:[#allocation25_spill] sm:$0xff] %v10401_v13  ;;  %v4084_v13 = vld [vmem:[%s12983_s2] sm:$0xff] }
 0x4ff   : > { %v7562_v22 = vpop.eup %7561  ;;  %v3424_v56 = vmul.f32 1.442695, %v3376_v39  ;;  %v3426_v61 = vmul.f32 1.442695, %v3377_v33  ;;  %v3552_v60 = vmul.f32 1.442695, %v3528_v6  ;;  %v10632_v18 = vadd.f32 %v10627_v10, %v4084_v13 }
 0x500   : > { %v7564_v23 = vpop.eup %7563  ;;  %3830 = vmatmul.f32.gmra.mxu1 %v7562_v22  ;;  %v6990_v13 = vld [vmem:[%s12799_s9 + $0x100] sm:$0xff] }
 0x501   : > { %v10386_v21 = vpop.eup %7565  ;;  %7567 = vpow2.f32 %v3424_v56  ;;  %6981 = vmatmul.msk.f32.gmra.mxu0 %vm2117_vm1, %v7564_v23  ;;  %v3484_v62 = vsel %vm2117_vm1, %v7564_v23, 0.0  ;;  %12984 = vst [vmem:[#allocation123_spill] sm:$0xff] %v10632_v18 }
 0x502   : > { %12930 = vst [vmem:[#allocation22_spill] sm:$0xff] %v10386_v21  ;;  %7569 = vpow2.f32 %v3426_v61  ;;  %6965 = vmatmul.msk.f32.gmra.mxu2 %vm2182_vm2, %v10386_v21  ;;  %v3325_v41 = vpop.xlane.xlu0 %3324  ;;  %v10392_v11 = vadd.f32 %v7562_v22, %v3484_v62  ;;  %v3275_v28 = vpop.xlane.xlu1 %3274  ;;  %v4151_v62 = vld [vmem:[%s8785_s21 + $0x70] sm:$0xff] }
 0x503   : > { %7571 = vpow2.f32 %v3552_v60  ;;  %v3353_v51 = vmax.f32 %v3271_v45, %v3325_v41  ;;  %7035 = vmatpush.xpose.msk.msra.mxu3 %vm1807_vm0, %v4151_v62  ;;  %v12937_v41 = vld [vmem:[#allocation88_spill] sm:$0xff] }
 0x505   : > { %v3378_v17 = vsub.f32 %v12931_v47, %v3353_v51  ;;  %v3379_v0 = vsub.f32 %v12932_v46, %v3353_v51  ;;  %v3529_v49 = vsub.f32 %v10089_v14, %v3353_v51 }
 0x507   : > { %v7568_v9 = vpop.eup %7567  ;;  %v3428_v43 = vmul.f32 1.442695, %v3378_v17  ;;  %v3430_v63 = vmul.f32 1.442695, %v3379_v0  ;;  %v3554_v54 = vmul.f32 1.442695, %v3529_v49  ;;  %7036 = vmatpush.xpose.msk.msra.mxu3 %vm1807_vm0, %v4150_v2 }
 0x508   : > { %v7570_v31 = vpop.eup %7569  ;;  %3833 = vmatmul.f32.gmra.mxu1 %v7568_v9  ;;  %v12939_v17 = vld [vmem:[#allocation30_spill] sm:$0xff] }
 0x509   : > { %v10399_v58 = vpop.eup %7571  ;;  %7573 = vpow2.f32 %v3428_v43  ;;  %6982 = vmatmul.msk.f32.gmra.mxu0 %vm2117_vm1, %v7570_v31  ;;  %v3488_v25 = vsel %vm2117_vm1, %v7570_v31, 0.0 }
 0x50a   : > { %12933 = vst [vmem:[#allocation86_spill] sm:$0xff] %v10399_v58  ;;  %7575 = vpow2.f32 %v3430_v63  ;;  %6966 = vmatmul.msk.f32.gmra.mxu2 %vm2182_vm2, %v10399_v58  ;;  %v3328_v14 = vpop.xlane.xlu2 %3327  ;;  %v10407_v8 = vadd.f32 %v7568_v9, %v3488_v25  ;;  %v3279_v23 = vpop.xlane.xlu0 %3278 }
 0x50b   : > { %7577 = vpow2.f32 %v3554_v54  ;;  %v3354_v48 = vmax.f32 %v3275_v28, %v3328_v14 }
 0x50d   : > { %v3380_v15 = vsub.f32 %v10082_v55, %v3354_v48  ;;  %v3381_v39 = vsub.f32 %v10075_v37, %v3354_v48  ;;  %v3530_v30 = vsub.f32 %v10108_v1, %v3354_v48  ;;  %v10424_v1 = vpop.f32.mrf.mxu2 }
 0x50e   : > { %12936 = vst [vmem:[#allocation87_spill] sm:$0xff] %v10424_v1 }
 0x50f   : > { %v7574_v33 = vpop.eup %7573  ;;  %v3432_v38 = vmul.f32 1.442695, %v3380_v15  ;;  %v3434_v6 = vmul.f32 1.442695, %v3381_v39  ;;  %v3556_v22 = vmul.f32 1.442695, %v3530_v30 }
 0x510   : > { %v7576_v56 = vpop.eup %7575  ;;  %3836 = vmatmul.f32.gmra.mxu1 %v7574_v33  ;;  %v12942_v15 = vld [vmem:[#allocation89_spill] sm:$0xff] }
 0x511   : > { %v10416_v61 = vpop.eup %7577  ;;  %7579 = vpow2.f32 %v3432_v38  ;;  %6983 = vmatmul.msk.f32.gmra.mxu0 %vm2117_vm1, %v7576_v56  ;;  %v3492_v60 = vsel %vm2117_vm1, %v7576_v56, 0.0  ;;  %v12943_v30 = vld [vmem:[#allocation29_spill] sm:$0xff]  ;;  %v12944_v38 = vld [vmem:[#allocation31_spill] sm:$0xff] }
 0x512   : > { %12935 = vst [vmem:[#allocation27_spill] sm:$0xff] %v10416_v61  ;;  %7581 = vpow2.f32 %v3434_v6  ;;  %6967 = vmatmul.msk.f32.gmra.mxu2 %vm2182_vm2, %v10416_v61  ;;  %v3331_v55 = vpop.xlane.xlu1 %3330  ;;  %v10422_v37 = vadd.f32 %v7574_v33, %v3492_v60  ;;  %v3283_v28 = vpop.xlane.xlu2 %3282 }
 0x513   : > { %7583 = vpow2.f32 %v3556_v22  ;;  %v3355_v45 = vmax.f32 %v3279_v23, %v3331_v55 }
 0x515   : > { %v3382_v51 = vsub.f32 %v12937_v41, %v3355_v45  ;;  %v3383_v47 = vsub.f32 %v12938_v3, %v3355_v45  ;;  %v3531_v46 = vsub.f32 %v12939_v17, %v3355_v45  ;;  %v10441_v50 = vpop.f32.mrf.mxu2  ;;  %v4149_v3 = vld [vmem:[%s8785_s21 + $0x60] sm:$0xff] }
 0x516   : > { %12941 = vst [vmem:[#allocation88_spill] sm:$0xff] %v10441_v50  ;;  %7037 = vmatpush.xpose.msk.msra.mxu3 %vm1807_vm0, %v4149_v3 }
 0x517   : > { %v7580_v0 = vpop.eup %7579  ;;  %v3436_v49 = vmul.f32 1.442695, %v3382_v51  ;;  %v3438_v9 = vmul.f32 1.442695, %v3383_v47  ;;  %v3558_v43 = vmul.f32 1.442695, %v3531_v46 }
 0x518   : > { %v7582_v63 = vpop.eup %7581  ;;  %3839 = vmatmul.f32.gmra.mxu1 %v7580_v0  ;;  %v12946_v46 = vld [vmem:[#allocation92_spill] sm:$0xff] }
 0x519   : > { %v10431_v54 = vpop.eup %7583  ;;  %7585 = vpow2.f32 %v3436_v49  ;;  %6984 = vmatmul.msk.f32.gmra.mxu0 %vm2117_vm1, %v7582_v63  ;;  %v3496_v31 = vsel %vm2117_vm1, %v7582_v63, 0.0  ;;  %v12947_v49 = vld [vmem:[#allocation91_spill] sm:$0xff]  ;;  %v4117_v63 = vld [vmem:[%s8817_s16 + $0x80] sm:$0xff] }
 0x51a   : > { %12940 = vst [vmem:[#allocation26_spill] sm:$0xff] %v10431_v54  ;;  %7587 = vpow2.f32 %v3438_v9  ;;  %6968 = vmatmul.msk.f32.gmra.mxu2 %vm2182_vm2, %v10431_v54  ;;  %v3334_v25 = vpop.xlane.xlu0 %3333  ;;  %v10437_v14 = vadd.f32 %v7580_v0, %v3496_v31  ;;  %v3287_v41 = vpop.xlane.xlu1 %3286  ;;  %5063 = vmatpush.msrb.mxu3 %v4184_v32  ;;  %v4085_v32 = vld [vmem:[%s12983_s2 + $0x8] sm:$0xff]  ;;  %v4175_v54 = vld [vmem:[%s9306_s0 + $0x90] sm:$0xff] }
 0x51b   : > { %7589 = vpow2.f32 %v3558_v43  ;;  %v3356_v48 = vmax.f32 %v3283_v28, %v3334_v25 }
 0x51d   : > { %v3384_v39 = vsub.f32 %v12942_v15, %v3356_v48  ;;  %v3385_v33 = vsub.f32 %v12943_v30, %v3356_v48  ;;  %v3532_v6 = vsub.f32 %v12944_v38, %v3356_v48  ;;  %v10460_v28 = vpop.f32.mrf.mxu2 }
 0x51e   : > { %12948 = vst [vmem:[#allocation30_spill] sm:$0xff] %v10460_v28 }
 0x51f   : > { %v7586_v22 = vpop.eup %7585  ;;  %v3440_v56 = vmul.f32 1.442695, %v3384_v39  ;;  %v3442_v60 = vmul.f32 1.442695, %v3385_v33  ;;  %v3560_v23 = vmul.f32 1.442695, %v3532_v6 }
 0x520   : > { %v7588_v55 = vpop.eup %7587  ;;  %3842 = vmatmul.f32.gmra.mxu1 %v7586_v22  ;;  %v10462_v39 = vmul.f32 0.125, %v4117_v63 }
 0x521   : > { %v10446_v45 = vpop.eup %7589  ;;  %7591 = vpow2.f32 %v3440_v56  ;;  %6985 = vmatmul.msk.f32.gmra.mxu0 %vm2117_vm1, %v7588_v55  ;;  %v3500_v62 = vsel %vm2117_vm1, %v7588_v55, 0.0  ;;  %v12951_v55 = vld [vmem:[#allocation33_spill] sm:$0xff] }
 0x522   : > { %12945 = vst [vmem:[#allocation28_spill] sm:$0xff] %v10446_v45  ;;  %7593 = vpow2.f32 %v3442_v60  ;;  %6969 = vmatmul.msk.f32.gmra.mxu2 %vm2182_vm2, %v10446_v45  ;;  %v3337_v51 = vpop.xlane.xlu2 %3336  ;;  %v10453_v47 = vadd.f32 %v7586_v22, %v3500_v62  ;;  %7038 = vmatmul.msk.f32.vlgmr.msra.gmra.mxu3 %vm1807_vm0, %v10462_v39  ;;  %v12950_v60 = vld [vmem:[#allocation94_spill] sm:$0xff] }
 0x523   : > { %7595 = vpow2.f32 %v3560_v23  ;;  %v3357_v17 = vmax.f32 %v3287_v41, %v3337_v51 }
 0x525   : > { %v3386_v0 = vsub.f32 %v12946_v46, %v3357_v17  ;;  %v3387_v9 = vsub.f32 %v12947_v49, %v3357_v17  ;;  %v3533_v43 = vsub.f32 %v10179_v57, %v3357_v17  ;;  %v3291_v57 = vpop.xlane.xlu0 %3290 }
 0x527   : > { %v7592_v31 = vpop.eup %7591  ;;  %v3444_v25 = vmul.f32 1.442695, %v3386_v0  ;;  %v3446_v48 = vmul.f32 1.442695, %v3387_v9  ;;  %v3562_v2 = vmul.f32 1.442695, %v3533_v43  ;;  %v10480_v9 = vpop.f32.mrf.mxu2 }
 0x528   : > { %v7594_v15 = vpop.eup %7593  ;;  %3845 = vmatmul.f32.gmra.mxu1 %v7592_v31  ;;  %v4118_v0 = vld [vmem:[%s8817_s16 + $0x88] sm:$0xff]  ;;  %12953 = vst [vmem:[#allocation31_spill] sm:$0xff] %v10480_v9 }
 0x529   : > { %v10464_v30 = vpop.eup %7595  ;;  %7597 = vpow2.f32 %v3444_v25  ;;  %6986 = vmatmul.msk.f32.gmra.mxu0 %vm2117_vm1, %v7594_v15  ;;  %v3504_v33 = vsel %vm2117_vm1, %v7594_v15, 0.0  ;;  %v4134_v43 = vmul.f32 0.125, %v4118_v0 }
 0x52a   : > { %12949 = vst [vmem:[#allocation89_spill] sm:$0xff] %v10464_v30  ;;  %7599 = vpow2.f32 %v3446_v48  ;;  %6970 = vmatmul.msk.f32.gmra.mxu2 %vm2182_vm2, %v10464_v30  ;;  %v3340_v38 = vpop.xlane.xlu1 %3339  ;;  %v10472_v6 = vadd.f32 %v7592_v31, %v3504_v33  ;;  %v3295_v63 = vpop.xlane.xlu2 %3294  ;;  %v12955_v33 = vld [vmem:[#allocation32_spill] sm:$0xff] }
 0x52b   : > { %7601 = vpow2.f32 %v3562_v2  ;;  %v3358_v22 = vmax.f32 %v3291_v57, %v3340_v38  ;;  %7039 = vmatmul.msk.f32.gmra.mxu3 %vm1807_vm0, %v4134_v43  ;;  %v12954_v2 = vld [vmem:[#allocation96_spill] sm:$0xff] }
 0x52d   : > { %v3388_v56 = vsub.f32 %v10170_v52, %v3358_v22  ;;  %v3389_v23 = vsub.f32 %v12950_v60, %v3358_v22  ;;  %v3534_v62 = vsub.f32 %v12951_v55, %v3358_v22 }
 0x52f   : > { %v7598_v41 = vpop.eup %7597  ;;  %v3448_v51 = vmul.f32 1.442695, %v3388_v56  ;;  %v3450_v3 = vmul.f32 1.442695, %v3389_v23  ;;  %v3564_v17 = vmul.f32 1.442695, %v3534_v62 }
 0x530   : > { %v7600_v46 = vpop.eup %7599  ;;  %3848 = vmatmul.f32.gmra.mxu1 %v7598_v41  ;;  %v4119_v62 = vld [vmem:[%s8817_s16 + $0x90] sm:$0xff] }
 0x531   : > { %v10478_v49 = vpop.eup %7601  ;;  %7603 = vpow2.f32 %v3448_v51  ;;  %6987 = vmatmul.msk.f32.gmra.mxu0 %vm2117_vm1, %v7600_v46  ;;  %v3508_v52 = vsel %vm2117_vm1, %v7600_v46, 0.0  ;;  %v4135_v51 = vmul.f32 0.125, %v4119_v62 }
 0x532   : > { %12952 = vst [vmem:[#allocation29_spill] sm:$0xff] %v10478_v49  ;;  %7605 = vpow2.f32 %v3450_v3  ;;  %6971 = vmatmul.msk.f32.gmra.mxu2 %vm2182_vm2, %v10478_v49  ;;  %v3343_v31 = vpop.xlane.xlu0 %3342  ;;  %v10486_v25 = vadd.f32 %v7598_v41, %v3508_v52  ;;  %v4120_v52 = vld [vmem:[%s8817_s16 + $0x98] sm:$0xff]  ;;  %v10871_v21 = vpop.xlane.xlu1 %2345 }
 0x533   : > { %7607 = vpow2.f32 %v3564_v17  ;;  %v3359_v48 = vmax.f32 %v3295_v63, %v3343_v31  ;;  %v10501_v17 = vpop.f32.mrf.mxu2  ;;  %7040 = vmatmul.msk.f32.gmra.mxu3 %vm1807_vm0, %v4135_v51  ;;  %v4136_v31 = vmul.f32 0.125, %v4120_v52  ;;  %13003 = vst [vmem:[#allocation126_spill] sm:$0xff] %v10871_v21 }
 0x534   : > { %12957 = vst [vmem:[#allocation91_spill] sm:$0xff] %v10501_v17 }
 0x535   : > { %v3390_v15 = vsub.f32 %v12954_v2, %v3359_v48  ;;  %v3391_v57 = vsub.f32 %v12955_v33, %v3359_v48  ;;  %v3535_v38 = vsub.f32 %v10220_v16, %v3359_v48 }
 0x537   : > { %v7604_v22 = vpop.eup %7603  ;;  %v3452_v56 = vmul.f32 1.442695, %v3390_v15  ;;  %v3454_v60 = vmul.f32 1.442695, %v3391_v57  ;;  %v3566_v23 = vmul.f32 1.442695, %v3535_v38 }
 0x538   : > { %v7606_v55 = vpop.eup %7605  ;;  %3851 = vmatmul.f32.gmra.mxu1 %v7604_v22  ;;  %v4121_v57 = vld [vmem:[%s8817_s16 + $0xa0] sm:$0xff] }
 0x539   : > { %v10493_v41 = vpop.eup %7607  ;;  %7609 = vpow2.f32 %v3452_v56  ;;  %6988 = vmatmul.msk.f32.gmra.mxu0 %vm2117_vm1, %v7606_v55  ;;  %v3512_v3 = vsel %vm2117_vm1, %v7606_v55, 0.0  ;;  %v4137_v38 = vmul.f32 0.125, %v4121_v57 }
 0x53a   : > { %12956 = vst [vmem:[#allocation92_spill] sm:$0xff] %v10493_v41  ;;  %7611 = vpow2.f32 %v3454_v60  ;;  %6972 = vmatmul.msk.f32.gmra.mxu2 %vm2182_vm2, %v10493_v41  ;;  %v10499_v16 = vadd.f32 %v7604_v22, %v3512_v3 }
 0x53b   : > { %7613 = vpow2.f32 %v3566_v23  ;;  %7041 = vmatmul.msk.f32.gmra.mxu3 %vm1807_vm0, %v4136_v31  ;;  %v10514_v15 = vpop.f32.mrf.mxu2  ;;  %v4122_v23 = vld [vmem:[%s8817_s16 + $0xa8] sm:$0xff] }
 0x53c   : > { %12959 = vst [vmem:[#allocation33_spill] sm:$0xff] %v10514_v15  ;;  %v4138_v55 = vmul.f32 0.125, %v4122_v23 }
 0x53f   : > { %v7610_v46 = vpop.eup %7609 }
 0x540   : > { %v7612_v0 = vpop.eup %7611  ;;  %3854 = vmatmul.f32.gmra.mxu1 %v7610_v46 }
 0x541   : > { %v10505_v63 = vpop.eup %7613  ;;  %6989 = vmatmul.msk.f32.gmra.mxu0 %vm2117_vm1, %v7612_v0  ;;  %v3516_v48 = vsel %vm2117_vm1, %v7612_v0, 0.0 }
 0x542   : > { %12958 = vst [vmem:[#allocation94_spill] sm:$0xff] %v10505_v63  ;;  %6973 = vmatmul.msk.f32.gmra.mxu2 %vm2182_vm2, %v10505_v63  ;;  %v10511_v2 = vadd.f32 %v7610_v46, %v3516_v48  ;;  %v4177_v63 = vld [vmem:[%s9306_s0 + $0xa0] sm:$0xff] }
 0x543   : > { %7042 = vmatmul.msk.f32.gmra.mxu3 %vm1807_vm0, %v4137_v38 }
 0x545   : > { %v3810_v33 = vpop.f32.mrf.mxu1 }
 0x548   : > { %7076 = vmatmul.msk.f32.vlgmr.msrb.gmra.mxu1 %vm1807_vm0, %v10462_v39 }
 0x54a   : > { %7058 = vmatmul.msk.f32.vlgmr.msra.gmra.mxu2 %vm1807_vm0, %v10462_v39  ;;  %v4123_v39 = vld [vmem:[%s8817_s16 + $0xb0] sm:$0xff] }
 0x54b   : > { %7043 = vmatmul.msk.f32.gmra.mxu3 %vm1807_vm0, %v4138_v55  ;;  %v4139_v0 = vmul.f32 0.125, %v4123_v39 }
 0x54d   : > { %v3697_v22 = vpop.f32.mrf.mxu2  ;;  %v3813_v56 = vpop.f32.mrf.mxu1 }
 0x54e   : > { %v10522_v60 = vadd.f32 %v3810_v33, %v3697_v22 }
 0x550   : > { %12960 = vst [vmem:[#allocation96_spill] sm:$0xff] %v10522_v60  ;;  %7077 = vmatmul.msk.f32.gmra.mxu1 %vm1807_vm0, %v4134_v43 }
 0x552   : > { %7059 = vmatmul.msk.f32.gmra.mxu2 %vm1807_vm0, %v4134_v43  ;;  %v4124_v43 = vld [vmem:[%s8817_s16 + $0xb8] sm:$0xff] }
 0x553   : > { %7044 = vmatmul.msk.f32.gmra.mxu3 %vm1807_vm0, %v4139_v0  ;;  %v4140_v57 = vmul.f32 0.125, %v4124_v43 }
 0x555   : > { %v3700_v62 = vpop.f32.mrf.mxu2  ;;  %v3816_v3 = vpop.f32.mrf.mxu1 }
 0x556   : > { %v10528_v46 = vadd.f32 %v3813_v56, %v3700_v62 }
 0x558   : > { %12961 = vst [vmem:[#allocation32_spill] sm:$0xff] %v10528_v46  ;;  %7078 = vmatmul.msk.f32.gmra.mxu1 %vm1807_vm0, %v4135_v51 }
 0x55a   : > { %7060 = vmatmul.msk.f32.gmra.mxu2 %vm1807_vm0, %v4135_v51  ;;  %v4125_v51 = vld [vmem:[%s8817_s16 + $0xc0] sm:$0xff] }
 0x55b   : > { %7045 = vmatmul.msk.f32.gmra.mxu3 %vm1807_vm0, %v4140_v57  ;;  %v4141_v62 = vmul.f32 0.125, %v4125_v51 }
 0x55d   : > { %v3703_v52 = vpop.f32.mrf.mxu2  ;;  %v3819_v48 = vpop.f32.mrf.mxu1 }
 0x55e   : > { %v10534_v33 = vadd.f32 %v3816_v3, %v3703_v52 }
 0x560   : > { %12962 = vst [vmem:[#allocation102_spill] sm:$0xff] %v10534_v33  ;;  %7079 = vmatmul.msk.f32.gmra.mxu1 %vm1807_vm0, %v4136_v31 }
 0x562   : > { %7061 = vmatmul.msk.f32.gmra.mxu2 %vm1807_vm0, %v4136_v31  ;;  %v4126_v31 = vld [vmem:[%s8817_s16 + $0xc8] sm:$0xff] }
 0x563   : > { %7046 = vmatmul.msk.f32.gmra.mxu3 %vm1807_vm0, %v4141_v62  ;;  %v4142_v43 = vmul.f32 0.125, %v4126_v31 }
 0x565   : > { %v3706_v22 = vpop.f32.mrf.mxu2  ;;  %v3822_v56 = vpop.f32.mrf.mxu1 }
 0x566   : > { %v10540_v23 = vadd.f32 %v3819_v48, %v3706_v22 }
 0x568   : > { %12963 = vst [vmem:[#allocation103_spill] sm:$0xff] %v10540_v23  ;;  %7080 = vmatmul.msk.f32.gmra.mxu1 %vm1807_vm0, %v4137_v38 }
 0x56a   : > { %7062 = vmatmul.msk.f32.gmra.mxu2 %vm1807_vm0, %v4137_v38  ;;  %v4127_v38 = vld [vmem:[%s8817_s16 + $0xd0] sm:$0xff] }
 0x56b   : > { %7047 = vmatmul.msk.f32.gmra.mxu3 %vm1807_vm0, %v4142_v43  ;;  %v4143_v17 = vmul.f32 0.125, %v4127_v38 }
 0x56d   : > { %v3709_v3 = vpop.f32.mrf.mxu2  ;;  %v3825_v39 = vpop.f32.mrf.mxu1 }
 0x56e   : > { %v10546_v52 = vadd.f32 %v3822_v56, %v3709_v3 }
 0x570   : > { %12964 = vst [vmem:[#allocation104_spill] sm:$0xff] %v10546_v52  ;;  %7081 = vmatmul.msk.f32.gmra.mxu1 %vm1807_vm0, %v4138_v55  ;;  %v4178_v52 = vld [vmem:[%s9306_s0 + $0xa8] sm:$0xff] }
 0x572   : > { %7063 = vmatmul.msk.f32.gmra.mxu2 %vm1807_vm0, %v4138_v55  ;;  %v4128_v55 = vld [vmem:[%s8817_s16 + $0xd8] sm:$0xff] }
 0x573   : > { %7048 = vmatmul.msk.f32.gmra.mxu3 %vm1807_vm0, %v4143_v17  ;;  %v4144_v9 = vmul.f32 0.125, %v4128_v55 }
 0x575   : > { %v3712_v48 = vpop.f32.mrf.mxu2  ;;  %v3828_v22 = vpop.f32.mrf.mxu1 }
 0x576   : > { %v10552_v51 = vadd.f32 %v3825_v39, %v3712_v48 }
 0x578   : > { %12965 = vst [vmem:[#allocation105_spill] sm:$0xff] %v10552_v51  ;;  %7082 = vmatmul.msk.f32.gmra.mxu1 %vm1807_vm0, %v4139_v0 }
 0x57a   : > { %7064 = vmatmul.msk.f32.gmra.mxu2 %vm1807_vm0, %v4139_v0  ;;  %v4129_v0 = vld [vmem:[%s8817_s16 + $0xe0] sm:$0xff] }
 0x57b   : > { %7049 = vmatmul.msk.f32.gmra.mxu3 %vm1807_vm0, %v4144_v9 }
 0x57d   : > { %v3715_v56 = vpop.f32.mrf.mxu2  ;;  %v3831_v3 = vpop.f32.mrf.mxu1 }
 0x57e   : > { %v10558_v31 = vadd.f32 %v3828_v22, %v3715_v56  ;;  %v4145_v22 = vmul.f32 0.125, %v4129_v0 }
 0x580   : > { %12966 = vst [vmem:[#allocation106_spill] sm:$0xff] %v10558_v31  ;;  %7083 = vmatmul.msk.f32.gmra.mxu1 %vm1807_vm0, %v4140_v57 }
 0x582   : > { %7065 = vmatmul.msk.f32.gmra.mxu2 %vm1807_vm0, %v4140_v57  ;;  %v4130_v57 = vld [vmem:[%s8817_s16 + $0xe8] sm:$0xff] }
 0x583   : > { %7050 = vmatmul.msk.f32.gmra.mxu3 %vm1807_vm0, %v4145_v22  ;;  %v4146_v50 = vmul.f32 0.125, %v4130_v57 }
 0x585   : > { %v3718_v39 = vpop.f32.mrf.mxu2  ;;  %v10564_v48 = vpop.f32.mrf.mxu1 }
 0x586   : > { %12967 = vst [vmem:[#allocation107_spill] sm:$0xff] %v10564_v48  ;;  %v10566_v38 = vadd.f32 %v3831_v3, %v3718_v39  ;;  %v4180_v48 = vld [vmem:[%s9306_s0 + $0xb8] sm:$0xff] }
 0x588   : > { %12968 = vst [vmem:[#allocation108_spill] sm:$0xff] %v10566_v38  ;;  %7084 = vmatmul.msk.f32.gmra.mxu1 %vm1807_vm0, %v4141_v62 }
 0x58a   : > { %7066 = vmatmul.msk.f32.gmra.mxu2 %vm1807_vm0, %v4141_v62  ;;  %v4131_v62 = vld [vmem:[%s8817_s16 + $0xf0] sm:$0xff] }
 0x58b   : > { %7051 = vmatmul.msk.f32.gmra.mxu3 %vm1807_vm0, %v4146_v50  ;;  %v4147_v0 = vmul.f32 0.125, %v4131_v62 }
 0x58d   : > { %v10572_v56 = vpop.f32.mrf.mxu2  ;;  %v10574_v55 = vpop.f32.mrf.mxu1 }
 0x58e   : > { %12969 = vst [vmem:[#allocation109_spill] sm:$0xff] %v10572_v56 }
 0x58f   : > { %12970 = vst [vmem:[#allocation110_spill] sm:$0xff] %v10574_v55  ;;  %v6994_v55 = vld [vmem:[%s12799_s9 + $0x120] sm:$0xff] }
 0x590   : > { %7085 = vmatmul.msk.f32.gmra.mxu1 %vm1807_vm0, %v4142_v43 }
 0x592   : > { %7067 = vmatmul.msk.f32.gmra.mxu2 %vm1807_vm0, %v4142_v43  ;;  %v4132_v43 = vld [vmem:[%s8817_s16 + $0xf8] sm:$0xff] }
 0x593   : > { %7052 = vmatmul.msk.f32.gmra.mxu3 %vm1807_vm0, %v4147_v0  ;;  %v4148_v57 = vmul.f32 0.125, %v4132_v43 }
 0x595   : > { %v10580_v3 = vpop.f32.mrf.mxu2  ;;  %v10582_v39 = vpop.f32.mrf.mxu1 }
 0x596   : > { %12971 = vst [vmem:[#allocation111_spill] sm:$0xff] %v10580_v3 }
 0x597   : > { %12972 = vst [vmem:[#allocation112_spill] sm:$0xff] %v10582_v39  ;;  %v12988_v39 = vld [vmem:[#allocation67_spill] sm:$0xff] }
 0x598   : > { %7086 = vmatmul.msk.f32.gmra.mxu1 %vm1807_vm0, %v4143_v17 }
 0x59a   : > { %7068 = vmatmul.msk.f32.gmra.mxu2 %vm1807_vm0, %v4143_v17 }
 0x59b   : > { %7053 = vmatmul.msk.f32.gmra.mxu3 %vm1807_vm0, %v4148_v57 }
 0x59d   : > { %v10588_v1 = vpop.f32.mrf.mxu2  ;;  %v10590_v5 = vpop.f32.mrf.mxu1 }
 0x59e   : > { %12973 = vst [vmem:[#allocation113_spill] sm:$0xff] %v10588_v1 }
 0x59f   : > { %12974 = vst [vmem:[#allocation114_spill] sm:$0xff] %v10590_v5 }
 0x5a0   : > { %7087 = vmatmul.msk.f32.gmra.mxu1 %vm1807_vm0, %v4144_v9 }
 0x5a2   : > { %7069 = vmatmul.msk.f32.gmra.mxu2 %vm1807_vm0, %v4144_v9 }
 0x5a5   : > { %v10596_v24 = vpop.f32.mrf.mxu2  ;;  %v10598_v62 = vpop.f32.mrf.mxu1 }
 0x5a6   : > { %12975 = vst [vmem:[#allocation115_spill] sm:$0xff] %v10596_v24  ;;  %v4318_v20 = vpop.f32.mrf.mxu3 }
 0x5a7   : > { %12976 = vst [vmem:[#allocation116_spill] sm:$0xff] %v10598_v62 }
 0x5a8   : > { %7088 = vmatmul.msk.f32.gmra.mxu1 %vm1807_vm0, %v4145_v22 }
 0x5aa   : > { %7070 = vmatmul.msk.f32.gmra.mxu2 %vm1807_vm0, %v4145_v22  ;;  %v4192_v22 = vld [vmem:[%s10616_s10 + $0x8] sm:$0xff] }
 0x5ab   : > { %4964 = vmatpush.msrb.mxu0 %v4192_v22 }
 0x5ad   : > { %v10602_v17 = vpop.f32.mrf.mxu2  ;;  %v10604_v15 = vpop.f32.mrf.mxu1 }
 0x5ae   : > { %12977 = vst [vmem:[#allocation117_spill] sm:$0xff] %v10602_v17  ;;  %v4321_v4 = vpop.f32.mrf.mxu3  ;;  %v4182_v17 = vld [vmem:[%s9306_s0 + $0xc8] sm:$0xff] }
 0x5af   : > { %12978 = vst [vmem:[#allocation118_spill] sm:$0xff] %v10604_v15 }
 0x5b0   : > { %7089 = vmatmul.msk.f32.gmra.mxu1 %vm1807_vm0, %v4146_v50 }
 0x5b2   : > { %7071 = vmatmul.msk.f32.gmra.mxu2 %vm1807_vm0, %v4146_v50 }
 0x5b5   : > { %v10608_v9 = vpop.f32.mrf.mxu2  ;;  %v10610_v43 = vpop.f32.mrf.mxu1 }
 0x5b6   : > { %12979 = vst [vmem:[#allocation119_spill] sm:$0xff] %v10608_v9  ;;  %v10654_v9 = vadd.f32 %v6990_v13, %v4318_v20  ;;  %v12987_v20 = vld [vmem:[#allocation69_spill] sm:$0xff] }
 0x5b7   : > { %12980 = vst [vmem:[#allocation120_spill] sm:$0xff] %v10610_v43  ;;  %v2403_v13 = vsel %vm2117_vm1, %v12987_v20, 0.0 }
 0x5b8   : > { %7090 = vmatmul.msk.f32.gmra.mxu1 %vm1807_vm0, %v4147_v0  ;;  %v2404_v1 = vadd.f32 %v12988_v39, %v2403_v13  ;;  %v6995_v39 = vld [vmem:[%s12799_s9 + $0x128] sm:$0xff] }
 0x5ba   : > { %7072 = vmatmul.msk.f32.gmra.mxu2 %vm1807_vm0, %v4147_v0  ;;  %v4324_v0 = vpop.f32.mrf.mxu3 }
 0x5bb   : > { %v10691_v13 = vadd.f32 %v6994_v55, %v4324_v0  ;;  %v12991_v55 = vld [vmem:[#allocation51_spill] sm:$0xff] }
 0x5bc   : > { %v2455_v0 = vsel %vm2182_vm2, %v12991_v55, 0.0 }
 0x5bd   : > { %v10619_v28 = vpop.f32.mrf.mxu2  ;;  %v10621_v50 = vpop.f32.mrf.mxu1 }
 0x5be   : > { %12981 = vst [vmem:[#allocation121_spill] sm:$0xff] %v10619_v28  ;;  %v4183_v28 = vld [vmem:[%s9306_s0 + $0xd0] sm:$0xff] }
 0x5bf   : > { %12982 = vst [vmem:[#allocation122_spill] sm:$0xff] %v10621_v50  ;;  %5064 = vmatpush.msrb.mxu3 %v4183_v28 }
 0x5c0   : > { %7091 = vmatmul.msk.f32.gmra.mxu1 %vm1807_vm0, %v4148_v57 }
 0x5c1   : > { %5065 = vmatpush.msrb.mxu3 %v4182_v17  ;;  %v6993_v17 = vld [vmem:[%s12799_s9 + $0x118] sm:$0xff] }
 0x5c2   : > { %7073 = vmatmul.msk.f32.gmra.mxu2 %vm1807_vm0, %v4148_v57  ;;  %v10649_v57 = vadd.f32 %v10627_v10, %v4085_v32 }
 0x5c4   : > { %12986 = vst [vmem:[#allocation125_spill] sm:$0xff] %v10649_v57 }
 0x5c5   : > { %v10634_v22 = vpop.f32.mrf.mxu2  ;;  %v4454_v43 = vpop.f32.mrf.mxu1 }
 0x5c6   : > { %12985 = vst [vmem:[#allocation124_spill] sm:$0xff] %v10634_v22  ;;  %v10637_v50 = vadd.f32 %v4454_v43, %v10632_v18  ;;  %v4327_v22 = vpop.f32.mrf.mxu3  ;;  %v6991_v43 = vld [vmem:[%s12799_s9 + $0x108] sm:$0xff] }
 0x5c8   : > { %v4566_v15 = vsel %vm2182_vm2, %v10637_v50, -inf }
 0x5c9   : > { %4567 = vmax.xlane.f32.xlu1 %v4566_v15 }
 0x5cd   : > { %v4383_v18 = vpop.f32.mrf.mxu2  ;;  %v4457_v28 = vpop.f32.mrf.mxu1 }
 0x5ce   : > { %v10656_v62 = vadd.f32 %v6991_v43, %v4383_v18  ;;  %v10659_v15 = vadd.f32 %v4457_v28, %v10649_v57  ;;  %v10669_v18 = vpop.f32.mrf.mxu3  ;;  %v4181_v57 = vld [vmem:[%s9306_s0 + $0xc0] sm:$0xff] }
 0x5cf   : > { %5066 = vmatpush.msrb.mxu3 %v4181_v57 }
 0x5d0   : > { %v4502_v32 = vsel %vm2117_vm1, %v10656_v62, -inf  ;;  %v4569_v5 = vsel %vm2182_vm2, %v10659_v15, -inf }
 0x5d1   : > { %v4503_v24 = vmax.f32 %v10654_v9, %v4502_v32  ;;  %4570 = vmax.xlane.f32.xlu1 %v4569_v5  ;;  %v12989_v5 = vld [vmem:[#allocation52_spill] sm:$0xff]  ;;  %5067 = vmatpush.msrb.mxu3 %v4180_v48 }
 0x5d2   : > { %v2458_v20 = vsel %vm2182_vm2, %v12989_v5, 0.0  ;;  %v6997_v48 = vld [vmem:[%s12799_s9 + $0x138] sm:$0xff] }
 0x5d3   : > { %4504 = vmax.xlane.f32.xlu0 %v4503_v24  ;;  %v6992_v24 = vld [vmem:[%s12799_s9 + $0x110] sm:$0xff] }
 0x5d4   : > { %v10689_v57 = vadd.f32 %v6992_v24, %v4321_v4 }
 0x5d5   : > { %v4386_v43 = vpop.f32.mrf.mxu2  ;;  %v4460_v28 = vpop.f32.mrf.mxu1 }
 0x5d6   : > { %v10676_v32 = vadd.f32 %v6993_v17, %v4386_v43  ;;  %v4086_v43 = vld [vmem:[%s12983_s2 + $0x10] sm:$0xff] }
 0x5d7   : > { %v10702_v56 = vadd.f32 %v10627_v10, %v4086_v43 }
 0x5d8   : > { %v4506_v3 = vsel %vm2117_vm1, %v10676_v32, -inf }
 0x5d9   : > { %2405 = vadd.xlane.f32.xlu1 %v2404_v1  ;;  %12990 = vst [vmem:[#allocation69_spill] sm:$0xff] %v10702_v56  ;;  %v10717_v43 = vadd.f32 %v4460_v28, %v10702_v56 }
 0x5db   : > { %2459 = vadd.xlane.f32.xlu0 %v2458_v20  ;;  %v4333_v20 = vpop.f32.mrf.mxu3 }
 0x5dd   : > { %v4389_v1 = vpop.f32.mrf.mxu2  ;;  %v4463_v17 = vpop.f32.mrf.mxu1 }
 0x5de   : > { %v10696_v5 = vadd.f32 %v6995_v39, %v4389_v1  ;;  %v4507_v39 = vmax.f32 %v10689_v57, %v4506_v3  ;;  %v6996_v1 = vld [vmem:[%s12799_s9 + $0x130] sm:$0xff]  ;;  %v4087_v3 = vld [vmem:[%s12983_s2 + $0x18] sm:$0xff] }
 0x5df   : > { %v10719_v55 = vadd.f32 %v6996_v1, %v4327_v22  ;;  %v4572_v22 = vsel %vm2182_vm2, %v10717_v43, -inf  ;;  %v12993_v1 = vld [vmem:[#allocation38_spill] sm:$0xff] }
 0x5e0   : > { %v4510_v4 = vsel %vm2117_vm1, %v10696_v5, -inf  ;;  %v2464_v56 = vsel %vm2182_vm2, %v12993_v1, 0.0  ;;  %v6999_v1 = vld [vmem:[%s12799_s9 + $0x148] sm:$0xff] }
 0x5e1   : > { %v4511_v24 = vmax.f32 %v10691_v13, %v4510_v4  ;;  %2456 = vadd.xlane.f32.xlu1 %v2455_v0 }
 0x5e3   : > { %4512 = vmax.xlane.f32.xlu2 %v4511_v24  ;;  %4508 = vmax.xlane.f32.xlu0 %v4507_v39  ;;  %v4179_v24 = vld [vmem:[%s9306_s0 + $0xb0] sm:$0xff]  ;;  %v10728_v39 = vadd.f32 %v10627_v10, %v4087_v3  ;;  %v4336_v31 = vpop.f32.mrf.mxu3  ;;  %v4088_v3 = vld [vmem:[%s12983_s2 + $0x20] sm:$0xff] }
 0x5e4   : > { %5068 = vmatpush.msrb.mxu3 %v4179_v24 }
 0x5e5   : > { %v4392_v38 = vpop.f32.mrf.mxu2  ;;  %v4466_v4 = vpop.f32.mrf.mxu1  ;;  %12992 = vst [vmem:[#allocation67_spill] sm:$0xff] %v10728_v39 }
 0x5e6   : > { %v10724_v0 = vadd.f32 %v6997_v48, %v4392_v38  ;;  %v10738_v38 = vadd.f32 %v4463_v17, %v10728_v39  ;;  %5069 = vmatpush.msrb.mxu3 %v4178_v52  ;;  %v6998_v17 = vld [vmem:[%s12799_s9 + $0x140] sm:$0xff]  ;;  %v7000_v52 = vld [vmem:[%s12799_s9 + $0x150] sm:$0xff] }
 0x5e7   : > { %v10771_v46 = vadd.f32 %v7000_v52, %v4333_v20  ;;  %v7002_v52 = vld [vmem:[%s12799_s9 + $0x160] sm:$0xff] }
 0x5e8   : > { %v4514_v28 = vsel %vm2117_vm1, %v10724_v0, -inf  ;;  %5070 = vmatpush.msrb.mxu3 %v4177_v63  ;;  %v7003_v63 = vld [vmem:[%s12799_s9 + $0x168] sm:$0xff]  ;;  %v10800_v41 = vadd.f32 %v7002_v52, %v4336_v31  ;;  %v12998_v52 = vld [vmem:[#allocation37_spill] sm:$0xff] }
 0x5e9   : > { %v4515_v51 = vmax.f32 %v10719_v55, %v4514_v28  ;;  %2465 = vadd.xlane.f32.xlu1 %v2464_v56  ;;  %v10748_v28 = vadd.f32 %v10627_v10, %v4088_v3 }
 0x5eb   : > { %4516 = vmax.xlane.f32.xlu2 %v4515_v51  ;;  %4573 = vmax.xlane.f32.xlu0 %v4572_v22  ;;  %12994 = vst [vmem:[#allocation52_spill] sm:$0xff] %v10748_v28  ;;  %v4575_v51 = vsel %vm2182_vm2, %v10738_v38, -inf  ;;  %v12995_v22 = vld [vmem:[#allocation39_spill] sm:$0xff]  ;;  %v4339_v23 = vpop.f32.mrf.mxu3  ;;  %v10766_v3 = vadd.f32 %v4466_v4, %v10748_v28  ;;  %v4191_v28 = vld [vmem:[%s10616_s10] sm:$0xff] }
 0x5ec   : > { %v2467_v39 = vsel %vm2182_vm2, %v12995_v22, 0.0  ;;  %v4089_v22 = vld [vmem:[%s12983_s2 + $0x28] sm:$0xff]  ;;  %4965 = vmatpush.msrb.mxu0 %v4191_v28  ;;  %v7004_v28 = vld [vmem:[%s12799_s9 + $0x170] sm:$0xff] }
 0x5ed   : > { %v4395_v48 = vpop.f32.mrf.mxu2  ;;  %v4469_v24 = vpop.f32.mrf.mxu1  ;;  %v10782_v4 = vadd.f32 %v10627_v10, %v4089_v22 }
 0x5ee   : > { %v10752_v56 = vadd.f32 %v6999_v1, %v4395_v48  ;;  %v7001_v48 = vld [vmem:[%s12799_s9 + $0x158] sm:$0xff]  ;;  %v10769_v1 = vadd.f32 %v6998_v17, %v10669_v18  ;;  %v4578_v18 = vsel %vm2182_vm2, %v10766_v3, -inf }
 0x5ef   : > { %12996 = vst [vmem:[#allocation51_spill] sm:$0xff] %v10782_v4 }
 0x5f3   : > { %2468 = vadd.xlane.f32.xlu2 %v2467_v39  ;;  %4576 = vmax.xlane.f32.xlu0 %v4575_v51  ;;  %v4518_v51 = vsel %vm2117_vm1, %v10752_v56, -inf  ;;  %v4342_v22 = vpop.f32.mrf.mxu3 }
 0x5f4   : > { %v4519_v17 = vmax.f32 %v10769_v1, %v4518_v51 }
 0x5f5   : > { %v4398_v33 = vpop.f32.mrf.mxu2  ;;  %v4472_v60 = vpop.f32.mrf.mxu1 }
 0x5f6   : > { %v10776_v39 = vadd.f32 %v7001_v48, %v4398_v33  ;;  %v10797_v48 = vadd.f32 %v4469_v24, %v10782_v4  ;;  %v2461_v4 = vsel %vm2182_vm2, %v12998_v52, 0.0 }
 0x5f8   : > { %v4522_v20 = vsel %vm2117_vm1, %v10776_v39, -inf  ;;  %v4581_v24 = vsel %vm2182_vm2, %v10797_v48, -inf }
 0x5f9   : > { %v4523_v33 = vmax.f32 %v10771_v46, %v4522_v20  ;;  %v4090_v20 = vld [vmem:[%s12983_s2 + $0x30] sm:$0xff] }
 0x5fa   : > { %v10809_v30 = vadd.f32 %v10627_v10, %v4090_v20 }
 0x5fb   : > { %4520 = vmax.xlane.f32.xlu2 %v4519_v17  ;;  %4579 = vmax.xlane.f32.xlu0 %v4578_v18  ;;  %v4176_v17 = vld [vmem:[%s9306_s0 + $0x98] sm:$0xff] }
 0x5fc   : > { %4524 = vmax.xlane.f32.xlu1 %v4523_v33  ;;  %5071 = vmatpush.msrb.mxu3 %v4176_v17  ;;  %12997 = vst [vmem:[#allocation38_spill] sm:$0xff] %v10809_v30  ;;  %v10827_v17 = vadd.f32 %v7004_v28, %v4339_v23 }
 0x5fd   : > { %v4401_v51 = vpop.f32.mrf.mxu2  ;;  %v4475_v49 = vpop.f32.mrf.mxu1 }
 0x5fe   : > { %v10805_v18 = vadd.f32 %v7003_v63, %v4401_v51  ;;  %v7005_v63 = vld [vmem:[%s12799_s9 + $0x178] sm:$0xff]  ;;  %v10825_v51 = vadd.f32 %v4472_v60, %v10809_v30  ;;  %5072 = vmatpush.msrb.mxu3 %v4175_v54  ;;  %v7006_v54 = vld [vmem:[%s12799_s9 + $0x180] sm:$0xff] }
 0x600   : > { %v4526_v31 = vsel %vm2117_vm1, %v10805_v18, -inf  ;;  %v4584_v23 = vsel %vm2182_vm2, %v10825_v51, -inf }
 0x601   : > { %v4527_v33 = vmax.f32 %v10800_v41, %v4526_v31  ;;  %v4091_v31 = vld [vmem:[%s12983_s2 + $0x38] sm:$0xff] }
 0x602   : > { %v10839_v60 = vadd.f32 %v10627_v10, %v4091_v31  ;;  %v7007_v31 = vld [vmem:[%s12799_s9 + $0x188] sm:$0xff] }
 0x603   : > { %4582 = vmax.xlane.f32.xlu2 %v4581_v24  ;;  %2462 = vadd.xlane.f32.xlu0 %v2461_v4  ;;  %v4092_v4 = vld [vmem:[%s12983_s2 + $0x40] sm:$0xff]  ;;  %v4345_v24 = vpop.f32.mrf.mxu3 }
 0x604   : > { %4528 = vmax.xlane.f32.xlu1 %v4527_v33  ;;  %12999 = vst [vmem:[#allocation39_spill] sm:$0xff] %v10839_v60  ;;  %v10858_v61 = vadd.f32 %v4475_v49, %v10839_v60 }
 0x605   : > { %v4404_v20 = vpop.f32.mrf.mxu2  ;;  %v4478_v52 = vpop.f32.mrf.mxu1 }
 0x606   : > { %v10832_v45 = vadd.f32 %v7005_v63, %v4404_v20  ;;  %v10847_v63 = vadd.f32 %v10627_v10, %v4092_v4  ;;  %v13001_v20 = vld [vmem:[#allocation40_spill] sm:$0xff]  ;;  %v10860_v4 = vadd.f32 %v7006_v54, %v4342_v22  ;;  %v4587_v49 = vsel %vm2182_vm2, %v10858_v61, -inf }
 0x607   : > { %v2470_v30 = vsel %vm2182_vm2, %v13001_v20, 0.0 }
 0x608   : > { %v4530_v33 = vsel %vm2117_vm1, %v10832_v45, -inf  ;;  %13000 = vst [vmem:[#allocation37_spill] sm:$0xff] %v10847_v63  ;;  %v10863_v58 = vadd.f32 %v4478_v52, %v10847_v63 }
 0x609   : > { %v4531_v28 = vmax.f32 %v10827_v17, %v4530_v33 }
 0x60a   : > { %13002 = vst [vmem:[#allocation40_spill] sm:$0xff] %v10863_v58  ;;  %v4590_v54 = vsel %vm2182_vm2, %v10863_v58, -inf }
 0x60b   : > { %4585 = vmax.xlane.f32.xlu2 %v4584_v23  ;;  %2471 = vadd.xlane.f32.xlu0 %v2470_v30  ;;  %v4093_v30 = vld [vmem:[%s12983_s2 + $0x48] sm:$0xff]  ;;  %v4348_v52 = vpop.f32.mrf.mxu3 }
 0x60c   : > { %4532 = vmax.xlane.f32.xlu1 %v4531_v28  ;;  %v4174_v23 = vld [vmem:[%s9306_s0 + $0x88] sm:$0xff] }
 0x60d   : > { %v4407_v33 = vpop.f32.mrf.mxu2  ;;  %v4481_v7 = vpop.f32.mrf.mxu1  ;;  %5073 = vmatpush.msrb.mxu3 %v4174_v23  ;;  %v7009_v23 = vld [vmem:[%s12799_s9 + $0x198] sm:$0xff] }
 0x60e   : > { %v10865_v20 = vadd.f32 %v7007_v31, %v4407_v33  ;;  %v10881_v31 = vadd.f32 %v10627_v10, %v4093_v30  ;;  %v7008_v33 = vld [vmem:[%s12799_s9 + $0x190] sm:$0xff] }
 0x60f   : > { %v10889_v60 = vadd.f32 %v7008_v33, %v4345_v24  ;;  %v4094_v30 = vld [vmem:[%s12983_s2 + $0x50] sm:$0xff]  ;;  %5074 = vmatpush.msrb.mxu3 %v4173_v42  ;;  %v13010_v33 = vld [vmem:[#allocation42_spill] sm:$0xff]  ;;  %v10912_v42 = vpop.xlane.xlu2 %2349 }
 0x610   : > { %v4534_v22 = vsel %vm2117_vm1, %v10865_v20, -inf  ;;  %13004 = vst [vmem:[#allocation127_spill] sm:$0xff] %v10881_v31 }
 0x611   : > { %v4535_v28 = vmax.f32 %v10860_v4, %v4534_v22  ;;  %13005 = vst [vmem:[#allocation128_spill] sm:$0xff] %v10889_v60  ;;  %v10892_v22 = vadd.f32 %v4481_v7, %v10881_v31 }
 0x612   : > { %13011 = vst [vmem:[#allocation42_spill] sm:$0xff] %v10912_v42  ;;  %v13016_v42 = vld [vmem:[#allocation43_spill] sm:$0xff] }
 0x613   : > { %4588 = vmax.xlane.f32.xlu2 %v4587_v49  ;;  %4536 = vmax.xlane.f32.xlu0 %v4535_v28  ;;  %13006 = vst [vmem:[#allocation129_spill] sm:$0xff] %v10892_v22  ;;  %v10902_v28 = vpop.xlane.xlu1 %2357  ;;  %v4593_v7 = vsel %vm2182_vm2, %v10892_v22, -inf  ;;  %v4351_v31 = vpop.f32.mrf.mxu3 }
 0x614   : > { %4591 = vmax.xlane.f32.xlu1 %v4590_v54  ;;  %13008 = vst [vmem:[#allocation131_spill] sm:$0xff] %v10902_v28  ;;  %v10921_v22 = vpop.xlane.xlu0 %2353 }
 0x615   : > { %v4410_v63 = vpop.f32.mrf.mxu2  ;;  %v4484_v54 = vpop.f32.mrf.mxu1  ;;  %13013 = vst [vmem:[#allocation134_spill] sm:$0xff] %v10921_v22 }
 0x616   : > { %v10894_v21 = vadd.f32 %v7009_v23, %v4410_v63  ;;  %v10908_v63 = vadd.f32 %v10627_v10, %v4094_v30  ;;  %v2476_v23 = vsel %vm2182_vm2, %v13010_v33, 0.0  ;;  %v7011_v30 = vld [vmem:[%s12799_s9 + $0x1a8] sm:$0xff] }
 0x617   : > { %v10949_v12 = vpop.xlane.xlu2 %2361 }
 0x618   : > { %13007 = vst [vmem:[#allocation130_spill] sm:$0xff] %v10894_v21  ;;  %v4538_v49 = vsel %vm2117_vm1, %v10894_v21, -inf  ;;  %v10915_v28 = vadd.f32 %v4484_v54, %v10908_v63  ;;  %v13015_v54 = vld [vmem:[#allocation45_spill] sm:$0xff] }
 0x619   : > { %v4539_v24 = vmax.f32 %v10889_v60, %v4538_v49  ;;  %13009 = vst [vmem:[#allocation132_spill] sm:$0xff] %v10908_v63  ;;  %v4172_v49 = vld [vmem:[%s9306_s0 + $0x78] sm:$0xff]  ;;  %v2485_v63 = vsel %vm2182_vm2, %v13015_v54, 0.0  ;;  %v2479_v60 = vsel %vm2182_vm2, %v13016_v42, 0.0 }
 0x61a   : > { %13012 = vst [vmem:[#allocation133_spill] sm:$0xff] %v10915_v28  ;;  %5075 = vmatpush.msrb.mxu3 %v4172_v49  ;;  %v4596_v33 = vsel %vm2182_vm2, %v10915_v28, -inf  ;;  %v7012_v49 = vld [vmem:[%s12799_s9 + $0x1b0] sm:$0xff]  ;;  %v4095_v42 = vld [vmem:[%s12983_s2 + $0x58] sm:$0xff] }
 0x61b   : > { %2477 = vadd.xlane.f32.xlu2 %v2476_v23  ;;  %4540 = vmax.xlane.f32.xlu0 %v4539_v24  ;;  %v10937_v22 = vpop.xlane.xlu1 %2369  ;;  %v10944_v58 = vadd.f32 %v7012_v49, %v4351_v31  ;;  %13020 = vst [vmem:[#allocation137_spill] sm:$0xff] %v10949_v12  ;;  %v7014_v49 = vld [vmem:[%s12799_s9 + $0x1c0] sm:$0xff] }
 0x61c   : > { %4594 = vmax.xlane.f32.xlu1 %v4593_v7  ;;  %v7010_v7 = vld [vmem:[%s12799_s9 + $0x1a0] sm:$0xff]  ;;  %13017 = vst [vmem:[#allocation45_spill] sm:$0xff] %v10937_v22 }
 0x61d   : > { %v4413_v21 = vpop.f32.mrf.mxu2  ;;  %v4487_v23 = vpop.f32.mrf.mxu1  ;;  %v10942_v28 = vadd.f32 %v7010_v7, %v4348_v52  ;;  %13019 = vst [vmem:[#allocation136_spill] sm:$0xff] %v10944_v58  ;;  %v10958_v52 = vadd.f32 %v10627_v10, %v4095_v42  ;;  %v7015_v42 = vld [vmem:[%s12799_s9 + $0x1c8] sm:$0xff] }
 0x61e   : > { %v10925_v24 = vadd.f32 %v7011_v30, %v4413_v21  ;;  %v7013_v21 = vld [vmem:[%s12799_s9 + $0x1b8] sm:$0xff]  ;;  %v4354_v30 = vpop.f32.mrf.mxu3  ;;  %v10962_v7 = vpop.xlane.xlu0 %2365 }
 0x61f   : > { %13018 = vst [vmem:[#allocation43_spill] sm:$0xff] %v10942_v28 }
 0x620   : > { %13014 = vst [vmem:[#allocation135_spill] sm:$0xff] %v10925_v24 }
 0x621   : > { %13022 = vst [vmem:[#allocation139_spill] sm:$0xff] %v10958_v52 }
 0x622   : > { %13023 = vst [vmem:[#allocation140_spill] sm:$0xff] %v10962_v7 }
 0x623   : > { %2486 = vadd.xlane.f32.xlu2 %v2485_v63  ;;  %2480 = vadd.xlane.f32.xlu0 %v2479_v60  ;;  %v4542_v60 = vsel %vm2117_vm1, %v10925_v24, -inf  ;;  %v10975_v7 = vpop.xlane.xlu1 %2381  ;;  %v4186_v24 = vld [vmem:[%s9306_s0 + $0xe8] sm:$0xff] }
 0x624   : > { %4597 = vmax.xlane.f32.xlu1 %v4596_v33  ;;  %v4543_v33 = vmax.f32 %v10942_v28, %v4542_v60  ;;  %v10973_v60 = vadd.f32 %v4487_v23, %v10958_v52  ;;  %13026 = vst [vmem:[#allocation141_spill] sm:$0xff] %v10975_v7  ;;  %v10986_v23 = vpop.xlane.xlu2 %2373  ;;  %v4170_v7 = vld [vmem:[%s9306_s0 + $0x68] sm:$0xff]  ;;  %v4185_v28 = vld [vmem:[%s9306_s0 + $0xe0] sm:$0xff] }
 0x625   : > { %v4416_v54 = vpop.f32.mrf.mxu2  ;;  %13029 = vst [vmem:[#allocation144_spill] sm:$0xff] %v10986_v23  ;;  %v13031_v23 = vld [vmem:[#allocation44_spill] sm:$0xff] }
 0x626   : > { %v10951_v22 = vadd.f32 %v7013_v21, %v4416_v54  ;;  %v13024_v21 = vld [vmem:[#allocation41_spill] sm:$0xff]  ;;  %v11003_v34 = vpop.xlane.xlu0 %2389 }
 0x627   : > { %v2473_v54 = vsel %vm2182_vm2, %v13024_v21, 0.0  ;;  %13025 = vst [vmem:[#allocation41_spill] sm:$0xff] %v10973_v60  ;;  %v4357_v21 = vpop.f32.mrf.mxu3 }
 0x628   : > { %13021 = vst [vmem:[#allocation138_spill] sm:$0xff] %v10951_v22  ;;  %v4546_v63 = vsel %vm2117_vm1, %v10951_v22, -inf  ;;  %v10977_v22 = vadd.f32 %v7014_v49, %v4354_v30  ;;  %v4599_v30 = vsel %vm2182_vm2, %v10973_v60, -inf  ;;  %v7155_v60 = vld [vmem:[%s8785_s21 + $0x1d8] sm:$0xff] }
 0x629   : > { %v4547_v31 = vmax.f32 %v10944_v58, %v4546_v63  ;;  %v4490_v63 = vpop.f32.mrf.mxu1  ;;  %v4171_v58 = vld [vmem:[%s9306_s0 + $0x70] sm:$0xff]  ;;  %13032 = vst [vmem:[#allocation44_spill] sm:$0xff] %v11003_v34  ;;  %v13038_v34 = vld [vmem:[#allocation48_spill] sm:$0xff]  ;;  %7184 = vmatpush.xpose.msk.msra.mxu1 %vm1807_vm0, %v7155_v60 }
 0x62a   : > { %13027 = vst [vmem:[#allocation142_spill] sm:$0xff] %v10977_v22  ;;  %5076 = vmatpush.msrb.mxu3 %v4171_v58  ;;  %v7017_v58 = vld [vmem:[%s12799_s9 + $0x1d8] sm:$0xff] }
 0x62b   : > { %4548 = vmax.xlane.f32.xlu2 %v4547_v31  ;;  %4544 = vmax.xlane.f32.xlu0 %v4543_v33  ;;  %v4096_v31 = vld [vmem:[%s12983_s2 + $0x60] sm:$0xff] }
 0x62c   : > { %2474 = vadd.xlane.f32.xlu1 %v2473_v54  ;;  %v4188_v54 = vld [vmem:[%s9306_s0 + $0xf8] sm:$0xff]  ;;  %v10993_v49 = vadd.f32 %v10627_v10, %v4096_v31  ;;  %5077 = vmatpush.msrb.mxu3 %v4170_v7  ;;  %v4097_v7 = vld [vmem:[%s12983_s2 + $0x68] sm:$0xff] }
 0x62d   : > { %v4419_v12 = vpop.f32.mrf.mxu2  ;;  %5140 = vmatpush.msrb.mxu2 %v4188_v54  ;;  %v4169_v54 = vld [vmem:[%s9306_s0 + $0x60] sm:$0xff] }
 0x62e   : > { %v10982_v33 = vadd.f32 %v7015_v42, %v4419_v12  ;;  %13030 = vst [vmem:[#allocation145_spill] sm:$0xff] %v10993_v49  ;;  %v4187_v12 = vld [vmem:[%s9306_s0 + $0xf0] sm:$0xff]  ;;  %v11006_v31 = vadd.f32 %v4490_v63, %v10993_v49  ;;  %5078 = vmatpush.msrb.mxu3 %v4169_v54  ;;  %v11026_v49 = vpop.xlane.xlu2 %2377  ;;  %v7018_v54 = vld [vmem:[%s12799_s9 + $0x1e0] sm:$0xff] }
 0x62f   : > { %5141 = vmatpush.msrb.mxu2 %v4187_v12  ;;  %13037 = vst [vmem:[#allocation150_spill] sm:$0xff] %v11026_v49 }
 0x630   : > { %13028 = vst [vmem:[#allocation143_spill] sm:$0xff] %v10982_v33  ;;  %v4550_v52 = vsel %vm2117_vm1, %v10982_v33, -inf  ;;  %v2482_v33 = vsel %vm2182_vm2, %v13031_v23, 0.0  ;;  %v11014_v23 = vpop.xlane.xlu1 %2385  ;;  %v4602_v63 = vsel %vm2182_vm2, %v11006_v31, -inf }
 0x631   : > { %v4551_v42 = vmax.f32 %v10977_v22, %v4550_v52  ;;  %13033 = vst [vmem:[#allocation146_spill] sm:$0xff] %v11006_v31  ;;  %5142 = vmatpush.msrb.mxu2 %v4186_v24  ;;  %v7016_v24 = vld [vmem:[%s12799_s9 + $0x1d0] sm:$0xff]  ;;  %v7159_v22 = vld [vmem:[%s8785_s21 + $0x1f8] sm:$0xff] }
 0x632   : > { %13034 = vst [vmem:[#allocation147_spill] sm:$0xff] %v11014_v23  ;;  %7216 = vmatpush.xpose.msk.msra.mxu0 %vm1807_vm0, %v7159_v22 }
 0x633   : > { %4552 = vmax.xlane.f32.xlu2 %v4551_v42  ;;  %4600 = vmax.xlane.f32.xlu0 %v4599_v30  ;;  %v4493_v30 = vpop.f32.mrf.mxu1  ;;  %v11024_v42 = vadd.f32 %v10627_v10, %v4097_v7  ;;  %v7019_v7 = vld [vmem:[%s12799_s9 + $0x1e8] sm:$0xff] }
 0x634   : > { %2483 = vadd.xlane.f32.xlu1 %v2482_v33  ;;  %5143 = vmatpush.msrb.mxu2 %v4185_v28  ;;  %v4360_v33 = vpop.f32.mrf.mxu3  ;;  %v2494_v28 = vsel %vm2182_vm2, %v13038_v34, 0.0 }
 0x635   : > { %v4422_v52 = vpop.f32.mrf.mxu2  ;;  %13036 = vst [vmem:[#allocation149_spill] sm:$0xff] %v11024_v42  ;;  %v11041_v34 = vadd.f32 %v4493_v30, %v11024_v42 }
 0x636   : > { %v11016_v12 = vadd.f32 %v7017_v58, %v4422_v52  ;;  %v11033_v58 = vadd.f32 %v7016_v24, %v4357_v21  ;;  %v13040_v52 = vld [vmem:[#allocation47_spill] sm:$0xff]  ;;  %v11045_v21 = vpop.f32.mrf.mxu0 }
 0x637   : > { %v2491_v23 = vsel %vm2182_vm2, %v13040_v52, 0.0  ;;  %13041 = vst [vmem:[#allocation47_spill] sm:$0xff] %v11041_v34  ;;  %v11052_v52 = vpop.xlane.xlu0 %2393 }
 0x638   : > { %13035 = vst [vmem:[#allocation148_spill] sm:$0xff] %v11016_v12  ;;  %v4554_v49 = vsel %vm2117_vm1, %v11016_v12, -inf  ;;  %v7181_v12 = vld [vmem:[%s10215_s14 + $0x18] sm:$0xff] }
 0x639   : > { %13039 = vst [vmem:[#allocation48_spill] sm:$0xff] %v11033_v58  ;;  %v4555_v30 = vmax.f32 %v11033_v58, %v4554_v49  ;;  %v7020_v49 = vld [vmem:[%s12799_s9 + $0x1f0] sm:$0xff]  ;;  %7236 = vmatpush.xpose.msk.msra.mxu3 %vm1807_vm0, %v7181_v12  ;;  %v7153_v12 = vld [vmem:[%s8785_s21 + $0x1c8] sm:$0xff] }
 0x63a   : > { %13042 = vst [vmem:[#allocation151_spill] sm:$0xff] %v11045_v21  ;;  %v4605_v21 = vsel %vm2182_vm2, %v11041_v34, -inf  ;;  %v7154_v58 = vld [vmem:[%s8785_s21 + $0x1d0] sm:$0xff] }
 0x63b   : > { %2495 = vadd.xlane.f32.xlu2 %v2494_v28  ;;  %4603 = vmax.xlane.f32.xlu0 %v4602_v63  ;;  %v11047_v28 = vadd.f32 %v7018_v54, %v4360_v33  ;;  %v4098_v63 = vld [vmem:[%s12983_s2 + $0x70] sm:$0xff]  ;;  %13044 = vst [vmem:[#allocation153_spill] sm:$0xff] %v11052_v52  ;;  %v4496_v42 = vpop.f32.mrf.mxu1  ;;  %v11075_v52 = vpop.xlane.xlu2 %2397 }
 0x63c   : > { %2492 = vadd.xlane.f32.xlu1 %v2491_v23  ;;  %v4568_v23 = vpop.xlane.xlu1 %4567  ;;  %v11064_v54 = vadd.f32 %v10627_v10, %v4098_v63  ;;  %v7021_v63 = vld [vmem:[%s12799_s9 + $0x1f8] sm:$0xff]  ;;  %13047 = vst [vmem:[#allocation156_spill] sm:$0xff] %v11075_v52  ;;  %7185 = vmatpush.xpose.msk.msra.mxu1 %vm1807_vm0, %v7154_v58  ;;  %v13051_v52 = vld [vmem:[#allocation46_spill] sm:$0xff] }
 0x63d   : > { %v4425_v24 = vpop.f32.mrf.mxu2  ;;  %13043 = vst [vmem:[#allocation152_spill] sm:$0xff] %v11047_v28 }
 0x63e   : > { %v11054_v31 = vadd.f32 %v7019_v7, %v4425_v24  ;;  %13046 = vst [vmem:[#allocation155_spill] sm:$0xff] %v11064_v54  ;;  %v4363_v24 = vpop.f32.mrf.mxu3  ;;  %v11078_v22 = vadd.f32 %v4496_v42, %v11064_v54 }
 0x640   : > { %13045 = vst [vmem:[#allocation154_spill] sm:$0xff] %v11054_v31  ;;  %v4558_v33 = vsel %vm2117_vm1, %v11054_v31, -inf  ;;  %v4099_v31 = vld [vmem:[%s12983_s2 + $0x78] sm:$0xff]  ;;  %7186 = vmatpush.xpose.msk.msra.mxu1 %vm1807_vm0, %v7153_v12 }
 0x641   : > { %v4559_v7 = vmax.f32 %v11047_v28, %v4558_v33  ;;  %v11080_v33 = vadd.f32 %v7020_v49, %v4363_v24  ;;  %v11096_v49 = vadd.f32 %v10627_v10, %v4099_v31 }
 0x643   : > { %4556 = vmax.xlane.f32.xlu2 %v4555_v30  ;;  %4606 = vmax.xlane.f32.xlu0 %v4605_v21  ;;  %v11087_v30 = vpop.f32.mrf.mxu0  ;;  %13050 = vst [vmem:[#allocation159_spill] sm:$0xff] %v11096_v49  ;;  %v4499_v54 = vpop.f32.mrf.mxu1 }
 0x644   : > { %4560 = vmax.xlane.f32.xlu1 %v4559_v7  ;;  %13049 = vst [vmem:[#allocation158_spill] sm:$0xff] %v11087_v30  ;;  %v4608_v7 = vsel %vm2182_vm2, %v11078_v22, -inf  ;;  %v2488_v30 = vsel %vm2182_vm2, %v13051_v52, 0.0  ;;  %v13053_v52 = vld [vmem:[#allocation49_spill] sm:$0xff] }
 0x645   : > { %v4428_v60 = vpop.f32.mrf.mxu2 }
 0x646   : > { %v11085_v28 = vadd.f32 %v7021_v63, %v4428_v60  ;;  %v4505_v21 = vpop.xlane.xlu0 %4504  ;;  %v4571_v60 = vpop.xlane.xlu1 %4570 }
 0x647   : > { %v4614_v34 = vmax.f32 %v4505_v21, %v4568_v23 }
 0x648   : > { %13048 = vst [vmem:[#allocation157_spill] sm:$0xff] %v11085_v28  ;;  %v4562_v42 = vsel %vm2117_vm1, %v11085_v28, -inf }
 0x649   : > { %v4630_v24 = vsub.f32 %v10654_v9, %v4614_v34  ;;  %v4631_v63 = vsub.f32 %v10656_v62, %v4614_v34  ;;  %v4790_v23 = vsub.f32 %v10637_v50, %v4614_v34  ;;  %v4563_v21 = vmax.f32 %v11080_v33, %v4562_v42  ;;  %v11109_v62 = vpop.xlane.xlu2 %2401  ;;  %v13055_v42 = vld [vmem:[#allocation50_spill] sm:$0xff] }
 0x64a   : > { %v11107_v9 = vadd.f32 %v4499_v54, %v11096_v49  ;;  %13052 = vst [vmem:[#allocation46_spill] sm:$0xff] %v11109_v62 }
 0x64b   : > { %v4662_v10 = vmul.f32 1.442695, %v4630_v24  ;;  %v4664_v31 = vmul.f32 1.442695, %v4631_v63  ;;  %v4806_v28 = vmul.f32 1.442695, %v4790_v23  ;;  %4609 = vmax.xlane.f32.xlu2 %v4608_v7  ;;  %2489 = vadd.xlane.f32.xlu0 %v2488_v30  ;;  %v11117_v34 = vpop.f32.mrf.mxu0 }
 0x64c   : > { %4564 = vmax.xlane.f32.xlu1 %v4563_v21  ;;  %v4611_v58 = vsel %vm2182_vm2, %v11107_v9, -inf  ;;  %v2497_v30 = vsel %vm2182_vm2, %v13053_v52, 0.0 }
 0x64d   : > { %7615 = vpow2.f32 %v4662_v10 }
 0x64e   : > { %7617 = vpow2.f32 %v4664_v31  ;;  %v11111_v50 = vpop.xlane.xlu0 %2459  ;;  %v11121_v7 = vpop.xlane.xlu1 %2405 }
 0x64f   : > { %7619 = vpow2.f32 %v4806_v28  ;;  %13054 = vst [vmem:[#allocation49_spill] sm:$0xff] %v11121_v7  ;;  %v2500_v28 = vsel %vm2182_vm2, %v13055_v42, 0.0 }
 0x653   : > { %v7616_v54 = vpop.eup %7615  ;;  %4612 = vmax.xlane.f32.xlu2 %v4611_v58  ;;  %2498 = vadd.xlane.f32.xlu0 %v2497_v30  ;;  %v7152_v58 = vld [vmem:[%s8785_s21 + $0x1c0] sm:$0xff] }
 0x654   : > { %v7618_v24 = vpop.eup %7617  ;;  %2501 = vadd.xlane.f32.xlu1 %v2500_v28  ;;  %5079 = vmatmul.f32.vlgmr.msrb.gmra.mxu3 %v7616_v54  ;;  %v11138_v28 = vpop.f32.mrf.mxu0 }
 0x655   : > { %v11125_v63 = vpop.eup %7619  ;;  %7108 = vmatmul.msk.f32.vlgmr.msrb.gmra.mxu2 %vm2117_vm1, %v7618_v24  ;;  %v4726_v23 = vsel %vm2117_vm1, %v7618_v24, 0.0  ;;  %7187 = vmatpush.xpose.msk.msra.mxu1 %vm1807_vm0, %v7152_v58 }
 0x656   : > { %13056 = vst [vmem:[#allocation50_spill] sm:$0xff] %v11125_v63  ;;  %7092 = vmatmul.msk.f32.vlgmr.msrb.gmra.mxu0 %vm2182_vm2, %v11125_v63  ;;  %v4513_v21 = vpop.xlane.xlu2 %4512  ;;  %v4509_v10 = vpop.xlane.xlu0 %4508  ;;  %v11131_v31 = vadd.f32 %v7616_v54, %v4726_v23  ;;  %v7158_v54 = vld [vmem:[%s8785_s21 + $0x1f0] sm:$0xff]  ;;  %v7151_v23 = vld [vmem:[%s8785_s21 + $0x1b8] sm:$0xff] }
 0x657   : > { %v4615_v12 = vmax.f32 %v4509_v10, %v4571_v60  ;;  %v11143_v60 = vpop.xlane.xlu1 %2456  ;;  %7217 = vmatpush.xpose.msk.msra.mxu0 %vm1807_vm0, %v7158_v54 }
 0x659   : > { %v4632_v52 = vsub.f32 %v10689_v57, %v4615_v12  ;;  %v4633_v30 = vsub.f32 %v10676_v32, %v4615_v12  ;;  %v4791_v42 = vsub.f32 %v10659_v15, %v4615_v12  ;;  %7188 = vmatpush.xpose.msk.msra.mxu1 %vm1807_vm0, %v7151_v23 }
 0x65b   : > { %v4666_v24 = vmul.f32 1.442695, %v4632_v52  ;;  %v4668_v49 = vmul.f32 1.442695, %v4633_v30  ;;  %v4808_v63 = vmul.f32 1.442695, %v4791_v42  ;;  %3458 = vadd.xlane.f32.xlu2 %v10257_v27  ;;  %3462 = vadd.xlane.f32.xlu0 %v10283_v40 }
 0x65c   : > { %3466 = vadd.xlane.f32.xlu1 %v10307_v44  ;;  %v7150_v30 = vld [vmem:[%s8785_s21 + $0x1b0] sm:$0xff] }
 0x65d   : > { %7621 = vpow2.f32 %v4666_v24  ;;  %7189 = vmatpush.xpose.msk.msra.mxu1 %vm1807_vm0, %v7150_v30 }
 0x65e   : > { %7623 = vpow2.f32 %v4668_v49  ;;  %v4517_v32 = vpop.xlane.xlu2 %4516  ;;  %v4574_v57 = vpop.xlane.xlu0 %4573 }
 0x65f   : > { %7625 = vpow2.f32 %v4808_v63  ;;  %v4616_v15 = vmax.f32 %v4513_v21, %v4574_v57 }
 0x661   : > { %v4634_v27 = vsub.f32 %v10691_v13, %v4616_v15  ;;  %v4635_v40 = vsub.f32 %v10696_v5, %v4616_v15  ;;  %v4792_v44 = vsub.f32 %v10717_v43, %v4616_v15  ;;  %v11157_v13 = vpop.f32.mrf.mxu0 }
 0x663   : > { %v7622_v10 = vpop.eup %7621  ;;  %v4670_v12 = vmul.f32 1.442695, %v4634_v27  ;;  %v4672_v58 = vmul.f32 1.442695, %v4635_v40  ;;  %v4810_v49 = vmul.f32 1.442695, %v4792_v44  ;;  %3470 = vadd.xlane.f32.xlu2 %v10327_v26  ;;  %3474 = vadd.xlane.f32.xlu0 %v10343_v53 }
 0x664   : > { %v7624_v63 = vpop.eup %7623  ;;  %3478 = vadd.xlane.f32.xlu1 %v10360_v19  ;;  %5082 = vmatmul.f32.gmra.mxu3 %v7622_v10  ;;  %v11167_v19 = vpop.xlane.xlu1 %2465 }
 0x665   : > { %v11155_v21 = vpop.eup %7625  ;;  %7627 = vpow2.f32 %v4670_v12  ;;  %7109 = vmatmul.msk.f32.gmra.mxu2 %vm2117_vm1, %v7624_v63  ;;  %v4730_v5 = vsel %vm2117_vm1, %v7624_v63, 0.0 }
 0x666   : > { %13057 = vst [vmem:[#allocation160_spill] sm:$0xff] %v11155_v21  ;;  %7629 = vpow2.f32 %v4672_v58  ;;  %7093 = vmatmul.msk.f32.gmra.mxu0 %vm2182_vm2, %v11155_v21  ;;  %v11163_v26 = vpop.xlane.xlu2 %2468  ;;  %v4577_v53 = vpop.xlane.xlu0 %4576  ;;  %v11165_v43 = vadd.f32 %v7622_v10, %v4730_v5 }
 0x667   : > { %7631 = vpow2.f32 %v4810_v49  ;;  %v4617_v52 = vmax.f32 %v4517_v32, %v4577_v53  ;;  %v7149_v49 = vld [vmem:[%s8785_s21 + $0x1a8] sm:$0xff] }
 0x668   : > { %7190 = vmatpush.xpose.msk.msra.mxu1 %vm1807_vm0, %v7149_v49 }
 0x669   : > { %v4636_v42 = vsub.f32 %v10719_v55, %v4617_v52  ;;  %v4637_v24 = vsub.f32 %v10724_v0, %v4617_v52  ;;  %v4793_v57 = vsub.f32 %v10738_v38, %v4617_v52 }
 0x66b   : > { %v7628_v15 = vpop.eup %7627  ;;  %v4674_v54 = vmul.f32 1.442695, %v4636_v42  ;;  %v4676_v23 = vmul.f32 1.442695, %v4637_v24  ;;  %v4812_v27 = vmul.f32 1.442695, %v4793_v57  ;;  %3482 = vadd.xlane.f32.xlu2 %v10375_v36  ;;  %3486 = vadd.xlane.f32.xlu0 %v10392_v11  ;;  %v11185_v11 = vpop.f32.mrf.mxu0 }
 0x66c   : > { %v7630_v40 = vpop.eup %7629  ;;  %3490 = vadd.xlane.f32.xlu1 %v10407_v8  ;;  %5085 = vmatmul.f32.gmra.mxu3 %v7628_v15  ;;  %v7148_v24 = vld [vmem:[%s8785_s21 + $0x1a0] sm:$0xff] }
 0x66d   : > { %v11177_v32 = vpop.eup %7631  ;;  %7633 = vpow2.f32 %v4674_v54  ;;  %7110 = vmatmul.msk.f32.gmra.mxu2 %vm2117_vm1, %v7630_v40  ;;  %v4734_v55 = vsel %vm2117_vm1, %v7630_v40, 0.0  ;;  %7191 = vmatpush.xpose.msk.msra.mxu1 %vm1807_vm0, %v7148_v24  ;;  %v7180_v24 = vld [vmem:[%s10215_s14 + $0x10] sm:$0xff] }
 0x66e   : > { %13058 = vst [vmem:[#allocation161_spill] sm:$0xff] %v11177_v32  ;;  %7635 = vpow2.f32 %v4676_v23  ;;  %7094 = vmatmul.msk.f32.gmra.mxu0 %vm2182_vm2, %v11177_v32  ;;  %v4521_v0 = vpop.xlane.xlu2 %4520  ;;  %v4580_v36 = vpop.xlane.xlu0 %4579  ;;  %v11183_v38 = vadd.f32 %v7628_v15, %v4734_v55  ;;  %7237 = vmatpush.xpose.msk.msra.mxu3 %vm1807_vm0, %v7180_v24  ;;  %v13070_v24 = vld [vmem:[#allocation21_spill] sm:$0xff] }
 0x66f   : > { %7637 = vpow2.f32 %v4812_v27  ;;  %v4618_v8 = vmax.f32 %v4521_v0, %v4580_v36  ;;  %v4525_v44 = vpop.xlane.xlu1 %4524 }
 0x671   : > { %v4638_v10 = vsub.f32 %v10769_v1, %v4618_v8  ;;  %v4639_v12 = vsub.f32 %v10752_v56, %v4618_v8  ;;  %v4794_v58 = vsub.f32 %v10766_v3, %v4618_v8 }
 0x673   : > { %v7634_v63 = vpop.eup %7633  ;;  %v4678_v5 = vmul.f32 1.442695, %v4638_v10  ;;  %v4680_v53 = vmul.f32 1.442695, %v4639_v12  ;;  %v4814_v52 = vmul.f32 1.442695, %v4794_v58  ;;  %3494 = vadd.xlane.f32.xlu2 %v10422_v37  ;;  %3498 = vadd.xlane.f32.xlu0 %v10437_v14  ;;  %v11206_v57 = vpop.f32.mrf.mxu0 }
 0x674   : > { %v7636_v30 = vpop.eup %7635  ;;  %3502 = vadd.xlane.f32.xlu1 %v10453_v47  ;;  %5088 = vmatmul.f32.gmra.mxu3 %v7634_v63 }
 0x675   : > { %v11194_v42 = vpop.eup %7637  ;;  %7639 = vpow2.f32 %v4678_v5  ;;  %7111 = vmatmul.msk.f32.gmra.mxu2 %vm2117_vm1, %v7636_v30  ;;  %v4738_v56 = vsel %vm2117_vm1, %v7636_v30, 0.0  ;;  %v3571_v5 = vsel %vm2182_vm2, %v10273_v59, 0.0 }
 0x676   : > { %13059 = vst [vmem:[#allocation162_spill] sm:$0xff] %v11194_v42  ;;  %7641 = vpow2.f32 %v4680_v53  ;;  %7095 = vmatmul.msk.f32.gmra.mxu0 %vm2182_vm2, %v11194_v42  ;;  %v4583_v37 = vpop.xlane.xlu2 %4582  ;;  %v11201_v14 = vpop.xlane.xlu0 %2462  ;;  %v11203_v3 = vadd.f32 %v7634_v63, %v4738_v56  ;;  %v3568_v63 = vsel %vm2182_vm2, %v10247_v29, 0.0 }
 0x677   : > { %7643 = vpow2.f32 %v4814_v52  ;;  %v4619_v47 = vmax.f32 %v4525_v44, %v4583_v37  ;;  %v4529_v1 = vpop.xlane.xlu1 %4528 }
 0x679   : > { %v4640_v15 = vsub.f32 %v10771_v46, %v4619_v47  ;;  %v4641_v54 = vsub.f32 %v10776_v39, %v4619_v47  ;;  %v4795_v23 = vsub.f32 %v10797_v48, %v4619_v47 }
 0x67b   : > { %v7640_v27 = vpop.eup %7639  ;;  %v4682_v40 = vmul.f32 1.442695, %v4640_v15  ;;  %v4684_v55 = vmul.f32 1.442695, %v4641_v54  ;;  %v4816_v0 = vmul.f32 1.442695, %v4795_v23  ;;  %3506 = vadd.xlane.f32.xlu2 %v10472_v6  ;;  %3510 = vadd.xlane.f32.xlu0 %v10486_v25  ;;  %v11236_v52 = vpop.f32.mrf.mxu0 }
 0x67c   : > { %v7642_v36 = vpop.eup %7641  ;;  %3514 = vadd.xlane.f32.xlu1 %v10499_v16  ;;  %5091 = vmatmul.f32.gmra.mxu3 %v7640_v27  ;;  %v7157_v6 = vld [vmem:[%s8785_s21 + $0x1e8] sm:$0xff]  ;;  %v7147_v25 = vld [vmem:[%s8785_s21 + $0x198] sm:$0xff]  ;;  %v7146_v15 = vld [vmem:[%s8785_s21 + $0x190] sm:$0xff] }
 0x67d   : > { %v11215_v46 = vpop.eup %7643  ;;  %7645 = vpow2.f32 %v4682_v40  ;;  %7112 = vmatmul.msk.f32.gmra.mxu2 %vm2117_vm1, %v7642_v36  ;;  %v4742_v39 = vsel %vm2117_vm1, %v7642_v36, 0.0  ;;  %7218 = vmatpush.xpose.msk.msra.mxu0 %vm1807_vm0, %v7157_v6  ;;  %v13063_v6 = vld [vmem:[#allocation35_spill] sm:$0xff] }
 0x67e   : > { %13060 = vst [vmem:[#allocation163_spill] sm:$0xff] %v11215_v46  ;;  %7647 = vpow2.f32 %v4684_v55  ;;  %7096 = vmatmul.msk.f32.gmra.mxu0 %vm2182_vm2, %v11215_v46  ;;  %v4586_v48 = vpop.xlane.xlu2 %4585  ;;  %v11221_v8 = vpop.xlane.xlu0 %2471  ;;  %v11225_v44 = vadd.f32 %v7640_v27, %v4742_v39  ;;  %7192 = vmatpush.xpose.msk.msra.mxu1 %vm1807_vm0, %v7147_v25  ;;  %v3574_v55 = vsel %vm2182_vm2, %v10297_v35, 0.0  ;;  %v13062_v39 = vld [vmem:[#allocation100_spill] sm:$0xff]  ;;  %v3580_v25 = vsel %vm2182_vm2, %v13063_v6, 0.0  ;;  %v7125_v46 = vld [vmem:[%s8817_s16 + $0x188] sm:$0xff] }
 0x67f   : > { %7649 = vpow2.f32 %v4816_v0  ;;  %v4620_v16 = vmax.f32 %v4529_v1, %v4586_v48  ;;  %v4533_v10 = vpop.xlane.xlu1 %4532  ;;  %v3577_v48 = vsel %vm2182_vm2, %v13062_v39, 0.0 }
 0x681   : > { %v4642_v12 = vsub.f32 %v10800_v41, %v4620_v16  ;;  %v4643_v58 = vsub.f32 %v10805_v18, %v4620_v16  ;;  %v4796_v49 = vsub.f32 %v10825_v51, %v4620_v16 }
 0x682   : > { %7193 = vmatpush.xpose.msk.msra.mxu1 %vm1807_vm0, %v7146_v15  ;;  %v3583_v15 = vsel %vm2182_vm2, %v13070_v24, 0.0 }
 0x683   : > { %v7646_v53 = vpop.eup %7645  ;;  %v4686_v30 = vmul.f32 1.442695, %v4642_v12  ;;  %v4688_v56 = vmul.f32 1.442695, %v4643_v58  ;;  %v4818_v37 = vmul.f32 1.442695, %v4796_v49  ;;  %3518 = vadd.xlane.f32.xlu2 %v10511_v2  ;;  %3569 = vadd.xlane.f32.xlu0 %v3568_v63 }
 0x684   : > { %v7648_v41 = vpop.eup %7647  ;;  %3572 = vadd.xlane.f32.xlu1 %v3571_v5  ;;  %5094 = vmatmul.f32.gmra.mxu3 %v7646_v53  ;;  %v13065_v58 = vld [vmem:[#allocation40_spill] sm:$0xff] }
 0x685   : > { %v11239_v18 = vpop.eup %7649  ;;  %7651 = vpow2.f32 %v4686_v30  ;;  %7113 = vmatmul.msk.f32.gmra.mxu2 %vm2117_vm1, %v7648_v41  ;;  %v4746_v29 = vsel %vm2117_vm1, %v7648_v41, 0.0 }
 0x686   : > { %13061 = vst [vmem:[#allocation164_spill] sm:$0xff] %v11239_v18  ;;  %7653 = vpow2.f32 %v4688_v56  ;;  %7097 = vmatmul.msk.f32.gmra.mxu0 %vm2182_vm2, %v11239_v18  ;;  %v4589_v59 = vpop.xlane.xlu2 %4588  ;;  %v4537_v51 = vpop.xlane.xlu0 %4536  ;;  %v11245_v2 = vadd.f32 %v7646_v53, %v4746_v29 }
 0x687   : > { %7655 = vpow2.f32 %v4818_v37  ;;  %v4621_v47 = vmax.f32 %v4533_v10, %v4589_v59  ;;  %v4592_v1 = vpop.xlane.xlu1 %4591  ;;  %v7145_v37 = vld [vmem:[%s8785_s21 + $0x188] sm:$0xff]  ;;  %v13068_v59 = vld [vmem:[#allocation128_spill] sm:$0xff] }
 0x688   : > { %v4622_v54 = vmax.f32 %v4537_v51, %v4592_v1  ;;  %7194 = vmatpush.xpose.msk.msra.mxu1 %vm1807_vm0, %v7145_v37 }
 0x689   : > { %v4644_v23 = vsub.f32 %v10827_v17, %v4621_v47  ;;  %v4645_v27 = vsub.f32 %v10832_v45, %v4621_v47  ;;  %v4797_v40 = vsub.f32 %v10858_v61, %v4621_v47  ;;  %v13069_v47 = vld [vmem:[#allocation130_spill] sm:$0xff] }
 0x68a   : > { %v4646_v0 = vsub.f32 %v10860_v4, %v4622_v54  ;;  %v4647_v36 = vsub.f32 %v10865_v20, %v4622_v54  ;;  %v11264_v4 = vpop.f32.mrf.mxu0  ;;  %v4798_v49 = vsub.f32 %v13065_v58, %v4622_v54  ;;  %v13071_v54 = vld [vmem:[#allocation24_spill] sm:$0xff] }
 0x68b   : > { %v7652_v16 = vpop.eup %7651  ;;  %v4690_v10 = vmul.f32 1.442695, %v4644_v23  ;;  %v4692_v17 = vmul.f32 1.442695, %v4645_v27  ;;  %v4820_v12 = vmul.f32 1.442695, %v4797_v40  ;;  %3575 = vadd.xlane.f32.xlu2 %v3574_v55  ;;  %3578 = vadd.xlane.f32.xlu0 %v3577_v48 }
 0x68c   : > { %v7654_v61 = vpop.eup %7653  ;;  %v4694_v45 = vmul.f32 1.442695, %v4646_v0  ;;  %3581 = vadd.xlane.f32.xlu1 %v3580_v25  ;;  %5097 = vmatmul.f32.gmra.mxu3 %v7652_v16  ;;  %v4696_v20 = vmul.f32 1.442695, %v4647_v36  ;;  %v4822_v29 = vmul.f32 1.442695, %v4798_v49 }
 0x68d   : > { %v11262_v35 = vpop.eup %7655  ;;  %7657 = vpow2.f32 %v4690_v10  ;;  %7114 = vmatmul.msk.f32.gmra.mxu2 %vm2117_vm1, %v7654_v61  ;;  %v4750_v63 = vsel %vm2117_vm1, %v7654_v61, 0.0  ;;  %v3586_v23 = vsel %vm2182_vm2, %v13071_v54, 0.0  ;;  %v13072_v40 = vld [vmem:[#allocation22_spill] sm:$0xff]  ;;  %v7144_v49 = vld [vmem:[%s8785_s21 + $0x180] sm:$0xff] }
 0x68e   : > { %13064 = vst [vmem:[#allocation100_spill] sm:$0xff] %v11262_v35  ;;  %7659 = vpow2.f32 %v4692_v17  ;;  %7098 = vmatmul.msk.f32.gmra.mxu0 %vm2182_vm2, %v11262_v35  ;;  %v11271_v5 = vpop.xlane.xlu2 %2477  ;;  %v4541_v53 = vpop.xlane.xlu0 %4540  ;;  %v11273_v30 = vadd.f32 %v7652_v16, %v4750_v63  ;;  %v3589_v55 = vsel %vm2182_vm2, %v13072_v40, 0.0  ;;  %7195 = vmatpush.xpose.msk.msra.mxu1 %vm1807_vm0, %v7144_v49  ;;  %v13086_v49 = vld [vmem:[#allocation133_spill] sm:$0xff] }
 0x68f   : > { %13066 = vst [vmem:[#allocation35_spill] sm:$0xff] %v11271_v5  ;;  %7661 = vpow2.f32 %v4820_v12  ;;  %v4595_v56 = vpop.xlane.xlu1 %4594 }
 0x690   : > { %13067 = vst [vmem:[#allocation40_spill] sm:$0xff] %v11273_v30  ;;  %7663 = vpow2.f32 %v4694_v45  ;;  %v4623_v41 = vmax.f32 %v4541_v53, %v4595_v56  ;;  %v13077_v45 = vld [vmem:[#allocation129_spill] sm:$0xff]  ;;  %v13079_v56 = vld [vmem:[#allocation86_spill] sm:$0xff] }
 0x691   : > { %7665 = vpow2.f32 %v4696_v20  ;;  %v3592_v37 = vsel %vm2182_vm2, %v13079_v56, 0.0  ;;  %v13087_v56 = vld [vmem:[#allocation28_spill] sm:$0xff] }
 0x692   : > { %v4648_v51 = vsub.f32 %v13068_v59, %v4623_v41  ;;  %v4649_v1 = vsub.f32 %v13069_v47, %v4623_v41  ;;  %7667 = vpow2.f32 %v4822_v29  ;;  %v11297_v61 = vpop.f32.mrf.mxu0  ;;  %v4799_v20 = vsub.f32 %v13077_v45, %v4623_v41  ;;  %v13080_v29 = vld [vmem:[#allocation27_spill] sm:$0xff]  ;;  %v13082_v41 = vld [vmem:[#allocation26_spill] sm:$0xff] }
 0x693   : > { %v7658_v27 = vpop.eup %7657  ;;  %3584 = vadd.xlane.f32.xlu2 %v3583_v15  ;;  %3587 = vadd.xlane.f32.xlu0 %v3586_v23  ;;  %v3595_v59 = vsel %vm2182_vm2, %v13080_v29, 0.0  ;;  %v13085_v45 = vld [vmem:[#allocation135_spill] sm:$0xff] }
 0x694   : > { %v7660_v0 = vpop.eup %7659  ;;  %v4698_v36 = vmul.f32 1.442695, %v4648_v51  ;;  %v4700_v39 = vmul.f32 1.442695, %v4649_v1  ;;  %3590 = vadd.xlane.f32.xlu1 %v3589_v55  ;;  %5100 = vmatmul.f32.gmra.mxu3 %v7658_v27  ;;  %v4824_v47 = vmul.f32 1.442695, %v4799_v20 }
 0x695   : > { %v11285_v48 = vpop.eup %7661  ;;  %7115 = vmatmul.msk.f32.gmra.mxu2 %vm2117_vm1, %v7660_v0  ;;  %v4754_v6 = vsel %vm2117_vm1, %v7660_v0, 0.0  ;;  %v3598_v1 = vsel %vm2182_vm2, %v13082_v41, 0.0  ;;  %v7156_v0 = vld [vmem:[%s8785_s21 + $0x1e0] sm:$0xff] }
 0x696   : > { %13073 = vst [vmem:[#allocation128_spill] sm:$0xff] %v11285_v48  ;;  %v7664_v25 = vpop.eup %7663  ;;  %7669 = vpow2.f32 %v4698_v36  ;;  %7099 = vmatmul.msk.f32.gmra.mxu0 %vm2182_vm2, %v11285_v48  ;;  %v11291_v16 = vpop.xlane.xlu2 %2486  ;;  %v11295_v17 = vadd.f32 %v7658_v27, %v4754_v6  ;;  %v7143_v36 = vld [vmem:[%s8785_s21 + $0x178] sm:$0xff] }
 0x697   : > { %13074 = vst [vmem:[#allocation130_spill] sm:$0xff] %v11291_v16  ;;  %v11293_v10 = vpop.xlane.xlu0 %2480  ;;  %v7666_v12 = vpop.eup %7665  ;;  %7671 = vpow2.f32 %v4700_v39  ;;  %7219 = vmatpush.xpose.msk.msra.mxu0 %vm1807_vm0, %v7156_v0  ;;  %7196 = vmatpush.xpose.msk.msra.mxu1 %vm1807_vm0, %v7143_v36 }
 0x698   : > { %13075 = vst [vmem:[#allocation21_spill] sm:$0xff] %v11293_v10  ;;  %v4598_v58 = vpop.xlane.xlu1 %4597  ;;  %v4758_v63 = vsel %vm2117_vm1, %v7666_v12, 0.0  ;;  %v11309_v51 = vpop.eup %7667  ;;  %7673 = vpow2.f32 %v4824_v47 }
 0x699   : > { %13076 = vst [vmem:[#allocation24_spill] sm:$0xff] %v11295_v17  ;;  %v11303_v53 = vadd.f32 %v7664_v25, %v4758_v63 }
 0x69a   : > { %13081 = vst [vmem:[#allocation129_spill] sm:$0xff] %v11309_v51  ;;  %v11325_v6 = vpop.f32.mrf.mxu0 }
 0x69b   : > { %13078 = vst [vmem:[#allocation22_spill] sm:$0xff] %v11303_v53  ;;  %3593 = vadd.xlane.f32.xlu2 %v3592_v37  ;;  %3596 = vadd.xlane.f32.xlu0 %v3595_v59  ;;  %v13088_v37 = vld [vmem:[#allocation89_spill] sm:$0xff] }
 0x69c   : > { %v7670_v24 = vpop.eup %7669  ;;  %3599 = vadd.xlane.f32.xlu1 %v3598_v1  ;;  %5103 = vmatmul.f32.gmra.mxu3 %v7664_v25  ;;  %v13084_v25 = vld [vmem:[#allocation43_spill] sm:$0xff]  ;;  %v3604_v29 = vsel %vm2182_vm2, %v13088_v37, 0.0  ;;  %v13089_v59 = vld [vmem:[#allocation29_spill] sm:$0xff]  ;;  %v13095_v37 = vld [vmem:[#allocation94_spill] sm:$0xff] }
 0x69d   : > { %v7672_v15 = vpop.eup %7671  ;;  %7116 = vmatmul.msk.f32.gmra.mxu2 %vm2117_vm1, %v7666_v12  ;;  %v3607_v47 = vsel %vm2182_vm2, %v13089_v59, 0.0 }
 0x69e   : > { %7100 = vmatmul.msk.f32.gmra.mxu0 %vm2182_vm2, %v11309_v51  ;;  %v4549_v54 = vpop.xlane.xlu2 %4548  ;;  %v4762_v27 = vsel %vm2117_vm1, %v7672_v15, 0.0 }
 0x69f   : > { %v4545_v23 = vpop.xlane.xlu0 %4544  ;;  %v11321_v39 = vadd.f32 %v7670_v24, %v4762_v27  ;;  %v11336_v27 = vpop.eup %7673 }
 0x6a0   : > { %v4624_v40 = vmax.f32 %v4545_v23, %v4598_v58  ;;  %v11317_v55 = vpop.xlane.xlu1 %2474  ;;  %v3601_v58 = vsel %vm2182_vm2, %v13087_v56, 0.0  ;;  %13090 = vst [vmem:[#allocation27_spill] sm:$0xff] %v11336_v27 }
 0x6a1   : > { %13083 = vst [vmem:[#allocation86_spill] sm:$0xff] %v11321_v39  ;;  %v7130_v39 = vld [vmem:[%s8817_s16 + $0x1b0] sm:$0xff] }
 0x6a2   : > { %v4650_v12 = vsub.f32 %v13084_v25, %v4624_v40  ;;  %v4651_v20 = vsub.f32 %v13085_v45, %v4624_v40  ;;  %v4800_v63 = vsub.f32 %v13086_v49, %v4624_v40  ;;  %v13091_v45 = vld [vmem:[#allocation136_spill] sm:$0xff] }
 0x6a3   : > { %3602 = vadd.xlane.f32.xlu2 %v3601_v58  ;;  %3605 = vadd.xlane.f32.xlu0 %v3604_v29  ;;  %v3613_v29 = vsel %vm2182_vm2, %v13095_v37, 0.0 }
 0x6a4   : > { %v4702_v41 = vmul.f32 1.442695, %v4650_v12  ;;  %v4704_v1 = vmul.f32 1.442695, %v4651_v20  ;;  %v4826_v23 = vmul.f32 1.442695, %v4800_v63  ;;  %3608 = vadd.xlane.f32.xlu1 %v3607_v47  ;;  %5106 = vmatmul.f32.gmra.mxu3 %v7670_v24  ;;  %v11352_v47 = vpop.f32.mrf.mxu0 }
 0x6a5   : > { %7117 = vmatmul.msk.f32.gmra.mxu2 %vm2117_vm1, %v7672_v15  ;;  %v7142_v12 = vld [vmem:[%s8785_s21 + $0x170] sm:$0xff]  ;;  %v13092_v20 = vld [vmem:[#allocation138_spill] sm:$0xff]  ;;  %v13093_v63 = vld [vmem:[#allocation41_spill] sm:$0xff] }
 0x6a6   : > { %7675 = vpow2.f32 %v4702_v41  ;;  %7101 = vmatmul.msk.f32.gmra.mxu0 %vm2182_vm2, %v11336_v27  ;;  %v4553_v40 = vpop.xlane.xlu2 %4552  ;;  %7197 = vmatpush.xpose.msk.msra.mxu1 %vm1807_vm0, %v7142_v12  ;;  %v13094_v15 = vld [vmem:[#allocation92_spill] sm:$0xff] }
 0x6a7   : > { %7677 = vpow2.f32 %v4704_v1  ;;  %v4601_v0 = vpop.xlane.xlu0 %4600  ;;  %v3610_v58 = vsel %vm2182_vm2, %v13094_v15, 0.0 }
 0x6a8   : > { %7679 = vpow2.f32 %v4826_v23  ;;  %v4625_v36 = vmax.f32 %v4549_v54, %v4601_v0  ;;  %v11341_v25 = vpop.xlane.xlu1 %2483 }
 0x6aa   : > { %v4652_v24 = vsub.f32 %v13091_v45, %v4625_v36  ;;  %v4653_v49 = vsub.f32 %v13092_v20, %v4625_v36  ;;  %v4801_v56 = vsub.f32 %v13093_v63, %v4625_v36  ;;  %v7141_v63 = vld [vmem:[%s8785_s21 + $0x168] sm:$0xff] }
 0x6ab   : > { %3611 = vadd.xlane.f32.xlu2 %v3610_v58  ;;  %3614 = vadd.xlane.f32.xlu0 %v3613_v29  ;;  %v13100_v58 = vld [vmem:[#allocation143_spill] sm:$0xff]  ;;  %v13101_v29 = vld [vmem:[#allocation146_spill] sm:$0xff] }
 0x6ac   : > { %v7676_v59 = vpop.eup %7675  ;;  %v4706_v54 = vmul.f32 1.442695, %v4652_v24  ;;  %v4708_v41 = vmul.f32 1.442695, %v4653_v49  ;;  %v4828_v1 = vmul.f32 1.442695, %v4801_v56  ;;  %7198 = vmatpush.xpose.msk.msra.mxu1 %vm1807_vm0, %v7141_v63 }
 0x6ad   : > { %v7678_v23 = vpop.eup %7677  ;;  %5109 = vmatmul.f32.gmra.mxu3 %v7676_v59  ;;  %v13099_v56 = vld [vmem:[#allocation142_spill] sm:$0xff]  ;;  %v7140_v63 = vld [vmem:[%s8785_s21 + $0x160] sm:$0xff]  ;;  %s8127_s21 = smov 64  }
 0x6ae   : > { %v11354_v0 = vpop.eup %7679  ;;  %7681 = vpow2.f32 %v4706_v54  ;;  %7118 = vmatmul.msk.f32.gmra.mxu2 %vm2117_vm1, %v7678_v23  ;;  %v4766_v36 = vsel %vm2117_vm1, %v7678_v23, 0.0  ;;  %v11360_v12 = vpop.xlane.xlu2 %2495 }
 0x6af   : > { %13096 = vst [vmem:[#allocation26_spill] sm:$0xff] %v11354_v0  ;;  %7683 = vpow2.f32 %v4708_v41  ;;  %7102 = vmatmul.msk.f32.gmra.mxu0 %vm2182_vm2, %v11354_v0  ;;  %v4604_v45 = vpop.xlane.xlu0 %4603  ;;  %v11362_v24 = vadd.f32 %v7676_v59, %v4766_v36  ;;  %v13106_v0 = vld [vmem:[#allocation47_spill] sm:$0xff] }
 0x6b0   : > { %13097 = vst [vmem:[#allocation43_spill] sm:$0xff] %v11360_v12  ;;  %7685 = vpow2.f32 %v4828_v1  ;;  %v4626_v20 = vmax.f32 %v4553_v40, %v4604_v45  ;;  %v11364_v49 = vpop.xlane.xlu1 %2492  ;;  %v11373_v40 = vpop.f32.mrf.mxu0  ;;  %7199 = vmatpush.xpose.msk.msra.mxu1 %vm1807_vm0, %v7140_v63 }
 0x6b1   : > { %13098 = vst [vmem:[#allocation135_spill] sm:$0xff] %v11362_v24 }
 0x6b2   : > { %v4654_v15 = vsub.f32 %v13099_v56, %v4626_v20  ;;  %v4655_v37 = vsub.f32 %v13100_v58, %v4626_v20  ;;  %v4802_v54 = vsub.f32 %v13101_v29, %v4626_v20 }
 0x6b4   : > { %v7682_v41 = vpop.eup %7681  ;;  %v4710_v23 = vmul.f32 1.442695, %v4654_v15  ;;  %v4712_v51 = vmul.f32 1.442695, %v4655_v37  ;;  %v4830_v27 = vmul.f32 1.442695, %v4802_v54 }
 0x6b5   : > { %v7684_v59 = vpop.eup %7683  ;;  %5112 = vmatmul.f32.gmra.mxu3 %v7682_v41  ;;  %v13104_v37 = vld [vmem:[#allocation48_spill] sm:$0xff] }
 0x6b6   : > { %v11371_v1 = vpop.eup %7685  ;;  %7687 = vpow2.f32 %v4710_v23  ;;  %7119 = vmatmul.msk.f32.gmra.mxu2 %vm2117_vm1, %v7684_v59  ;;  %v4770_v36 = vsel %vm2117_vm1, %v7684_v59, 0.0  ;;  %v4557_v45 = vpop.xlane.xlu2 %4556  ;;  %v13105_v54 = vld [vmem:[#allocation148_spill] sm:$0xff] }
 0x6b7   : > { %13102 = vst [vmem:[#allocation133_spill] sm:$0xff] %v11371_v1  ;;  %7689 = vpow2.f32 %v4712_v51  ;;  %7103 = vmatmul.msk.f32.gmra.mxu0 %vm2182_vm2, %v11371_v1  ;;  %v4607_v20 = vpop.xlane.xlu0 %4606  ;;  %v11380_v56 = vadd.f32 %v7682_v41, %v4770_v36  ;;  %v7124_v51 = vld [vmem:[%s8817_s16 + $0x180] sm:$0xff] }
 0x6b8   : > { %7691 = vpow2.f32 %v4830_v27  ;;  %v4627_v15 = vmax.f32 %v4557_v45, %v4607_v20  ;;  %v4561_v58 = vpop.xlane.xlu1 %4560  ;;  %v11387_v41 = vmul.f32 0.125, %v7124_v51  ;;  %v11401_v63 = vpop.f32.mrf.mxu0 }
 0x6b9   : > { %13103 = vst [vmem:[#allocation28_spill] sm:$0xff] %v11380_v56 }
 0x6ba   : > { %v4656_v29 = vsub.f32 %v13104_v37, %v4627_v15  ;;  %v4657_v23 = vsub.f32 %v13105_v54, %v4627_v15  ;;  %v4803_v59 = vsub.f32 %v13106_v0, %v4627_v15  ;;  %7200 = vmatmul.msk.f32.vlgmr.msra.gmra.mxu1 %vm1807_vm0, %v11387_v41  ;;  %v13110_v37 = vld [vmem:[#allocation152_spill] sm:$0xff] }
 0x6bc   : > { %v7688_v18 = vpop.eup %7687  ;;  %v4714_v35 = vmul.f32 1.442695, %v4656_v29  ;;  %v4716_v1 = vmul.f32 1.442695, %v4657_v23  ;;  %v4832_v48 = vmul.f32 1.442695, %v4803_v59 }
 0x6bd   : > { %v7690_v32 = vpop.eup %7689  ;;  %5115 = vmatmul.f32.gmra.mxu3 %v7688_v18 }
 0x6be   : > { %v11389_v27 = vpop.eup %7691  ;;  %7693 = vpow2.f32 %v4714_v35  ;;  %7120 = vmatmul.msk.f32.gmra.mxu2 %vm2117_vm1, %v7690_v32  ;;  %v4774_v36 = vsel %vm2117_vm1, %v7690_v32, 0.0  ;;  %v4610_v0 = vpop.xlane.xlu2 %4609 }
 0x6bf   : > { %13107 = vst [vmem:[#allocation89_spill] sm:$0xff] %v11389_v27  ;;  %7695 = vpow2.f32 %v4716_v1  ;;  %7104 = vmatmul.msk.f32.gmra.mxu0 %vm2182_vm2, %v11389_v27  ;;  %v11395_v45 = vpop.xlane.xlu0 %2489  ;;  %v11399_v20 = vadd.f32 %v7688_v18, %v4774_v36  ;;  %v4628_v35 = vmax.f32 %v4561_v58, %v4610_v0  ;;  %v13111_v1 = vld [vmem:[#allocation154_spill] sm:$0xff] }
 0x6c0   : > { %13108 = vst [vmem:[#allocation29_spill] sm:$0xff] %v11395_v45  ;;  %7697 = vpow2.f32 %v4832_v48  ;;  %v4565_v15 = vpop.xlane.xlu1 %4564  ;;  %v11410_v48 = vmul.f32 0.125, %v7125_v46  ;;  %v11423_v46 = vpop.f32.mrf.mxu0 }
 0x6c1   : > { %13109 = vst [vmem:[#allocation136_spill] sm:$0xff] %v11399_v20  ;;  %v4658_v32 = vsub.f32 %v13110_v37, %v4628_v35  ;;  %v4659_v29 = vsub.f32 %v13111_v1, %v4628_v35  ;;  %v4804_v54 = vsub.f32 %v11078_v22, %v4628_v35  ;;  %v7129_v20 = vld [vmem:[%s8817_s16 + $0x1a8] sm:$0xff] }
 0x6c2   : > { %7201 = vmatmul.msk.f32.gmra.mxu1 %vm1807_vm0, %v11410_v48 }
 0x6c3   : > { %v4718_v59 = vmul.f32 1.442695, %v4658_v32  ;;  %v4720_v51 = vmul.f32 1.442695, %v4659_v29  ;;  %v4834_v27 = vmul.f32 1.442695, %v4804_v54 }
 0x6c4   : > { %v7694_v23 = vpop.eup %7693  ;;  %v13116_v32 = vld [vmem:[#allocation157_spill] sm:$0xff] }
 0x6c5   : > { %v7696_v42 = vpop.eup %7695  ;;  %5118 = vmatmul.f32.gmra.mxu3 %v7694_v23  ;;  %7699 = vpow2.f32 %v4718_v59 }
 0x6c6   : > { %v11407_v18 = vpop.eup %7697  ;;  %7121 = vmatmul.msk.f32.gmra.mxu2 %vm2117_vm1, %v7696_v42  ;;  %v4778_v58 = vsel %vm2117_vm1, %v7696_v42, 0.0  ;;  %7701 = vpow2.f32 %v4720_v51  ;;  %v4613_v22 = vpop.xlane.xlu2 %4612 }
 0x6c7   : > { %13112 = vst [vmem:[#allocation138_spill] sm:$0xff] %v11407_v18  ;;  %7105 = vmatmul.msk.f32.gmra.mxu0 %vm2182_vm2, %v11407_v18  ;;  %v11415_v36 = vpop.xlane.xlu0 %2498  ;;  %v11417_v0 = vadd.f32 %v7694_v23, %v4778_v58  ;;  %7703 = vpow2.f32 %v4834_v27  ;;  %v4629_v35 = vmax.f32 %v4565_v15, %v4613_v22  ;;  %v7126_v27 = vld [vmem:[%s8817_s16 + $0x190] sm:$0xff] }
 0x6c8   : > { %13113 = vst [vmem:[#allocation41_spill] sm:$0xff] %v11415_v36  ;;  %v11419_v37 = vpop.xlane.xlu1 %2501  ;;  %v5243_v22 = vmul.f32 0.125, %v7126_v27 }
 0x6c9   : > { %13114 = vst [vmem:[#allocation92_spill] sm:$0xff] %v11417_v0  ;;  %v4660_v42 = vsub.f32 %v11080_v33, %v4629_v35  ;;  %v4661_v1 = vsub.f32 %v13116_v32, %v4629_v35  ;;  %v4805_v29 = vsub.f32 %v11107_v9, %v4629_v35  ;;  %v7128_v0 = vld [vmem:[%s8817_s16 + $0x1a0] sm:$0xff] }
 0x6ca   : > { %13115 = vst [vmem:[#allocation94_spill] sm:$0xff] %v11419_v37  ;;  %7202 = vmatmul.msk.f32.gmra.mxu1 %vm1807_vm0, %v5243_v22 }
 0x6cb   : > { %v7700_v54 = vpop.eup %7699  ;;  %v4722_v59 = vmul.f32 1.442695, %v4660_v42  ;;  %v4724_v51 = vmul.f32 1.442695, %v4661_v1  ;;  %v4836_v23 = vmul.f32 1.442695, %v4805_v29  ;;  %v11444_v29 = vpop.f32.mrf.mxu0 }
 0x6cc   : > { %v7702_v58 = vpop.eup %7701 }
 0x6cd   : > { %5121 = vmatmul.f32.gmra.mxu3 %v7700_v54  ;;  %v11429_v15 = vpop.eup %7703  ;;  %7705 = vpow2.f32 %v4722_v59  ;;  %v4782_v33 = vsel %vm2117_vm1, %v7702_v58, 0.0  ;;  %v7127_v59 = vld [vmem:[%s8817_s16 + $0x198] sm:$0xff] }
 0x6ce   : > { %13117 = vst [vmem:[#allocation142_spill] sm:$0xff] %v11429_v15  ;;  %7122 = vmatmul.msk.f32.gmra.mxu2 %vm2117_vm1, %v7702_v58  ;;  %7707 = vpow2.f32 %v4724_v51  ;;  %v11435_v9 = vpop.xlane.xlu2 %3458  ;;  %v11439_v42 = vadd.f32 %v7700_v54, %v4782_v33  ;;  %v5244_v58 = vmul.f32 0.125, %v7127_v59 }
 0x6cf   : > { %7106 = vmatmul.msk.f32.gmra.mxu0 %vm2182_vm2, %v11429_v15  ;;  %v11437_v35 = vpop.xlane.xlu0 %3462  ;;  %7709 = vpow2.f32 %v4836_v23 }
 0x6d0   : > { %13118 = vst [vmem:[#allocation143_spill] sm:$0xff] %v11439_v42  ;;  %v11441_v32 = vpop.xlane.xlu1 %3466 }
 0x6d2   : > { %7203 = vmatmul.msk.f32.gmra.mxu1 %vm1807_vm0, %v5244_v58 }
 0x6d3   : > { %v7706_v1 = vpop.eup %7705  ;;  %v11462_v59 = vpop.f32.mrf.mxu0 }
 0x6d4   : > { %v7708_v51 = vpop.eup %7707  ;;  %13121 = vst [vmem:[#allocation148_spill] sm:$0xff] %v11462_v59 }
 0x6d5   : > { %5124 = vmatmul.f32.gmra.mxu3 %v7706_v1  ;;  %v11447_v27 = vpop.eup %7709  ;;  %v4786_v54 = vsel %vm2117_vm1, %v7708_v51, 0.0 }
 0x6d6   : > { %13119 = vst [vmem:[#allocation146_spill] sm:$0xff] %v11447_v27  ;;  %7123 = vmatmul.msk.f32.gmra.mxu2 %vm2117_vm1, %v7708_v51  ;;  %v11453_v23 = vpop.xlane.xlu2 %3470  ;;  %v11457_v15 = vadd.f32 %v7706_v1, %v4786_v54  ;;  %v5245_v51 = vmul.f32 0.125, %v7128_v0  ;;  %v11483_v0 = vmul.f32 0.125, %v7129_v20 }
 0x6d7   : > { %7107 = vmatmul.msk.f32.gmra.mxu0 %vm2182_vm2, %v11447_v27  ;;  %v11455_v33 = vpop.xlane.xlu0 %3474  ;;  %v11473_v1 = vpop.f32.mrf.mxu3 }
 0x6d8   : > { %13120 = vst [vmem:[#allocation48_spill] sm:$0xff] %v11457_v15  ;;  %v11459_v18 = vpop.xlane.xlu1 %3478  ;;  %v11478_v59 = vpop.f32.mrf.mxu2 }
 0x6d9   : > { %13122 = vst [vmem:[#allocation47_spill] sm:$0xff] %v11473_v1 }
 0x6da   : > { %7204 = vmatmul.msk.f32.gmra.mxu1 %vm1807_vm0, %v5245_v51  ;;  %13123 = vst [vmem:[#allocation152_spill] sm:$0xff] %v11478_v59 }
 0x6dd   : > { %7238 = vmatmul.msk.f32.vlgmr.msra.gmra.mxu3 %vm1807_vm0, %v11387_v41 }
 0x6de   : > { %v11469_v27 = vpop.xlane.xlu2 %3482 }
 0x6df   : > { %7220 = vmatmul.msk.f32.vlgmr.msra.gmra.mxu0 %vm1807_vm0, %v11387_v41  ;;  %v11471_v24 = vpop.xlane.xlu0 %3486 }
 0x6e0   : > { %v11475_v54 = vpop.xlane.xlu1 %3490 }
 0x6e2   : > { %7205 = vmatmul.msk.f32.gmra.mxu1 %vm1807_vm0, %v11483_v0 }
 0x6e3   : > { %v4970_v15 = vpop.f32.mrf.mxu0 }
 0x6e5   : > { %7239 = vmatmul.msk.f32.gmra.mxu3 %vm1807_vm0, %v11410_v48 }
 0x6e6   : > { %v11487_v41 = vpop.xlane.xlu2 %3494 }
 0x6e7   : > { %7221 = vmatmul.msk.f32.gmra.mxu0 %vm1807_vm0, %v11410_v48  ;;  %v11489_v1 = vpop.xlane.xlu0 %3498  ;;  %v5083_v42 = vpop.f32.mrf.mxu3  ;;  %v11501_v48 = vmul.f32 0.125, %v7130_v39  ;;  %v7131_v39 = vld [vmem:[%s8817_s16 + $0x1b8] sm:$0xff] }
 0x6e8   : > { %v11491_v21 = vpop.xlane.xlu1 %3502  ;;  %v11495_v59 = vadd.f32 %v5083_v42, %v4970_v15  ;;  %v11497_v56 = vpop.f32.mrf.mxu2 }
 0x6e9   : > { %13125 = vst [vmem:[#allocation157_spill] sm:$0xff] %v11497_v56 }
 0x6ea   : > { %13124 = vst [vmem:[#allocation154_spill] sm:$0xff] %v11495_v59  ;;  %7206 = vmatmul.msk.f32.gmra.mxu1 %vm1807_vm0, %v11501_v48 }
 0x6eb   : > { %v4973_v20 = vpop.f32.mrf.mxu0 }
 0x6ed   : > { %7240 = vmatmul.msk.f32.gmra.mxu3 %vm1807_vm0, %v5243_v22 }
 0x6ee   : > { %v11504_v36 = vpop.xlane.xlu2 %3506 }
 0x6ef   : > { %7222 = vmatmul.msk.f32.gmra.mxu0 %vm1807_vm0, %v5243_v22  ;;  %v11506_v62 = vpop.xlane.xlu0 %3510  ;;  %v5086_v12 = vpop.f32.mrf.mxu3  ;;  %v11518_v22 = vmul.f32 0.125, %v7131_v39 }
 0x6f0   : > { %v11508_v17 = vpop.xlane.xlu1 %3514  ;;  %v11512_v15 = vadd.f32 %v5086_v12, %v4973_v20  ;;  %v11514_v42 = vpop.f32.mrf.mxu2 }
 0x6f1   : > { %13127 = vst [vmem:[#allocation166_spill] sm:$0xff] %v11514_v42 }
 0x6f2   : > { %13126 = vst [vmem:[#allocation165_spill] sm:$0xff] %v11512_v15  ;;  %7207 = vmatmul.msk.f32.gmra.mxu1 %vm1807_vm0, %v11518_v22 }
 0x6f3   : > { %v4976_v56 = vpop.f32.mrf.mxu0 }
 0x6f5   : > { %7241 = vmatmul.msk.f32.gmra.mxu3 %vm1807_vm0, %v5244_v58 }
 0x6f6   : > { %v11521_v59 = vpop.xlane.xlu2 %3518 }
 0x6f7   : > { %7223 = vmatmul.msk.f32.gmra.mxu0 %vm1807_vm0, %v5244_v58  ;;  %v3570_v45 = vpop.xlane.xlu0 %3569  ;;  %v5089_v10 = vpop.f32.mrf.mxu3  ;;  %v7132_v58 = vld [vmem:[%s8817_s16 + $0x1c0] sm:$0xff] }
 0x6f8   : > { %v3616_v53 = vadd.f32 %v3570_v45, %v11435_v9  ;;  %v3573_v16 = vpop.xlane.xlu1 %3572  ;;  %v11527_v20 = vadd.f32 %v5089_v10, %v4976_v56  ;;  %v11529_v42 = vpop.f32.mrf.mxu2  ;;  %v11533_v15 = vmul.f32 0.125, %v7132_v58  ;;  %v13130_v45 = vld [vmem:[#allocation96_spill] sm:$0xff]  ;;  %v13131_v9 = vld [vmem:[#allocation151_spill] sm:$0xff]  ;;  %v13133_v56 = vld [vmem:[#allocation158_spill] sm:$0xff] }
 0x6f9   : > { %v3617_v12 = vadd.f32 %v3573_v16, %v11437_v35  ;;  %13129 = vst [vmem:[#allocation168_spill] sm:$0xff] %v11529_v42  ;;  %v3876_v30 = vadd.f32 %v13131_v9, %v13130_v45  ;;  %v13132_v10 = vld [vmem:[#allocation32_spill] sm:$0xff] }
 0x6fa   : > { %13128 = vst [vmem:[#allocation167_spill] sm:$0xff] %v11527_v20  ;;  %7711 = vrcp.f32 %v3616_v53  ;;  %v3879_v35 = vadd.f32 %v13133_v56, %v13132_v10  ;;  %7208 = vmatmul.msk.f32.gmra.mxu1 %vm1807_vm0, %v11533_v15 }
 0x6fb   : > { %7713 = vrcp.f32 %v3617_v12  ;;  %v4979_v39 = vpop.f32.mrf.mxu0 }
 0x6fd   : > { %7242 = vmatmul.msk.f32.gmra.mxu3 %vm1807_vm0, %v5245_v51 }
 0x6fe   : > { %v3576_v5 = vpop.xlane.xlu2 %3575 }
 0x6ff   : > { %7224 = vmatmul.msk.f32.gmra.mxu0 %vm1807_vm0, %v5245_v51  ;;  %v3579_v37 = vpop.xlane.xlu0 %3578  ;;  %v3618_v53 = vadd.f32 %v3576_v5, %v11441_v32  ;;  %v5092_v20 = vpop.f32.mrf.mxu3 }
 0x700   : > { %v7712_v16 = vpop.eup %7711  ;;  %v3619_v12 = vadd.f32 %v3579_v37, %v11453_v23  ;;  %v3582_v42 = vpop.xlane.xlu1 %3581  ;;  %v11545_v51 = vadd.f32 %v5092_v20, %v4979_v39  ;;  %v7133_v37 = vld [vmem:[%s8817_s16 + $0x1c8] sm:$0xff] }
 0x701   : > { %v7714_v58 = vpop.eup %7713  ;;  %v3620_v45 = vadd.f32 %v3582_v42, %v11455_v33  ;;  %v11547_v9 = vpop.f32.mrf.mxu2  ;;  %v3939_v7 = vmul.f32 %v7712_v16, %v3876_v30  ;;  %7715 = vrcp.f32 %v3618_v53  ;;  %v11554_v32 = vmul.f32 0.125, %v7133_v37  ;;  %v13135_v23 = vld [vmem:[#allocation102_spill] sm:$0xff] }
 0x702   : > { %13134 = vst [vmem:[#allocation96_spill] sm:$0xff] %v11547_v9  ;;  %v3940_v10 = vmul.f32 %v7714_v58, %v3879_v35  ;;  %7717 = vrcp.f32 %v3619_v12  ;;  %v3882_v33 = vadd.f32 %v11117_v34, %v13135_v23  ;;  %v13137_v12 = vld [vmem:[#allocation104_spill] sm:$0xff] }
 0x703   : > { %3971 = vrot.lane.b32.xlu1 %v3939_v7, %s8127_s21  ;;  %7719 = vrcp.f32 %v3620_v45  ;;  %v4982_v5 = vpop.f32.mrf.mxu0  ;;  %v13136_v7 = vld [vmem:[#allocation103_spill] sm:$0xff]  ;;  %7209 = vmatmul.msk.f32.gmra.mxu1 %vm1807_vm0, %v11554_v32 }
 0x704   : > { %3973 = vrot.lane.b32.xlu2 %v3940_v10, %s8127_s21  ;;  %v3885_v39 = vadd.f32 %v11138_v28, %v13136_v7  ;;  %v13141_v7 = vld [vmem:[#allocation106_spill] sm:$0xff] }
 0x705   : > { %7243 = vmatmul.msk.f32.gmra.mxu3 %vm1807_vm0, %v11483_v0 }
 0x706   : > { %v3585_v30 = vpop.xlane.xlu2 %3584 }
 0x707   : > { %7225 = vmatmul.msk.f32.gmra.mxu0 %vm1807_vm0, %v11483_v0  ;;  %v3588_v42 = vpop.xlane.xlu0 %3587  ;;  %v7716_v20 = vpop.eup %7715  ;;  %v3621_v16 = vadd.f32 %v3585_v30, %v11459_v18  ;;  %v3888_v0 = vadd.f32 %v11157_v13, %v13137_v12  ;;  %v7134_v30 = vld [vmem:[%s8817_s16 + $0x1d0] sm:$0xff] }
 0x708   : > { %v3622_v56 = vadd.f32 %v3588_v42, %v11469_v27  ;;  %v3591_v35 = vpop.xlane.xlu1 %3590  ;;  %v5095_v53 = vpop.f32.mrf.mxu3  ;;  %v3941_v28 = vmul.f32 %v7716_v20, %v3882_v33  ;;  %v11579_v13 = vmul.f32 0.125, %v7134_v30  ;;  %v13147_v30 = vld [vmem:[#allocation111_spill] sm:$0xff] }
 0x709   : > { %v7718_v34 = vpop.eup %7717  ;;  %v3623_v58 = vadd.f32 %v3591_v35, %v11471_v24  ;;  %v11569_v45 = vadd.f32 %v5095_v53, %v4982_v5  ;;  %v11571_v10 = vpop.f32.mrf.mxu2  ;;  %7721 = vrcp.f32 %v3621_v16  ;;  %v13140_v24 = vld [vmem:[#allocation105_spill] sm:$0xff] }
 0x70a   : > { %13139 = vst [vmem:[#allocation32_spill] sm:$0xff] %v11571_v10  ;;  %v7720_v18 = vpop.eup %7719  ;;  %v3942_v27 = vmul.f32 %v7718_v34, %v3885_v39  ;;  %7723 = vrcp.f32 %v3622_v56  ;;  %3975 = vrot.lane.b32.xlu0 %v3941_v28, %s8127_s21  ;;  %v3891_v5 = vadd.f32 %v11185_v11, %v13140_v24  ;;  %v3894_v39 = vadd.f32 %v11206_v57, %v13141_v7  ;;  %v13142_v11 = vld [vmem:[#allocation108_spill] sm:$0xff]  ;;  %v13145_v28 = vld [vmem:[#allocation109_spill] sm:$0xff] }
 0x70b   : > { %13138 = vst [vmem:[#allocation151_spill] sm:$0xff] %v11569_v45  ;;  %v3943_v37 = vmul.f32 %v7720_v18, %v3888_v0  ;;  %7725 = vrcp.f32 %v3623_v58  ;;  %v4985_v23 = vpop.f32.mrf.mxu0  ;;  %7210 = vmatmul.msk.f32.gmra.mxu1 %vm1807_vm0, %v11579_v13  ;;  %v3897_v12 = vadd.f32 %v11236_v52, %v13142_v11  ;;  %v13146_v18 = vld [vmem:[#allocation107_spill] sm:$0xff]  ;;  %v13148_v52 = vld [vmem:[#allocation110_spill] sm:$0xff]  ;;  %v7997_v45 = vld [vmem:[%s12799_s9 + $0x1f8] sm:$0xff] }
 0x70c   : > { %3977 = vrot.lane.b32.xlu2 %v3942_v27, %s8127_s21  ;;  %v3835_v27 = vadd.f32 %v13146_v18, %v13145_v28  ;;  %v3838_v24 = vadd.f32 %v13148_v52, %v13147_v30  ;;  %v13153_v28 = vld [vmem:[#allocation115_spill] sm:$0xff]  ;;  %v13156_v30 = vld [vmem:[#allocation116_spill] sm:$0xff] }
 0x70d   : > { %3979 = vrot.lane.b32.xlu1 %v3943_v37, %s8127_s21  ;;  %7244 = vmatmul.msk.f32.gmra.mxu3 %vm1807_vm0, %v11501_v48  ;;  %v13157_v52 = vld [vmem:[#allocation119_spill] sm:$0xff] }
 0x70e   : > { %v3594_v33 = vpop.xlane.xlu2 %3593  ;;  %v3900_v7 = vadd.f32 %v11264_v4, %v3835_v27 }
 0x70f   : > { %7226 = vmatmul.msk.f32.gmra.mxu0 %vm1807_vm0, %v11501_v48  ;;  %v3597_v42 = vpop.xlane.xlu0 %3596  ;;  %v7722_v20 = vpop.eup %7721  ;;  %v3624_v16 = vadd.f32 %v3594_v33, %v11475_v54  ;;  %v13149_v33 = vld [vmem:[#allocation113_spill] sm:$0xff] }
 0x710   : > { %v3625_v56 = vadd.f32 %v3597_v42, %v11487_v41  ;;  %v3600_v35 = vpop.xlane.xlu1 %3599  ;;  %v5098_v53 = vpop.f32.mrf.mxu3  ;;  %v3944_v57 = vmul.f32 %v7722_v20, %v3891_v5  ;;  %v13150_v5 = vld [vmem:[#allocation112_spill] sm:$0xff] }
 0x711   : > { %v7724_v34 = vpop.eup %7723  ;;  %v3626_v48 = vadd.f32 %v3600_v35, %v11489_v1  ;;  %v11594_v0 = vadd.f32 %v5098_v53, %v4985_v23  ;;  %v11596_v58 = vpop.f32.mrf.mxu2  ;;  %7727 = vrcp.f32 %v3624_v16  ;;  %v7135_v23 = vld [vmem:[%s8817_s16 + $0x1d8] sm:$0xff]  ;;  %v3841_v42 = vadd.f32 %v13150_v5, %v13149_v33 }
 0x712   : > { %13144 = vst [vmem:[#allocation102_spill] sm:$0xff] %v11596_v58  ;;  %v7726_v54 = vpop.eup %7725  ;;  %v3945_v41 = vmul.f32 %v7724_v34, %v3894_v39  ;;  %7729 = vrcp.f32 %v3625_v56  ;;  %3981 = vrot.lane.b32.xlu0 %v3944_v57, %s8127_s21  ;;  %v11610_v20 = vmul.f32 0.125, %v7135_v23  ;;  %v3903_v35 = vadd.f32 %v11297_v61, %v3838_v24  ;;  %v13158_v24 = vld [vmem:[#allocation118_spill] sm:$0xff] }
 0x713   : > { %13143 = vst [vmem:[#allocation158_spill] sm:$0xff] %v11594_v0  ;;  %v3946_v37 = vmul.f32 %v7726_v54, %v3897_v12  ;;  %7731 = vrcp.f32 %v3626_v48  ;;  %v4988_v1 = vpop.f32.mrf.mxu0  ;;  %v3906_v4 = vadd.f32 %v11325_v6, %v3841_v42 }
 0x714   : > { %3983 = vrot.lane.b32.xlu2 %v3945_v41, %s8127_s21  ;;  %7211 = vmatmul.msk.f32.gmra.mxu1 %vm1807_vm0, %v11610_v20 }
 0x715   : > { %3985 = vrot.lane.b32.xlu1 %v3946_v37, %s8127_s21  ;;  %7245 = vmatmul.msk.f32.gmra.mxu3 %vm1807_vm0, %v11518_v22  ;;  %v13155_v37 = vld [vmem:[#allocation117_spill] sm:$0xff] }
 0x716   : > { %v3603_v39 = vpop.xlane.xlu2 %3602  ;;  %v3847_v6 = vadd.f32 %v13156_v30, %v13155_v37 }
 0x717   : > { %7227 = vmatmul.msk.f32.gmra.mxu0 %vm1807_vm0, %v11518_v22  ;;  %v3606_v16 = vpop.xlane.xlu0 %3605  ;;  %v7728_v56 = vpop.eup %7727  ;;  %v3627_v53 = vadd.f32 %v3603_v39, %v11491_v21 }
 0x718   : > { %v3628_v34 = vadd.f32 %v3606_v16, %v11504_v36  ;;  %v3609_v11 = vpop.xlane.xlu1 %3608  ;;  %v5101_v12 = vpop.f32.mrf.mxu3  ;;  %v3947_v41 = vmul.f32 %v7728_v56, %v3900_v7  ;;  %v13154_v36 = vld [vmem:[#allocation114_spill] sm:$0xff]  ;;  %v3912_v7 = vadd.f32 %v11373_v40, %v3847_v6 }
 0x719   : > { %v7730_v48 = vpop.eup %7729  ;;  %v3629_v57 = vadd.f32 %v3609_v11, %v11506_v62  ;;  %v11622_v22 = vadd.f32 %v5101_v12, %v4988_v1  ;;  %v11624_v54 = vpop.f32.mrf.mxu2  ;;  %7733 = vrcp.f32 %v3627_v53  ;;  %v3844_v18 = vadd.f32 %v13154_v36, %v13153_v28 }
 0x71a   : > { %13152 = vst [vmem:[#allocation104_spill] sm:$0xff] %v11624_v54  ;;  %v7732_v61 = vpop.eup %7731  ;;  %v3948_v21 = vmul.f32 %v7730_v48, %v3903_v35  ;;  %7735 = vrcp.f32 %v3628_v34  ;;  %3987 = vrot.lane.b32.xlu0 %v3947_v41, %s8127_s21  ;;  %v3850_v1 = vadd.f32 %v13158_v24, %v13157_v52  ;;  %v13159_v48 = vld [vmem:[#allocation121_spill] sm:$0xff]  ;;  %v13162_v41 = vld [vmem:[#allocation124_spill] sm:$0xff] }
 0x71b   : > { %13151 = vst [vmem:[#allocation103_spill] sm:$0xff] %v11622_v22  ;;  %v3949_v27 = vmul.f32 %v7732_v61, %v3906_v4  ;;  %7737 = vrcp.f32 %v3629_v57  ;;  %v4991_v62 = vpop.f32.mrf.mxu0  ;;  %v3909_v23 = vadd.f32 %v11352_v47, %v3844_v18  ;;  %v13160_v4 = vld [vmem:[#allocation120_spill] sm:$0xff]  ;;  %v13163_v61 = vld [vmem:[#allocation122_spill] sm:$0xff] }
 0x71c   : > { %3989 = vrot.lane.b32.xlu2 %v3948_v21, %s8127_s21  ;;  %v3915_v53 = vadd.f32 %v11401_v63, %v3850_v1  ;;  %v3853_v57 = vadd.f32 %v13160_v4, %v13159_v48  ;;  %v3856_v21 = vadd.f32 %v13163_v61, %v13162_v41 }
 0x71d   : > { %3991 = vrot.lane.b32.xlu1 %v3949_v27, %s8127_s21  ;;  %7246 = vmatmul.msk.f32.gmra.mxu3 %vm1807_vm0, %v11533_v15 }
 0x71e   : > { %v3612_v33 = vpop.xlane.xlu2 %3611  ;;  %v3918_v36 = vadd.f32 %v11423_v46, %v3853_v57  ;;  %v3921_v27 = vadd.f32 %v11444_v29, %v3856_v21 }
 0x71f   : > { %7228 = vmatmul.msk.f32.gmra.mxu0 %vm1807_vm0, %v11533_v15  ;;  %v3615_v5 = vpop.xlane.xlu0 %3614  ;;  %v7734_v42 = vpop.eup %7733  ;;  %v3630_v39 = vadd.f32 %v3612_v33, %v11508_v17 }
 0x720   : > { %v3631_v16 = vadd.f32 %v3615_v5, %v11521_v59  ;;  %v5104_v56 = vpop.f32.mrf.mxu3  ;;  %v7736_v35 = vpop.eup %7735  ;;  %v3950_v47 = vmul.f32 %v7734_v42, %v3909_v23  ;;  %v7136_v59 = vld [vmem:[%s8817_s16 + $0x1e0] sm:$0xff]  ;;  %v7137_v23 = vld [vmem:[%s8817_s16 + $0x1e8] sm:$0xff] }
 0x721   : > { %v5105_v34 = vadd.f32 %v5104_v56, %v4991_v62  ;;  %v5169_v11 = vpop.f32.mrf.mxu2  ;;  %v7738_v12 = vpop.eup %7737  ;;  %7739 = vrcp.f32 %v3630_v39  ;;  %v3951_v15 = vmul.f32 %v7736_v35, %v3912_v7  ;;  %v5253_v28 = vmul.f32 0.125, %v7136_v59  ;;  %v7138_v7 = vld [vmem:[%s8817_s16 + $0x1f0] sm:$0xff] }
 0x722   : > { %7741 = vrcp.f32 %v3631_v16  ;;  %3993 = vrot.lane.b32.xlu0 %v3950_v47, %s8127_s21  ;;  %v3952_v17 = vmul.f32 %v7738_v12, %v3915_v53  ;;  %v5254_v46 = vmul.f32 0.125, %v7137_v23  ;;  %v5255_v16 = vmul.f32 0.125, %v7138_v7  ;;  %v7175_v23 = vld [vmem:[%s9306_s0 + $0x1d8] sm:$0xff] }
 0x723   : > { %v11646_v40 = vadd.f32 %v5169_v11, %v5105_v34  ;;  %v4994_v63 = vpop.f32.mrf.mxu0  ;;  %7212 = vmatmul.msk.f32.gmra.mxu1 %vm1807_vm0, %v5253_v28  ;;  %v7139_v34 = vld [vmem:[%s8817_s16 + $0x1f8] sm:$0xff]  ;;  %s6725_s16 = sshll.u32 %s8779_s28, 8 }
 0x724   : > { %3995 = vrot.lane.b32.xlu2 %v3951_v15, %s8127_s21  ;;  %v5256_v47 = vmul.f32 0.125, %v7139_v34  ;;  %6173 = vmatpush.msrb.mxu1 %v7175_v23  ;;  %s11737_s30 = scalar_lea.vmem [#allocation9], %s6725_s16 }
 0x725   : > { %13161 = vst [vmem:[#allocation105_spill] sm:$0xff] %v11646_v40  ;;  %3997 = vrot.lane.b32.xlu1 %v3952_v17, %s8127_s21  ;;  %7247 = vmatmul.msk.f32.gmra.mxu3 %vm1807_vm0, %v11554_v32  ;;  %s6446_s7 = sshll.u32 %s11737_s30, 4  ;;  %s6447_s7 = int_to_ptr.vmem [resolvable:$true] %s6446_s7 }
 0x727   : > { %7229 = vmatmul.msk.f32.gmra.mxu0 %vm1807_vm0, %v11554_v32  ;;  %v7740_v18 = vpop.eup %7739 }
 0x728   : > { %v5107_v37 = vpop.f32.mrf.mxu3  ;;  %v7742_v30 = vpop.eup %7741  ;;  %v3953_v52 = vmul.f32 %v7740_v18, %v3918_v36 }
 0x729   : > { %v5108_v6 = vadd.f32 %v5107_v37, %v4994_v63  ;;  %v5172_v62 = vpop.f32.mrf.mxu2  ;;  %v3954_v24 = vmul.f32 %v7742_v30, %v3921_v27 }
 0x72a   : > { %3999 = vrot.lane.b32.xlu0 %v3953_v52, %s8127_s21 }
 0x72b   : > { %v11661_v1 = vadd.f32 %v5172_v62, %v5108_v6  ;;  %7213 = vmatmul.msk.f32.gmra.mxu1 %vm1807_vm0, %v5254_v46  ;;  %v7183_v6 = vld [vmem:[%s10616_s10 + $0x18] sm:$0xff] }
 0x72c   : > { %v4997_v33 = vpop.f32.mrf.mxu0  ;;  %4001 = vrot.lane.b32.xlu2 %v3954_v24, %s8127_s21  ;;  %6074 = vmatpush.msra.mxu2 %v7183_v6  ;;  %v7970_v6 = vld [vmem:[%s12799_s9 + $0x118] sm:$0xff] }
 0x72d   : > { %13164 = vst [vmem:[#allocation106_spill] sm:$0xff] %v11661_v1  ;;  %7248 = vmatmul.msk.f32.gmra.mxu3 %vm1807_vm0, %v11579_v13  ;;  %v13269_v1 = vld [vmem:[#allocation92_spill] sm:$0xff] }
 0x72f   : > { %7230 = vmatmul.msk.f32.gmra.mxu0 %vm1807_vm0, %v11579_v13 }
 0x730   : > { %v5110_v29 = vpop.f32.mrf.mxu3 }
 0x731   : > { %v5111_v32 = vadd.f32 %v5110_v29, %v4997_v33  ;;  %v5175_v5 = vpop.f32.mrf.mxu2  ;;  %v13174_v33 = vld [vmem:[#allocation93_spill] sm:$0xff] }
 0x733   : > { %v11671_v42 = vadd.f32 %v5175_v5, %v5111_v32  ;;  %7214 = vmatmul.msk.f32.gmra.mxu1 %vm1807_vm0, %v5255_v16  ;;  %v7179_v32 = vld [vmem:[%s9306_s0 + $0x1f8] sm:$0xff] }
 0x734   : > { %v5000_v39 = vpop.f32.mrf.mxu0  ;;  %6250 = vmatpush.msrb.mxu0 %v7179_v32 }
 0x735   : > { %13165 = vst [vmem:[#allocation108_spill] sm:$0xff] %v11671_v42  ;;  %7249 = vmatmul.msk.f32.gmra.mxu3 %vm1807_vm0, %v11610_v20 }
 0x737   : > { %7231 = vmatmul.msk.f32.gmra.mxu0 %vm1807_vm0, %v11610_v20  ;;  %v5428_v12 = vpop.f32.mrf.mxu1 }
 0x738   : > { %v5113_v56 = vpop.f32.mrf.mxu3 }
 0x739   : > { %v5114_v35 = vadd.f32 %v5113_v56, %v5000_v39  ;;  %v5178_v53 = vpop.f32.mrf.mxu2  ;;  %v7967_v39 = vld [vmem:[%s12799_s9 + $0x100] sm:$0xff]  ;;  %v7968_v56 = vld [vmem:[%s12799_s9 + $0x108] sm:$0xff] }
 0x73b   : > { %v11679_v13 = vadd.f32 %v5178_v53, %v5114_v35  ;;  %7215 = vmatmul.msk.f32.gmra.mxu1 %vm1807_vm0, %v5256_v47 }
 0x73c   : > { %v5003_v11 = vpop.f32.mrf.mxu0 }
 0x73d   : > { %13166 = vst [vmem:[#allocation109_spill] sm:$0xff] %v11679_v13  ;;  %7250 = vmatmul.msk.f32.gmra.mxu3 %vm1807_vm0, %v5253_v28  ;;  %v7162_v13 = vld [vmem:[%s9306_s0 + $0x170] sm:$0xff] }
 0x73f   : > { %7232 = vmatmul.msk.f32.gmra.mxu0 %vm1807_vm0, %v5253_v28  ;;  %v5431_v59 = vpop.f32.mrf.mxu1  ;;  %v13169_v28 = vld [vmem:[#allocation42_spill] sm:$0xff] }
 0x740   : > { %v5116_v15 = vpop.f32.mrf.mxu3  ;;  %v2504_v36 = vadd.f32 %v11111_v50, %v13169_v28  ;;  %v13172_v50 = vld [vmem:[#allocation131_spill] sm:$0xff]  ;;  %v13181_v28 = vld [vmem:[#allocation98_spill] sm:$0xff] }
 0x741   : > { %v5117_v48 = vadd.f32 %v5116_v15, %v5003_v11  ;;  %v5181_v4 = vpop.f32.mrf.mxu2 }
 0x742   : > { %7743 = vrcp.f32 %v2504_v36 }
 0x743   : > { %v11685_v57 = vadd.f32 %v5181_v4, %v5117_v48 }
 0x744   : > { %v5006_v20 = vpop.f32.mrf.mxu0 }
 0x745   : > { %13167 = vst [vmem:[#allocation107_spill] sm:$0xff] %v11685_v57  ;;  %7251 = vmatmul.msk.f32.gmra.mxu3 %vm1807_vm0, %v5254_v46  ;;  %v13265_v57 = vld [vmem:[#allocation48_spill] sm:$0xff] }
 0x747   : > { %7233 = vmatmul.msk.f32.gmra.mxu0 %vm1807_vm0, %v5254_v46  ;;  %v11696_v30 = vpop.f32.mrf.mxu1  ;;  %v13175_v46 = vld [vmem:[#allocation71_spill] sm:$0xff] }
 0x748   : > { %v5119_v17 = vpop.f32.mrf.mxu3  ;;  %v2701_v29 = vadd.f32 %v13175_v46, %v13174_v33  ;;  %v7744_v5 = vpop.eup %7743  ;;  %v13182_v46 = vld [vmem:[#allocation126_spill] sm:$0xff] }
 0x749   : > { %v5120_v41 = vadd.f32 %v5119_v17, %v5006_v20  ;;  %v5184_v61 = vpop.f32.mrf.mxu2  ;;  %v13179_v20 = vld [vmem:[#allocation73_spill] sm:$0xff]  ;;  %v13180_v17 = vld [vmem:[#allocation123_spill] sm:$0xff] }
 0x74b   : > { %v11689_v21 = vadd.f32 %v5184_v61, %v5120_v41  ;;  %v7174_v61 = vld [vmem:[%s9306_s0 + $0x1d0] sm:$0xff] }
 0x74c   : > { %v5009_v63 = vpop.f32.mrf.mxu0  ;;  %6174 = vmatpush.msrb.mxu1 %v7174_v61 }
 0x74d   : > { %13168 = vst [vmem:[#allocation111_spill] sm:$0xff] %v11689_v21  ;;  %7252 = vmatmul.msk.f32.gmra.mxu3 %vm1807_vm0, %v5255_v16 }
 0x74f   : > { %4744 = vadd.xlane.f32.xlu1 %v11225_v44  ;;  %7234 = vmatmul.msk.f32.gmra.mxu0 %vm1807_vm0, %v5255_v16  ;;  %v2506_v44 = vadd.f32 %v11167_v19, %v13172_v50  ;;  %v11720_v19 = vadd.f32 %v7967_v39, %v5428_v12  ;;  %v11722_v16 = vpop.f32.mrf.mxu1  ;;  %v13177_v12 = vld [vmem:[#allocation45_spill] sm:$0xff] }
 0x750   : > { %v5122_v18 = vpop.f32.mrf.mxu3  ;;  %v2509_v15 = vadd.f32 %v11317_v55, %v13177_v12  ;;  %v13184_v39 = vld [vmem:[#allocation57_spill] sm:$0xff] }
 0x751   : > { %v5123_v27 = vadd.f32 %v5122_v18, %v5009_v63  ;;  %v5187_v37 = vpop.f32.mrf.mxu2  ;;  %7745 = vrcp.f32 %v2506_v44  ;;  %v13187_v12 = vld [vmem:[#allocation65_spill] sm:$0xff] }
 0x752   : > { %7747 = vrcp.f32 %v2509_v15 }
 0x753   : > { %v11699_v62 = vadd.f32 %v5187_v37, %v5123_v27  ;;  %v7969_v27 = vld [vmem:[%s12799_s9 + $0x110] sm:$0xff] }
 0x754   : > { %v11701_v52 = vpop.f32.mrf.mxu0  ;;  %4736 = vadd.xlane.f32.xlu0 %v11183_v38  ;;  %v11752_v37 = vadd.f32 %v7969_v27, %v5431_v59 }
 0x755   : > { %13170 = vst [vmem:[#allocation110_spill] sm:$0xff] %v11699_v62  ;;  %4728 = vadd.xlane.f32.xlu2 %v11131_v31  ;;  %7253 = vmatmul.msk.f32.gmra.mxu3 %vm1807_vm0, %v5256_v47  ;;  %v13176_v31 = vld [vmem:[#allocation97_spill] sm:$0xff] }
 0x756   : > { %13171 = vst [vmem:[#allocation113_spill] sm:$0xff] %v11701_v52  ;;  %v2766_v38 = vadd.f32 %v13176_v31, %v2701_v29  ;;  %v2503_v29 = vadd.f32 %v11143_v60, %v13182_v46  ;;  %v7176_v62 = vld [vmem:[%s9306_s0 + $0x1e0] sm:$0xff] }
 0x757   : > { %7235 = vmatmul.msk.f32.gmra.mxu0 %vm1807_vm0, %v5256_v47  ;;  %v7746_v63 = vpop.eup %7745  ;;  %v11759_v33 = vpop.f32.mrf.mxu1 }
 0x758   : > { %v11709_v24 = vpop.f32.mrf.mxu3  ;;  %v2827_v53 = vmul.f32 %v7744_v5, %v2766_v38  ;;  %v13183_v5 = vld [vmem:[#allocation141_spill] sm:$0xff]  ;;  %v7748_v60 = vpop.eup %7747  ;;  %7749 = vrcp.f32 %v2503_v29 }
 0x759   : > { %13173 = vst [vmem:[#allocation112_spill] sm:$0xff] %v11709_v24  ;;  %v2512_v31 = vadd.f32 %v11341_v25, %v13183_v5  ;;  %v13262_v24 = vld [vmem:[#allocation136_spill] sm:$0xff] }
 0x75b   : > { %7751 = vrcp.f32 %v2512_v31  ;;  %v13194_v31 = vld [vmem:[#allocation137_spill] sm:$0xff] }
 0x75c   : > { %v5493_v7 = vpop.f32.mrf.mxu0  ;;  %4740 = vadd.xlane.f32.xlu0 %v11203_v3 }
 0x75d   : > { %v11727_v35 = vadd.f32 %v7968_v56, %v5493_v7  ;;  %4732 = vadd.xlane.f32.xlu2 %v11165_v43  ;;  %v13178_v43 = vld [vmem:[#allocation54_spill] sm:$0xff]  ;;  %v13185_v56 = vld [vmem:[#allocation76_spill] sm:$0xff] }
 0x75e   : > { %v3974_v34 = vpop.permute.xlu2 %3973  ;;  %v2707_v3 = vadd.f32 %v13179_v20, %v13178_v43  ;;  %v7972_v20 = vld [vmem:[%s12799_s9 + $0x128] sm:$0xff] }
 0x75f   : > { %v5612_v11 = vsel %vm2117_vm1, %v11727_v35, -inf  ;;  %v4020_v47 = vsel %vm1807_vm0, %v2827_v53, %v3974_v34  ;;  %v2716_v53 = vadd.f32 %v13185_v56, %v13184_v39  ;;  %v13186_v34 = vld [vmem:[#allocation125_spill] sm:$0xff]  ;;  %v11801_v29 = vpop.f32.mrf.mxu1 }
 0x760   : > { %v5613_v48 = vmax.f32 %v11720_v19, %v5612_v11  ;;  %4036 = vst [vmem:[%s11737_s30 + $0x8] sm:$0xff] %v4020_v47  ;;  %v5564_v4 = vpop.f32.mrf.mxu3  ;;  %v2772_v36 = vadd.f32 %v13181_v28, %v2707_v3  ;;  %v7173_v47 = vld [vmem:[%s9306_s0 + $0x1c8] sm:$0xff]  ;;  %v7172_v56 = vld [vmem:[%s9306_s0 + $0x1c0] sm:$0xff] }
 0x761   : > { %v11743_v41 = vadd.f32 %v5564_v4, %v13180_v17  ;;  %6175 = vmatpush.msrb.mxu1 %v7173_v47  ;;  %v2781_v15 = vadd.f32 %v13187_v12, %v2716_v53  ;;  %v7971_v4 = vld [vmem:[%s12799_s9 + $0x120] sm:$0xff] }
 0x762   : > { %5614 = vmax.xlane.f32.xlu1 %v5613_v48  ;;  %v2829_v44 = vmul.f32 %v7746_v63, %v2772_v36  ;;  %v11783_v43 = vadd.f32 %v7971_v4, %v11696_v30  ;;  %v13188_v63 = vld [vmem:[#allocation134_spill] sm:$0xff]  ;;  %v13197_v47 = vld [vmem:[#allocation25_spill] sm:$0xff] }
 0x763   : > { %v5676_v55 = vsel %vm2182_vm2, %v11743_v41, -inf  ;;  %v2832_v17 = vmul.f32 %v7748_v60, %v2781_v15  ;;  %v2505_v28 = vadd.f32 %v11201_v14, %v13188_v63  ;;  %v13189_v30 = vld [vmem:[#allocation90_spill] sm:$0xff]  ;;  %v13193_v14 = vld [vmem:[#allocation79_spill] sm:$0xff]  ;;  %6176 = vmatpush.msrb.mxu1 %v7172_v56  ;;  %v13198_v63 = vld [vmem:[#allocation140_spill] sm:$0xff] }
 0x764   : > { %v5496_v18 = vpop.f32.mrf.mxu0  ;;  %5677 = vmax.xlane.f32.xlu0 %v5676_v55 }
 0x765   : > { %v11757_v50 = vadd.f32 %v7970_v6, %v5496_v18  ;;  %v13190_v18 = vld [vmem:[#allocation70_spill] sm:$0xff]  ;;  %v13191_v6 = vld [vmem:[#allocation153_spill] sm:$0xff]  ;;  %7753 = vrcp.f32 %v2505_v28  ;;  %v2508_v28 = vadd.f32 %v11221_v8, %v13198_v63 }
 0x766   : > { %v3978_v23 = vpop.permute.xlu2 %3977  ;;  %v2698_v27 = vadd.f32 %v13190_v18, %v13189_v30  ;;  %v13199_v30 = vld [vmem:[#allocation53_spill] sm:$0xff]  ;;  %v13200_v18 = vld [vmem:[#allocation72_spill] sm:$0xff] }
 0x767   : > { %v5616_v32 = vsel %vm2117_vm1, %v11757_v50, -inf  ;;  %v4022_v59 = vsel %vm1807_vm0, %v2829_v44, %v3978_v23  ;;  %v2515_v44 = vadd.f32 %v11364_v49, %v13191_v6  ;;  %v13201_v6 = vld [vmem:[#allocation49_spill] sm:$0xff] }
 0x768   : > { %v5617_v38 = vmax.f32 %v11752_v37, %v5616_v32  ;;  %4038 = vst [vmem:[%s11737_s30 + $0x18] sm:$0xff] %v4022_v59  ;;  %v5567_v7 = vpop.f32.mrf.mxu3  ;;  %v7750_v32 = vpop.eup %7749  ;;  %v13192_v59 = vld [vmem:[#allocation60_spill] sm:$0xff] }
 0x769   : > { %v11773_v11 = vadd.f32 %v5567_v7, %v13186_v34  ;;  %v2725_v5 = vadd.f32 %v13193_v14, %v13192_v59  ;;  %v13195_v7 = vld [vmem:[#allocation69_spill] sm:$0xff]  ;;  %v7752_v53 = vpop.eup %7751  ;;  %v13196_v34 = vld [vmem:[#allocation95_spill] sm:$0xff]  ;;  %7755 = vrcp.f32 %v2515_v44  ;;  %v13202_v44 = vld [vmem:[#allocation94_spill] sm:$0xff] }
 0x76a   : > { %5618 = vmax.xlane.f32.xlu2 %v5617_v38  ;;  %v2507_v38 = vadd.f32 %v11163_v26, %v13194_v31  ;;  %v2763_v49 = vadd.f32 %v13196_v34, %v2698_v27  ;;  %v2704_v27 = vadd.f32 %v13200_v18, %v13199_v30  ;;  %v13203_v59 = vld [vmem:[#allocation63_spill] sm:$0xff]  ;;  %v13204_v14 = vld [vmem:[#allocation82_spill] sm:$0xff]  ;;  %v13213_v18 = vld [vmem:[#allocation40_spill] sm:$0xff] }
 0x76b   : > { %v5679_v25 = vsel %vm2182_vm2, %v11773_v11, -inf  ;;  %v2790_v60 = vadd.f32 %v13197_v47, %v2725_v5  ;;  %v2734_v5 = vadd.f32 %v13204_v14, %v13203_v59  ;;  %v13206_v31 = vld [vmem:[#allocation35_spill] sm:$0xff]  ;;  %v13208_v47 = vld [vmem:[#allocation34_spill] sm:$0xff] }
 0x76c   : > { %v5499_v48 = vpop.f32.mrf.mxu0  ;;  %5680 = vmax.xlane.f32.xlu1 %v5679_v25  ;;  %v2826_v26 = vmul.f32 %v7750_v32, %v2763_v49  ;;  %7757 = vrcp.f32 %v2507_v38  ;;  %v7973_v25 = vld [vmem:[%s12799_s9 + $0x138] sm:$0xff]  ;;  %v7754_v32 = vpop.eup %7753  ;;  %v7178_v34 = vld [vmem:[%s9306_s0 + $0x1f0] sm:$0xff] }
 0x76d   : > { %v11788_v3 = vadd.f32 %v7972_v20, %v5499_v48  ;;  %v2835_v4 = vmul.f32 %v7752_v53, %v2790_v60  ;;  %v7171_v53 = vld [vmem:[%s9306_s0 + $0x1b8] sm:$0xff]  ;;  %v2769_v60 = vadd.f32 %v13208_v47, %v2704_v27  ;;  %6251 = vmatpush.msrb.mxu0 %v7178_v34  ;;  %7759 = vrcp.f32 %v2508_v28 }
 0x76e   : > { %v3984_v61 = vpop.permute.xlu2 %3983  ;;  %6177 = vmatpush.msrb.mxu1 %v7171_v53  ;;  %v13216_v34 = vld [vmem:[#allocation56_spill] sm:$0xff] }
 0x76f   : > { %v5620_v36 = vsel %vm2117_vm1, %v11788_v3, -inf  ;;  %v4025_v55 = vsel %vm1807_vm0, %v2832_v17, %v3984_v61  ;;  %v7756_v49 = vpop.eup %7755  ;;  %v2828_v27 = vmul.f32 %v7754_v32, %v2769_v60 }
 0x770   : > { %v5621_v23 = vmax.f32 %v11783_v43, %v5620_v36  ;;  %4041 = vst [vmem:[%s11737_s30 + $0x30] sm:$0xff] %v4025_v55  ;;  %v5570_v46 = vpop.f32.mrf.mxu3 }
 0x771   : > { %v11808_v39 = vadd.f32 %v5570_v46, %v13195_v7  ;;  %v13207_v7 = vld [vmem:[#allocation67_spill] sm:$0xff] }
 0x772   : > { %5622 = vmax.xlane.f32.xlu0 %v5621_v23  ;;  %v2518_v23 = vadd.f32 %v13202_v44, %v13201_v6  ;;  %v7975_v6 = vld [vmem:[%s12799_s9 + $0x148] sm:$0xff] }
 0x773   : > { %v5682_v12 = vsel %vm2182_vm2, %v11808_v39, -inf }
 0x774   : > { %v5502_v15 = vpop.f32.mrf.mxu0  ;;  %5683 = vmax.xlane.f32.xlu2 %v5682_v12  ;;  %4748 = vadd.xlane.f32.xlu1 %v11245_v2  ;;  %v7974_v2 = vld [vmem:[%s12799_s9 + $0x130] sm:$0xff]  ;;  %7761 = vrcp.f32 %v2518_v23  ;;  %v7976_v23 = vld [vmem:[%s12799_s9 + $0x140] sm:$0xff] }
 0x775   : > { %v11819_v48 = vadd.f32 %v7973_v25, %v5502_v15  ;;  %v3972_v20 = vpop.permute.xlu1 %3971  ;;  %v11828_v36 = vadd.f32 %v7974_v2, %v11722_v16  ;;  %v13205_v16 = vld [vmem:[#allocation144_spill] sm:$0xff]  ;;  %v13209_v12 = vld [vmem:[#allocation55_spill] sm:$0xff]  ;;  %v13210_v15 = vld [vmem:[#allocation74_spill] sm:$0xff]  ;;  %v11851_v25 = vpop.f32.mrf.mxu1 }
 0x776   : > { %v3990_v17 = vpop.permute.xlu2 %3989  ;;  %v4019_v61 = vsel %vm1807_vm0, %v2826_v26, %v3972_v20  ;;  %v2510_v38 = vadd.f32 %v13206_v31, %v13205_v16  ;;  %v2710_v26 = vadd.f32 %v13210_v15, %v13209_v12  ;;  %v13211_v20 = vld [vmem:[#allocation30_spill] sm:$0xff]  ;;  %v13212_v2 = vld [vmem:[#allocation99_spill] sm:$0xff]  ;;  %v13215_v16 = vld [vmem:[#allocation21_spill] sm:$0xff] }
 0x777   : > { %v4028_v55 = vsel %vm1807_vm0, %v2835_v4, %v3990_v17  ;;  %4035 = vst [vmem:[%s11737_s30] sm:$0xff] %v4019_v61  ;;  %v5624_v46 = vsel %vm2117_vm1, %v11819_v48, -inf  ;;  %v7758_v4 = vpop.eup %7757  ;;  %v2799_v17 = vadd.f32 %v13211_v20, %v2734_v5  ;;  %v13214_v5 = vld [vmem:[#allocation150_spill] sm:$0xff]  ;;  %v7170_v12 = vld [vmem:[%s9306_s0 + $0x1b0] sm:$0xff] }
 0x778   : > { %4044 = vst [vmem:[%s11737_s30 + $0x48] sm:$0xff] %v4028_v55  ;;  %v5573_v8 = vpop.f32.mrf.mxu3  ;;  %v5625_v61 = vmax.f32 %v11828_v36, %v5624_v46  ;;  %v2775_v55 = vadd.f32 %v13212_v2, %v2710_v26  ;;  %7763 = vrcp.f32 %v2510_v38  ;;  %v2511_v31 = vadd.f32 %v13215_v16, %v13214_v5  ;;  %v7760_v15 = vpop.eup %7759  ;;  %v13218_v26 = vld [vmem:[#allocation68_spill] sm:$0xff]  ;;  %6178 = vmatpush.msrb.mxu1 %v7170_v12  ;;  %v7978_v12 = vld [vmem:[%s12799_s9 + $0x150] sm:$0xff] }
 0x779   : > { %v11844_v56 = vadd.f32 %v5573_v8, %v13207_v7  ;;  %v2838_v46 = vmul.f32 %v7756_v49, %v2799_v17  ;;  %v11868_v8 = vadd.f32 %v7976_v23, %v11759_v33  ;;  %v13217_v49 = vld [vmem:[#allocation75_spill] sm:$0xff]  ;;  %v13222_v2 = vld [vmem:[#allocation52_spill] sm:$0xff] }
 0x77a   : > { %v2830_v14 = vmul.f32 %v7758_v4, %v2775_v55  ;;  %v2713_v47 = vadd.f32 %v13217_v49, %v13216_v34  ;;  %v13219_v4 = vld [vmem:[#allocation85_spill] sm:$0xff]  ;;  %v13220_v17 = vld [vmem:[#allocation147_spill] sm:$0xff]  ;;  %7765 = vrcp.f32 %v2511_v31  ;;  %v13227_v16 = vld [vmem:[#allocation36_spill] sm:$0xff] }
 0x77b   : > { %v5685_v63 = vsel %vm2182_vm2, %v11844_v56, -inf  ;;  %v2743_v20 = vadd.f32 %v13219_v4, %v13218_v26  ;;  %v13228_v34 = vld [vmem:[#allocation22_spill] sm:$0xff] }
 0x77c   : > { %v5505_v30 = vpop.f32.mrf.mxu0  ;;  %5686 = vmax.xlane.f32.xlu0 %v5685_v63  ;;  %4752 = vadd.xlane.f32.xlu2 %v13213_v18  ;;  %v3976_v44 = vpop.permute.xlu0 %3975  ;;  %v13223_v18 = vld [vmem:[#allocation101_spill] sm:$0xff] }
 0x77d   : > { %v11862_v28 = vadd.f32 %v7975_v6, %v5505_v30  ;;  %5626 = vmax.xlane.f32.xlu1 %v5625_v61  ;;  %v4021_v32 = vsel %vm1807_vm0, %v2828_v27, %v3976_v44  ;;  %v13221_v61 = vld [vmem:[#allocation130_spill] sm:$0xff]  ;;  %v7762_v30 = vpop.eup %7761  ;;  %v2778_v27 = vadd.f32 %v13223_v18, %v2713_v47  ;;  %v13225_v44 = vld [vmem:[#allocation77_spill] sm:$0xff]  ;;  %v11899_v47 = vpop.f32.mrf.mxu1 }
 0x77e   : > { %v3996_v59 = vpop.permute.xlu2 %3995  ;;  %4037 = vst [vmem:[%s11737_s30 + $0x10] sm:$0xff] %v4021_v32  ;;  %v2513_v63 = vadd.f32 %v13221_v61, %v13220_v17  ;;  %v13224_v6 = vld [vmem:[#allocation58_spill] sm:$0xff]  ;;  %v7764_v32 = vpop.eup %7763  ;;  %v13229_v17 = vld [vmem:[#allocation44_spill] sm:$0xff]  ;;  %v13230_v61 = vld [vmem:[#allocation29_spill] sm:$0xff] }
 0x77f   : > { %v5628_v38 = vsel %vm2117_vm1, %v11862_v28, -inf  ;;  %v4031_v7 = vsel %vm1807_vm0, %v2838_v46, %v3996_v59  ;;  %v3980_v53 = vpop.permute.xlu1 %3979  ;;  %v2719_v46 = vadd.f32 %v13225_v44, %v13224_v6  ;;  %v13226_v59 = vld [vmem:[#allocation33_spill] sm:$0xff]  ;;  %v2831_v49 = vmul.f32 %v7760_v15, %v2778_v27  ;;  %v13231_v27 = vld [vmem:[#allocation59_spill] sm:$0xff]  ;;  %v13232_v6 = vld [vmem:[#allocation78_spill] sm:$0xff] }
 0x780   : > { %4047 = vst [vmem:[%s11737_s30 + $0x60] sm:$0xff] %v4031_v7  ;;  %v4023_v33 = vsel %vm1807_vm0, %v2830_v14, %v3980_v53  ;;  %v5576_v60 = vpop.f32.mrf.mxu3  ;;  %v5629_v23 = vmax.f32 %v11868_v8, %v5628_v38  ;;  %v2808_v14 = vadd.f32 %v13226_v59, %v2743_v20  ;;  %7767 = vrcp.f32 %v2513_v63  ;;  %v7977_v38 = vld [vmem:[%s12799_s9 + $0x158] sm:$0xff]  ;;  %v7766_v59 = vpop.eup %7765 }
 0x781   : > { %4039 = vst [vmem:[%s11737_s30 + $0x20] sm:$0xff] %v4023_v33  ;;  %v11888_v55 = vadd.f32 %v5576_v60, %v13222_v2  ;;  %v2784_v7 = vadd.f32 %v13227_v16, %v2719_v46  ;;  %v11910_v15 = vadd.f32 %v7978_v12, %v11801_v29  ;;  %v2514_v63 = vadd.f32 %v13230_v61, %v13229_v17  ;;  %v13235_v16 = vld [vmem:[#allocation51_spill] sm:$0xff] }
 0x782   : > { %v2841_v60 = vmul.f32 %v7762_v30, %v2808_v14  ;;  %v2722_v44 = vadd.f32 %v13232_v6, %v13231_v27  ;;  %v13234_v14 = vld [vmem:[#allocation43_spill] sm:$0xff] }
 0x783   : > { %v5688_v5 = vsel %vm2182_vm2, %v11888_v55, -inf  ;;  %v2833_v20 = vmul.f32 %v7764_v32, %v2784_v7  ;;  %v13233_v32 = vld [vmem:[#allocation156_spill] sm:$0xff]  ;;  %7769 = vrcp.f32 %v2514_v63 }
 0x784   : > { %v5508_v53 = vpop.f32.mrf.mxu0  ;;  %4760 = vadd.xlane.f32.xlu0 %v13228_v34  ;;  %5630 = vmax.xlane.f32.xlu2 %v5629_v23  ;;  %v3982_v33 = vpop.permute.xlu0 %3981  ;;  %v7169_v23 = vld [vmem:[%s9306_s0 + $0x1a8] sm:$0xff] }
 0x785   : > { %v11904_v31 = vadd.f32 %v7977_v38, %v5508_v53  ;;  %5689 = vmax.xlane.f32.xlu1 %v5688_v5  ;;  %v4024_v26 = vsel %vm1807_vm0, %v2831_v49, %v3982_v33  ;;  %v2516_v5 = vadd.f32 %v13234_v14, %v13233_v32  ;;  %6179 = vmatpush.msrb.mxu1 %v7169_v23  ;;  %v13236_v53 = vld [vmem:[#allocation23_spill] sm:$0xff]  ;;  %v13237_v49 = vld [vmem:[#allocation61_spill] sm:$0xff]  ;;  %v13238_v38 = vld [vmem:[#allocation80_spill] sm:$0xff] }
 0x786   : > { %v4002_v4 = vpop.permute.xlu2 %4001  ;;  %4040 = vst [vmem:[%s11737_s30 + $0x28] sm:$0xff] %v4024_v26  ;;  %v2787_v34 = vadd.f32 %v13236_v53, %v2722_v44  ;;  %v2728_v33 = vadd.f32 %v13238_v38, %v13237_v49  ;;  %v7768_v12 = vpop.eup %7767 }
 0x787   : > { %v5632_v2 = vsel %vm2117_vm1, %v11904_v31, -inf  ;;  %v4034_v30 = vsel %vm1807_vm0, %v2841_v60, %v4002_v4  ;;  %v3986_v18 = vpop.permute.xlu1 %3985  ;;  %v13239_v4 = vld [vmem:[#allocation87_spill] sm:$0xff]  ;;  %7771 = vrcp.f32 %v2516_v5  ;;  %v5452_v44 = vpop.f32.mrf.mxu1  ;;  %v13243_v5 = vld [vmem:[#allocation62_spill] sm:$0xff] }
 0x788   : > { %4050 = vst [vmem:[%s11737_s30 + $0x78] sm:$0xff] %v4034_v30  ;;  %v4026_v29 = vsel %vm1807_vm0, %v2833_v20, %v3986_v18  ;;  %v5579_v46 = vpop.f32.mrf.mxu3  ;;  %v5633_v60 = vmax.f32 %v11910_v15, %v5632_v2  ;;  %v2793_v20 = vadd.f32 %v13239_v4, %v2728_v33  ;;  %v2834_v61 = vmul.f32 %v7766_v59, %v2787_v34  ;;  %v7979_v30 = vld [vmem:[%s12799_s9 + $0x168] sm:$0xff]  ;;  %v13240_v2 = vld [vmem:[#allocation24_spill] sm:$0xff]  ;;  %v7980_v59 = vld [vmem:[%s12799_s9 + $0x160] sm:$0xff] }
 0x789   : > { %4042 = vst [vmem:[%s11737_s30 + $0x38] sm:$0xff] %v4026_v29  ;;  %v11928_v7 = vadd.f32 %v5579_v46, %v13235_v16  ;;  %v13241_v29 = vld [vmem:[#allocation46_spill] sm:$0xff]  ;;  %v13242_v46 = vld [vmem:[#allocation41_spill] sm:$0xff]  ;;  %v11950_v32 = vadd.f32 %v7980_v59, %v11851_v25  ;;  %v13246_v25 = vld [vmem:[#allocation88_spill] sm:$0xff] }
 0x78a   : > { %v2836_v6 = vmul.f32 %v7768_v12, %v2793_v20  ;;  %v2517_v23 = vadd.f32 %v13242_v46, %v13241_v29  ;;  %v13244_v16 = vld [vmem:[#allocation81_spill] sm:$0xff]  ;;  %v13245_v12 = vld [vmem:[#allocation38_spill] sm:$0xff]  ;;  %v13247_v20 = vld [vmem:[#allocation64_spill] sm:$0xff] }
 0x78b   : > { %v5691_v26 = vsel %vm2182_vm2, %v11928_v7, -inf  ;;  %v2731_v53 = vadd.f32 %v13244_v16, %v13243_v5  ;;  %v7168_v33 = vld [vmem:[%s9306_s0 + $0x1a0] sm:$0xff]  ;;  %v13250_v59 = vld [vmem:[#allocation86_spill] sm:$0xff]  ;;  %v7981_v5 = vld [vmem:[%s12799_s9 + $0x178] sm:$0xff] }
 0x78c   : > { %v5511_v17 = vpop.f32.mrf.mxu0  ;;  %5634 = vmax.xlane.f32.xlu0 %v5633_v60  ;;  %5692 = vmax.xlane.f32.xlu2 %v5691_v26  ;;  %v3988_v63 = vpop.permute.xlu0 %3987  ;;  %7773 = vrcp.f32 %v2517_v23 }
 0x78d   : > { %v11940_v18 = vadd.f32 %v7979_v30, %v5511_v17  ;;  %4756 = vadd.xlane.f32.xlu1 %v13240_v2  ;;  %v4027_v27 = vsel %vm1807_vm0, %v2834_v61, %v3988_v63  ;;  %v7770_v60 = vpop.eup %7769  ;;  %6180 = vmatpush.msrb.mxu1 %v7168_v33  ;;  %v2796_v4 = vadd.f32 %v13246_v25, %v2731_v53  ;;  %v13248_v17 = vld [vmem:[#allocation83_spill] sm:$0xff] }
 0x78e   : > { %4043 = vst [vmem:[%s11737_s30 + $0x40] sm:$0xff] %v4027_v27  ;;  %v2737_v61 = vadd.f32 %v13248_v17, %v13247_v20  ;;  %v7182_v30 = vld [vmem:[%s10616_s10 + $0x10] sm:$0xff]  ;;  %v7772_v2 = vpop.eup %7771 }
 0x78f   : > { %v3992_v14 = vpop.permute.xlu1 %3991  ;;  %v5636_v34 = vsel %vm2117_vm1, %v11940_v18, -inf  ;;  %6075 = vmatpush.msra.mxu2 %v7182_v30  ;;  %v7167_v30 = vld [vmem:[%s9306_s0 + $0x198] sm:$0xff] }
 0x790   : > { %v4029_v49 = vsel %vm1807_vm0, %v2836_v6, %v3992_v14  ;;  %v5582_v38 = vpop.f32.mrf.mxu3  ;;  %v5637_v63 = vmax.f32 %v11950_v32, %v5636_v34  ;;  %v13249_v6 = vld [vmem:[#allocation31_spill] sm:$0xff]  ;;  %v2837_v14 = vmul.f32 %v7770_v60, %v2796_v4  ;;  %v13251_v60 = vld [vmem:[#allocation66_spill] sm:$0xff]  ;;  %6181 = vmatpush.msrb.mxu1 %v7167_v30 }
 0x791   : > { %4045 = vst [vmem:[%s11737_s30 + $0x50] sm:$0xff] %v4029_v49  ;;  %v11961_v26 = vadd.f32 %v5582_v38, %v13245_v12  ;;  %v2802_v29 = vadd.f32 %v13249_v6, %v2737_v61  ;;  %v7982_v49 = vld [vmem:[%s12799_s9 + $0x170] sm:$0xff]  ;;  %v13252_v12 = vld [vmem:[#allocation84_spill] sm:$0xff]  ;;  %v5455_v61 = vpop.f32.mrf.mxu1 }
 0x792   : > { %v11982_v38 = vadd.f32 %v7982_v49, %v11899_v47  ;;  %v2740_v25 = vadd.f32 %v13252_v12, %v13251_v60  ;;  %v13254_v47 = vld [vmem:[#allocation91_spill] sm:$0xff] }
 0x793   : > { %v5694_v27 = vsel %vm2182_vm2, %v11961_v26, -inf  ;;  %v2839_v34 = vmul.f32 %v7772_v2, %v2802_v29  ;;  %v7774_v2 = vpop.eup %7773  ;;  %v7177_v29 = vld [vmem:[%s9306_s0 + $0x1e8] sm:$0xff] }
 0x794   : > { %v5514_v46 = vpop.f32.mrf.mxu0  ;;  %5695 = vmax.xlane.f32.xlu0 %v5694_v27  ;;  %4764 = vadd.xlane.f32.xlu2 %v13250_v59  ;;  %v3994_v16 = vpop.permute.xlu0 %3993  ;;  %v2805_v6 = vadd.f32 %v13254_v47, %v2740_v25 }
 0x795   : > { %v11975_v23 = vadd.f32 %v7981_v5, %v5514_v46  ;;  %5638 = vmax.xlane.f32.xlu1 %v5637_v63  ;;  %v4030_v53 = vsel %vm1807_vm0, %v2837_v14, %v3994_v16  ;;  %v13253_v63 = vld [vmem:[#allocation39_spill] sm:$0xff]  ;;  %6252 = vmatpush.msrb.mxu0 %v7177_v29  ;;  %v7983_v16 = vld [vmem:[%s12799_s9 + $0x188] sm:$0xff]  ;;  %v7986_v29 = vld [vmem:[%s12799_s9 + $0x198] sm:$0xff] }
 0x796   : > { %4046 = vst [vmem:[%s11737_s30 + $0x58] sm:$0xff] %v4030_v53  ;;  %v2840_v5 = vmul.f32 %v7774_v2, %v2805_v6 }
 0x797   : > { %v3998_v33 = vpop.permute.xlu1 %3997  ;;  %v5640_v4 = vsel %vm2117_vm1, %v11975_v23, -inf  ;;  %6253 = vmatpush.msrb.mxu0 %v7176_v62 }
 0x798   : > { %v4032_v20 = vsel %vm1807_vm0, %v2839_v34, %v3998_v33  ;;  %v5585_v17 = vpop.f32.mrf.mxu3  ;;  %v5641_v46 = vmax.f32 %v11982_v38, %v5640_v4  ;;  %v7984_v33 = vld [vmem:[%s12799_s9 + $0x180] sm:$0xff]  ;;  %v7166_v4 = vld [vmem:[%s9306_s0 + $0x190] sm:$0xff] }
 0x799   : > { %4048 = vst [vmem:[%s11737_s30 + $0x68] sm:$0xff] %v4032_v20  ;;  %v11993_v27 = vadd.f32 %v5585_v17, %v13253_v63  ;;  %v12009_v60 = vadd.f32 %v7984_v33, %v5452_v44  ;;  %v13255_v20 = vld [vmem:[#allocation37_spill] sm:$0xff]  ;;  %6182 = vmatpush.msrb.mxu1 %v7166_v4  ;;  %v5458_v30 = vpop.f32.mrf.mxu1  ;;  %v7985_v44 = vld [vmem:[%s12799_s9 + $0x190] sm:$0xff]  ;;  %v13257_v4 = vld [vmem:[#allocation28_spill] sm:$0xff] }
 0x79a   : > { %v12024_v6 = vadd.f32 %v7985_v44, %v5455_v61 }
 0x79b   : > { %v5697_v59 = vsel %vm2182_vm2, %v11993_v27, -inf }
 0x79c   : > { %v5517_v14 = vpop.f32.mrf.mxu0  ;;  %5698 = vmax.xlane.f32.xlu0 %v5697_v59  ;;  %v4000_v34 = vpop.permute.xlu0 %3999 }
 0x79d   : > { %v12003_v53 = vadd.f32 %v7983_v16, %v5517_v14  ;;  %5642 = vmax.xlane.f32.xlu1 %v5641_v46  ;;  %v4033_v49 = vsel %vm1807_vm0, %v2840_v5, %v4000_v34  ;;  %v7165_v16 = vld [vmem:[%s9306_s0 + $0x188] sm:$0xff]  ;;  %v13256_v34 = vld [vmem:[#allocation127_spill] sm:$0xff] }
 0x79e   : > { %4049 = vst [vmem:[%s11737_s30 + $0x70] sm:$0xff] %v4033_v49  ;;  %6183 = vmatpush.msrb.mxu1 %v7165_v16 }
 0x79f   : > { %v5644_v12 = vsel %vm2117_vm1, %v12003_v53, -inf }
 0x7a0   : > { %v5588_v25 = vpop.f32.mrf.mxu3  ;;  %v5645_v2 = vmax.f32 %v12009_v60, %v5644_v12  ;;  %v7987_v12 = vld [vmem:[%s12799_s9 + $0x1a0] sm:$0xff] }
 0x7a1   : > { %v12016_v17 = vadd.f32 %v5588_v25, %v13255_v20  ;;  %v12043_v25 = vadd.f32 %v7987_v12, %v5458_v30  ;;  %v5461_v20 = vpop.f32.mrf.mxu1 }
 0x7a3   : > { %v5700_v63 = vsel %vm2182_vm2, %v12016_v17, -inf }
 0x7a4   : > { %v5520_v47 = vpop.f32.mrf.mxu0  ;;  %5701 = vmax.xlane.f32.xlu0 %v5700_v63 }
 0x7a5   : > { %v12029_v46 = vadd.f32 %v7986_v29, %v5520_v47  ;;  %5646 = vmax.xlane.f32.xlu1 %v5645_v2  ;;  %v7988_v2 = vld [vmem:[%s12799_s9 + $0x1a8] sm:$0xff] }
 0x7a7   : > { %v5648_v59 = vsel %vm2117_vm1, %v12029_v46, -inf }
 0x7a8   : > { %v5649_v14 = vmax.f32 %v12024_v6, %v5648_v59  ;;  %v5591_v5 = vpop.f32.mrf.mxu3  ;;  %v7164_v59 = vld [vmem:[%s9306_s0 + $0x180] sm:$0xff] }
 0x7a9   : > { %v12036_v49 = vadd.f32 %v5591_v5, %v13256_v34  ;;  %6184 = vmatpush.msrb.mxu1 %v7164_v59  ;;  %v7989_v34 = vld [vmem:[%s12799_s9 + $0x1b0] sm:$0xff]  ;;  %v5464_v12 = vpop.f32.mrf.mxu1  ;;  %v7163_v59 = vld [vmem:[%s9306_s0 + $0x178] sm:$0xff] }
 0x7aa   : > { %5650 = vmax.xlane.f32.xlu2 %v5649_v14  ;;  %v13258_v14 = vld [vmem:[#allocation132_spill] sm:$0xff] }
 0x7ab   : > { %v5703_v61 = vsel %vm2182_vm2, %v12036_v49, -inf  ;;  %6185 = vmatpush.msrb.mxu1 %v7163_v59 }
 0x7ac   : > { %v5523_v33 = vpop.f32.mrf.mxu0  ;;  %4772 = vadd.xlane.f32.xlu0 %v13257_v4  ;;  %v7990_v4 = vld [vmem:[%s12799_s9 + $0x1b8] sm:$0xff] }
 0x7ad   : > { %v12049_v63 = vadd.f32 %v7988_v2, %v5523_v33  ;;  %5704 = vmax.xlane.f32.xlu1 %v5703_v61  ;;  %v12063_v61 = vadd.f32 %v7989_v34, %v5461_v20  ;;  %v13259_v33 = vld [vmem:[#allocation143_spill] sm:$0xff]  ;;  %v13261_v34 = vld [vmem:[#allocation160_spill] sm:$0xff]  ;;  %6186 = vmatpush.msrb.mxu1 %v7162_v13  ;;  %v7161_v13 = vld [vmem:[%s9306_s0 + $0x168] sm:$0xff] }
 0x7af   : > { %v5652_v47 = vsel %vm2117_vm1, %v12049_v63, -inf  ;;  %6187 = vmatpush.msrb.mxu1 %v7161_v13 }
 0x7b0   : > { %v5653_v44 = vmax.f32 %v12043_v25, %v5652_v47  ;;  %v5594_v29 = vpop.f32.mrf.mxu3 }
 0x7b1   : > { %v12056_v30 = vadd.f32 %v5594_v29, %v13258_v14  ;;  %v13260_v14 = vld [vmem:[#allocation139_spill] sm:$0xff]  ;;  %v5467_v59 = vpop.f32.mrf.mxu1 }
 0x7b2   : > { %5654 = vmax.xlane.f32.xlu2 %v5653_v44 }
 0x7b3   : > { %v5706_v5 = vsel %vm2182_vm2, %v12056_v30, -inf }
 0x7b4   : > { %v5526_v16 = vpop.f32.mrf.mxu0  ;;  %4784 = vadd.xlane.f32.xlu0 %v13259_v33  ;;  %v4841_v33 = vsel %vm2182_vm2, %v13261_v34, 0.0 }
 0x7b5   : > { %v12069_v2 = vadd.f32 %v7990_v4, %v5526_v16  ;;  %5707 = vmax.xlane.f32.xlu1 %v5706_v5  ;;  %v7991_v4 = vld [vmem:[%s12799_s9 + $0x1c0] sm:$0xff] }
 0x7b7   : > { %v5656_v47 = vsel %vm2117_vm1, %v12069_v2, -inf }
 0x7b8   : > { %v5657_v44 = vmax.f32 %v12063_v61, %v5656_v47  ;;  %v5597_v29 = vpop.f32.mrf.mxu3  ;;  %v12085_v47 = vadd.f32 %v7991_v4, %v5464_v12  ;;  %v13263_v4 = vld [vmem:[#allocation135_spill] sm:$0xff] }
 0x7b9   : > { %v12076_v20 = vadd.f32 %v5597_v29, %v13260_v14  ;;  %v7992_v29 = vld [vmem:[%s12799_s9 + $0x1c8] sm:$0xff]  ;;  %v5470_v52 = vpop.f32.mrf.mxu1 }
 0x7ba   : > { %5658 = vmax.xlane.f32.xlu2 %v5657_v44 }
 0x7bb   : > { %v5709_v5 = vsel %vm2182_vm2, %v12076_v20, -inf }
 0x7bc   : > { %4842 = vadd.xlane.f32.xlu0 %v4841_v33  ;;  %v5529_v16 = vpop.f32.mrf.mxu0 }
 0x7bd   : > { %5710 = vmax.xlane.f32.xlu1 %v5709_v5  ;;  %v12090_v44 = vadd.f32 %v7992_v29, %v5529_v16  ;;  %v7993_v5 = vld [vmem:[%s12799_s9 + $0x1d0] sm:$0xff]  ;;  %v7994_v29 = vld [vmem:[%s12799_s9 + $0x1d8] sm:$0xff] }
 0x7be   : > { %v12101_v16 = vadd.f32 %v7993_v5, %v5467_v59  ;;  %v7160_v59 = vld [vmem:[%s9306_s0 + $0x160] sm:$0xff] }
 0x7bf   : > { %v5660_v14 = vsel %vm2117_vm1, %v12090_v44, -inf  ;;  %6188 = vmatpush.msrb.mxu1 %v7160_v59 }
 0x7c0   : > { %v5661_v34 = vmax.f32 %v12085_v47, %v5660_v14  ;;  %v5600_v33 = vpop.f32.mrf.mxu3 }
 0x7c2   : > { %4776 = vadd.xlane.f32.xlu2 %v13262_v24 }
 0x7c4   : > { %5662 = vmax.xlane.f32.xlu0 %v5661_v34  ;;  %v5532_v12 = vpop.f32.mrf.mxu0 }
 0x7c5   : > { %4768 = vadd.xlane.f32.xlu1 %v13263_v4  ;;  %v12107_v14 = vadd.f32 %v7994_v29, %v5532_v12  ;;  %v13266_v4 = vld [vmem:[#allocation145_spill] sm:$0xff] }
 0x7c6   : > { %v12118_v21 = vadd.f32 %v5600_v33, %v13266_v4  ;;  %v7995_v29 = vld [vmem:[%s12799_s9 + $0x1e0] sm:$0xff]  ;;  %v12133_v33 = vpop.xlane.xlu1 %4744 }
 0x7c7   : > { %v5664_v62 = vsel %vm2117_vm1, %v12107_v14, -inf  ;;  %v12113_v34 = vpop.xlane.xlu0 %4736  ;;  %v12123_v40 = vadd.f32 %v7995_v29, %v5470_v52 }
 0x7c8   : > { %v5665_v24 = vmax.f32 %v12101_v16, %v5664_v62  ;;  %13264 = vst [vmem:[#allocation115_spill] sm:$0xff] %v12113_v34  ;;  %v5603_v5 = vpop.f32.mrf.mxu3  ;;  %v12125_v62 = vpop.xlane.xlu2 %4728  ;;  %v5712_v59 = vsel %vm2182_vm2, %v12118_v21, -inf }
 0x7c9   : > { %13267 = vst [vmem:[#allocation114_spill] sm:$0xff] %v12123_v40 }
 0x7ca   : > { %4788 = vadd.xlane.f32.xlu2 %v13265_v57  ;;  %13268 = vst [vmem:[#allocation117_spill] sm:$0xff] %v12125_v62  ;;  %v7996_v57 = vld [vmem:[%s12799_s9 + $0x1e8] sm:$0xff]  ;;  %v13272_v62 = vld [vmem:[#allocation149_spill] sm:$0xff] }
 0x7cb   : > { %v12143_v42 = vadd.f32 %v5603_v5, %v13272_v62 }
 0x7cc   : > { %5666 = vmax.xlane.f32.xlu0 %v5665_v24  ;;  %v5535_v12 = vpop.f32.mrf.mxu0 }
 0x7cd   : > { %4780 = vadd.xlane.f32.xlu1 %v13269_v1  ;;  %v12131_v13 = vadd.f32 %v7996_v57, %v5535_v12  ;;  %v5473_v1 = vpop.f32.mrf.mxu1  ;;  %v13273_v12 = vld [vmem:[#allocation50_spill] sm:$0xff] }
 0x7ce   : > { %v4838_v57 = vsel %vm2182_vm2, %v13273_v12, 0.0  ;;  %v5715_v12 = vsel %vm2182_vm2, %v12143_v42, -inf }
 0x7cf   : > { %13270 = vst [vmem:[#allocation116_spill] sm:$0xff] %v12131_v13  ;;  %v5668_v24 = vsel %vm2117_vm1, %v12131_v13, -inf  ;;  %v12140_v4 = vpop.xlane.xlu0 %4740 }
 0x7d0   : > { %v5669_v52 = vmax.f32 %v12123_v40, %v5668_v24  ;;  %13271 = vst [vmem:[#allocation119_spill] sm:$0xff] %v12140_v4  ;;  %v5606_v29 = vpop.f32.mrf.mxu3  ;;  %v7998_v24 = vld [vmem:[%s12799_s9 + $0x1f0] sm:$0xff]  ;;  %v12157_v5 = vpop.xlane.xlu2 %4732 }
 0x7d2   : > { %5713 = vmax.xlane.f32.xlu2 %v5712_v59  ;;  %v12155_v59 = vadd.f32 %v7998_v24, %v5473_v1  ;;  %v13276_v1 = vld [vmem:[#allocation155_spill] sm:$0xff] }
 0x7d3   : > { %v12167_v24 = vadd.f32 %v5606_v29, %v13276_v1  ;;  %v13279_v1 = vld [vmem:[#allocation161_spill] sm:$0xff] }
 0x7d4   : > { %5670 = vmax.xlane.f32.xlu0 %v5669_v52  ;;  %v5538_v10 = vpop.f32.mrf.mxu0 }
 0x7d5   : > { %4839 = vadd.xlane.f32.xlu1 %v4838_v57  ;;  %v12150_v58 = vadd.f32 %v7997_v45, %v5538_v10  ;;  %v5615_v62 = vpop.xlane.xlu1 %5614  ;;  %v13275_v10 = vld [vmem:[#allocation163_spill] sm:$0xff]  ;;  %v5718_v29 = vsel %vm2182_vm2, %v12167_v24, -inf }
 0x7d6   : > { %v4850_v54 = vsel %vm2182_vm2, %v13275_v10, 0.0 }
 0x7d7   : > { %13274 = vst [vmem:[#allocation118_spill] sm:$0xff] %v12150_v58  ;;  %v5672_v52 = vsel %vm2117_vm1, %v12150_v58, -inf  ;;  %v5678_v57 = vpop.xlane.xlu0 %5677 }
 0x7d8   : > { %v5673_v0 = vmax.f32 %v12155_v59, %v5672_v52  ;;  %v5724_v45 = vmax.f32 %v5615_v62, %v5678_v57  ;;  %v5609_v22 = vpop.f32.mrf.mxu3  ;;  %v13277_v62 = vld [vmem:[#allocation159_spill] sm:$0xff] }
 0x7d9   : > { %v12173_v52 = vadd.f32 %v5609_v22, %v13277_v62  ;;  %v13278_v22 = vld [vmem:[#allocation162_spill] sm:$0xff]  ;;  %v4844_v62 = vsel %vm2182_vm2, %v13279_v1, 0.0 }
 0x7da   : > { %5716 = vmax.xlane.f32.xlu2 %v5715_v12  ;;  %v5740_v34 = vsub.f32 %v11720_v19, %v5724_v45  ;;  %v5741_v4 = vsub.f32 %v11727_v35, %v5724_v45  ;;  %v5900_v58 = vsub.f32 %v11743_v41, %v5724_v45  ;;  %v4847_v41 = vsel %vm2182_vm2, %v13278_v22, 0.0 }
 0x7db   : > { %v5721_v35 = vsel %vm2182_vm2, %v12173_v52, -inf }
 0x7dc   : > { %4851 = vadd.xlane.f32.xlu0 %v4850_v54  ;;  %v5772_v13 = vmul.f32 1.442695, %v5740_v34  ;;  %v5774_v40 = vmul.f32 1.442695, %v5741_v4  ;;  %v5916_v9 = vmul.f32 1.442695, %v5900_v58 }
 0x7dd   : > { %5674 = vmax.xlane.f32.xlu1 %v5673_v0  ;;  %v5619_v12 = vpop.xlane.xlu2 %5618 }
 0x7de   : > { %7775 = vpow2.f32 %v5772_v13 }
 0x7df   : > { %v5681_v57 = vpop.xlane.xlu1 %5680  ;;  %7777 = vpow2.f32 %v5774_v40 }
 0x7e0   : > { %v5725_v19 = vmax.f32 %v5619_v12, %v5681_v57  ;;  %7779 = vpow2.f32 %v5916_v9 }
 0x7e2   : > { %v5742_v54 = vsub.f32 %v11752_v37, %v5725_v19  ;;  %v5743_v58 = vsub.f32 %v11757_v50, %v5725_v19  ;;  %v5901_v0 = vsub.f32 %v11773_v11, %v5725_v19  ;;  %5719 = vmax.xlane.f32.xlu2 %v5718_v29  ;;  %v13280_v19 = vld [vmem:[#allocation128_spill] sm:$0xff] }
 0x7e4   : > { %v5776_v34 = vmul.f32 1.442695, %v5742_v54  ;;  %v5778_v13 = vmul.f32 1.442695, %v5743_v58  ;;  %v5918_v4 = vmul.f32 1.442695, %v5901_v0  ;;  %5722 = vmax.xlane.f32.xlu0 %v5721_v35  ;;  %v12184_v40 = vpop.eup %7775 }
 0x7e5   : > { %4848 = vadd.xlane.f32.xlu1 %v4847_v41  ;;  %v12186_v9 = vpop.eup %7777  ;;  %v5623_v45 = vpop.xlane.xlu0 %5622  ;;  %6189 = vmatmul.f32.vlgmr.msrb.gmra.mxu1 %v12184_v40  ;;  %v4859_v35 = vsel %vm2182_vm2, %v13280_v19, 0.0  ;;  %v13281_v54 = vld [vmem:[#allocation100_spill] sm:$0xff] }
 0x7e6   : > { %7781 = vpow2.f32 %v5776_v34  ;;  %v12189_v37 = vpop.eup %7779  ;;  %7270 = vmatmul.msk.f32.vlgmr.msrb.gmra.mxu0 %vm2117_vm1, %v12186_v9  ;;  %v4856_v58 = vsel %vm2182_vm2, %v13281_v54, 0.0 }
 0x7e7   : > { %7783 = vpow2.f32 %v5778_v13  ;;  %v5684_v50 = vpop.xlane.xlu2 %5683  ;;  %v12193_v11 = vpop.xlane.xlu1 %4748  ;;  %7254 = vmatmul.msk.f32.vlgmr.msra.gmra.mxu2 %vm2182_vm2, %v12189_v37 }
 0x7e8   : > { %7785 = vpow2.f32 %v5918_v4  ;;  %v5726_v10 = vmax.f32 %v5623_v45, %v5684_v50  ;;  %v13282_v50 = vld [vmem:[#allocation164_spill] sm:$0xff] }
 0x7ea   : > { %v5744_v12 = vsub.f32 %v11783_v43, %v5726_v10  ;;  %v5745_v57 = vsub.f32 %v11788_v3, %v5726_v10  ;;  %v5902_v29 = vsub.f32 %v11808_v39, %v5726_v10  ;;  %4845 = vadd.xlane.f32.xlu2 %v4844_v62  ;;  %v4853_v10 = vsel %vm2182_vm2, %v13282_v50, 0.0 }
 0x7ec   : > { %v12206_v0 = vpop.eup %7781  ;;  %v5780_v22 = vmul.f32 1.442695, %v5744_v12  ;;  %v5782_v41 = vmul.f32 1.442695, %v5745_v57  ;;  %v5920_v34 = vmul.f32 1.442695, %v5902_v29  ;;  %4860 = vadd.xlane.f32.xlu0 %v4859_v35 }
 0x7ed   : > { %v12208_v13 = vpop.eup %7783  ;;  %4857 = vadd.xlane.f32.xlu1 %v4856_v58  ;;  %6192 = vmatmul.f32.gmra.mxu1 %v12206_v0  ;;  %v13283_v57 = vld [vmem:[#allocation26_spill] sm:$0xff]  ;;  %v13284_v35 = vld [vmem:[#allocation27_spill] sm:$0xff] }
 0x7ee   : > { %v12210_v43 = vpop.eup %7785  ;;  %7787 = vpow2.f32 %v5780_v22  ;;  %7271 = vmatmul.msk.f32.gmra.mxu0 %vm2117_vm1, %v12208_v13  ;;  %v4868_v29 = vsel %vm2182_vm2, %v13283_v57, 0.0  ;;  %v4865_v54 = vsel %vm2182_vm2, %v13284_v35, 0.0 }
 0x7ef   : > { %7789 = vpow2.f32 %v5782_v41  ;;  %v5687_v3 = vpop.xlane.xlu0 %5686  ;;  %v12215_v39 = vpop.xlane.xlu2 %4752  ;;  %7255 = vmatmul.msk.f32.gmra.mxu2 %vm2182_vm2, %v12210_v43 }
 0x7f0   : > { %7791 = vpow2.f32 %v5920_v34  ;;  %v5627_v4 = vpop.xlane.xlu1 %5626 }
 0x7f1   : > { %v5727_v45 = vmax.f32 %v5627_v4, %v5687_v3 }
 0x7f2   : > { %4854 = vadd.xlane.f32.xlu2 %v4853_v10 }
 0x7f3   : > { %v5746_v1 = vsub.f32 %v11828_v36, %v5727_v45  ;;  %v5747_v62 = vsub.f32 %v11819_v48, %v5727_v45  ;;  %v5903_v12 = vsub.f32 %v11844_v56, %v5727_v45  ;;  %v13285_v45 = vld [vmem:[#allocation129_spill] sm:$0xff] }
 0x7f4   : > { %v12226_v19 = vpop.eup %7787  ;;  %4869 = vadd.xlane.f32.xlu0 %v4868_v29  ;;  %v4862_v50 = vsel %vm2182_vm2, %v13285_v45, 0.0  ;;  %v13287_v29 = vld [vmem:[#allocation89_spill] sm:$0xff] }
 0x7f5   : > { %v12230_v58 = vpop.eup %7789  ;;  %v5784_v22 = vmul.f32 1.442695, %v5746_v1  ;;  %v5786_v41 = vmul.f32 1.442695, %v5747_v62  ;;  %v5922_v34 = vmul.f32 1.442695, %v5903_v12  ;;  %4866 = vadd.xlane.f32.xlu1 %v4865_v54  ;;  %6195 = vmatmul.f32.gmra.mxu1 %v12226_v19 }
 0x7f6   : > { %v12232_v36 = vpop.eup %7791  ;;  %7272 = vmatmul.msk.f32.gmra.mxu0 %vm2117_vm1, %v12230_v58  ;;  %v13286_v12 = vld [vmem:[#allocation138_spill] sm:$0xff]  ;;  %v4874_v35 = vsel %vm2182_vm2, %v13287_v29, 0.0 }
 0x7f7   : > { %7793 = vpow2.f32 %v5784_v22  ;;  %v12237_v48 = vpop.xlane.xlu0 %4760  ;;  %v5631_v56 = vpop.xlane.xlu2 %5630  ;;  %7256 = vmatmul.msk.f32.gmra.mxu2 %vm2182_vm2, %v12232_v36  ;;  %v4877_v57 = vsel %vm2182_vm2, %v13286_v12, 0.0 }
 0x7f8   : > { %7795 = vpow2.f32 %v5786_v41  ;;  %v5690_v3 = vpop.xlane.xlu1 %5689 }
 0x7f9   : > { %7797 = vpow2.f32 %v5922_v34  ;;  %v5728_v4 = vmax.f32 %v5631_v56, %v5690_v3  ;;  %v5836_v3 = vsel %vm2117_vm1, %v12186_v9, 0.0 }
 0x7fa   : > { %4863 = vadd.xlane.f32.xlu2 %v4862_v50  ;;  %v13288_v50 = vld [vmem:[#allocation133_spill] sm:$0xff]  ;;  %v5837_v9 = vadd.f32 %v12184_v40, %v5836_v3 }
 0x7fb   : > { %v5748_v10 = vsub.f32 %v11868_v8, %v5728_v4  ;;  %v5749_v1 = vsub.f32 %v11862_v28, %v5728_v4  ;;  %v5904_v62 = vsub.f32 %v11888_v55, %v5728_v4 }
 0x7fc   : > { %4878 = vadd.xlane.f32.xlu0 %v4877_v57  ;;  %v13289_v57 = vld [vmem:[#allocation146_spill] sm:$0xff] }
 0x7fd   : > { %v12250_v54 = vpop.eup %7793  ;;  %v5788_v22 = vmul.f32 1.442695, %v5748_v10  ;;  %v5790_v41 = vmul.f32 1.442695, %v5749_v1  ;;  %v5924_v34 = vmul.f32 1.442695, %v5904_v62  ;;  %4875 = vadd.xlane.f32.xlu1 %v4874_v35 }
 0x7fe   : > { %v7796_v56 = vpop.eup %7795  ;;  %6198 = vmatmul.f32.gmra.mxu1 %v12250_v54  ;;  %v4871_v10 = vsel %vm2182_vm2, %v13288_v50, 0.0  ;;  %v4883_v29 = vsel %vm2182_vm2, %v13289_v57, 0.0 }
 0x7ff   : > { %v12253_v8 = vpop.eup %7797  ;;  %7799 = vpow2.f32 %v5788_v22  ;;  %7273 = vmatmul.msk.f32.gmra.mxu0 %vm2117_vm1, %v7796_v56  ;;  %v5635_v28 = vpop.xlane.xlu0 %5634 }
 0x800   : > { %v5693_v55 = vpop.xlane.xlu2 %5692  ;;  %7801 = vpow2.f32 %v5790_v41  ;;  %7257 = vmatmul.msk.f32.gmra.mxu2 %vm2182_vm2, %v12253_v8  ;;  %v12260_v45 = vpop.xlane.xlu1 %4756 }
 0x801   : > { %v5729_v4 = vmax.f32 %v5635_v28, %v5693_v55  ;;  %7803 = vpow2.f32 %v5924_v34  ;;  %v13290_v55 = vld [vmem:[#allocation142_spill] sm:$0xff] }
 0x802   : > { %4872 = vadd.xlane.f32.xlu2 %v4871_v10  ;;  %v4880_v3 = vsel %vm2182_vm2, %v13290_v55, 0.0 }
 0x803   : > { %v5750_v1 = vsub.f32 %v11910_v15, %v5729_v4  ;;  %v5751_v62 = vsub.f32 %v11904_v31, %v5729_v4  ;;  %v5905_v12 = vsub.f32 %v11928_v7, %v5729_v4 }
 0x804   : > { %5838 = vadd.xlane.f32.xlu0 %v5837_v9 }
 0x805   : > { %v5792_v35 = vmul.f32 1.442695, %v5750_v1  ;;  %v5794_v22 = vmul.f32 1.442695, %v5751_v62  ;;  %v5926_v41 = vmul.f32 1.442695, %v5905_v12  ;;  %v12270_v34 = vpop.eup %7799  ;;  %4884 = vadd.xlane.f32.xlu1 %v4883_v29 }
 0x806   : > { %v12272_v28 = vpop.eup %7801  ;;  %6201 = vmatmul.f32.gmra.mxu1 %v12270_v34  ;;  %v5954_v1 = vsel %vm2182_vm2, %v12232_v36, 0.0  ;;  %v5951_v12 = vsel %vm2182_vm2, %v12210_v43, 0.0  ;;  %v5844_v36 = vsel %vm2117_vm1, %v12230_v58, 0.0  ;;  %v5840_v58 = vsel %vm2117_vm1, %v12208_v13, 0.0 }
 0x807   : > { %7805 = vpow2.f32 %v5792_v35  ;;  %v12275_v31 = vpop.eup %7803  ;;  %7274 = vmatmul.msk.f32.gmra.mxu0 %vm2117_vm1, %v12272_v28  ;;  %v5696_v15 = vpop.xlane.xlu0 %5695  ;;  %v5845_v55 = vadd.f32 %v12226_v19, %v5844_v36  ;;  %v5841_v13 = vadd.f32 %v12206_v0, %v5840_v58 }
 0x808   : > { %7807 = vpow2.f32 %v5794_v22  ;;  %7258 = vmatmul.msk.f32.gmra.mxu2 %vm2182_vm2, %v12275_v31  ;;  %v5639_v7 = vpop.xlane.xlu1 %5638 }
 0x809   : > { %7809 = vpow2.f32 %v5926_v41  ;;  %v5730_v40 = vmax.f32 %v5639_v7, %v5696_v15  ;;  %v5948_v41 = vsel %vm2182_vm2, %v12189_v37, 0.0 }
 0x80a   : > { %4881 = vadd.xlane.f32.xlu2 %v4880_v3 }
 0x80b   : > { %v5752_v4 = vsub.f32 %v11950_v32, %v5730_v40  ;;  %v5753_v50 = vsub.f32 %v11940_v18, %v5730_v40  ;;  %v5906_v10 = vsub.f32 %v11961_v26, %v5730_v40  ;;  %v5848_v26 = vsel %vm2117_vm1, %v7796_v56, 0.0 }
 0x80c   : > { %5955 = vadd.xlane.f32.xlu0 %v5954_v1  ;;  %v5849_v15 = vadd.f32 %v12250_v54, %v5848_v26 }
 0x80d   : > { %v12288_v62 = vpop.eup %7805  ;;  %v5796_v57 = vmul.f32 1.442695, %v5752_v4  ;;  %v5798_v29 = vmul.f32 1.442695, %v5753_v50  ;;  %v5928_v35 = vmul.f32 1.442695, %v5906_v10  ;;  %5952 = vadd.xlane.f32.xlu1 %v5951_v12  ;;  %v12310_v4 = vpop.xlane.xlu2 %4764 }
 0x80e   : > { %v12292_v9 = vpop.eup %7807  ;;  %6204 = vmatmul.f32.gmra.mxu1 %v12288_v62 }
 0x80f   : > { %v7810_v32 = vpop.eup %7809  ;;  %7811 = vpow2.f32 %v5796_v57  ;;  %7275 = vmatmul.msk.f32.gmra.mxu0 %vm2117_vm1, %v12292_v9  ;;  %v5699_v18 = vpop.xlane.xlu0 %5698 }
 0x810   : > { %7813 = vpow2.f32 %v5798_v29  ;;  %7259 = vmatmul.msk.f32.gmra.mxu2 %vm2182_vm2, %v7810_v32  ;;  %v5643_v43 = vpop.xlane.xlu1 %5642  ;;  %v5963_v29 = vsel %vm2182_vm2, %v7810_v32, 0.0  ;;  %v5856_v32 = vsel %vm2117_vm1, %v12292_v9, 0.0 }
 0x811   : > { %7815 = vpow2.f32 %v5928_v35  ;;  %v5731_v22 = vmax.f32 %v5643_v43, %v5699_v18  ;;  %v5960_v35 = vsel %vm2182_vm2, %v12275_v31, 0.0  ;;  %v5857_v58 = vadd.f32 %v12288_v62, %v5856_v32 }
 0x812   : > { %5949 = vadd.xlane.f32.xlu2 %v5948_v41 }
 0x813   : > { %v5754_v7 = vsub.f32 %v11982_v38, %v5731_v22  ;;  %v5755_v40 = vsub.f32 %v11975_v23, %v5731_v22  ;;  %v5907_v56 = vsub.f32 %v11993_v27, %v5731_v22 }
 0x814   : > { %5850 = vadd.xlane.f32.xlu0 %v5849_v15  ;;  %v5957_v15 = vsel %vm2182_vm2, %v12253_v8, 0.0 }
 0x815   : > { %v7812_v3 = vpop.eup %7811  ;;  %v5800_v50 = vmul.f32 1.442695, %v5754_v7  ;;  %v5802_v37 = vmul.f32 1.442695, %v5755_v40  ;;  %v5930_v10 = vmul.f32 1.442695, %v5907_v56  ;;  %5846 = vadd.xlane.f32.xlu1 %v5845_v55 }
 0x816   : > { %v7814_v54 = vpop.eup %7813  ;;  %6207 = vmatmul.f32.gmra.mxu1 %v7812_v3 }
 0x817   : > { %v12312_v38 = vpop.eup %7815  ;;  %7817 = vpow2.f32 %v5800_v50  ;;  %7276 = vmatmul.msk.f32.gmra.mxu0 %vm2117_vm1, %v7814_v54  ;;  %v5702_v23 = vpop.xlane.xlu0 %5701  ;;  %v5852_v50 = vsel %vm2117_vm1, %v12272_v28, 0.0 }
 0x818   : > { %7819 = vpow2.f32 %v5802_v37  ;;  %7260 = vmatmul.msk.f32.gmra.mxu2 %vm2182_vm2, %v12312_v38  ;;  %v5647_v27 = vpop.xlane.xlu1 %5646 }
 0x819   : > { %7821 = vpow2.f32 %v5930_v10  ;;  %v5732_v19 = vmax.f32 %v5647_v27, %v5702_v23 }
 0x81a   : > { %5842 = vadd.xlane.f32.xlu2 %v5841_v13 }
 0x81b   : > { %v5756_v1 = vsub.f32 %v12009_v60, %v5732_v19  ;;  %v5757_v12 = vsub.f32 %v12003_v53, %v5732_v19  ;;  %v5908_v57 = vsub.f32 %v12016_v17, %v5732_v19  ;;  %v5860_v17 = vsel %vm2117_vm1, %v7814_v54, 0.0 }
 0x81c   : > { %5964 = vadd.xlane.f32.xlu0 %v5963_v29  ;;  %v5861_v7 = vadd.f32 %v7812_v3, %v5860_v17  ;;  %v5966_v17 = vsel %vm2182_vm2, %v12312_v38, 0.0 }
 0x81d   : > { %v12324_v18 = vpop.eup %7817  ;;  %v5804_v26 = vmul.f32 1.442695, %v5756_v1  ;;  %v5806_v43 = vmul.f32 1.442695, %v5757_v12  ;;  %v5932_v0 = vmul.f32 1.442695, %v5908_v57  ;;  %v5651_v36 = vpop.xlane.xlu2 %5650  ;;  %5961 = vadd.xlane.f32.xlu1 %v5960_v35 }
 0x81e   : > { %v12326_v22 = vpop.eup %7819  ;;  %6210 = vmatmul.f32.gmra.mxu1 %v12324_v18 }
 0x81f   : > { %v7822_v53 = vpop.eup %7821  ;;  %7823 = vpow2.f32 %v5804_v26  ;;  %7277 = vmatmul.msk.f32.gmra.mxu0 %vm2117_vm1, %v12326_v22  ;;  %v12331_v60 = vpop.xlane.xlu0 %4772 }
 0x820   : > { %7825 = vpow2.f32 %v5806_v43  ;;  %7261 = vmatmul.msk.f32.gmra.mxu2 %vm2182_vm2, %v7822_v53  ;;  %v5705_v31 = vpop.xlane.xlu1 %5704  ;;  %v5969_v1 = vsel %vm2182_vm2, %v7822_v53, 0.0 }
 0x821   : > { %7827 = vpow2.f32 %v5932_v0  ;;  %v5733_v41 = vmax.f32 %v5651_v36, %v5705_v31 }
 0x822   : > { %5958 = vadd.xlane.f32.xlu2 %v5957_v15 }
 0x823   : > { %v5758_v40 = vsub.f32 %v12024_v6, %v5733_v41  ;;  %v5759_v56 = vsub.f32 %v12029_v46, %v5733_v41  ;;  %v5909_v55 = vsub.f32 %v12036_v49, %v5733_v41  ;;  %v5853_v49 = vadd.f32 %v12270_v34, %v5852_v50 }
 0x824   : > { %5862 = vadd.xlane.f32.xlu0 %v5861_v7 }
 0x825   : > { %v7824_v9 = vpop.eup %7823  ;;  %v5808_v37 = vmul.f32 1.442695, %v5758_v40  ;;  %v5810_v10 = vmul.f32 1.442695, %v5759_v56  ;;  %v5934_v54 = vmul.f32 1.442695, %v5909_v55  ;;  %v5655_v23 = vpop.xlane.xlu2 %5654  ;;  %5858 = vadd.xlane.f32.xlu1 %v5857_v58 }
 0x826   : > { %v7826_v8 = vpop.eup %7825  ;;  %6213 = vmatmul.f32.gmra.mxu1 %v7824_v9 }
 0x827   : > { %v7828_v3 = vpop.eup %7827  ;;  %7829 = vpow2.f32 %v5808_v37  ;;  %7278 = vmatmul.msk.f32.gmra.mxu0 %vm2117_vm1, %v7826_v8  ;;  %v12346_v6 = vpop.xlane.xlu0 %4784  ;;  %v5868_v36 = vsel %vm2117_vm1, %v7826_v8, 0.0 }
 0x828   : > { %7831 = vpow2.f32 %v5810_v10  ;;  %7262 = vmatmul.msk.f32.gmra.mxu2 %vm2182_vm2, %v7828_v3  ;;  %v5708_v46 = vpop.xlane.xlu1 %5707  ;;  %v5972_v19 = vsel %vm2182_vm2, %v7828_v3, 0.0  ;;  %v5869_v7 = vadd.f32 %v7824_v9, %v5868_v36  ;;  %v13292_v10 = vld [vmem:[#allocation157_spill] sm:$0xff] }
 0x829   : > { %7833 = vpow2.f32 %v5934_v54  ;;  %v5734_v28 = vmax.f32 %v5655_v23, %v5708_v46 }
 0x82a   : > { %5854 = vadd.xlane.f32.xlu2 %v5853_v49 }
 0x82b   : > { %v5760_v62 = vsub.f32 %v12043_v25, %v5734_v28  ;;  %v5761_v27 = vsub.f32 %v12049_v63, %v5734_v28  ;;  %v5910_v13 = vsub.f32 %v12056_v30, %v5734_v28 }
 0x82c   : > { %5973 = vadd.xlane.f32.xlu0 %v5972_v19 }
 0x82d   : > { %v7830_v12 = vpop.eup %7829  ;;  %v5812_v57 = vmul.f32 1.442695, %v5760_v62  ;;  %v5814_v29 = vmul.f32 1.442695, %v5761_v27  ;;  %v5936_v35 = vmul.f32 1.442695, %v5910_v13  ;;  %v5659_v26 = vpop.xlane.xlu2 %5658  ;;  %5970 = vadd.xlane.f32.xlu1 %v5969_v1 }
 0x82e   : > { %v7832_v34 = vpop.eup %7831  ;;  %6216 = vmatmul.f32.gmra.mxu1 %v7830_v12 }
 0x82f   : > { %v7834_v43 = vpop.eup %7833  ;;  %7835 = vpow2.f32 %v5812_v57  ;;  %7279 = vmatmul.msk.f32.gmra.mxu0 %vm2117_vm1, %v7832_v34  ;;  %v4843_v25 = vpop.xlane.xlu0 %4842  ;;  %v5872_v63 = vsel %vm2117_vm1, %v7832_v34, 0.0 }
 0x830   : > { %7837 = vpow2.f32 %v5814_v29  ;;  %7263 = vmatmul.msk.f32.gmra.mxu2 %vm2182_vm2, %v7834_v43  ;;  %v4887_v30 = vadd.f32 %v4843_v25, %v12157_v5  ;;  %v5711_v0 = vpop.xlane.xlu1 %5710  ;;  %v5873_v31 = vadd.f32 %v7830_v12, %v5872_v63  ;;  %v5864_v5 = vsel %vm2117_vm1, %v12326_v22, 0.0 }
 0x831   : > { %7839 = vpow2.f32 %v5936_v35  ;;  %v5735_v53 = vmax.f32 %v5659_v26, %v5711_v0  ;;  %v5865_v54 = vadd.f32 %v12324_v18, %v5864_v5  ;;  %v5975_v19 = vsel %vm2182_vm2, %v7834_v43, 0.0 }
 0x832   : > { %7841 = vrcp.f32 %v4887_v30  ;;  %5967 = vadd.xlane.f32.xlu2 %v5966_v17 }
 0x833   : > { %v5762_v32 = vsub.f32 %v12063_v61, %v5735_v53  ;;  %v5763_v41 = vsub.f32 %v12069_v2, %v5735_v53  ;;  %v5911_v15 = vsub.f32 %v12076_v20, %v5735_v53  ;;  %v13291_v61 = vld [vmem:[#allocation154_spill] sm:$0xff] }
 0x834   : > { %5874 = vadd.xlane.f32.xlu0 %v5873_v31  ;;  %v5149_v2 = vadd.f32 %v13292_v10, %v13291_v61 }
 0x835   : > { %v7836_v40 = vpop.eup %7835  ;;  %v5816_v56 = vmul.f32 1.442695, %v5762_v32  ;;  %v5818_v55 = vmul.f32 1.442695, %v5763_v41  ;;  %v5938_v58 = vmul.f32 1.442695, %v5911_v15  ;;  %v12367_v50 = vpop.xlane.xlu2 %4776  ;;  %5870 = vadd.xlane.f32.xlu1 %v5869_v7 }
 0x836   : > { %v7838_v38 = vpop.eup %7837  ;;  %6219 = vmatmul.f32.gmra.mxu1 %v7836_v40 }
 0x837   : > { %v7840_v37 = vpop.eup %7839  ;;  %7843 = vpow2.f32 %v5816_v56  ;;  %7280 = vmatmul.msk.f32.gmra.mxu0 %vm2117_vm1, %v7838_v38  ;;  %v5663_v20 = vpop.xlane.xlu0 %5662  ;;  %v5876_v57 = vsel %vm2117_vm1, %v7838_v38, 0.0  ;;  %v13293_v38 = vld [vmem:[#allocation96_spill] sm:$0xff] }
 0x838   : > { %v7842_v9 = vpop.eup %7841  ;;  %7845 = vpow2.f32 %v5818_v55  ;;  %7264 = vmatmul.msk.f32.gmra.mxu2 %vm2182_vm2, %v7840_v37  ;;  %v12373_v22 = vpop.xlane.xlu1 %4768  ;;  %v5978_v8 = vsel %vm2182_vm2, %v7840_v37, 0.0  ;;  %v5877_v30 = vadd.f32 %v7836_v40, %v5876_v57  ;;  %v5158_v37 = vadd.f32 %v13293_v38, %v11545_v51 }
 0x839   : > { %7847 = vpow2.f32 %v5938_v58  ;;  %v12376_v23 = vmul.f32 %v7842_v9, %v5149_v2  ;;  %v13294_v2 = vld [vmem:[#allocation114_spill] sm:$0xff]  ;;  %v13295_v9 = vld [vmem:[#allocation116_spill] sm:$0xff] }
 0x83a   : > { %5866 = vadd.xlane.f32.xlu2 %v5865_v54 }
 0x83d   : > { %v7844_v3 = vpop.eup %7843  ;;  %v12379_v46 = vpop.xlane.xlu2 %4788  ;;  %5979 = vadd.xlane.f32.xlu1 %v5978_v8 }
 0x83e   : > { %v7846_v49 = vpop.eup %7845  ;;  %6222 = vmatmul.f32.gmra.mxu1 %v7844_v3 }
 0x83f   : > { %v7848_v28 = vpop.eup %7847  ;;  %7281 = vmatmul.msk.f32.gmra.mxu0 %vm2117_vm1, %v7846_v49  ;;  %v5667_v62 = vpop.xlane.xlu0 %5666  ;;  %v5880_v13 = vsel %vm2117_vm1, %v7846_v49, 0.0 }
 0x840   : > { %7265 = vmatmul.msk.f32.gmra.mxu2 %vm2182_vm2, %v7848_v28  ;;  %v5981_v18 = vsel %vm2182_vm2, %v7848_v28, 0.0  ;;  %v12384_v27 = vpop.xlane.xlu1 %4780  ;;  %v5881_v1 = vadd.f32 %v7844_v3, %v5880_v13  ;;  %v13296_v28 = vld [vmem:[#allocation119_spill] sm:$0xff] }
 0x841   : > { %5982 = vadd.xlane.f32.xlu0 %v5981_v18 }
 0x842   : > { %5976 = vadd.xlane.f32.xlu2 %v5975_v19 }
 0x845   : > { %v5714_v12 = vpop.xlane.xlu2 %5713  ;;  %5882 = vadd.xlane.f32.xlu1 %v5881_v1 }
 0x846   : > { %v5736_v29 = vmax.f32 %v5663_v20, %v5714_v12 }
 0x847   : > { %v5671_v35 = vpop.xlane.xlu0 %5670 }
 0x848   : > { %v5764_v26 = vsub.f32 %v12085_v47, %v5736_v29  ;;  %v5765_v34 = vsub.f32 %v12090_v44, %v5736_v29  ;;  %v5912_v25 = vsub.f32 %v12118_v21, %v5736_v29  ;;  %v12392_v63 = vpop.xlane.xlu1 %4839  ;;  %v13297_v29 = vld [vmem:[#allocation118_spill] sm:$0xff] }
 0x84a   : > { %v5820_v0 = vmul.f32 1.442695, %v5764_v26  ;;  %v5822_v36 = vmul.f32 1.442695, %v5765_v34  ;;  %v5940_v43 = vmul.f32 1.442695, %v5912_v25  ;;  %5878 = vadd.xlane.f32.xlu2 %v5877_v30 }
 0x84c   : > { %7849 = vpow2.f32 %v5820_v0 }
 0x84d   : > { %7851 = vpow2.f32 %v5822_v36  ;;  %v5717_v53 = vpop.xlane.xlu2 %5716 }
 0x84e   : > { %7853 = vpow2.f32 %v5940_v43  ;;  %v5737_v17 = vmax.f32 %v5667_v62, %v5717_v53 }
 0x84f   : > { %v4852_v31 = vpop.xlane.xlu0 %4851 }
 0x850   : > { %v5766_v32 = vsub.f32 %v12101_v16, %v5737_v17  ;;  %v5767_v47 = vsub.f32 %v12107_v14, %v5737_v17  ;;  %v5913_v44 = vsub.f32 %v12143_v42, %v5737_v17  ;;  %v4890_v21 = vadd.f32 %v4852_v31, %v12133_v33  ;;  %v5675_v41 = vpop.xlane.xlu1 %5674  ;;  %v13299_v31 = vld [vmem:[#allocation167_spill] sm:$0xff] }
 0x852   : > { %v7850_v15 = vpop.eup %7849  ;;  %v5824_v7 = vmul.f32 1.442695, %v5766_v32  ;;  %v5826_v5 = vmul.f32 1.442695, %v5767_v47  ;;  %v5942_v40 = vmul.f32 1.442695, %v5913_v44  ;;  %7855 = vrcp.f32 %v4890_v21 }
 0x853   : > { %v7852_v56 = vpop.eup %7851  ;;  %6225 = vmatmul.f32.gmra.mxu1 %v7850_v15  ;;  %v13300_v32 = vld [vmem:[#allocation168_spill] sm:$0xff] }
 0x854   : > { %v7854_v55 = vpop.eup %7853  ;;  %7857 = vpow2.f32 %v5824_v7  ;;  %7282 = vmatmul.msk.f32.gmra.mxu0 %vm2117_vm1, %v7852_v56  ;;  %v5884_v16 = vsel %vm2117_vm1, %v7852_v56, 0.0  ;;  %v5155_v47 = vadd.f32 %v13300_v32, %v13299_v31  ;;  %v12424_v56 = vpop.f32.mrf.mxu2 }
 0x855   : > { %7859 = vpow2.f32 %v5826_v5  ;;  %7266 = vmatmul.msk.f32.gmra.mxu2 %vm2182_vm2, %v7854_v55  ;;  %v5984_v42 = vsel %vm2182_vm2, %v7854_v55, 0.0  ;;  %v5720_v14 = vpop.xlane.xlu2 %5719  ;;  %v5885_v33 = vadd.f32 %v7850_v15, %v5884_v16 }
 0x856   : > { %7861 = vpow2.f32 %v5942_v40  ;;  %5985 = vadd.xlane.f32.xlu2 %v5984_v42  ;;  %v5738_v58 = vmax.f32 %v5671_v35, %v5720_v14 }
 0x857   : > { %5886 = vadd.xlane.f32.xlu0 %v5885_v33  ;;  %v5723_v61 = vpop.xlane.xlu0 %5722 }
 0x858   : > { %v7856_v10 = vpop.eup %7855  ;;  %v5768_v20 = vsub.f32 %v13294_v2, %v5738_v58  ;;  %v5769_v54 = vsub.f32 %v13295_v9, %v5738_v58  ;;  %v5914_v8 = vsub.f32 %v12167_v24, %v5738_v58  ;;  %v5739_v3 = vmax.f32 %v5675_v41, %v5723_v61  ;;  %v4849_v49 = vpop.xlane.xlu1 %4848  ;;  %v13302_v2 = vld [vmem:[#allocation166_spill] sm:$0xff] }
 0x859   : > { %v4889_v62 = vadd.f32 %v4849_v49, %v13296_v28  ;;  %v12408_v18 = vmul.f32 %v7856_v10, %v5158_v37  ;;  %v13301_v10 = vld [vmem:[#allocation165_spill] sm:$0xff] }
 0x85a   : > { %v7858_v13 = vpop.eup %7857  ;;  %v5828_v19 = vmul.f32 1.442695, %v5768_v20  ;;  %v5830_v1 = vmul.f32 1.442695, %v5769_v54  ;;  %v5944_v12 = vmul.f32 1.442695, %v5914_v8  ;;  %v5770_v51 = vsub.f32 %v12155_v59, %v5739_v3 }
 0x85b   : > { %v7860_v57 = vpop.eup %7859  ;;  %v5771_v35 = vsub.f32 %v13297_v29, %v5739_v3  ;;  %v5915_v26 = vsub.f32 %v12173_v52, %v5739_v3  ;;  %7863 = vrcp.f32 %v4889_v62  ;;  %6228 = vmatmul.f32.gmra.mxu1 %v7858_v13  ;;  %v13298_v52 = vld [vmem:[#allocation115_spill] sm:$0xff]  ;;  %v5152_v20 = vadd.f32 %v13302_v2, %v13301_v10  ;;  %v13304_v3 = vld [vmem:[#allocation104_spill] sm:$0xff] }
 0x85c   : > { %v7862_v24 = vpop.eup %7861  ;;  %7865 = vpow2.f32 %v5828_v19  ;;  %v5832_v34 = vmul.f32 1.442695, %v5770_v51  ;;  %7283 = vmatmul.msk.f32.gmra.mxu0 %vm2117_vm1, %v7860_v57  ;;  %v5888_v25 = vsel %vm2117_vm1, %v7860_v57, 0.0  ;;  %v13303_v8 = vld [vmem:[#allocation103_spill] sm:$0xff] }
 0x85d   : > { %7867 = vpow2.f32 %v5830_v1  ;;  %v5834_v30 = vmul.f32 1.442695, %v5771_v35  ;;  %v5946_v0 = vmul.f32 1.442695, %v5915_v26  ;;  %7267 = vmatmul.msk.f32.gmra.mxu2 %vm2182_vm2, %v7862_v24  ;;  %v5987_v59 = vsel %vm2182_vm2, %v7862_v24, 0.0  ;;  %v4846_v36 = vpop.xlane.xlu2 %4845  ;;  %v13305_v1 = vld [vmem:[#allocation158_spill] sm:$0xff] }
 0x85e   : > { %7869 = vpow2.f32 %v5944_v12  ;;  %5988 = vadd.xlane.f32.xlu1 %v5987_v59  ;;  %v4888_v43 = vadd.f32 %v4846_v36, %v13298_v52  ;;  %v5889_v53 = vadd.f32 %v7858_v13, %v5888_v25  ;;  %v5167_v49 = vadd.f32 %v13304_v3, %v13303_v8  ;;  %v13306_v12 = vld [vmem:[#allocation102_spill] sm:$0xff]  ;;  %v13312_v2 = vld [vmem:[#allocation111_spill] sm:$0xff] }
 0x85f   : > { %7871 = vpow2.f32 %v5832_v34  ;;  %v4861_v17 = vpop.xlane.xlu0 %4860 }
 0x860   : > { %7873 = vpow2.f32 %v5834_v30  ;;  %5890 = vadd.xlane.f32.xlu2 %v5889_v53  ;;  %v4893_v44 = vadd.f32 %v4861_v17, %v12260_v45  ;;  %v4858_v21 = vpop.xlane.xlu1 %4857  ;;  %v13307_v30 = vld [vmem:[#allocation151_spill] sm:$0xff] }
 0x861   : > { %v7864_v41 = vpop.eup %7863  ;;  %7875 = vpow2.f32 %v5946_v0  ;;  %v4892_v15 = vadd.f32 %v4858_v21, %v12215_v39  ;;  %v13308_v0 = vld [vmem:[#allocation32_spill] sm:$0xff] }
 0x862   : > { %v7866_v7 = vpop.eup %7865  ;;  %7877 = vrcp.f32 %v4888_v43  ;;  %v12422_v5 = vmul.f32 %v7864_v41, %v5155_v47  ;;  %v12426_v55 = vpop.f32.mrf.mxu1  ;;  %v5161_v59 = vadd.f32 %v13308_v0, %v13307_v30  ;;  %v13309_v41 = vld [vmem:[#allocation108_spill] sm:$0xff] }
 0x863   : > { %v7868_v40 = vpop.eup %7867  ;;  %7879 = vrcp.f32 %v4893_v44  ;;  %6231 = vmatmul.f32.gmra.mxu1 %v7866_v7  ;;  %v12429_v45 = vpop.f32.mrf.mxu0 }
 0x864   : > { %v7870_v16 = vpop.eup %7869  ;;  %7881 = vrcp.f32 %v4892_v15  ;;  %7284 = vmatmul.msk.f32.gmra.mxu0 %vm2117_vm1, %v7868_v40  ;;  %v5892_v42 = vsel %vm2117_vm1, %v7868_v40, 0.0 }
 0x865   : > { %v7872_v39 = vpop.eup %7871  ;;  %7268 = vmatmul.msk.f32.gmra.mxu2 %vm2182_vm2, %v7870_v16  ;;  %v5990_v14 = vsel %vm2182_vm2, %v7870_v16, 0.0  ;;  %v4855_v33 = vpop.xlane.xlu2 %4854  ;;  %v5893_v58 = vadd.f32 %v7866_v7, %v5892_v42  ;;  %v13310_v7 = vld [vmem:[#allocation106_spill] sm:$0xff] }
 0x866   : > { %v7874_v38 = vpop.eup %7873  ;;  %5991 = vadd.xlane.f32.xlu0 %v5990_v14  ;;  %v4891_v37 = vadd.f32 %v4855_v33, %v12193_v11  ;;  %v5164_v11 = vadd.f32 %v13306_v12, %v13305_v1  ;;  %v13316_v12 = vld [vmem:[#allocation109_spill] sm:$0xff] }
 0x867   : > { %v7876_v61 = vpop.eup %7875  ;;  %5894 = vadd.xlane.f32.xlu1 %v5893_v58  ;;  %v4870_v9 = vpop.xlane.xlu0 %4869  ;;  %v5896_v57 = vsel %vm2117_vm1, %v7874_v38, 0.0  ;;  %v13311_v58 = vld [vmem:[#allocation105_spill] sm:$0xff] }
 0x868   : > { %v7878_v54 = vpop.eup %7877  ;;  %7883 = vrcp.f32 %v4891_v37  ;;  %v5993_v28 = vsel %vm2182_vm2, %v7876_v61, 0.0  ;;  %v4896_v62 = vadd.f32 %v4870_v9, %v12373_v22  ;;  %v4867_v13 = vpop.xlane.xlu1 %4866  ;;  %v5897_v25 = vadd.f32 %v7872_v39, %v5896_v57  ;;  %v13313_v9 = vld [vmem:[#allocation107_spill] sm:$0xff] }
 0x869   : > { %v7880_v19 = vpop.eup %7879  ;;  %5994 = vadd.xlane.f32.xlu2 %v5993_v28  ;;  %v4895_v51 = vadd.f32 %v4867_v13, %v12310_v4  ;;  %v12445_v29 = vmul.f32 %v7878_v54, %v5152_v20 }
 0x86a   : > { %v7882_v35 = vpop.eup %7881  ;;  %7885 = vrcp.f32 %v4896_v62  ;;  %v12447_v26 = vmul.f32 %v7880_v19, %v5167_v49  ;;  %v12449_v24 = vpop.f32.mrf.mxu2  ;;  %v13315_v49 = vld [vmem:[#allocation112_spill] sm:$0xff] }
 0x86b   : > { %7887 = vrcp.f32 %v4895_v51  ;;  %6234 = vmatmul.f32.gmra.mxu1 %v7872_v39  ;;  %v12451_v22 = vpop.f32.mrf.mxu1  ;;  %v12453_v34 = vmul.f32 %v7882_v35, %v5164_v11  ;;  %v12456_v4 = vpop.f32.mrf.mxu0 }
 0x86c   : > { %7285 = vmatmul.msk.f32.gmra.mxu0 %vm2117_vm1, %v7874_v38 }
 0x86d   : > { %7269 = vmatmul.msk.f32.gmra.mxu2 %vm2182_vm2, %v7876_v61  ;;  %v4864_v36 = vpop.xlane.xlu2 %4863 }
 0x86e   : > { %v7884_v52 = vpop.eup %7883  ;;  %5898 = vadd.xlane.f32.xlu0 %v5897_v25  ;;  %v4894_v43 = vadd.f32 %v4864_v36, %v12237_v48 }
 0x86f   : > { %v4879_v53 = vpop.xlane.xlu0 %4878  ;;  %v12462_v17 = vmul.f32 %v7884_v52, %v5161_v59 }
 0x870   : > { %v7886_v31 = vpop.eup %7885  ;;  %7889 = vrcp.f32 %v4894_v43  ;;  %v4899_v32 = vadd.f32 %v4879_v53, %v12384_v27  ;;  %v4876_v47 = vpop.xlane.xlu1 %4875  ;;  %v13317_v53 = vld [vmem:[#allocation110_spill] sm:$0xff] }
 0x871   : > { %v7888_v44 = vpop.eup %7887  ;;  %v4898_v21 = vadd.f32 %v4876_v47, %v12367_v50  ;;  %v12467_v15 = vmul.f32 %v7886_v31, %v13309_v41 }
 0x872   : > { %7891 = vrcp.f32 %v4899_v32  ;;  %v12470_v40 = vmul.f32 %v7888_v44, %v13310_v7  ;;  %v6080_v48 = vpop.f32.mrf.mxu2 }
 0x873   : > { %7893 = vrcp.f32 %v4898_v21  ;;  %v6196_v16 = vpop.f32.mrf.mxu1  ;;  %v6261_v42 = vpop.f32.mrf.mxu0 }
 0x875   : > { %v4873_v39 = vpop.xlane.xlu2 %4872 }
 0x876   : > { %v7890_v14 = vpop.eup %7889  ;;  %v4897_v33 = vadd.f32 %v4873_v39, %v12331_v60  ;;  %v13314_v60 = vld [vmem:[#allocation113_spill] sm:$0xff] }
 0x877   : > { %v5839_v27 = vpop.xlane.xlu0 %5838  ;;  %v12474_v38 = vmul.f32 %v7890_v14, %v13311_v58  ;;  %v5126_v28 = vadd.f32 %v13315_v49, %v13314_v60 }
 0x878   : > { %v7892_v50 = vpop.eup %7891  ;;  %7895 = vrcp.f32 %v4897_v33  ;;  %v4885_v37 = vpop.xlane.xlu1 %4884 }
 0x879   : > { %v7894_v61 = vpop.eup %7893  ;;  %v4901_v10 = vadd.f32 %v4885_v37, %v12379_v46  ;;  %v12478_v20 = vmul.f32 %v7892_v50, %v13312_v2  ;;  %v5191_v46 = vadd.f32 %v12424_v56, %v5126_v28  ;;  %v6191_v56 = vadd.f32 %v12426_v55, %v12449_v24 }
 0x87a   : > { %v12481_v54 = vmul.f32 %v7894_v61, %v13313_v9  ;;  %v6083_v8 = vpop.f32.mrf.mxu2 }
 0x87b   : > { %7897 = vrcp.f32 %v4901_v10  ;;  %v6199_v3 = vpop.f32.mrf.mxu1  ;;  %v6197_v41 = vadd.f32 %v6196_v16, %v6083_v8  ;;  %v6256_v39 = vadd.f32 %v12429_v45, %v6191_v56  ;;  %v6194_v10 = vadd.f32 %v12451_v22, %v6080_v48 }
 0x87c   : > { %v6264_v62 = vpop.f32.mrf.mxu0 }
 0x87d   : > { %v4882_v13 = vpop.xlane.xlu2 %4881  ;;  %v6262_v50 = vadd.f32 %v6261_v42, %v6197_v41  ;;  %v6259_v45 = vadd.f32 %v12456_v4, %v6194_v10 }
 0x87e   : > { %v7896_v19 = vpop.eup %7895  ;;  %v4900_v1 = vadd.f32 %v4882_v13, %v12346_v6 }
 0x87f   : > { %v12487_v11 = vmul.f32 %v7896_v19, %v13316_v12  ;;  %v5956_v51 = vpop.xlane.xlu0 %5955 }
 0x880   : > { %7899 = vrcp.f32 %v4900_v1  ;;  %v5953_v57 = vpop.xlane.xlu1 %5952 }
 0x881   : > { %v7898_v35 = vpop.eup %7897 }
 0x882   : > { %v12490_v25 = vmul.f32 %v7898_v35, %v5191_v46 }
 0x883   : > { %v6086_v30 = vpop.f32.mrf.mxu2  ;;  %v6202_v0 = vpop.f32.mrf.mxu1 }
 0x884   : > { %v6267_v59 = vpop.f32.mrf.mxu0  ;;  %v6200_v13 = vadd.f32 %v6199_v3, %v6086_v30 }
 0x885   : > { %v5950_v36 = vpop.xlane.xlu2 %5949 }
 0x886   : > { %v7900_v52 = vpop.eup %7899  ;;  %v5996_v43 = vadd.f32 %v5950_v36, %v5839_v27  ;;  %v6265_v12 = vadd.f32 %v6264_v62, %v6200_v13 }
 0x887   : > { %v12493_v31 = vmul.f32 %v7900_v52, %v13317_v53  ;;  %v5851_v47 = vpop.xlane.xlu0 %5850 }
 0x888   : > { %7901 = vrcp.f32 %v5996_v43  ;;  %v5847_v6 = vpop.xlane.xlu1 %5846 }
 0x889   : > { %v5998_v32 = vadd.f32 %v5956_v51, %v5847_v6 }
 0x88b   : > { %7903 = vrcp.f32 %v5998_v32  ;;  %v6089_v44 = vpop.f32.mrf.mxu2  ;;  %v6205_v21 = vpop.f32.mrf.mxu1 }
 0x88c   : > { %v6270_v7 = vpop.f32.mrf.mxu0  ;;  %v6203_v6 = vadd.f32 %v6202_v0, %v6089_v44 }
 0x88d   : > { %v5843_v14 = vpop.xlane.xlu2 %5842 }
 0x88e   : > { %v7902_v33 = vpop.eup %7901  ;;  %v5997_v27 = vadd.f32 %v5953_v57, %v5843_v14  ;;  %v6268_v56 = vadd.f32 %v6267_v59, %v6203_v6 }
 0x88f   : > { %v6319_v58 = vmul.f32 %v7902_v33, %v6256_v39  ;;  %v5965_v9 = vpop.xlane.xlu0 %5964 }
 0x890   : > { %7905 = vrcp.f32 %v5997_v27  ;;  %v5962_v37 = vpop.xlane.xlu1 %5961 }
 0x891   : > { %v7904_v61 = vpop.eup %7903  ;;  %6351 = vrot.lane.b32.xlu1 %v6319_v58, %s8127_s21 }
 0x892   : > { %v6321_v55 = vmul.f32 %v7904_v61, %v6262_v50 }
 0x893   : > { %v6092_v24 = vpop.f32.mrf.mxu2  ;;  %v6208_v2 = vpop.f32.mrf.mxu1 }
 0x894   : > { %v6273_v16 = vpop.f32.mrf.mxu0  ;;  %6355 = vrot.lane.b32.xlu2 %v6321_v55, %s8127_s21  ;;  %v6206_v1 = vadd.f32 %v6205_v21, %v6092_v24 }
 0x895   : > { %v5959_v8 = vpop.xlane.xlu2 %5958 }
 0x896   : > { %v7906_v60 = vpop.eup %7905  ;;  %v5999_v49 = vadd.f32 %v5959_v8, %v5851_v47  ;;  %v6271_v52 = vadd.f32 %v6270_v7, %v6206_v1 }
 0x897   : > { %v6320_v42 = vmul.f32 %v7906_v60, %v6259_v45  ;;  %v5863_v35 = vpop.xlane.xlu0 %5862 }
 0x898   : > { %7907 = vrcp.f32 %v5999_v49  ;;  %v5859_v28 = vpop.xlane.xlu1 %5858 }
 0x899   : > { %6353 = vrot.lane.b32.xlu0 %v6320_v42, %s8127_s21  ;;  %v6001_v22 = vadd.f32 %v5965_v9, %v5859_v28 }
 0x89b   : > { %7909 = vrcp.f32 %v6001_v22  ;;  %v6095_v48 = vpop.f32.mrf.mxu2  ;;  %v6211_v19 = vpop.f32.mrf.mxu1 }
 0x89c   : > { %v6276_v51 = vpop.f32.mrf.mxu0  ;;  %v6209_v33 = vadd.f32 %v6208_v2, %v6095_v48 }
 0x89d   : > { %v5855_v46 = vpop.xlane.xlu2 %5854 }
 0x89e   : > { %v7908_v57 = vpop.eup %7907  ;;  %v6000_v4 = vadd.f32 %v5962_v37, %v5855_v46  ;;  %v6274_v58 = vadd.f32 %v6273_v16, %v6209_v33 }
 0x89f   : > { %v6322_v36 = vmul.f32 %v7908_v57, %v6265_v12  ;;  %v5974_v14 = vpop.xlane.xlu0 %5973 }
 0x8a0   : > { %7911 = vrcp.f32 %v6000_v4  ;;  %v5971_v43 = vpop.xlane.xlu1 %5970 }
 0x8a1   : > { %v7910_v53 = vpop.eup %7909  ;;  %6357 = vrot.lane.b32.xlu0 %v6322_v36, %s8127_s21 }
 0x8a2   : > { %v6324_v3 = vmul.f32 %v7910_v53, %v6271_v52 }
 0x8a3   : > { %v6098_v30 = vpop.f32.mrf.mxu2  ;;  %v6214_v62 = vpop.f32.mrf.mxu1 }
 0x8a4   : > { %6361 = vrot.lane.b32.xlu2 %v6324_v3, %s8127_s21  ;;  %v6279_v41 = vpop.f32.mrf.mxu0  ;;  %v6212_v45 = vadd.f32 %v6211_v19, %v6098_v30 }
 0x8a5   : > { %v5968_v32 = vpop.xlane.xlu2 %5967 }
 0x8a6   : > { %v7912_v47 = vpop.eup %7911  ;;  %v6002_v21 = vadd.f32 %v5968_v32, %v5863_v35  ;;  %v6277_v42 = vadd.f32 %v6276_v51, %v6212_v45 }
 0x8a7   : > { %v6323_v39 = vmul.f32 %v7912_v47, %v6268_v56  ;;  %v5875_v49 = vpop.xlane.xlu0 %5874 }
 0x8a8   : > { %7913 = vrcp.f32 %v6002_v21  ;;  %v5871_v7 = vpop.xlane.xlu1 %5870 }
 0x8a9   : > { %6359 = vrot.lane.b32.xlu1 %v6323_v39, %s8127_s21  ;;  %v6004_v0 = vadd.f32 %v5974_v14, %v5871_v7 }
 0x8ab   : > { %7915 = vrcp.f32 %v6004_v0  ;;  %v6101_v44 = vpop.f32.mrf.mxu2  ;;  %v6217_v61 = vpop.f32.mrf.mxu1 }
 0x8ac   : > { %v6215_v27 = vadd.f32 %v6214_v62, %v6101_v44  ;;  %v6282_v8 = vpop.f32.mrf.mxu0 }
 0x8ad   : > { %v5867_v50 = vpop.xlane.xlu2 %5866 }
 0x8ae   : > { %v7914_v37 = vpop.eup %7913  ;;  %v6003_v59 = vadd.f32 %v5971_v43, %v5867_v50  ;;  %v6280_v55 = vadd.f32 %v6279_v41, %v6215_v27 }
 0x8af   : > { %v6325_v10 = vmul.f32 %v7914_v37, %v6274_v58 }
 0x8b0   : > { %7917 = vrcp.f32 %v6003_v59  ;;  %v5980_v24 = vpop.xlane.xlu1 %5979 }
 0x8b1   : > { %v7916_v9 = vpop.eup %7915  ;;  %6363 = vrot.lane.b32.xlu0 %v6325_v10, %s8127_s21 }
 0x8b2   : > { %v6327_v2 = vmul.f32 %v7916_v9, %v6280_v55 }
 0x8b3   : > { %v6104_v60 = vpop.f32.mrf.mxu2  ;;  %v6220_v1 = vpop.f32.mrf.mxu1 }
 0x8b4   : > { %6367 = vrot.lane.b32.xlu2 %v6327_v2, %s8127_s21  ;;  %v6218_v48 = vadd.f32 %v6217_v61, %v6104_v60  ;;  %v6285_v19 = vpop.f32.mrf.mxu0  ;;  %v5983_v57 = vpop.xlane.xlu0 %5982 }
 0x8b5   : > { %v5977_v16 = vpop.xlane.xlu2 %5976 }
 0x8b6   : > { %v7918_v28 = vpop.eup %7917  ;;  %v6005_v13 = vadd.f32 %v5977_v16, %v5875_v49  ;;  %v6283_v35 = vadd.f32 %v6282_v8, %v6218_v48 }
 0x8b7   : > { %v6326_v22 = vmul.f32 %v7918_v28, %v6277_v42 }
 0x8b8   : > { %7919 = vrcp.f32 %v6005_v13  ;;  %v5883_v12 = vpop.xlane.xlu1 %5882 }
 0x8b9   : > { %6365 = vrot.lane.b32.xlu1 %v6326_v22, %s8127_s21  ;;  %v6007_v4 = vadd.f32 %v5983_v57, %v5883_v12 }
 0x8bb   : > { %v6107_v46 = vpop.f32.mrf.mxu2  ;;  %v6223_v6 = vpop.f32.mrf.mxu1 }
 0x8bc   : > { %v6221_v51 = vadd.f32 %v6220_v1, %v6107_v46  ;;  %v6288_v32 = vpop.f32.mrf.mxu0 }
 0x8bd   : > { %v5879_v36 = vpop.xlane.xlu2 %5878 }
 0x8be   : > { %v7920_v52 = vpop.eup %7919  ;;  %v6006_v43 = vadd.f32 %v5980_v24, %v5879_v36  ;;  %v6286_v56 = vadd.f32 %v6285_v19, %v6221_v51 }
 0x8bf   : > { %v6328_v53 = vmul.f32 %v7920_v52, %v6283_v35 }
 0x8c0   : > { %7921 = vrcp.f32 %v6006_v43 }
 0x8c1   : > { %7923 = vrcp.f32 %v6007_v4  ;;  %6369 = vrot.lane.b32.xlu0 %v6328_v53, %s8127_s21 }
 0x8c3   : > { %v6110_v3 = vpop.f32.mrf.mxu2 }
 0x8c4   : > { %v6224_v30 = vadd.f32 %v6223_v6, %v6110_v3 }
 0x8c6   : > { %v7922_v62 = vpop.eup %7921  ;;  %v6289_v47 = vadd.f32 %v6288_v32, %v6224_v30 }
 0x8c7   : > { %v7924_v21 = vpop.eup %7923  ;;  %v6329_v41 = vmul.f32 %v7922_v62, %v6286_v56  ;;  %v13318_v56 = vld [vmem:[#allocation117_spill] sm:$0xff] }
 0x8c8   : > { %v6330_v39 = vmul.f32 %v7924_v21, %v6289_v47  ;;  %v4886_v32 = vadd.f32 %v12392_v63, %v13318_v56  ;;  %v13319_v47 = vld [vmem:[#allocation148_spill] sm:$0xff]  ;;  %v13320_v21 = vld [vmem:[#allocation47_spill] sm:$0xff] }
 0x8c9   : > { %6371 = vrot.lane.b32.xlu1 %v6329_v41, %s8127_s21  ;;  %v5986_v14 = vpop.xlane.xlu2 %5985 }
 0x8ca   : > { %6373 = vrot.lane.b32.xlu2 %v6330_v39, %s8127_s21  ;;  %v5887_v7 = vpop.xlane.xlu0 %5886 }
 0x8cb   : > { %v6008_v33 = vadd.f32 %v5986_v14, %v5887_v7  ;;  %v13321_v7 = vld [vmem:[#allocation152_spill] sm:$0xff] }
 0x8cd   : > { %7925 = vrcp.f32 %v6008_v33 }
 0x8d0   : > { %v6226_v0 = vpop.f32.mrf.mxu1 }
 0x8d1   : > { %v6291_v44 = vpop.f32.mrf.mxu0  ;;  %v5989_v27 = vpop.xlane.xlu1 %5988 }
 0x8d3   : > { %v5891_v58 = vpop.xlane.xlu2 %5890  ;;  %v7926_v10 = vpop.eup %7925 }
 0x8d4   : > { %v6009_v59 = vadd.f32 %v5989_v27, %v5891_v58 }
 0x8d6   : > { %7927 = vrcp.f32 %v6009_v59 }
 0x8d8   : > { %v6113_v50 = vpop.f32.mrf.mxu2  ;;  %v6229_v55 = vpop.f32.mrf.mxu1 }
 0x8d9   : > { %v6227_v37 = vadd.f32 %v6226_v0, %v6113_v50  ;;  %v5992_v9 = vpop.xlane.xlu0 %5991  ;;  %v6294_v45 = vpop.f32.mrf.mxu0 }
 0x8da   : > { %v5895_v8 = vpop.xlane.xlu1 %5894 }
 0x8db   : > { %v6292_v61 = vadd.f32 %v6291_v44, %v6227_v37  ;;  %v6010_v49 = vadd.f32 %v5992_v9, %v5895_v8 }
 0x8dc   : > { %v7928_v16 = vpop.eup %7927  ;;  %v5995_v13 = vpop.xlane.xlu2 %5994 }
 0x8dd   : > { %v6331_v24 = vmul.f32 %v7926_v10, %v6292_v61  ;;  %7929 = vrcp.f32 %v6010_v49 }
 0x8df   : > { %6375 = vrot.lane.b32.xlu0 %v6331_v24, %s8127_s21 }
 0x8e0   : > { %v6116_v2 = vpop.f32.mrf.mxu2  ;;  %v6232_v22 = vpop.f32.mrf.mxu1 }
 0x8e1   : > { %v6230_v60 = vadd.f32 %v6229_v55, %v6116_v2  ;;  %v5899_v48 = vpop.xlane.xlu0 %5898  ;;  %v6297_v1 = vpop.f32.mrf.mxu0 }
 0x8e2   : > { %v6011_v46 = vadd.f32 %v5995_v13, %v5899_v48 }
 0x8e3   : > { %v6295_v42 = vadd.f32 %v6294_v45, %v6230_v60  ;;  %v7930_v35 = vpop.eup %7929 }
 0x8e4   : > { %7931 = vrcp.f32 %v6011_v46 }
 0x8e5   : > { %v6332_v28 = vmul.f32 %v7928_v16, %v6295_v42  ;;  %7933 = vrcp.f32 %v4886_v32 }
 0x8e7   : > { %6377 = vrot.lane.b32.xlu1 %v6332_v28, %s8127_s21 }
 0x8e8   : > { %v6119_v12 = vpop.f32.mrf.mxu2  ;;  %v6235_v43 = vpop.f32.mrf.mxu1 }
 0x8e9   : > { %v6233_v19 = vadd.f32 %v6232_v22, %v6119_v12  ;;  %v6300_v6 = vpop.f32.mrf.mxu0 }
 0x8ea   : > { %v7932_v30 = vpop.eup %7931 }
 0x8eb   : > { %v6298_v57 = vadd.f32 %v6297_v1, %v6233_v19  ;;  %v7934_v39 = vpop.eup %7933 }
 0x8ed   : > { %v6333_v4 = vmul.f32 %v7930_v35, %v6298_v57 }
 0x8ee   : > { %v6356_v36 = vpop.permute.xlu2 %6355 }
 0x8ef   : > { %6379 = vrot.lane.b32.xlu2 %v6333_v4, %s8127_s21  ;;  %v6401_v52 = vsel %vm1807_vm0, %v12445_v29, %v6356_v36  ;;  %v5081_v29 = vadd.f32 %v13320_v21, %v13319_v47 }
 0x8f0   : > { %v6122_v53 = vpop.f32.mrf.mxu2  ;;  %6417 = vst [vmem:[%s11737_s30 + $0x90] sm:$0xff] %v6401_v52 }
 0x8f1   : > { %v6236_v51 = vadd.f32 %v6235_v43, %v6122_v53  ;;  %v5146_v33 = vadd.f32 %v13321_v7, %v5081_v29 }
 0x8f3   : > { %v6301_v3 = vadd.f32 %v6300_v6, %v6236_v51  ;;  %v5209_v63 = vmul.f32 %v7934_v39, %v5146_v33 }
 0x8f5   : > { %v6334_v62 = vmul.f32 %v7932_v30, %v6301_v3 }
 0x8f7   : > { %6381 = vrot.lane.b32.xlu0 %v6334_v62, %s8127_s21  ;;  %s13322_s21 = sld [smem:[#allocation15_spill]] }
 0x8fd   : > { %s7316_s27 = smul.u32 96, %s13322_s21 }
 0x8fe   : > { %v6362_v41 = vpop.permute.xlu2 %6361 }
 0x8ff   : > { %v6404_v14 = vsel %vm1807_vm0, %v12462_v17, %v6362_v41  ;;  %s6443_s8 = sadd.s32 %s7316_s27, %s7287_s29 }
 0x900   : > { %6420 = vst [vmem:[%s11737_s30 + $0xa8] sm:$0xff] %v6404_v14  ;;  %s7288_s16 = sshll.u32 %s6443_s8, 3  ;;  %s8019_s8 = scalar_lea.hbm %s13324_s12, 1536 }
 0x901   : > { %s6445_s10 = scalar_lea.hbm %s13323_s13, %s7288_s16 }
 0x902   : > { %s6448_s11 = sshll.u32 %s6445_s10, 4  ;;  %s6449_s11 = int_to_ptr.hbm [resolvable:$true] %s6448_s11 }
 0x903   : > { %v6352_v0 = vpop.permute.xlu1 %6351  ;;  %s8013_s21 = sshra.s32 %s6449_s11, 4  ;;  %s8014_s21 = int_to_ptr.hbm [resolvable:$true] %s8013_s21 }
 0x904   : > { %v6399_v44 = vsel %vm1807_vm0, %v5209_v63, %v6352_v0  ;;  %s8015_s1 = scalar_lea.hbm %s8014_s21, 256  ;;  %p8020_p5 = scmp.lt.s32.totalorder %s8014_s21, %s13324_s12 }
 0x905   : > { %6415 = vst [vmem:[%s11737_s30 + $0x80] sm:$0xff] %v6399_v44  ;;  %p8016_p13 = scmp.ne.s32.totalorder %s8014_s21, %s8015_s1  ;;  %p8021_p7 = scmp.lt.s32.totalorder %s8019_s8, %s8015_s1 }
 0x907   : > { %p8017_p0 = pnand %p8016_p13, %p8308_p6  ;;  %p8022_p8 = por %p8021_p7, %p8020_p5 }
 0x909   : > { %p8018_p4 = pneg %p8017_p0 }
 0x90b   : > { %v6354_v27 = vpop.permute.xlu0 %6353  ;;  %p8023_p2 = pnand %p8022_p8, %p8018_p4 }
 0x90c   : > { %v6400_v58 = vsel %vm1807_vm0, %v12376_v23, %v6354_v27 }
 0x90d   : > { %6416 = vst [vmem:[%s11737_s30 + $0x88] sm:$0xff] %v6400_v58 }
 0x90e   : > { %v6368_v50 = vpop.permute.xlu2 %6367 }
 0x90f   : > { %v6407_v17 = vsel %vm1807_vm0, %v12474_v38, %v6368_v50 }
 0x910   : > { %6423 = vst [vmem:[%s11737_s30 + $0xc0] sm:$0xff] %v6407_v17 }
 0x913   : > { %v6358_v37 = vpop.permute.xlu0 %6357 }
 0x914   : > { %v6402_v59 = vsel %vm1807_vm0, %v12422_v5, %v6358_v37 }
 0x915   : > { %6418 = vst [vmem:[%s11737_s30 + $0x98] sm:$0xff] %v6402_v59 }
 0x91b   : > { %v6360_v61 = vpop.permute.xlu1 %6359 }
 0x91c   : > { %v6403_v10 = vsel %vm1807_vm0, %v12408_v18, %v6360_v61 }
 0x91d   : > { %6419 = vst [vmem:[%s11737_s30 + $0xa0] sm:$0xff] %v6403_v10 }
 0x923   : > { %v6364_v23 = vpop.permute.xlu0 %6363 }
 0x924   : > { %v6405_v55 = vsel %vm1807_vm0, %v12453_v34, %v6364_v23  ;;  %v6374_v38 = vpop.permute.xlu2 %6373 }
 0x925   : > { %6421 = vst [vmem:[%s11737_s30 + $0xb0] sm:$0xff] %v6405_v55  ;;  %v6410_v24 = vsel %vm1807_vm0, %v12487_v11, %v6374_v38 }
 0x926   : > { %6426 = vst [vmem:[%s11737_s30 + $0xd8] sm:$0xff] %v6410_v24 }
 0x92b   : > { %v6366_v5 = vpop.permute.xlu1 %6365 }
 0x92c   : > { %v6406_v9 = vsel %vm1807_vm0, %v12447_v26, %v6366_v5 }
 0x92d   : > { %6422 = vst [vmem:[%s11737_s30 + $0xb8] sm:$0xff] %v6406_v9 }
 0x933   : > { %v6370_v18 = vpop.permute.xlu0 %6369 }
 0x934   : > { %v6408_v34 = vsel %vm1807_vm0, %v12470_v40, %v6370_v18 }
 0x935   : > { %6424 = vst [vmem:[%s11737_s30 + $0xc8] sm:$0xff] %v6408_v34 }
 0x93b   : > { %v6372_v45 = vpop.permute.xlu1 %6371 }
 0x93c   : > { %v6409_v8 = vsel %vm1807_vm0, %v12467_v15, %v6372_v45 }
 0x93d   : > { %6425 = vst [vmem:[%s11737_s30 + $0xd0] sm:$0xff] %v6409_v8 }
 0x949   : > { %v6380_v11 = vpop.permute.xlu2 %6379 }
 0x94a   : > { %v6413_v2 = vsel %vm1807_vm0, %v12493_v31, %v6380_v11 }
 0x94b   : > { %6429 = vst [vmem:[%s11737_s30 + $0xf0] sm:$0xff] %v6413_v2 }
 0x951   : > { %v6376_v26 = vpop.permute.xlu0 %6375 }
 0x952   : > { %v6411_v60 = vsel %vm1807_vm0, %v12481_v54, %v6376_v26 }
 0x953   : > { %6427 = vst [vmem:[%s11737_s30 + $0xe0] sm:$0xff] %v6411_v60 }
 0x959   : > { %v6378_v40 = vpop.permute.xlu1 %6377 }
 0x95a   : > { %v6412_v15 = vsel %vm1807_vm0, %v12478_v20, %v6378_v40 }
 0x95b   : > { %6428 = vst [vmem:[%s11737_s30 + $0xe8] sm:$0xff] %v6412_v15 }
 0x969   : > { %v6382_v54 = vpop.permute.xlu0 %6381 }
 0x96a   : > { %v6414_v31 = vsel %vm1807_vm0, %v12490_v25, %v6382_v54 }
 0x96b   : > { %6430 = vst [vmem:[%s11737_s30 + $0xf8] sm:$0xff] %v6414_v31 }
 0x96c   : > { %8026 = shalt.err (!%p8023_p2)
}
 0x96d   : > { %s8128_s28 = smov 128   ;;  %s8129_s30 = smov 8  }
 0x96e   : > { %7317 = dma.vmem_to_hbm [thread:$0]  (%p8308_p6), %s6447_s7, 4096, %s6449_s11, %s6432_s26, %s8128_s28, %s8128_s28, %s8129_s30  }
 0x96f PF: > { %s13325_s0 = sld [smem:[#allocation12_spill]]  ;;  %p7323_p1 = scmp.ge.s32.totalorder %s8125_s24, 2 }
 0x971   : > { %p7320_p3 = pnand %p7323_p1, %p8319_p10 }
 0x973   : > { %p7321_p9 = pneg %p7320_p3 }
 0x975   : > { %s6463_s13 = sand.u32 1, %s13325_s0  }
 0x976   : > { %s6464_s10 = scalar_lea.sflag [#allocation10], %s6463_s13 }
 0x977   : > { %8076 = dma.done.wait (%p7321_p9), %s6464_s10, 4096  }
 0x978   : > { %8078 = vsyncadd (%p7321_p9), %s6464_s10, 4294963200  ;;  %s23_s24 = sadd.s32 1, %s8125_s24   ;;  %s13326_s1 = sld [smem:[#allocation20_spill]] }
 0x979   : > { %p20_p11 = scmp.ge.s32.totalorder %s23_s24, 8   ;;  %s13327_s25 = sld [smem:[#allocation19_spill]] }
 0x97a   : > { %s13328_s7 = sld [smem:[#allocation18_spill]]  ;;  %s13331_s13 = smov %s8101_s18 }
 0x97b   : > { %s13329_s11 = sld [smem:[#allocation16_spill]]  ;;  %s13332_s14 = smov %s8089_s15 }
 0x97c   : > { %s13330_s26 = sld [smem:[#allocation17_spill]]  ;;  %s13334_s16 = smov %s8097_s17 }
 0x97d   : > { %s13336_s18 = smov %s8105_s19  ;;  %s13338_s20 = smov %s8117_s22 }
 0x97e   : > { %s13333_s15 = smov %s13326_s1  ;;  %s13339_s21 = smov %s8121_s23 }
 0x97f   : > { %s13335_s17 = smov %s13327_s25  ;;  %22 = sbr.rel (!%p20_p11) target bundleno = 15 (0xf), region = 422 }
 0x980   : > { %s13337_s19 = smov %s13328_s7 }
 0x981   : > { %s13340_s22 = smov %s13329_s11 }
 0x982   : > { %s13341_s23 = smov %s13330_s26 }
 0x984   :  { %6470 = vsyncpa [#allocation10], 1 }
 0x985   :  { %6472 = vsyncpa [#allocation10 + $0x1], 1 }

</bundles_post_ra>
